<compile_context>
chip_gen: v5e
topology: v5e:2x2
jax: 0.10.0
libtpu: 0.0.40
codegen_flags: <defaults>
</compile_context>

<pallas_src>
import functools

import numpy as np
import jax
import jax.numpy as jnp
from jax.experimental import pallas as pl
from jax.experimental.pallas import tpu as pltpu


VMEM_LIMIT = 32 * 1024 * 1024  # safe on v5e/v6e/v7x (v7x has 64 MiB physical)


# ---------------------------------------------------------------------------
# tiling helpers
# ---------------------------------------------------------------------------
def _pick_tile(M):
    """Largest power-of-two tile <= 512 dividing M with >= 2 grid steps."""
    for t in (512, 256, 128, 64, 32, 16, 8):
        if M % t == 0 and M // t >= 2:
            return t
    return M


def _pick_rows(Ho, Wo):
    """Largest divisor of Ho giving >=2 row tiles (when possible) and a
    modest matmul M (tr*Wo <= 512)."""
    divisors = [d for d in range(1, Ho + 1) if Ho % d == 0]
    good = [d for d in divisors if d * Wo <= 512 and Ho // d >= 2]
    if good:
        return max(good)
    fit = [d for d in divisors if d * Wo <= 512]
    return max(fit) if fit else 1


# ---------------------------------------------------------------------------
# Pallas kernels
# ---------------------------------------------------------------------------
def _conv1x1_kernel(x_ref, w_ref, b_ref, o_ref, *, relu):
    """y = [relu]( x @ W' + bias );  W' has the BN scale folded in."""
    y = jnp.dot(x_ref[0], w_ref[...], preferred_element_type=jnp.float32)
    y = y + b_ref[...]
    if relu:
        y = jnp.maximum(y, 0.0)
    o_ref[0] = y.astype(o_ref.dtype)


def _gconv3x3_kernel(*refs, stride, tr, Wo, groups, with_sum):
    """Fused grouped 3x3 conv (+ folded-BN bias + ReLU) on one row tile.

    The whole padded, stride-phase-split per-sample input map is resident in
    VMEM; each of the 9 taps is a unit-stride shifted window, multiplied
    against its per-group weight slice and accumulated in f32.  Optionally
    also accumulates per-sample channel sums (for the SE branch) into a
    revisited (1, 1, C) output.
    """
    if with_sum:
        yph_ref, w_ref, b_ref, o_ref, sum_ref = refs
    else:
        yph_ref, w_ref, b_ref, o_ref = refs
    s = stride
    gw = w_ref.shape[2]          # input channels per group
    opg = w_ref.shape[3]         # output channels per group
    cb = groups * gw
    m = tr * Wo
    i = pl.program_id(1)
    r0 = i * tr

    accs = [jnp.zeros((m, opg), jnp.float32) for _ in range(groups)]
    for kh in range(3):
        for kw in range(3):
            rp, rq = kh % s, kh // s
            cp, cq = kw % s, kw // s
            ph = rp * s + cp                      # static phase index
            win = yph_ref[0, ph, pl.ds(r0 + rq, tr), pl.ds(cq, Wo), :]
            # (tr, Wo, cb) -> (tr*Wo, cb): routed through f32 where this
            # collapse is a layout-trivial shape cast (Wo is a multiple of 8
            # here), then back to bf16 for the MXU.
            win = win.astype(jnp.float32).reshape(m, cb).astype(jnp.bfloat16)
            for g in range(groups):
                xg = win[:, g * gw:(g + 1) * gw]
                wg = w_ref[kh * 3 + kw, g]        # (gw, opg) bf16
                accs[g] = accs[g] + jnp.dot(
                    xg, wg, preferred_element_type=jnp.float32)

    if with_sum:
        @pl.when(i == 0)
        def _():
            sum_ref[...] = jnp.zeros_like(sum_ref)

    for g in range(groups):
        sl = slice(g * opg, (g + 1) * opg)
        yg = accs[g] + b_ref[:, sl]               # folded-BN bias (f32)
        yg = jnp.maximum(yg, 0.0)
        o_ref[0, :, sl] = yg.astype(o_ref.dtype)
        if with_sum:
            sum_ref[0, :, sl] += jnp.sum(yg, axis=0, keepdims=True)


def _se_gate_kernel(sum_ref, w1_ref, b1_ref, w2_ref, b2_ref, g_ref, *, inv_m):
    """gate = sigmoid(W2 relu(W1 mean + b1) + b2) from per-sample channel sums."""
    mvec = sum_ref[0] * inv_m                               # (1, C) mean
    z = jnp.dot(mvec, w1_ref[...], preferred_element_type=jnp.float32)
    z = jnp.maximum(z + b1_ref[...], 0.0)
    t = jnp.dot(z, w2_ref[...], preferred_element_type=jnp.float32)
    t = t + b2_ref[...]
    g_ref[0] = 1.0 / (1.0 + jnp.exp(-t))                    # sigmoid


def _block3_kernel(*refs, has_se, skip_conv):
    """Fused: SE gating + 1x1 conv (+BN) + skip (conv or identity) + ReLU."""
    pos = 0
    h_ref = refs[pos]; pos += 1
    if has_se:
        g_ref = refs[pos]; pos += 1
    w3_ref = refs[pos]; b3_ref = refs[pos + 1]; pos += 2
    if skip_conv:
        xs_ref, wsk_ref, bsk_ref = refs[pos:pos + 3]; pos += 3
    else:
        xid_ref = refs[pos]; pos += 1
    o_ref = refs[pos]

    h = h_ref[0]                                            # (tm, w_b) bf16
    if has_se:
        h = (h.astype(jnp.float32) * g_ref[0]).astype(jnp.bfloat16)
    y = jnp.dot(h, w3_ref[...], preferred_element_type=jnp.float32)
    y = y + b3_ref[...]
    if skip_conv:
        y = y + jnp.dot(xs_ref[0], wsk_ref[...],
                        preferred_element_type=jnp.float32) + bsk_ref[...]
    else:
        y = y + xid_ref[0].astype(jnp.float32)              # identity skip
    y = jnp.maximum(y, 0.0)                                 # final ReLU
    o_ref[0] = y.astype(o_ref.dtype)


# ---------------------------------------------------------------------------
# Pallas wrappers
# ---------------------------------------------------------------------------
def conv1x1_bn(x, w, b, *, relu):
    """x: (N, M, Cin) bf16 -> (N, M, Cout) bf16; W has folded BN scale."""
    N, M, Cin = x.shape
    Cout = w.shape[1]
    tm = _pick_tile(M)
    return pl.pallas_call(
        functools.partial(_conv1x1_kernel, relu=relu),
        out_shape=jax.ShapeDtypeStruct((N, M, Cout), jnp.bfloat16),
        grid=(N, M // tm),
        in_specs=[
            pl.BlockSpec((1, tm, Cin), lambda n, i: (n, i, 0)),
            pl.BlockSpec((Cin, Cout), lambda n, i: (0, 0)),
            pl.BlockSpec((1, Cout), lambda n, i: (0, 0)),
        ],
        out_specs=pl.BlockSpec((1, tm, Cout), lambda n, i: (n, i, 0)),
        compiler_params=pltpu.CompilerParams(
            dimension_semantics=("parallel", "parallel"),
            vmem_limit_bytes=VMEM_LIMIT),
    )(x, w, b)


def gconv3x3_bn_relu(y1, w2, b2, *, stride, groups, want_sum):
    """Grouped 3x3 conv (padding=1, stride s) + folded BN + ReLU, fused.

    y1: (N, H, W, Cb) bf16.
    Returns (conv_out [, channel_sums]), Ho, Wo with conv_out (N, Ho*Wo, Cb).
    """
    N, H, W, Cb = y1.shape
    s = stride
    Ho = (H - 1) // s + 1
    Wo = (W - 1) // s + 1

    # conv halo (padding=1), then round padded dims up to a multiple of the
    # stride so the phase decomposition below is exact.
    Hp, Wp = H + 2, W + 2
    hpad, wpad = (-Hp) % s, (-Wp) % s
    y1p = jnp.pad(y1, ((0, 0), (1, 1 + hpad), (1, 1 + wpad), (0, 0)))
    Hp += hpad
    Wp += wpad
    Hop, Wop = Hp // s, Wp // s

    # Stride-phase split: yph[n, a*s+b, i, j, c] == y1p[n, s*i+a, s*j+b, c].
    # Every 3x3 tap then becomes a *unit-stride* shifted window of one phase,
    # so the kernel never needs strided / gathered loads.
    yph = (y1p.reshape(N, Hop, s, Wop, s, Cb)
              .transpose(0, 2, 4, 1, 3, 5)
              .reshape(N, s * s, Hop, Wop, Cb))

    # static bounds checks: within-phase offsets stay inside the padded map
    assert (Ho - 1) + 2 // s <= Hop - 1
    assert (Wo - 1) + 2 // s <= Wop - 1

    tr = _pick_rows(Ho, Wo)
    grid = (N, Ho // tr)

    kernel = functools.partial(_gconv3x3_kernel, stride=s, tr=tr, Wo=Wo,
                               groups=groups, with_sum=want_sum)
    in_specs = [
        # whole (small) per-sample phase-split map stays resident across the
        # row-tile loop -> one DMA per sample, no im2col materialisation.
        pl.BlockSpec((1, s * s, Hop, Wop, Cb),
                     lambda n, i: (n, 0, 0, 0, 0)),
        pl.BlockSpec(w2.shape, lambda n, i: (0, 0, 0, 0)),
        pl.BlockSpec((1, Cb), lambda n, i: (0, 0)),
    ]
    conv_shape = jax.ShapeDtypeStruct((N, Ho * Wo, Cb), jnp.bfloat16)
    conv_spec = pl.BlockSpec((1, tr * Wo, Cb), lambda n, i: (n, i, 0))
    if want_sum:
        out_shape = (conv_shape, jax.ShapeDtypeStruct((N, 1, Cb), jnp.float32))
        out_specs = (conv_spec,
                     pl.BlockSpec((1, 1, Cb), lambda n, i: (n, 0, 0)))
        sem = ("parallel", "arbitrary")   # channel sums accumulate over tiles
    else:
        out_shape = conv_shape
        out_specs = conv_spec
        sem = ("parallel", "parallel")
    out = pl.pallas_call(
        kernel,
        out_shape=out_shape,
        grid=grid,
        in_specs=in_specs,
        out_specs=out_specs,
        compiler_params=pltpu.CompilerParams(
            dimension_semantics=sem, vmem_limit_bytes=VMEM_LIMIT),
    )(yph, w2, b2)
    return out, Ho, Wo


def se_gate(sums, w1, b1, w2, b2, *, inv_m):
    """Per-sample SE gate from channel sums: (N,1,C) f32 -> (N,1,C) f32."""
    N, _, Cb = sums.shape
    Cse = w1.shape[1]
    return pl.pallas_call(
        functools.partial(_se_gate_kernel, inv_m=inv_m),
        out_shape=jax.ShapeDtypeStruct((N, 1, Cb), jnp.float32),
        grid=(N,),
        in_specs=[
            pl.BlockSpec((1, 1, Cb), lambda n: (n, 0, 0)),
            pl.BlockSpec((Cb, Cse), lambda n: (0, 0)),
            pl.BlockSpec((1, Cse), lambda n: (0, 0)),
            pl.BlockSpec((Cse, Cb), lambda n: (0, 0)),
            pl.BlockSpec((1, Cb), lambda n: (0, 0)),
        ],
        out_specs=pl.BlockSpec((1, 1, Cb), lambda n: (n, 0, 0)),
        compiler_params=pltpu.CompilerParams(
            dimension_semantics=("parallel",),
            vmem_limit_bytes=VMEM_LIMIT),
    )(sums, w1, b1, w2, b2)


def block3_fused(h, gate, w3, b3, *, skip_x=None, wskip=None, bskip=None,
                 skip_identity=None):
    """Fused block3: SE gating + 1x1 conv (+BN) + skip(conv/identity) + ReLU."""
    N, M, Cb = h.shape
    Cout = w3.shape[1]
    tm = _pick_tile(M)
    has_se = gate is not None
    skip_conv = skip_x is not None

    in_specs = [pl.BlockSpec((1, tm, Cb), lambda n, i: (n, i, 0))]
    args = [h]
    if has_se:
        in_specs.append(pl.BlockSpec((1, 1, Cb), lambda n, i: (n, 0, 0)))
        args.append(gate)
    in_specs += [pl.BlockSpec((Cb, Cout), lambda n, i: (0, 0)),
                 pl.BlockSpec((1, Cout), lambda n, i: (0, 0))]
    args += [w3, b3]
    if skip_conv:
        Cin = skip_x.shape[-1]
        in_specs += [pl.BlockSpec((1, tm, Cin), lambda n, i: (n, i, 0)),
                     pl.BlockSpec((Cin, Cout), lambda n, i: (0, 0)),
                     pl.BlockSpec((1, Cout), lambda n, i: (0, 0))]
        args += [skip_x, wskip, bskip]
    else:
        in_specs.append(pl.BlockSpec((1, tm, Cout), lambda n, i: (n, i, 0)))
        args.append(skip_identity)

    return pl.pallas_call(
        functools.partial(_block3_kernel, has_se=has_se, skip_conv=skip_conv),
        out_shape=jax.ShapeDtypeStruct((N, M, Cout), jnp.bfloat16),
        grid=(N, M // tm),
        in_specs=in_specs,
        out_specs=pl.BlockSpec((1, tm, Cout), lambda n, i: (n, i, 0)),
        compiler_params=pltpu.CompilerParams(
            dimension_semantics=("parallel", "parallel"),
            vmem_limit_bytes=VMEM_LIMIT),
    )(*args)


# ---------------------------------------------------------------------------
# Parameter init (deterministic, mirrors the PyTorch module's shapes);
# inference-mode BN is folded into weight scale + per-channel bias.
# ---------------------------------------------------------------------------
def fold_bn(gamma, beta, mean, var, eps=1e-5):
    scale = gamma / jnp.sqrt(var + eps)
    bias = beta - mean * scale
    return scale, bias


def _conv_w(key, cin, cout):
    return jax.random.normal(key, (cin, cout), jnp.float32) / np.sqrt(float(cin))


def _bn_params(key, c):
    k1, k2, k3, k4 = jax.random.split(key, 4)
    gamma = jax.random.uniform(k1, (c,), jnp.float32, 0.5, 1.5)
    beta = jax.random.uniform(k2, (c,), jnp.float32, -0.2, 0.2)
    mean = jax.random.uniform(k3, (c,), jnp.float32, -0.1, 0.1)
    var = jax.random.uniform(k4, (c,), jnp.float32, 0.5, 1.5)
    return fold_bn(gamma, beta, mean, var)


def init_xblock(key, w_in, w_out, stride, bot_mul, group_w, se_ratio):
    w_b = max(1, int(round(w_out * bot_mul)))
    groups = w_b // group_w
    out_per_g = w_b // groups
    ks = jax.random.split(key, 12)
    p = {"stride": stride, "w_b": w_b, "w_out": w_out, "groups": groups}

    # block1: 1x1 conv + BN + ReLU (BN scale folded into the weight columns)
    w1 = _conv_w(ks[0], w_in, w_b)
    s1, b1 = _bn_params(ks[1], w_b)
    p["w1"] = (w1 * s1[None, :]).astype(jnp.bfloat16)
    p["b1"] = b1.reshape(1, w_b)

    # block2: grouped 3x3 conv (PyTorch weight (w_b, group_w, 3, 3)) + BN + ReLU
    wg = (jax.random.normal(ks[2], (w_b, group_w, 3, 3), jnp.float32)
          / np.sqrt(float(group_w * 9)))
    s2, b2 = _bn_params(ks[3], w_b)
    wg = wg * s2[:, None, None, None]                    # fold BN scale
    # -> (9 taps, groups, in-per-group, out-per-group), tap index = kh*3+kw
    w2 = (jnp.transpose(wg, (2, 3, 1, 0))                # (3, 3, group_w, w_b)
          .reshape(9, group_w, groups, out_per_g)
          .transpose(0, 2, 1, 3))
    p["w2"] = w2.astype(jnp.bfloat16)
    p["b2"] = b2.reshape(1, w_b)

    # SE block (YBlock): tiny gate MLP, kept in f32
    if se_ratio is not None:
        w_se = max(1, int(round(w_in * se_ratio)))
        p["se"] = (
            _conv_w(ks[4], w_b, w_se),
            jax.random.uniform(ks[5], (1, w_se), jnp.float32, -0.1, 0.1),
            _conv_w(ks[6], w_se, w_b),
            jax.random.uniform(ks[7], (1, w_b), jnp.float32, -0.1, 0.1),
        )
    else:
        p["se"] = None

    # block3: 1x1 conv + BN (final ReLU is fused after the residual add)
    w3 = _conv_w(ks[8], w_b, w_out)
    s3, b3 = _bn_params(ks[9], w_out)
    p["w3"] = (w3 * s3[None, :]).astype(jnp.bfloat16)
    p["b3"] = b3.reshape(1, w_out)

    # skip: strided 1x1 conv + BN, only on shape/stride mismatch
    if stride != 1 or w_in != w_out:
        wsk = _conv_w(ks[10], w_in, w_out)
        ssk, bsk = _bn_params(ks[11], w_out)
        p["wskip"] = (wsk * ssk[None, :]).astype(jnp.bfloat16)
        p["bskip"] = bsk.reshape(1, w_out)
    else:
        p["wskip"] = None
    return p


def init_stage(key, num_blocks, w_in, w_out, stride, bot_mul, group_w,
               se_ratio=None):
    keys = jax.random.split(key, num_blocks)
    blocks = [init_xblock(keys[0], w_in, w_out, stride, bot_mul, group_w,
                          se_ratio)]
    for i in range(1, num_blocks):
        blocks.append(init_xblock(keys[i], w_out, w_out, 1, bot_mul, group_w,
                                  se_ratio))
    return blocks


# ---------------------------------------------------------------------------
# Forward
# ---------------------------------------------------------------------------
def xblock_forward(x, p):
    """x: (N, H, W, Cin) NHWC bf16 -> (N, Ho, Wo, w_out) bf16."""
    N, H, W, Cin = x.shape
    s = p["stride"]
    w_b = p["w_b"]
    w_out = p["w_out"]

    # block1: 1x1 conv + folded BN + ReLU
    h = conv1x1_bn(x.reshape(N, H * W, Cin), p["w1"], p["b1"], relu=True)
    h = h.reshape(N, H, W, w_b)

    # block2: fused grouped 3x3 conv + folded BN + ReLU (+ SE channel sums)
    want_se = p["se"] is not None
    res, Ho, Wo = gconv3x3_bn_relu(h, p["w2"], p["b2"], stride=s,
                                   groups=p["groups"], want_sum=want_se)
    if want_se:
        h2, sums = res
        gate = se_gate(sums, *p["se"], inv_m=1.0 / float(Ho * Wo))
    else:
        h2 = res
        gate = None
    Mo = Ho * Wo

    # block3 (+ SE gating + skip conv / identity residual + final ReLU), fused
    if p["wskip"] is not None:
        # TODO(synk): the stride-s spatial subsample of x is one cheap XLA
        # slice; the skip 1x1 conv + BN itself is fused into the block3 kernel.
        xs = x[:, ::s, ::s, :].reshape(N, Mo, Cin)
        out = block3_fused(h2, gate, p["w3"], p["b3"],
                           skip_x=xs, wskip=p["wskip"], bskip=p["bskip"])
    else:
        out = block3_fused(h2, gate, p["w3"], p["b3"],
                           skip_identity=x.reshape(N, Mo, w_out))
    return out.reshape(N, Ho, Wo, w_out)


def stage_forward(x, blocks):
    x = x.astype(jnp.bfloat16)
    for p in blocks:
        x = xblock_forward(x, p)
    return x


# ---------------------------------------------------------------------------
if __name__ == "__main__":
    key = jax.random.PRNGKey(0)
    k_x, k_p = jax.random.split(key)

    # Stage config (small): 2 blocks, w_in=4 -> w_out=8, stride=2, YBlock (SE).
    num_blocks, w_in, w_out = 2, 4, 8
    stride, bot_mul, group_w, se_ratio = 2, 1.0, 2, 0.25

    N, H, W = 2, 16, 16
    # PyTorch input would be NCHW (2, 4, 16, 16); our layout is NHWC.
    x = jax.random.normal(k_x, (N, H, W, w_in), jnp.float32)

    blocks = init_stage(k_p, num_blocks, w_in, w_out, stride, bot_mul,
                        group_w, se_ratio)

    fwd = jax.jit(lambda t: stage_forward(t, blocks))
    y = jax.block_until_ready(fwd(x))

    assert y.shape == (N, H // stride, W // stride, w_out), y.shape
    yf = jnp.asarray(y, jnp.float32)
    assert bool(jnp.all(jnp.isfinite(yf)))
    assert bool(jnp.all(yf >= 0.0))   # final ReLU
    print("KERNEL_OK")
</pallas_src>

<mosaic_0001>
module attributes {stable_mosaic.version = 11 : i64} {
  func.func @_conv1x1_kernel(%arg0: i32, %arg1: i32, %arg2: memref<1x128x4xbf16, #tpu.memory_space<vmem>>, %arg3: memref<4x8xbf16, #tpu.memory_space<vmem>>, %arg4: memref<1x8xf32, #tpu.memory_space<vmem>>, %arg5: memref<1x128x8xbf16, #tpu.memory_space<vmem>>) attributes {dimension_semantics = [#tpu.dimension_semantics<parallel>, #tpu.dimension_semantics<parallel>], iteration_bounds = array<i64: 2, 2>, scalar_prefetch = 0 : i64, scratch_operands = 0 : i64, tpu.core_type = #tpu.core_type<tc>, window_params = [{transform_indices = @transform_0, window_bounds = array<i64: 1, 128, 4>}, {pipeline_mode = #tpu.pipeline_mode<synchronous>, transform_indices = @transform_1, window_bounds = array<i64: 4, 8>}, {pipeline_mode = #tpu.pipeline_mode<synchronous>, transform_indices = @transform_2, window_bounds = array<i64: 1, 8>}, {transform_indices = @transform_3, window_bounds = array<i64: 1, 128, 8>}]} {
    %c0 = arith.constant 0 : index
    %c0_0 = arith.constant 0 : index
    %c0_1 = arith.constant 0 : index
    %0 = vector.load %arg2[%c0, %c0_0, %c0_1] : memref<1x128x4xbf16, #tpu.memory_space<vmem>>, vector<1x128x4xbf16>
    %1 = vector.shape_cast %0 : vector<1x128x4xbf16> to vector<128x4xbf16>
    %c0_2 = arith.constant 0 : index
    %c0_3 = arith.constant 0 : index
    %2 = vector.load %arg3[%c0_2, %c0_3] : memref<4x8xbf16, #tpu.memory_space<vmem>>, vector<4x8xbf16>
    %cst = arith.constant dense<0.000000e+00> : vector<128x8xf32>
    %3 = tpu.matmul %1, %2, %cst {dimension_numbers = #tpu.dot_dimension_numbers<[1], [0], [0], [1], [0, 0, 1, 1], [], []>} : vector<128x4xbf16>, vector<4x8xbf16>, vector<128x8xf32> -> vector<128x8xf32>
    %c0_4 = arith.constant 0 : index
    %c0_5 = arith.constant 0 : index
    %4 = vector.load %arg4[%c0_4, %c0_5] : memref<1x8xf32, #tpu.memory_space<vmem>>, vector<1x8xf32>
    %5 = vector.broadcast %4 : vector<1x8xf32> to vector<128x8xf32>
    %6 = arith.addf %3, %5 : vector<128x8xf32>
    %cst_6 = arith.constant 0.000000e+00 : f32
    %7 = vector.broadcast %cst_6 : f32 to vector<128x8xf32>
    %8 = arith.maximumf %6, %7 : vector<128x8xf32>
    %9 = arith.truncf %8 : vector<128x8xf32> to vector<128x8xbf16>
    %c0_7 = arith.constant 0 : index
    %c0_8 = arith.constant 0 : index
    %c0_9 = arith.constant 0 : index
    %10 = vector.load %arg5[%c0_7, %c0_8, %c0_9] : memref<1x128x8xbf16, #tpu.memory_space<vmem>>, vector<1x128x8xbf16>
    %11 = vector.shape_cast %10 : vector<1x128x8xbf16> to vector<128x8xbf16>
    %12 = vector.shape_cast %9 : vector<128x8xbf16> to vector<1x128x8xbf16>
    tpu.vector_store %arg5[%c0_7, %c0_8, %c0_9], %12 {strides = array<i32>} : memref<1x128x8xbf16, #tpu.memory_space<vmem>>, vector<1x128x8xbf16>,
    return
  }
  func.func @transform_0(%arg0: i32, %arg1: i32) -> (i32, i32, i32) {
    %c0_i32 = arith.constant 0 : i32
    %c0_i32_0 = arith.constant 0 : i32
    return %arg0, %arg1, %c0_i32 : i32, i32, i32
  }
  func.func @transform_1(%arg0: i32, %arg1: i32) -> (i32, i32) {
    %c0_i32 = arith.constant 0 : i32
    %c0_i32_0 = arith.constant 0 : i32
    %c0_i32_1 = arith.constant 0 : i32
    return %c0_i32, %c0_i32_0 : i32, i32
  }
  func.func @transform_2(%arg0: i32, %arg1: i32) -> (i32, i32) {
    %c0_i32 = arith.constant 0 : i32
    %c0_i32_0 = arith.constant 0 : i32
    %c0_i32_1 = arith.constant 0 : i32
    return %c0_i32, %c0_i32_0 : i32, i32
  }
  func.func @transform_3(%arg0: i32, %arg1: i32) -> (i32, i32, i32) {
    %c0_i32 = arith.constant 0 : i32
    %c0_i32_0 = arith.constant 0 : i32
    return %arg0, %arg1, %c0_i32 : i32, i32, i32
  }
}

module attributes {stable_mosaic.version = 11 : i64} {
  func.func @_gconv3x3_kernel(%arg0: i32, %arg1: i32, %arg2: memref<1x4x9x9x8xbf16, #tpu.memory_space<vmem>>, %arg3: memref<9x4x2x2xbf16, #tpu.memory_space<vmem>>, %arg4: memref<1x8xf32, #tpu.memory_space<vmem>>, %arg5: memref<1x32x8xbf16, #tpu.memory_space<vmem>>, %arg6: memref<1x1x8xf32, #tpu.memory_space<vmem>>) attributes {dimension_semantics = [#tpu.dimension_semantics<parallel>, #tpu.dimension_semantics<arbitrary>], iteration_bounds = array<i64: 2, 2>, scalar_prefetch = 0 : i64, scratch_operands = 0 : i64, tpu.core_type = #tpu.core_type<tc>, window_params = [{transform_indices = @transform_0, window_bounds = array<i64: 1, 4, 9, 9, 8>}, {pipeline_mode = #tpu.pipeline_mode<synchronous>, transform_indices = @transform_1, window_bounds = array<i64: 9, 4, 2, 2>}, {pipeline_mode = #tpu.pipeline_mode<synchronous>, transform_indices = @transform_2, window_bounds = array<i64: 1, 8>}, {transform_indices = @transform_3, window_bounds = array<i64: 1, 32, 8>}, {transform_indices = @transform_4, window_bounds = array<i64: 1, 1, 8>}]} {
    %c4_i32 = arith.constant 4 : i32
    %0 = arith.muli %arg1, %c4_i32 : i32
    %cst = arith.constant 0.000000e+00 : f32
    %1 = vector.broadcast %cst : f32 to vector<32x2xf32>
    %cst_0 = arith.constant 0.000000e+00 : f32
    %2 = vector.broadcast %cst_0 : f32 to vector<32x2xf32>
    %cst_1 = arith.constant 0.000000e+00 : f32
    %3 = vector.broadcast %cst_1 : f32 to vector<32x2xf32>
    %cst_2 = arith.constant 0.000000e+00 : f32
    %4 = vector.broadcast %cst_2 : f32 to vector<32x2xf32>
    %c0_i32 = arith.constant 0 : i32
    %5 = arith.addi %0, %c0_i32 : i32
    %c0 = arith.constant 0 : index
    %c0_3 = arith.constant 0 : index
    %6 = arith.index_cast %5 : i32 to index
    %c0_4 = arith.constant 0 : index
    %c0_5 = arith.constant 0 : index
    %7 = vector.load %arg2[%c0, %c0_3, %6, %c0_4, %c0_5] : memref<1x4x9x9x8xbf16, #tpu.memory_space<vmem>>, vector<1x1x4x8x8xbf16>
    %8 = vector.shape_cast %7 : vector<1x1x4x8x8xbf16> to vector<4x8x8xbf16>
    %9 = arith.extf %8 : vector<4x8x8xbf16> to vector<4x8x8xf32>
    %10 = vector.shape_cast %9 : vector<4x8x8xf32> to vector<32x8xf32>
    %11 = arith.truncf %10 : vector<32x8xf32> to vector<32x8xbf16>
    %12 = vector.extract_strided_slice %11 {offsets = [0, 0], sizes = [32, 2], strides = [1, 1]} : vector<32x8xbf16> to vector<32x2xbf16>
    %c0_6 = arith.constant 0 : index
    %c0_7 = arith.constant 0 : index
    %c0_8 = arith.constant 0 : index
    %c0_9 = arith.constant 0 : index
    %13 = vector.load %arg3[%c0_6, %c0_7, %c0_8, %c0_9] : memref<9x4x2x2xbf16, #tpu.memory_space<vmem>>, vector<1x1x2x2xbf16>
    %14 = vector.shape_cast %13 : vector<1x1x2x2xbf16> to vector<2x2xbf16>
    %cst_10 = arith.constant dense<0.000000e+00> : vector<32x2xf32>
    %15 = tpu.matmul %12, %14, %cst_10 {dimension_numbers = #tpu.dot_dimension_numbers<[1], [0], [0], [1], [0, 0, 1, 1], [], []>} : vector<32x2xbf16>, vector<2x2xbf16>, vector<32x2xf32> -> vector<32x2xf32>
    %16 = arith.addf %1, %15 : vector<32x2xf32>
    %17 = vector.extract_strided_slice %11 {offsets = [0, 2], sizes = [32, 2], strides = [1, 1]} : vector<32x8xbf16> to vector<32x2xbf16>
    %c0_11 = arith.constant 0 : index
    %c1 = arith.constant 1 : index
    %c0_12 = arith.constant 0 : index
    %c0_13 = arith.constant 0 : index
    %18 = vector.load %arg3[%c0_11, %c1, %c0_12, %c0_13] : memref<9x4x2x2xbf16, #tpu.memory_space<vmem>>, vector<1x1x2x2xbf16>
    %19 = vector.shape_cast %18 : vector<1x1x2x2xbf16> to vector<2x2xbf16>
    %cst_14 = arith.constant dense<0.000000e+00> : vector<32x2xf32>
    %20 = tpu.matmul %17, %19, %cst_14 {dimension_numbers = #tpu.dot_dimension_numbers<[1], [0], [0], [1], [0, 0, 1, 1], [], []>} : vector<32x2xbf16>, vector<2x2xbf16>, vector<32x2xf32> -> vector<32x2xf32>
    %21 = arith.addf %2, %20 : vector<32x2xf32>
    %22 = vector.extract_strided_slice %11 {offsets = [0, 4], sizes = [32, 2], strides = [1, 1]} : vector<32x8xbf16> to vector<32x2xbf16>
    %c0_15 = arith.constant 0 : index
    %c2 = arith.constant 2 : index
    %c0_16 = arith.constant 0 : index
    %c0_17 = arith.constant 0 : index
    %23 = vector.load %arg3[%c0_15, %c2, %c0_16, %c0_17] : memref<9x4x2x2xbf16, #tpu.memory_space<vmem>>, vector<1x1x2x2xbf16>
    %24 = vector.shape_cast %23 : vector<1x1x2x2xbf16> to vector<2x2xbf16>
    %cst_18 = arith.constant dense<0.000000e+00> : vector<32x2xf32>
    %25 = tpu.matmul %22, %24, %cst_18 {dimension_numbers = #tpu.dot_dimension_numbers<[1], [0], [0], [1], [0, 0, 1, 1], [], []>} : vector<32x2xbf16>, vector<2x2xbf16>, vector<32x2xf32> -> vector<32x2xf32>
    %26 = arith.addf %3, %25 : vector<32x2xf32>
    %27 = vector.extract_strided_slice %11 {offsets = [0, 6], sizes = [32, 2], strides = [1, 1]} : vector<32x8xbf16> to vector<32x2xbf16>
    %c0_19 = arith.constant 0 : index
    %c3 = arith.constant 3 : index
    %c0_20 = arith.constant 0 : index
    %c0_21 = arith.constant 0 : index
    %28 = vector.load %arg3[%c0_19, %c3, %c0_20, %c0_21] : memref<9x4x2x2xbf16, #tpu.memory_space<vmem>>, vector<1x1x2x2xbf16>
    %29 = vector.shape_cast %28 : vector<1x1x2x2xbf16> to vector<2x2xbf16>
    %cst_22 = arith.constant dense<0.000000e+00> : vector<32x2xf32>
    %30 = tpu.matmul %27, %29, %cst_22 {dimension_numbers = #tpu.dot_dimension_numbers<[1], [0], [0], [1], [0, 0, 1, 1], [], []>} : vector<32x2xbf16>, vector<2x2xbf16>, vector<32x2xf32> -> vector<32x2xf32>
    %31 = arith.addf %4, %30 : vector<32x2xf32>
    %c0_i32_23 = arith.constant 0 : i32
    %32 = arith.addi %0, %c0_i32_23 : i32
    %c0_24 = arith.constant 0 : index
    %c1_25 = arith.constant 1 : index
    %33 = arith.index_cast %32 : i32 to index
    %c0_26 = arith.constant 0 : index
    %c0_27 = arith.constant 0 : index
    %34 = vector.load %arg2[%c0_24, %c1_25, %33, %c0_26, %c0_27] : memref<1x4x9x9x8xbf16, #tpu.memory_space<vmem>>, vector<1x1x4x8x8xbf16>
    %35 = vector.shape_cast %34 : vector<1x1x4x8x8xbf16> to vector<4x8x8xbf16>
    %36 = arith.extf %35 : vector<4x8x8xbf16> to vector<4x8x8xf32>
    %37 = vector.shape_cast %36 : vector<4x8x8xf32> to vector<32x8xf32>
    %38 = arith.truncf %37 : vector<32x8xf32> to vector<32x8xbf16>
    %39 = vector.extract_strided_slice %38 {offsets = [0, 0], sizes = [32, 2], strides = [1, 1]} : vector<32x8xbf16> to vector<32x2xbf16>
    %c1_28 = arith.constant 1 : index
    %c0_29 = arith.constant 0 : index
    %c0_30 = arith.constant 0 : index
    %c0_31 = arith.constant 0 : index
    %40 = vector.load %arg3[%c1_28, %c0_29, %c0_30, %c0_31] : memref<9x4x2x2xbf16, #tpu.memory_space<vmem>>, vector<1x1x2x2xbf16>
    %41 = vector.shape_cast %40 : vector<1x1x2x2xbf16> to vector<2x2xbf16>
    %cst_32 = arith.constant dense<0.000000e+00> : vector<32x2xf32>
    %42 = tpu.matmul %39, %41, %cst_32 {dimension_numbers = #tpu.dot_dimension_numbers<[1], [0], [0], [1], [0, 0, 1, 1], [], []>} : vector<32x2xbf16>, vector<2x2xbf16>, vector<32x2xf32> -> vector<32x2xf32>
    %43 = arith.addf %16, %42 : vector<32x2xf32>
    %44 = vector.extract_strided_slice %38 {offsets = [0, 2], sizes = [32, 2], strides = [1, 1]} : vector<32x8xbf16> to vector<32x2xbf16>
    %c1_33 = arith.constant 1 : index
    %c1_34 = arith.constant 1 : index
    %c0_35 = arith.constant 0 : index
    %c0_36 = arith.constant 0 : index
    %45 = vector.load %arg3[%c1_33, %c1_34, %c0_35, %c0_36] : memref<9x4x2x2xbf16, #tpu.memory_space<vmem>>, vector<1x1x2x2xbf16>
    %46 = vector.shape_cast %45 : vector<1x1x2x2xbf16> to vector<2x2xbf16>
    %cst_37 = arith.constant dense<0.000000e+00> : vector<32x2xf32>
    %47 = tpu.matmul %44, %46, %cst_37 {dimension_numbers = #tpu.dot_dimension_numbers<[1], [0], [0], [1], [0, 0, 1, 1], [], []>} : vector<32x2xbf16>, vector<2x2xbf16>, vector<32x2xf32> -> vector<32x2xf32>
    %48 = arith.addf %21, %47 : vector<32x2xf32>
    %49 = vector.extract_strided_slice %38 {offsets = [0, 4], sizes = [32, 2], strides = [1, 1]} : vector<32x8xbf16> to vector<32x2xbf16>
    %c1_38 = arith.constant 1 : index
    %c2_39 = arith.constant 2 : index
    %c0_40 = arith.constant 0 : index
    %c0_41 = arith.constant 0 : index
    %50 = vector.load %arg3[%c1_38, %c2_39, %c0_40, %c0_41] : memref<9x4x2x2xbf16, #tpu.memory_space<vmem>>, vector<1x1x2x2xbf16>
    %51 = vector.shape_cast %50 : vector<1x1x2x2xbf16> to vector<2x2xbf16>
    %cst_42 = arith.constant dense<0.000000e+00> : vector<32x2xf32>
    %52 = tpu.matmul %49, %51, %cst_42 {dimension_numbers = #tpu.dot_dimension_numbers<[1], [0], [0], [1], [0, 0, 1, 1], [], []>} : vector<32x2xbf16>, vector<2x2xbf16>, vector<32x2xf32> -> vector<32x2xf32>
    %53 = arith.addf %26, %52 : vector<32x2xf32>
    %54 = vector.extract_strided_slice %38 {offsets = [0, 6], sizes = [32, 2], strides = [1, 1]} : vector<32x8xbf16> to vector<32x2xbf16>
    %c1_43 = arith.constant 1 : index
    %c3_44 = arith.constant 3 : index
    %c0_45 = arith.constant 0 : index
    %c0_46 = arith.constant 0 : index
    %55 = vector.load %arg3[%c1_43, %c3_44, %c0_45, %c0_46] : memref<9x4x2x2xbf16, #tpu.memory_space<vmem>>, vector<1x1x2x2xbf16>
    %56 = vector.shape_cast %55 : vector<1x1x2x2xbf16> to vector<2x2xbf16>
    %cst_47 = arith.constant dense<0.000000e+00> : vector<32x2xf32>
    %57 = tpu.matmul %54, %56, %cst_47 {dimension_numbers = #tpu.dot_dimension_numbers<[1], [0], [0], [1], [0, 0, 1, 1], [], []>} : vector<32x2xbf16>, vector<2x2xbf16>, vector<32x2xf32> -> vector<32x2xf32>
    %58 = arith.addf %31, %57 : vector<32x2xf32>
    %c0_i32_48 = arith.constant 0 : i32
    %59 = arith.addi %0, %c0_i32_48 : i32
    %c0_49 = arith.constant 0 : index
    %c0_50 = arith.constant 0 : index
    %60 = arith.index_cast %59 : i32 to index
    %c1_51 = arith.constant 1 : index
    %c0_52 = arith.constant 0 : index
    %61 = vector.load %arg2[%c0_49, %c0_50, %60, %c1_51, %c0_52] : memref<1x4x9x9x8xbf16, #tpu.memory_space<vmem>>, vector<1x1x4x8x8xbf16>
    %62 = vector.shape_cast %61 : vector<1x1x4x8x8xbf16> to vector<4x8x8xbf16>
    %63 = arith.extf %62 : vector<4x8x8xbf16> to vector<4x8x8xf32>
    %64 = vector.shape_cast %63 : vector<4x8x8xf32> to vector<32x8xf32>
    %65 = arith.truncf %64 : vector<32x8xf32> to vector<32x8xbf16>
    %66 = vector.extract_strided_slice %65 {offsets = [0, 0], sizes = [32, 2], strides = [1, 1]} : vector<32x8xbf16> to vector<32x2xbf16>
    %c2_53 = arith.constant 2 : index
    %c0_54 = arith.constant 0 : index
    %c0_55 = arith.constant 0 : index
    %c0_56 = arith.constant 0 : index
    %67 = vector.load %arg3[%c2_53, %c0_54, %c0_55, %c0_56] : memref<9x4x2x2xbf16, #tpu.memory_space<vmem>>, vector<1x1x2x2xbf16>
    %68 = vector.shape_cast %67 : vector<1x1x2x2xbf16> to vector<2x2xbf16>
    %cst_57 = arith.constant dense<0.000000e+00> : vector<32x2xf32>
    %69 = tpu.matmul %66, %68, %cst_57 {dimension_numbers = #tpu.dot_dimension_numbers<[1], [0], [0], [1], [0, 0, 1, 1], [], []>} : vector<32x2xbf16>, vector<2x2xbf16>, vector<32x2xf32> -> vector<32x2xf32>
    %70 = arith.addf %43, %69 : vector<32x2xf32>
    %71 = vector.extract_strided_slice %65 {offsets = [0, 2], sizes = [32, 2], strides = [1, 1]} : vector<32x8xbf16> to vector<32x2xbf16>
    %c2_58 = arith.constant 2 : index
    %c1_59 = arith.constant 1 : index
    %c0_60 = arith.constant 0 : index
    %c0_61 = arith.constant 0 : index
    %72 = vector.load %arg3[%c2_58, %c1_59, %c0_60, %c0_61] : memref<9x4x2x2xbf16, #tpu.memory_space<vmem>>, vector<1x1x2x2xbf16>
    %73 = vector.shape_cast %72 : vector<1x1x2x2xbf16> to vector<2x2xbf16>
    %cst_62 = arith.constant dense<0.000000e+00> : vector<32x2xf32>
    %74 = tpu.matmul %71, %73, %cst_62 {dimension_numbers = #tpu.dot_dimension_numbers<[1], [0], [0], [1], [0, 0, 1, 1], [], []>} : vector<32x2xbf16>, vector<2x2xbf16>, vector<32x2xf32> -> vector<32x2xf32>
    %75 = arith.addf %48, %74 : vector<32x2xf32>
    %76 = vector.extract_strided_slice %65 {offsets = [0, 4], sizes = [32, 2], strides = [1, 1]} : vector<32x8xbf16> to vector<32x2xbf16>
    %c2_63 = arith.constant 2 : index
    %c2_64 = arith.constant 2 : index
    %c0_65 = arith.constant 0 : index
    %c0_66 = arith.constant 0 : index
    %77 = vector.load %arg3[%c2_63, %c2_64, %c0_65, %c0_66] : memref<9x4x2x2xbf16, #tpu.memory_space<vmem>>, vector<1x1x2x2xbf16>
    %78 = vector.shape_cast %77 : vector<1x1x2x2xbf16> to vector<2x2xbf16>
    %cst_67 = arith.constant dense<0.000000e+00> : vector<32x2xf32>
    %79 = tpu.matmul %76, %78, %cst_67 {dimension_numbers = #tpu.dot_dimension_numbers<[1], [0], [0], [1], [0, 0, 1, 1], [], []>} : vector<32x2xbf16>, vector<2x2xbf16>, vector<32x2xf32> -> vector<32x2xf32>
    %80 = arith.addf %53, %79 : vector<32x2xf32>
    %81 = vector.extract_strided_slice %65 {offsets = [0, 6], sizes = [32, 2], strides = [1, 1]} : vector<32x8xbf16> to vector<32x2xbf16>
    %c2_68 = arith.constant 2 : index
    %c3_69 = arith.constant 3 : index
    %c0_70 = arith.constant 0 : index
    %c0_71 = arith.constant 0 : index
    %82 = vector.load %arg3[%c2_68, %c3_69, %c0_70, %c0_71] : memref<9x4x2x2xbf16, #tpu.memory_space<vmem>>, vector<1x1x2x2xbf16>
    %83 = vector.shape_cast %82 : vector<1x1x2x2xbf16> to vector<2x2xbf16>
    %cst_72 = arith.constant dense<0.000000e+00> : vector<32x2xf32>
    %84 = tpu.matmul %81, %83, %cst_72 {dimension_numbers = #tpu.dot_dimension_numbers<[1], [0], [0], [1], [0, 0, 1, 1], [], []>} : vector<32x2xbf16>, vector<2x2xbf16>, vector<32x2xf32> -> vector<32x2xf32>
    %85 = arith.addf %58, %84 : vector<32x2xf32>
    %c0_i32_73 = arith.constant 0 : i32
    %86 = arith.addi %0, %c0_i32_73 : i32
    %c0_74 = arith.constant 0 : index
    %c2_75 = arith.constant 2 : index
    %87 = arith.index_cast %86 : i32 to index
    %c0_76 = arith.constant 0 : index
    %c0_77 = arith.constant 0 : index
    %88 = vector.load %arg2[%c0_74, %c2_75, %87, %c0_76, %c0_77] : memref<1x4x9x9x8xbf16, #tpu.memory_space<vmem>>, vector<1x1x4x8x8xbf16>
    %89 = vector.shape_cast %88 : vector<1x1x4x8x8xbf16> to vector<4x8x8xbf16>
    %90 = arith.extf %89 : vector<4x8x8xbf16> to vector<4x8x8xf32>
    %91 = vector.shape_cast %90 : vector<4x8x8xf32> to vector<32x8xf32>
    %92 = arith.truncf %91 : vector<32x8xf32> to vector<32x8xbf16>
    %93 = vector.extract_strided_slice %92 {offsets = [0, 0], sizes = [32, 2], strides = [1, 1]} : vector<32x8xbf16> to vector<32x2xbf16>
    %c3_78 = arith.constant 3 : index
    %c0_79 = arith.constant 0 : index
    %c0_80 = arith.constant 0 : index
    %c0_81 = arith.constant 0 : index
    %94 = vector.load %arg3[%c3_78, %c0_79, %c0_80, %c0_81] : memref<9x4x2x2xbf16, #tpu.memory_space<vmem>>, vector<1x1x2x2xbf16>
    %95 = vector.shape_cast %94 : vector<1x1x2x2xbf16> to vector<2x2xbf16>
    %cst_82 = arith.constant dense<0.000000e+00> : vector<32x2xf32>
    %96 = tpu.matmul %93, %95, %cst_82 {dimension_numbers = #tpu.dot_dimension_numbers<[1], [0], [0], [1], [0, 0, 1, 1], [], []>} : vector<32x2xbf16>, vector<2x2xbf16>, vector<32x2xf32> -> vector<32x2xf32>
    %97 = arith.addf %70, %96 : vector<32x2xf32>
    %98 = vector.extract_strided_slice %92 {offsets = [0, 2], sizes = [32, 2], strides = [1, 1]} : vector<32x8xbf16> to vector<32x2xbf16>
    %c3_83 = arith.constant 3 : index
    %c1_84 = arith.constant 1 : index
    %c0_85 = arith.constant 0 : index
    %c0_86 = arith.constant 0 : index
    %99 = vector.load %arg3[%c3_83, %c1_84, %c0_85, %c0_86] : memref<9x4x2x2xbf16, #tpu.memory_space<vmem>>, vector<1x1x2x2xbf16>
    %100 = vector.shape_cast %99 : vector<1x1x2x2xbf16> to vector<2x2xbf16>
    %cst_87 = arith.constant dense<0.000000e+00> : vector<32x2xf32>
    %101 = tpu.matmul %98, %100, %cst_87 {dimension_numbers = #tpu.dot_dimension_numbers<[1], [0], [0], [1], [0, 0, 1, 1], [], []>} : vector<32x2xbf16>, vector<2x2xbf16>, vector<32x2xf32> -> vector<32x2xf32>
    %102 = arith.addf %75, %101 : vector<32x2xf32>
    %103 = vector.extract_strided_slice %92 {offsets = [0, 4], sizes = [32, 2], strides = [1, 1]} : vector<32x8xbf16> to vector<32x2xbf16>
    %c3_88 = arith.constant 3 : index
    %c2_89 = arith.constant 2 : index
    %c0_90 = arith.constant 0 : index
    %c0_91 = arith.constant 0 : index
    %104 = vector.load %arg3[%c3_88, %c2_89, %c0_90, %c0_91] : memref<9x4x2x2xbf16, #tpu.memory_space<vmem>>, vector<1x1x2x2xbf16>
    %105 = vector.shape_cast %104 : vector<1x1x2x2xbf16> to vector<2x2xbf16>
    %cst_92 = arith.constant dense<0.000000e+00> : vector<32x2xf32>
    %106 = tpu.matmul %103, %105, %cst_92 {dimension_numbers = #tpu.dot_dimension_numbers<[1], [0], [0], [1], [0, 0, 1, 1], [], []>} : vector<32x2xbf16>, vector<2x2xbf16>, vector<32x2xf32> -> vector<32x2xf32>
    %107 = arith.addf %80, %106 : vector<32x2xf32>
    %108 = vector.extract_strided_slice %92 {offsets = [0, 6], sizes = [32, 2], strides = [1, 1]} : vector<32x8xbf16> to vector<32x2xbf16>
    %c3_93 = arith.constant 3 : index
    %c3_94 = arith.constant 3 : index
    %c0_95 = arith.constant 0 : index
    %c0_96 = arith.constant 0 : index
    %109 = vector.load %arg3[%c3_93, %c3_94, %c0_95, %c0_96] : memref<9x4x2x2xbf16, #tpu.memory_space<vmem>>, vector<1x1x2x2xbf16>
    %110 = vector.shape_cast %109 : vector<1x1x2x2xbf16> to vector<2x2xbf16>
    %cst_97 = arith.constant dense<0.000000e+00> : vector<32x2xf32>
    %111 = tpu.matmul %108, %110, %cst_97 {dimension_numbers = #tpu.dot_dimension_numbers<[1], [0], [0], [1], [0, 0, 1, 1], [], []>} : vector<32x2xbf16>, vector<2x2xbf16>, vector<32x2xf32> -> vector<32x2xf32>
    %112 = arith.addf %85, %111 : vector<32x2xf32>
    %c0_i32_98 = arith.constant 0 : i32
    %113 = arith.addi %0, %c0_i32_98 : i32
    %c0_99 = arith.constant 0 : index
    %c3_100 = arith.constant 3 : index
    %114 = arith.index_cast %113 : i32 to index
    %c0_101 = arith.constant 0 : index
    %c0_102 = arith.constant 0 : index
    %115 = vector.load %arg2[%c0_99, %c3_100, %114, %c0_101, %c0_102] : memref<1x4x9x9x8xbf16, #tpu.memory_space<vmem>>, vector<1x1x4x8x8xbf16>
    %116 = vector.shape_cast %115 : vector<1x1x4x8x8xbf16> to vector<4x8x8xbf16>
    %117 = arith.extf %116 : vector<4x8x8xbf16> to vector<4x8x8xf32>
    %118 = vector.shape_cast %117 : vector<4x8x8xf32> to vector<32x8xf32>
    %119 = arith.truncf %118 : vector<32x8xf32> to vector<32x8xbf16>
    %120 = vector.extract_strided_slice %119 {offsets = [0, 0], sizes = [32, 2], strides = [1, 1]} : vector<32x8xbf16> to vector<32x2xbf16>
    %c4 = arith.constant 4 : index
    %c0_103 = arith.constant 0 : index
    %c0_104 = arith.constant 0 : index
    %c0_105 = arith.constant 0 : index
    %121 = vector.load %arg3[%c4, %c0_103, %c0_104, %c0_105] : memref<9x4x2x2xbf16, #tpu.memory_space<vmem>>, vector<1x1x2x2xbf16>
    %122 = vector.shape_cast %121 : vector<1x1x2x2xbf16> to vector<2x2xbf16>
    %cst_106 = arith.constant dense<0.000000e+00> : vector<32x2xf32>
    %123 = tpu.matmul %120, %122, %cst_106 {dimension_numbers = #tpu.dot_dimension_numbers<[1], [0], [0], [1], [0, 0, 1, 1], [], []>} : vector<32x2xbf16>, vector<2x2xbf16>, vector<32x2xf32> -> vector<32x2xf32>
    %124 = arith.addf %97, %123 : vector<32x2xf32>
    %125 = vector.extract_strided_slice %119 {offsets = [0, 2], sizes = [32, 2], strides = [1, 1]} : vector<32x8xbf16> to vector<32x2xbf16>
    %c4_107 = arith.constant 4 : index
    %c1_108 = arith.constant 1 : index
    %c0_109 = arith.constant 0 : index
    %c0_110 = arith.constant 0 : index
    %126 = vector.load %arg3[%c4_107, %c1_108, %c0_109, %c0_110] : memref<9x4x2x2xbf16, #tpu.memory_space<vmem>>, vector<1x1x2x2xbf16>
    %127 = vector.shape_cast %126 : vector<1x1x2x2xbf16> to vector<2x2xbf16>
    %cst_111 = arith.constant dense<0.000000e+00> : vector<32x2xf32>
    %128 = tpu.matmul %125, %127, %cst_111 {dimension_numbers = #tpu.dot_dimension_numbers<[1], [0], [0], [1], [0, 0, 1, 1], [], []>} : vector<32x2xbf16>, vector<2x2xbf16>, vector<32x2xf32> -> vector<32x2xf32>
    %129 = arith.addf %102, %128 : vector<32x2xf32>
    %130 = vector.extract_strided_slice %119 {offsets = [0, 4], sizes = [32, 2], strides = [1, 1]} : vector<32x8xbf16> to vector<32x2xbf16>
    %c4_112 = arith.constant 4 : index
    %c2_113 = arith.constant 2 : index
    %c0_114 = arith.constant 0 : index
    %c0_115 = arith.constant 0 : index
    %131 = vector.load %arg3[%c4_112, %c2_113, %c0_114, %c0_115] : memref<9x4x2x2xbf16, #tpu.memory_space<vmem>>, vector<1x1x2x2xbf16>
    %132 = vector.shape_cast %131 : vector<1x1x2x2xbf16> to vector<2x2xbf16>
    %cst_116 = arith.constant dense<0.000000e+00> : vector<32x2xf32>
    %133 = tpu.matmul %130, %132, %cst_116 {dimension_numbers = #tpu.dot_dimension_numbers<[1], [0], [0], [1], [0, 0, 1, 1], [], []>} : vector<32x2xbf16>, vector<2x2xbf16>, vector<32x2xf32> -> vector<32x2xf32>
    %134 = arith.addf %107, %133 : vector<32x2xf32>
    %135 = vector.extract_strided_slice %119 {offsets = [0, 6], sizes = [32, 2], strides = [1, 1]} : vector<32x8xbf16> to vector<32x2xbf16>
    %c4_117 = arith.constant 4 : index
    %c3_118 = arith.constant 3 : index
    %c0_119 = arith.constant 0 : index
    %c0_120 = arith.constant 0 : index
    %136 = vector.load %arg3[%c4_117, %c3_118, %c0_119, %c0_120] : memref<9x4x2x2xbf16, #tpu.memory_space<vmem>>, vector<1x1x2x2xbf16>
    %137 = vector.shape_cast %136 : vector<1x1x2x2xbf16> to vector<2x2xbf16>
    %cst_121 = arith.constant dense<0.000000e+00> : vector<32x2xf32>
    %138 = tpu.matmul %135, %137, %cst_121 {dimension_numbers = #tpu.dot_dimension_numbers<[1], [0], [0], [1], [0, 0, 1, 1], [], []>} : vector<32x2xbf16>, vector<2x2xbf16>, vector<32x2xf32> -> vector<32x2xf32>
    %139 = arith.addf %112, %138 : vector<32x2xf32>
    %c0_i32_122 = arith.constant 0 : i32
    %140 = arith.addi %0, %c0_i32_122 : i32
    %c0_123 = arith.constant 0 : index
    %c2_124 = arith.constant 2 : index
    %141 = arith.index_cast %140 : i32 to index
    %c1_125 = arith.constant 1 : index
    %c0_126 = arith.constant 0 : index
    %142 = vector.load %arg2[%c0_123, %c2_124, %141, %c1_125, %c0_126] : memref<1x4x9x9x8xbf16, #tpu.memory_space<vmem>>, vector<1x1x4x8x8xbf16>
    %143 = vector.shape_cast %142 : vector<1x1x4x8x8xbf16> to vector<4x8x8xbf16>
    %144 = arith.extf %143 : vector<4x8x8xbf16> to vector<4x8x8xf32>
    %145 = vector.shape_cast %144 : vector<4x8x8xf32> to vector<32x8xf32>
    %146 = arith.truncf %145 : vector<32x8xf32> to vector<32x8xbf16>
    %147 = vector.extract_strided_slice %146 {offsets = [0, 0], sizes = [32, 2], strides = [1, 1]} : vector<32x8xbf16> to vector<32x2xbf16>
    %c5 = arith.constant 5 : index
    %c0_127 = arith.constant 0 : index
    %c0_128 = arith.constant 0 : index
    %c0_129 = arith.constant 0 : index
    %148 = vector.load %arg3[%c5, %c0_127, %c0_128, %c0_129] : memref<9x4x2x2xbf16, #tpu.memory_space<vmem>>, vector<1x1x2x2xbf16>
    %149 = vector.shape_cast %148 : vector<1x1x2x2xbf16> to vector<2x2xbf16>
    %cst_130 = arith.constant dense<0.000000e+00> : vector<32x2xf32>
    %150 = tpu.matmul %147, %149, %cst_130 {dimension_numbers = #tpu.dot_dimension_numbers<[1], [0], [0], [1], [0, 0, 1, 1], [], []>} : vector<32x2xbf16>, vector<2x2xbf16>, vector<32x2xf32> -> vector<32x2xf32>
    %151 = arith.addf %124, %150 : vector<32x2xf32>
    %152 = vector.extract_strided_slice %146 {offsets = [0, 2], sizes = [32, 2], strides = [1, 1]} : vector<32x8xbf16> to vector<32x2xbf16>
    %c5_131 = arith.constant 5 : index
    %c1_132 = arith.constant 1 : index
    %c0_133 = arith.constant 0 : index
    %c0_134 = arith.constant 0 : index
    %153 = vector.load %arg3[%c5_131, %c1_132, %c0_133, %c0_134] : memref<9x4x2x2xbf16, #tpu.memory_space<vmem>>, vector<1x1x2x2xbf16>
    %154 = vector.shape_cast %153 : vector<1x1x2x2xbf16> to vector<2x2xbf16>
    %cst_135 = arith.constant dense<0.000000e+00> : vector<32x2xf32>
    %155 = tpu.matmul %152, %154, %cst_135 {dimension_numbers = #tpu.dot_dimension_numbers<[1], [0], [0], [1], [0, 0, 1, 1], [], []>} : vector<32x2xbf16>, vector<2x2xbf16>, vector<32x2xf32> -> vector<32x2xf32>
    %156 = arith.addf %129, %155 : vector<32x2xf32>
    %157 = vector.extract_strided_slice %146 {offsets = [0, 4], sizes = [32, 2], strides = [1, 1]} : vector<32x8xbf16> to vector<32x2xbf16>
    %c5_136 = arith.constant 5 : index
    %c2_137 = arith.constant 2 : index
    %c0_138 = arith.constant 0 : index
    %c0_139 = arith.constant 0 : index
    %158 = vector.load %arg3[%c5_136, %c2_137, %c0_138, %c0_139] : memref<9x4x2x2xbf16, #tpu.memory_space<vmem>>, vector<1x1x2x2xbf16>
    %159 = vector.shape_cast %158 : vector<1x1x2x2xbf16> to vector<2x2xbf16>
    %cst_140 = arith.constant dense<0.000000e+00> : vector<32x2xf32>
    %160 = tpu.matmul %157, %159, %cst_140 {dimension_numbers = #tpu.dot_dimension_numbers<[1], [0], [0], [1], [0, 0, 1, 1], [], []>} : vector<32x2xbf16>, vector<2x2xbf16>, vector<32x2xf32> -> vector<32x2xf32>
    %161 = arith.addf %134, %160 : vector<32x2xf32>
    %162 = vector.extract_strided_slice %146 {offsets = [0, 6], sizes = [32, 2], strides = [1, 1]} : vector<32x8xbf16> to vector<32x2xbf16>
    %c5_141 = arith.constant 5 : index
    %c3_142 = arith.constant 3 : index
    %c0_143 = arith.constant 0 : index
    %c0_144 = arith.constant 0 : index
    %163 = vector.load %arg3[%c5_141, %c3_142, %c0_143, %c0_144] : memref<9x4x2x2xbf16, #tpu.memory_space<vmem>>, vector<1x1x2x2xbf16>
    %164 = vector.shape_cast %163 : vector<1x1x2x2xbf16> to vector<2x2xbf16>
    %cst_145 = arith.constant dense<0.000000e+00> : vector<32x2xf32>
    %165 = tpu.matmul %162, %164, %cst_145 {dimension_numbers = #tpu.dot_dimension_numbers<[1], [0], [0], [1], [0, 0, 1, 1], [], []>} : vector<32x2xbf16>, vector<2x2xbf16>, vector<32x2xf32> -> vector<32x2xf32>
    %166 = arith.addf %139, %165 : vector<32x2xf32>
    %c1_i32 = arith.constant 1 : i32
    %167 = arith.addi %0, %c1_i32 : i32
    %c0_146 = arith.constant 0 : index
    %c0_147 = arith.constant 0 : index
    %168 = arith.index_cast %167 : i32 to index
    %c0_148 = arith.constant 0 : index
    %c0_149 = arith.constant 0 : index
    %169 = vector.load %arg2[%c0_146, %c0_147, %168, %c0_148, %c0_149] : memref<1x4x9x9x8xbf16, #tpu.memory_space<vmem>>, vector<1x1x4x8x8xbf16>
    %170 = vector.shape_cast %169 : vector<1x1x4x8x8xbf16> to vector<4x8x8xbf16>
    %171 = arith.extf %170 : vector<4x8x8xbf16> to vector<4x8x8xf32>
    %172 = vector.shape_cast %171 : vector<4x8x8xf32> to vector<32x8xf32>
    %173 = arith.truncf %172 : vector<32x8xf32> to vector<32x8xbf16>
    %174 = vector.extract_strided_slice %173 {offsets = [0, 0], sizes = [32, 2], strides = [1, 1]} : vector<32x8xbf16> to vector<32x2xbf16>
    %c6 = arith.constant 6 : index
    %c0_150 = arith.constant 0 : index
    %c0_151 = arith.constant 0 : index
    %c0_152 = arith.constant 0 : index
    %175 = vector.load %arg3[%c6, %c0_150, %c0_151, %c0_152] : memref<9x4x2x2xbf16, #tpu.memory_space<vmem>>, vector<1x1x2x2xbf16>
    %176 = vector.shape_cast %175 : vector<1x1x2x2xbf16> to vector<2x2xbf16>
    %cst_153 = arith.constant dense<0.000000e+00> : vector<32x2xf32>
    %177 = tpu.matmul %174, %176, %cst_153 {dimension_numbers = #tpu.dot_dimension_numbers<[1], [0], [0], [1], [0, 0, 1, 1], [], []>} : vector<32x2xbf16>, vector<2x2xbf16>, vector<32x2xf32> -> vector<32x2xf32>
    %178 = arith.addf %151, %177 : vector<32x2xf32>
    %179 = vector.extract_strided_slice %173 {offsets = [0, 2], sizes = [32, 2], strides = [1, 1]} : vector<32x8xbf16> to vector<32x2xbf16>
    %c6_154 = arith.constant 6 : index
    %c1_155 = arith.constant 1 : index
    %c0_156 = arith.constant 0 : index
    %c0_157 = arith.constant 0 : index
    %180 = vector.load %arg3[%c6_154, %c1_155, %c0_156, %c0_157] : memref<9x4x2x2xbf16, #tpu.memory_space<vmem>>, vector<1x1x2x2xbf16>
    %181 = vector.shape_cast %180 : vector<1x1x2x2xbf16> to vector<2x2xbf16>
    %cst_158 = arith.constant dense<0.000000e+00> : vector<32x2xf32>
    %182 = tpu.matmul %179, %181, %cst_158 {dimension_numbers = #tpu.dot_dimension_numbers<[1], [0], [0], [1], [0, 0, 1, 1], [], []>} : vector<32x2xbf16>, vector<2x2xbf16>, vector<32x2xf32> -> vector<32x2xf32>
    %183 = arith.addf %156, %182 : vector<32x2xf32>
    %184 = vector.extract_strided_slice %173 {offsets = [0, 4], sizes = [32, 2], strides = [1, 1]} : vector<32x8xbf16> to vector<32x2xbf16>
    %c6_159 = arith.constant 6 : index
    %c2_160 = arith.constant 2 : index
    %c0_161 = arith.constant 0 : index
    %c0_162 = arith.constant 0 : index
    %185 = vector.load %arg3[%c6_159, %c2_160, %c0_161, %c0_162] : memref<9x4x2x2xbf16, #tpu.memory_space<vmem>>, vector<1x1x2x2xbf16>
    %186 = vector.shape_cast %185 : vector<1x1x2x2xbf16> to vector<2x2xbf16>
    %cst_163 = arith.constant dense<0.000000e+00> : vector<32x2xf32>
    %187 = tpu.matmul %184, %186, %cst_163 {dimension_numbers = #tpu.dot_dimension_numbers<[1], [0], [0], [1], [0, 0, 1, 1], [], []>} : vector<32x2xbf16>, vector<2x2xbf16>, vector<32x2xf32> -> vector<32x2xf32>
    %188 = arith.addf %161, %187 : vector<32x2xf32>
    %189 = vector.extract_strided_slice %173 {offsets = [0, 6], sizes = [32, 2], strides = [1, 1]} : vector<32x8xbf16> to vector<32x2xbf16>
    %c6_164 = arith.constant 6 : index
    %c3_165 = arith.constant 3 : index
    %c0_166 = arith.constant 0 : index
    %c0_167 = arith.constant 0 : index
    %190 = vector.load %arg3[%c6_164, %c3_165, %c0_166, %c0_167] : memref<9x4x2x2xbf16, #tpu.memory_space<vmem>>, vector<1x1x2x2xbf16>
    %191 = vector.shape_cast %190 : vector<1x1x2x2xbf16> to vector<2x2xbf16>
    %cst_168 = arith.constant dense<0.000000e+00> : vector<32x2xf32>
    %192 = tpu.matmul %189, %191, %cst_168 {dimension_numbers = #tpu.dot_dimension_numbers<[1], [0], [0], [1], [0, 0, 1, 1], [], []>} : vector<32x2xbf16>, vector<2x2xbf16>, vector<32x2xf32> -> vector<32x2xf32>
    %193 = arith.addf %166, %192 : vector<32x2xf32>
    %c1_i32_169 = arith.constant 1 : i32
    %194 = arith.addi %0, %c1_i32_169 : i32
    %c0_170 = arith.constant 0 : index
    %c1_171 = arith.constant 1 : index
    %195 = arith.index_cast %194 : i32 to index
    %c0_172 = arith.constant 0 : index
    %c0_173 = arith.constant 0 : index
    %196 = vector.load %arg2[%c0_170, %c1_171, %195, %c0_172, %c0_173] : memref<1x4x9x9x8xbf16, #tpu.memory_space<vmem>>, vector<1x1x4x8x8xbf16>
    %197 = vector.shape_cast %196 : vector<1x1x4x8x8xbf16> to vector<4x8x8xbf16>
    %198 = arith.extf %197 : vector<4x8x8xbf16> to vector<4x8x8xf32>
    %199 = vector.shape_cast %198 : vector<4x8x8xf32> to vector<32x8xf32>
    %200 = arith.truncf %199 : vector<32x8xf32> to vector<32x8xbf16>
    %201 = vector.extract_strided_slice %200 {offsets = [0, 0], sizes = [32, 2], strides = [1, 1]} : vector<32x8xbf16> to vector<32x2xbf16>
    %c7 = arith.constant 7 : index
    %c0_174 = arith.constant 0 : index
    %c0_175 = arith.constant 0 : index
    %c0_176 = arith.constant 0 : index
    %202 = vector.load %arg3[%c7, %c0_174, %c0_175, %c0_176] : memref<9x4x2x2xbf16, #tpu.memory_space<vmem>>, vector<1x1x2x2xbf16>
    %203 = vector.shape_cast %202 : vector<1x1x2x2xbf16> to vector<2x2xbf16>
    %cst_177 = arith.constant dense<0.000000e+00> : vector<32x2xf32>
    %204 = tpu.matmul %201, %203, %cst_177 {dimension_numbers = #tpu.dot_dimension_numbers<[1], [0], [0], [1], [0, 0, 1, 1], [], []>} : vector<32x2xbf16>, vector<2x2xbf16>, vector<32x2xf32> -> vector<32x2xf32>
    %205 = arith.addf %178, %204 : vector<32x2xf32>
    %206 = vector.extract_strided_slice %200 {offsets = [0, 2], sizes = [32, 2], strides = [1, 1]} : vector<32x8xbf16> to vector<32x2xbf16>
    %c7_178 = arith.constant 7 : index
    %c1_179 = arith.constant 1 : index
    %c0_180 = arith.constant 0 : index
    %c0_181 = arith.constant 0 : index
    %207 = vector.load %arg3[%c7_178, %c1_179, %c0_180, %c0_181] : memref<9x4x2x2xbf16, #tpu.memory_space<vmem>>, vector<1x1x2x2xbf16>
    %208 = vector.shape_cast %207 : vector<1x1x2x2xbf16> to vector<2x2xbf16>
    %cst_182 = arith.constant dense<0.000000e+00> : vector<32x2xf32>
    %209 = tpu.matmul %206, %208, %cst_182 {dimension_numbers = #tpu.dot_dimension_numbers<[1], [0], [0], [1], [0, 0, 1, 1], [], []>} : vector<32x2xbf16>, vector<2x2xbf16>, vector<32x2xf32> -> vector<32x2xf32>
    %210 = arith.addf %183, %209 : vector<32x2xf32>
    %211 = vector.extract_strided_slice %200 {offsets = [0, 4], sizes = [32, 2], strides = [1, 1]} : vector<32x8xbf16> to vector<32x2xbf16>
    %c7_183 = arith.constant 7 : index
    %c2_184 = arith.constant 2 : index
    %c0_185 = arith.constant 0 : index
    %c0_186 = arith.constant 0 : index
    %212 = vector.load %arg3[%c7_183, %c2_184, %c0_185, %c0_186] : memref<9x4x2x2xbf16, #tpu.memory_space<vmem>>, vector<1x1x2x2xbf16>
    %213 = vector.shape_cast %212 : vector<1x1x2x2xbf16> to vector<2x2xbf16>
    %cst_187 = arith.constant dense<0.000000e+00> : vector<32x2xf32>
    %214 = tpu.matmul %211, %213, %cst_187 {dimension_numbers = #tpu.dot_dimension_numbers<[1], [0], [0], [1], [0, 0, 1, 1], [], []>} : vector<32x2xbf16>, vector<2x2xbf16>, vector<32x2xf32> -> vector<32x2xf32>
    %215 = arith.addf %188, %214 : vector<32x2xf32>
    %216 = vector.extract_strided_slice %200 {offsets = [0, 6], sizes = [32, 2], strides = [1, 1]} : vector<32x8xbf16> to vector<32x2xbf16>
    %c7_188 = arith.constant 7 : index
    %c3_189 = arith.constant 3 : index
    %c0_190 = arith.constant 0 : index
    %c0_191 = arith.constant 0 : index
    %217 = vector.load %arg3[%c7_188, %c3_189, %c0_190, %c0_191] : memref<9x4x2x2xbf16, #tpu.memory_space<vmem>>, vector<1x1x2x2xbf16>
    %218 = vector.shape_cast %217 : vector<1x1x2x2xbf16> to vector<2x2xbf16>
    %cst_192 = arith.constant dense<0.000000e+00> : vector<32x2xf32>
    %219 = tpu.matmul %216, %218, %cst_192 {dimension_numbers = #tpu.dot_dimension_numbers<[1], [0], [0], [1], [0, 0, 1, 1], [], []>} : vector<32x2xbf16>, vector<2x2xbf16>, vector<32x2xf32> -> vector<32x2xf32>
    %220 = arith.addf %193, %219 : vector<32x2xf32>
    %c1_i32_193 = arith.constant 1 : i32
    %221 = arith.addi %0, %c1_i32_193 : i32
    %c0_194 = arith.constant 0 : index
    %c0_195 = arith.constant 0 : index
    %222 = arith.index_cast %221 : i32 to index
    %c1_196 = arith.constant 1 : index
    %c0_197 = arith.constant 0 : index
    %223 = vector.load %arg2[%c0_194, %c0_195, %222, %c1_196, %c0_197] : memref<1x4x9x9x8xbf16, #tpu.memory_space<vmem>>, vector<1x1x4x8x8xbf16>
    %224 = vector.shape_cast %223 : vector<1x1x4x8x8xbf16> to vector<4x8x8xbf16>
    %225 = arith.extf %224 : vector<4x8x8xbf16> to vector<4x8x8xf32>
    %226 = vector.shape_cast %225 : vector<4x8x8xf32> to vector<32x8xf32>
    %227 = arith.truncf %226 : vector<32x8xf32> to vector<32x8xbf16>
    %228 = vector.extract_strided_slice %227 {offsets = [0, 0], sizes = [32, 2], strides = [1, 1]} : vector<32x8xbf16> to vector<32x2xbf16>
    %c8 = arith.constant 8 : index
    %c0_198 = arith.constant 0 : index
    %c0_199 = arith.constant 0 : index
    %c0_200 = arith.constant 0 : index
    %229 = vector.load %arg3[%c8, %c0_198, %c0_199, %c0_200] : memref<9x4x2x2xbf16, #tpu.memory_space<vmem>>, vector<1x1x2x2xbf16>
    %230 = vector.shape_cast %229 : vector<1x1x2x2xbf16> to vector<2x2xbf16>
    %cst_201 = arith.constant dense<0.000000e+00> : vector<32x2xf32>
    %231 = tpu.matmul %228, %230, %cst_201 {dimension_numbers = #tpu.dot_dimension_numbers<[1], [0], [0], [1], [0, 0, 1, 1], [], []>} : vector<32x2xbf16>, vector<2x2xbf16>, vector<32x2xf32> -> vector<32x2xf32>
    %232 = arith.addf %205, %231 : vector<32x2xf32>
    %233 = vector.extract_strided_slice %227 {offsets = [0, 2], sizes = [32, 2], strides = [1, 1]} : vector<32x8xbf16> to vector<32x2xbf16>
    %c8_202 = arith.constant 8 : index
    %c1_203 = arith.constant 1 : index
    %c0_204 = arith.constant 0 : index
    %c0_205 = arith.constant 0 : index
    %234 = vector.load %arg3[%c8_202, %c1_203, %c0_204, %c0_205] : memref<9x4x2x2xbf16, #tpu.memory_space<vmem>>, vector<1x1x2x2xbf16>
    %235 = vector.shape_cast %234 : vector<1x1x2x2xbf16> to vector<2x2xbf16>
    %cst_206 = arith.constant dense<0.000000e+00> : vector<32x2xf32>
    %236 = tpu.matmul %233, %235, %cst_206 {dimension_numbers = #tpu.dot_dimension_numbers<[1], [0], [0], [1], [0, 0, 1, 1], [], []>} : vector<32x2xbf16>, vector<2x2xbf16>, vector<32x2xf32> -> vector<32x2xf32>
    %237 = arith.addf %210, %236 : vector<32x2xf32>
    %238 = vector.extract_strided_slice %227 {offsets = [0, 4], sizes = [32, 2], strides = [1, 1]} : vector<32x8xbf16> to vector<32x2xbf16>
    %c8_207 = arith.constant 8 : index
    %c2_208 = arith.constant 2 : index
    %c0_209 = arith.constant 0 : index
    %c0_210 = arith.constant 0 : index
    %239 = vector.load %arg3[%c8_207, %c2_208, %c0_209, %c0_210] : memref<9x4x2x2xbf16, #tpu.memory_space<vmem>>, vector<1x1x2x2xbf16>
    %240 = vector.shape_cast %239 : vector<1x1x2x2xbf16> to vector<2x2xbf16>
    %cst_211 = arith.constant dense<0.000000e+00> : vector<32x2xf32>
    %241 = tpu.matmul %238, %240, %cst_211 {dimension_numbers = #tpu.dot_dimension_numbers<[1], [0], [0], [1], [0, 0, 1, 1], [], []>} : vector<32x2xbf16>, vector<2x2xbf16>, vector<32x2xf32> -> vector<32x2xf32>
    %242 = arith.addf %215, %241 : vector<32x2xf32>
    %243 = vector.extract_strided_slice %227 {offsets = [0, 6], sizes = [32, 2], strides = [1, 1]} : vector<32x8xbf16> to vector<32x2xbf16>
    %c8_212 = arith.constant 8 : index
    %c3_213 = arith.constant 3 : index
    %c0_214 = arith.constant 0 : index
    %c0_215 = arith.constant 0 : index
    %244 = vector.load %arg3[%c8_212, %c3_213, %c0_214, %c0_215] : memref<9x4x2x2xbf16, #tpu.memory_space<vmem>>, vector<1x1x2x2xbf16>
    %245 = vector.shape_cast %244 : vector<1x1x2x2xbf16> to vector<2x2xbf16>
    %cst_216 = arith.constant dense<0.000000e+00> : vector<32x2xf32>
    %246 = tpu.matmul %243, %245, %cst_216 {dimension_numbers = #tpu.dot_dimension_numbers<[1], [0], [0], [1], [0, 0, 1, 1], [], []>} : vector<32x2xbf16>, vector<2x2xbf16>, vector<32x2xf32> -> vector<32x2xf32>
    %247 = arith.addf %220, %246 : vector<32x2xf32>
    %c0_i32_217 = arith.constant 0 : i32
    %248 = arith.cmpi eq, %arg1, %c0_i32_217 : i32
    %249 = arith.extui %248 : i1 to i32
    %c0_i32_218 = arith.constant 0 : i32
    %250 = arith.cmpi ne, %249, %c0_i32_218 : i32
    scf.if %250 {
      %cst_271 = arith.constant 0.000000e+00 : f32
      %319 = vector.broadcast %cst_271 : f32 to vector<1x1x8xf32>
      %c0_272 = arith.constant 0 : index
      %c0_273 = arith.constant 0 : index
      %c0_274 = arith.constant 0 : index
      %320 = vector.load %arg6[%c0_272, %c0_273, %c0_274] : memref<1x1x8xf32, #tpu.memory_space<vmem>>, vector<1x1x8xf32>
      tpu.vector_store %arg6[%c0_272, %c0_273, %c0_274], %319 {strides = array<i32>} : memref<1x1x8xf32, #tpu.memory_space<vmem>>, vector<1x1x8xf32>,
    } else {
    }
    %c0_219 = arith.constant 0 : index
    %c0_220 = arith.constant 0 : index
    %251 = vector.load %arg4[%c0_219, %c0_220] : memref<1x8xf32, #tpu.memory_space<vmem>>, vector<1x2xf32>
    %252 = vector.broadcast %251 : vector<1x2xf32> to vector<32x2xf32>
    %253 = arith.addf %232, %252 : vector<32x2xf32>
    %cst_221 = arith.constant 0.000000e+00 : f32
    %254 = vector.broadcast %cst_221 : f32 to vector<32x2xf32>
    %255 = arith.maximumf %253, %254 : vector<32x2xf32>
    %256 = arith.truncf %255 : vector<32x2xf32> to vector<32x2xbf16>
    %c0_222 = arith.constant 0 : index
    %c0_223 = arith.constant 0 : index
    %c0_224 = arith.constant 0 : index
    %257 = vector.load %arg5[%c0_222, %c0_223, %c0_224] : memref<1x32x8xbf16, #tpu.memory_space<vmem>>, vector<1x32x2xbf16>
    %258 = vector.shape_cast %257 : vector<1x32x2xbf16> to vector<32x2xbf16>
    %259 = vector.shape_cast %256 : vector<32x2xbf16> to vector<1x32x2xbf16>
    tpu.vector_store %arg5[%c0_222, %c0_223, %c0_224], %259 {strides = array<i32>} : memref<1x32x8xbf16, #tpu.memory_space<vmem>>, vector<1x32x2xbf16>,
    %c0_225 = arith.constant 0 : index
    %c0_226 = arith.constant 0 : index
    %c0_227 = arith.constant 0 : index
    %260 = vector.load %arg6[%c0_225, %c0_226, %c0_227] : memref<1x1x8xf32, #tpu.memory_space<vmem>>, vector<1x1x2xf32>
    %261 = vector.shape_cast %260 : vector<1x1x2xf32> to vector<1x2xf32>
    %cst_228 = arith.constant dense<0.000000e+00> : vector<2xf32>
    %262 = vector.multi_reduction <add>, %255, %cst_228 [0] : vector<32x2xf32> to vector<2xf32>
    %263 = vector.shape_cast %262 : vector<2xf32> to vector<1x2xf32>
    %264 = arith.addf %261, %263 : vector<1x2xf32>
    %c0_229 = arith.constant 0 : index
    %c0_230 = arith.constant 0 : index
    %c0_231 = arith.constant 0 : index
    %265 = vector.load %arg6[%c0_229, %c0_230, %c0_231] : memref<1x1x8xf32, #tpu.memory_space<vmem>>, vector<1x1x2xf32>
    %266 = vector.shape_cast %265 : vector<1x1x2xf32> to vector<1x2xf32>
    %267 = vector.shape_cast %264 : vector<1x2xf32> to vector<1x1x2xf32>
    tpu.vector_store %arg6[%c0_229, %c0_230, %c0_231], %267 {strides = array<i32>} : memref<1x1x8xf32, #tpu.memory_space<vmem>>, vector<1x1x2xf32>,
    %c0_232 = arith.constant 0 : index
    %c2_233 = arith.constant 2 : index
    %268 = vector.load %arg4[%c0_232, %c2_233] : memref<1x8xf32, #tpu.memory_space<vmem>>, vector<1x2xf32>
    %269 = vector.broadcast %268 : vector<1x2xf32> to vector<32x2xf32>
    %270 = arith.addf %237, %269 : vector<32x2xf32>
    %cst_234 = arith.constant 0.000000e+00 : f32
    %271 = vector.broadcast %cst_234 : f32 to vector<32x2xf32>
    %272 = arith.maximumf %270, %271 : vector<32x2xf32>
    %273 = arith.truncf %272 : vector<32x2xf32> to vector<32x2xbf16>
    %c0_235 = arith.constant 0 : index
    %c0_236 = arith.constant 0 : index
    %c2_237 = arith.constant 2 : index
    %274 = vector.load %arg5[%c0_235, %c0_236, %c2_237] : memref<1x32x8xbf16, #tpu.memory_space<vmem>>, vector<1x32x2xbf16>
    %275 = vector.shape_cast %274 : vector<1x32x2xbf16> to vector<32x2xbf16>
    %276 = vector.shape_cast %273 : vector<32x2xbf16> to vector<1x32x2xbf16>
    tpu.vector_store %arg5[%c0_235, %c0_236, %c2_237], %276 {strides = array<i32>} : memref<1x32x8xbf16, #tpu.memory_space<vmem>>, vector<1x32x2xbf16>,
    %c0_238 = arith.constant 0 : index
    %c0_239 = arith.constant 0 : index
    %c2_240 = arith.constant 2 : index
    %277 = vector.load %arg6[%c0_238, %c0_239, %c2_240] : memref<1x1x8xf32, #tpu.memory_space<vmem>>, vector<1x1x2xf32>
    %278 = vector.shape_cast %277 : vector<1x1x2xf32> to vector<1x2xf32>
    %cst_241 = arith.constant dense<0.000000e+00> : vector<2xf32>
    %279 = vector.multi_reduction <add>, %272, %cst_241 [0] : vector<32x2xf32> to vector<2xf32>
    %280 = vector.shape_cast %279 : vector<2xf32> to vector<1x2xf32>
    %281 = arith.addf %278, %280 : vector<1x2xf32>
    %c0_242 = arith.constant 0 : index
    %c0_243 = arith.constant 0 : index
    %c2_244 = arith.constant 2 : index
    %282 = vector.load %arg6[%c0_242, %c0_243, %c2_244] : memref<1x1x8xf32, #tpu.memory_space<vmem>>, vector<1x1x2xf32>
    %283 = vector.shape_cast %282 : vector<1x1x2xf32> to vector<1x2xf32>
    %284 = vector.shape_cast %281 : vector<1x2xf32> to vector<1x1x2xf32>
    tpu.vector_store %arg6[%c0_242, %c0_243, %c2_244], %284 {strides = array<i32>} : memref<1x1x8xf32, #tpu.memory_space<vmem>>, vector<1x1x2xf32>,
    %c0_245 = arith.constant 0 : index
    %c4_246 = arith.constant 4 : index
    %285 = vector.load %arg4[%c0_245, %c4_246] : memref<1x8xf32, #tpu.memory_space<vmem>>, vector<1x2xf32>
    %286 = vector.broadcast %285 : vector<1x2xf32> to vector<32x2xf32>
    %287 = arith.addf %242, %286 : vector<32x2xf32>
    %cst_247 = arith.constant 0.000000e+00 : f32
    %288 = vector.broadcast %cst_247 : f32 to vector<32x2xf32>
    %289 = arith.maximumf %287, %288 : vector<32x2xf32>
    %290 = arith.truncf %289 : vector<32x2xf32> to vector<32x2xbf16>
    %c0_248 = arith.constant 0 : index
    %c0_249 = arith.constant 0 : index
    %c4_250 = arith.constant 4 : index
    %291 = vector.load %arg5[%c0_248, %c0_249, %c4_250] : memref<1x32x8xbf16, #tpu.memory_space<vmem>>, vector<1x32x2xbf16>
    %292 = vector.shape_cast %291 : vector<1x32x2xbf16> to vector<32x2xbf16>
    %293 = vector.shape_cast %290 : vector<32x2xbf16> to vector<1x32x2xbf16>
    tpu.vector_store %arg5[%c0_248, %c0_249, %c4_250], %293 {strides = array<i32>} : memref<1x32x8xbf16, #tpu.memory_space<vmem>>, vector<1x32x2xbf16>,
    %c0_251 = arith.constant 0 : index
    %c0_252 = arith.constant 0 : index
    %c4_253 = arith.constant 4 : index
    %294 = vector.load %arg6[%c0_251, %c0_252, %c4_253] : memref<1x1x8xf32, #tpu.memory_space<vmem>>, vector<1x1x2xf32>
    %295 = vector.shape_cast %294 : vector<1x1x2xf32> to vector<1x2xf32>
    %cst_254 = arith.constant dense<0.000000e+00> : vector<2xf32>
    %296 = vector.multi_reduction <add>, %289, %cst_254 [0] : vector<32x2xf32> to vector<2xf32>
    %297 = vector.shape_cast %296 : vector<2xf32> to vector<1x2xf32>
    %298 = arith.addf %295, %297 : vector<1x2xf32>
    %c0_255 = arith.constant 0 : index
    %c0_256 = arith.constant 0 : index
    %c4_257 = arith.constant 4 : index
    %299 = vector.load %arg6[%c0_255, %c0_256, %c4_257] : memref<1x1x8xf32, #tpu.memory_space<vmem>>, vector<1x1x2xf32>
    %300 = vector.shape_cast %299 : vector<1x1x2xf32> to vector<1x2xf32>
    %301 = vector.shape_cast %298 : vector<1x2xf32> to vector<1x1x2xf32>
    tpu.vector_store %arg6[%c0_255, %c0_256, %c4_257], %301 {strides = array<i32>} : memref<1x1x8xf32, #tpu.memory_space<vmem>>, vector<1x1x2xf32>,
    %c0_258 = arith.constant 0 : index
    %c6_259 = arith.constant 6 : index
    %302 = vector.load %arg4[%c0_258, %c6_259] : memref<1x8xf32, #tpu.memory_space<vmem>>, vector<1x2xf32>
    %303 = vector.broadcast %302 : vector<1x2xf32> to vector<32x2xf32>
    %304 = arith.addf %247, %303 : vector<32x2xf32>
    %cst_260 = arith.constant 0.000000e+00 : f32
    %305 = vector.broadcast %cst_260 : f32 to vector<32x2xf32>
    %306 = arith.maximumf %304, %305 : vector<32x2xf32>
    %307 = arith.truncf %306 : vector<32x2xf32> to vector<32x2xbf16>
    %c0_261 = arith.constant 0 : index
    %c0_262 = arith.constant 0 : index
    %c6_263 = arith.constant 6 : index
    %308 = vector.load %arg5[%c0_261, %c0_262, %c6_263] : memref<1x32x8xbf16, #tpu.memory_space<vmem>>, vector<1x32x2xbf16>
    %309 = vector.shape_cast %308 : vector<1x32x2xbf16> to vector<32x2xbf16>
    %310 = vector.shape_cast %307 : vector<32x2xbf16> to vector<1x32x2xbf16>
    tpu.vector_store %arg5[%c0_261, %c0_262, %c6_263], %310 {strides = array<i32>} : memref<1x32x8xbf16, #tpu.memory_space<vmem>>, vector<1x32x2xbf16>,
    %c0_264 = arith.constant 0 : index
    %c0_265 = arith.constant 0 : index
    %c6_266 = arith.constant 6 : index
    %311 = vector.load %arg6[%c0_264, %c0_265, %c6_266] : memref<1x1x8xf32, #tpu.memory_space<vmem>>, vector<1x1x2xf32>
    %312 = vector.shape_cast %311 : vector<1x1x2xf32> to vector<1x2xf32>
    %cst_267 = arith.constant dense<0.000000e+00> : vector<2xf32>
    %313 = vector.multi_reduction <add>, %306, %cst_267 [0] : vector<32x2xf32> to vector<2xf32>
    %314 = vector.shape_cast %313 : vector<2xf32> to vector<1x2xf32>
    %315 = arith.addf %312, %314 : vector<1x2xf32>
    %c0_268 = arith.constant 0 : index
    %c0_269 = arith.constant 0 : index
    %c6_270 = arith.constant 6 : index
    %316 = vector.load %arg6[%c0_268, %c0_269, %c6_270] : memref<1x1x8xf32, #tpu.memory_space<vmem>>, vector<1x1x2xf32>
    %317 = vector.shape_cast %316 : vector<1x1x2xf32> to vector<1x2xf32>
    %318 = vector.shape_cast %315 : vector<1x2xf32> to vector<1x1x2xf32>
    tpu.vector_store %arg6[%c0_268, %c0_269, %c6_270], %318 {strides = array<i32>} : memref<1x1x8xf32, #tpu.memory_space<vmem>>, vector<1x1x2xf32>,
    return
  }
  func.func @transform_0(%arg0: i32, %arg1: i32) -> (i32, i32, i32, i32, i32) {
    %c0_i32 = arith.constant 0 : i32
    %c0_i32_0 = arith.constant 0 : i32
    %c0_i32_1 = arith.constant 0 : i32
    %c0_i32_2 = arith.constant 0 : i32
    %c0_i32_3 = arith.constant 0 : i32
    return %arg0, %c0_i32, %c0_i32_0, %c0_i32_1, %c0_i32_2 : i32, i32, i32, i32, i32
  }
  func.func @transform_1(%arg0: i32, %arg1: i32) -> (i32, i32, i32, i32) {
    %c0_i32 = arith.constant 0 : i32
    %c0_i32_0 = arith.constant 0 : i32
    %c0_i32_1 = arith.constant 0 : i32
    %c0_i32_2 = arith.constant 0 : i32
    %c0_i32_3 = arith.constant 0 : i32
    return %c0_i32, %c0_i32_0, %c0_i32_1, %c0_i32_2 : i32, i32, i32, i32
  }
  func.func @transform_2(%arg0: i32, %arg1: i32) -> (i32, i32) {
    %c0_i32 = arith.constant 0 : i32
    %c0_i32_0 = arith.constant 0 : i32
    %c0_i32_1 = arith.constant 0 : i32
    return %c0_i32, %c0_i32_0 : i32, i32
  }
  func.func @transform_3(%arg0: i32, %arg1: i32) -> (i32, i32, i32) {
    %c0_i32 = arith.constant 0 : i32
    %c0_i32_0 = arith.constant 0 : i32
    return %arg0, %arg1, %c0_i32 : i32, i32, i32
  }
  func.func @transform_4(%arg0: i32, %arg1: i32) -> (i32, i32, i32) {
    %c0_i32 = arith.constant 0 : i32
    %c0_i32_0 = arith.constant 0 : i32
    %c0_i32_1 = arith.constant 0 : i32
    return %arg0, %c0_i32, %c0_i32_0 : i32, i32, i32
  }
}

module attributes {stable_mosaic.version = 11 : i64} {
  func.func @_se_gate_kernel(%arg0: i32, %arg1: memref<1x1x8xf32, #tpu.memory_space<vmem>>, %arg2: memref<8x1xf32, #tpu.memory_space<vmem>>, %arg3: memref<1x1xf32, #tpu.memory_space<vmem>>, %arg4: memref<1x8xf32, #tpu.memory_space<vmem>>, %arg5: memref<1x8xf32, #tpu.memory_space<vmem>>, %arg6: memref<1x1x8xf32, #tpu.memory_space<vmem>>) attributes {dimension_semantics = [#tpu.dimension_semantics<parallel>], iteration_bounds = array<i64: 2>, scalar_prefetch = 0 : i64, scratch_operands = 0 : i64, tpu.core_type = #tpu.core_type<tc>, window_params = [{transform_indices = @transform_0, window_bounds = array<i64: 1, 1, 8>}, {pipeline_mode = #tpu.pipeline_mode<synchronous>, transform_indices = @transform_1, window_bounds = array<i64: 8, 1>}, {pipeline_mode = #tpu.pipeline_mode<synchronous>, transform_indices = @transform_2, window_bounds = array<i64: 1, 1>}, {pipeline_mode = #tpu.pipeline_mode<synchronous>, transform_indices = @transform_3, window_bounds = array<i64: 1, 8>}, {pipeline_mode = #tpu.pipeline_mode<synchronous>, transform_indices = @transform_4, window_bounds = array<i64: 1, 8>}, {transform_indices = @transform_5, window_bounds = array<i64: 1, 1, 8>}]} {
    %c0 = arith.constant 0 : index
    %c0_0 = arith.constant 0 : index
    %c0_1 = arith.constant 0 : index
    %0 = vector.load %arg1[%c0, %c0_0, %c0_1] : memref<1x1x8xf32, #tpu.memory_space<vmem>>, vector<1x1x8xf32>
    %1 = vector.shape_cast %0 : vector<1x1x8xf32> to vector<1x8xf32>
    %cst = arith.constant 1.562500e-02 : f32
    %2 = vector.broadcast %cst : f32 to vector<1x8xf32>
    %3 = arith.mulf %1, %2 : vector<1x8xf32>
    %c0_2 = arith.constant 0 : index
    %c0_3 = arith.constant 0 : index
    %4 = vector.load %arg2[%c0_2, %c0_3] : memref<8x1xf32, #tpu.memory_space<vmem>>, vector<8x1xf32>
    %cst_4 = arith.constant dense<0.000000e+00> : vector<1x1xf32>
    %5 = tpu.matmul %3, %4, %cst_4 {dimension_numbers = #tpu.dot_dimension_numbers<[1], [0], [0], [1], [0, 0, 1, 1], [], []>} : vector<1x8xf32>, vector<8x1xf32>, vector<1x1xf32> -> vector<1x1xf32>
    %c0_5 = arith.constant 0 : index
    %c0_6 = arith.constant 0 : index
    %6 = vector.load %arg3[%c0_5, %c0_6] : memref<1x1xf32, #tpu.memory_space<vmem>>, vector<1x1xf32>
    %7 = arith.addf %5, %6 : vector<1x1xf32>
    %cst_7 = arith.constant 0.000000e+00 : f32
    %8 = vector.broadcast %cst_7 : f32 to vector<1x1xf32>
    %9 = arith.maximumf %7, %8 : vector<1x1xf32>
    %c0_8 = arith.constant 0 : index
    %c0_9 = arith.constant 0 : index
    %10 = vector.load %arg4[%c0_8, %c0_9] : memref<1x8xf32, #tpu.memory_space<vmem>>, vector<1x8xf32>
    %cst_10 = arith.constant dense<0.000000e+00> : vector<1x8xf32>
    %11 = tpu.matmul %9, %10, %cst_10 {dimension_numbers = #tpu.dot_dimension_numbers<[1], [0], [0], [1], [0, 0, 1, 1], [], []>} : vector<1x1xf32>, vector<1x8xf32>, vector<1x8xf32> -> vector<1x8xf32>
    %c0_11 = arith.constant 0 : index
    %c0_12 = arith.constant 0 : index
    %12 = vector.load %arg5[%c0_11, %c0_12] : memref<1x8xf32, #tpu.memory_space<vmem>>, vector<1x8xf32>
    %13 = arith.addf %11, %12 : vector<1x8xf32>
    %cst_13 = arith.constant 0.000000e+00 : f32
    %14 = vector.broadcast %cst_13 : f32 to vector<1x8xf32>
    %15 = arith.subf %14, %13 : vector<1x8xf32>
    %16 = math.exp %15 : vector<1x8xf32>
    %cst_14 = arith.constant 1.000000e+00 : f32
    %17 = vector.broadcast %cst_14 : f32 to vector<1x8xf32>
    %18 = arith.addf %17, %16 : vector<1x8xf32>
    %cst_15 = arith.constant 1.000000e+00 : f32
    %19 = vector.broadcast %cst_15 : f32 to vector<1x8xf32>
    %20 = arith.divf %19, %18 : vector<1x8xf32>
    %c0_16 = arith.constant 0 : index
    %c0_17 = arith.constant 0 : index
    %c0_18 = arith.constant 0 : index
    %21 = vector.load %arg6[%c0_16, %c0_17, %c0_18] : memref<1x1x8xf32, #tpu.memory_space<vmem>>, vector<1x1x8xf32>
    %22 = vector.shape_cast %21 : vector<1x1x8xf32> to vector<1x8xf32>
    %23 = vector.shape_cast %20 : vector<1x8xf32> to vector<1x1x8xf32>
    tpu.vector_store %arg6[%c0_16, %c0_17, %c0_18], %23 {strides = array<i32>} : memref<1x1x8xf32, #tpu.memory_space<vmem>>, vector<1x1x8xf32>,
    return
  }
  func.func @transform_0(%arg0: i32) -> (i32, i32, i32) {
    %c0_i32 = arith.constant 0 : i32
    %c0_i32_0 = arith.constant 0 : i32
    %c0_i32_1 = arith.constant 0 : i32
    return %arg0, %c0_i32, %c0_i32_0 : i32, i32, i32
  }
  func.func @transform_1(%arg0: i32) -> (i32, i32) {
    %c0_i32 = arith.constant 0 : i32
    %c0_i32_0 = arith.constant 0 : i32
    %c0_i32_1 = arith.constant 0 : i32
    return %c0_i32, %c0_i32_0 : i32, i32
  }
  func.func @transform_2(%arg0: i32) -> (i32, i32) {
    %c0_i32 = arith.constant 0 : i32
    %c0_i32_0 = arith.constant 0 : i32
    %c0_i32_1 = arith.constant 0 : i32
    return %c0_i32, %c0_i32_0 : i32, i32
  }
  func.func @transform_3(%arg0: i32) -> (i32, i32) {
    %c0_i32 = arith.constant 0 : i32
    %c0_i32_0 = arith.constant 0 : i32
    %c0_i32_1 = arith.constant 0 : i32
    return %c0_i32, %c0_i32_0 : i32, i32
  }
  func.func @transform_4(%arg0: i32) -> (i32, i32) {
    %c0_i32 = arith.constant 0 : i32
    %c0_i32_0 = arith.constant 0 : i32
    %c0_i32_1 = arith.constant 0 : i32
    return %c0_i32, %c0_i32_0 : i32, i32
  }
  func.func @transform_5(%arg0: i32) -> (i32, i32, i32) {
    %c0_i32 = arith.constant 0 : i32
    %c0_i32_0 = arith.constant 0 : i32
    %c0_i32_1 = arith.constant 0 : i32
    return %arg0, %c0_i32, %c0_i32_0 : i32, i32, i32
  }
}

module attributes {stable_mosaic.version = 11 : i64} {
  func.func @_block3_kernel(%arg0: i32, %arg1: i32, %arg2: memref<1x32x8xbf16, #tpu.memory_space<vmem>>, %arg3: memref<1x1x8xf32, #tpu.memory_space<vmem>>, %arg4: memref<8x8xbf16, #tpu.memory_space<vmem>>, %arg5: memref<1x8xf32, #tpu.memory_space<vmem>>, %arg6: memref<1x32x4xbf16, #tpu.memory_space<vmem>>, %arg7: memref<4x8xbf16, #tpu.memory_space<vmem>>, %arg8: memref<1x8xf32, #tpu.memory_space<vmem>>, %arg9: memref<1x32x8xbf16, #tpu.memory_space<vmem>>) attributes {dimension_semantics = [#tpu.dimension_semantics<parallel>, #tpu.dimension_semantics<parallel>], iteration_bounds = array<i64: 2, 2>, scalar_prefetch = 0 : i64, scratch_operands = 0 : i64, tpu.core_type = #tpu.core_type<tc>, window_params = [{transform_indices = @transform_0, window_bounds = array<i64: 1, 32, 8>}, {transform_indices = @transform_1, window_bounds = array<i64: 1, 1, 8>}, {pipeline_mode = #tpu.pipeline_mode<synchronous>, transform_indices = @transform_2, window_bounds = array<i64: 8, 8>}, {pipeline_mode = #tpu.pipeline_mode<synchronous>, transform_indices = @transform_3, window_bounds = array<i64: 1, 8>}, {transform_indices = @transform_4, window_bounds = array<i64: 1, 32, 4>}, {pipeline_mode = #tpu.pipeline_mode<synchronous>, transform_indices = @transform_5, window_bounds = array<i64: 4, 8>}, {pipeline_mode = #tpu.pipeline_mode<synchronous>, transform_indices = @transform_6, window_bounds = array<i64: 1, 8>}, {transform_indices = @transform_7, window_bounds = array<i64: 1, 32, 8>}]} {
    %c0 = arith.constant 0 : index
    %c0_0 = arith.constant 0 : index
    %c0_1 = arith.constant 0 : index
    %0 = vector.load %arg2[%c0, %c0_0, %c0_1] : memref<1x32x8xbf16, #tpu.memory_space<vmem>>, vector<1x32x8xbf16>
    %1 = vector.shape_cast %0 : vector<1x32x8xbf16> to vector<32x8xbf16>
    %2 = arith.extf %1 : vector<32x8xbf16> to vector<32x8xf32>
    %c0_2 = arith.constant 0 : index
    %c0_3 = arith.constant 0 : index
    %c0_4 = arith.constant 0 : index
    %3 = vector.load %arg3[%c0_2, %c0_3, %c0_4] : memref<1x1x8xf32, #tpu.memory_space<vmem>>, vector<1x1x8xf32>
    %4 = vector.shape_cast %3 : vector<1x1x8xf32> to vector<1x8xf32>
    %5 = vector.broadcast %4 : vector<1x8xf32> to vector<32x8xf32>
    %6 = arith.mulf %2, %5 : vector<32x8xf32>
    %7 = arith.truncf %6 : vector<32x8xf32> to vector<32x8xbf16>
    %c0_5 = arith.constant 0 : index
    %c0_6 = arith.constant 0 : index
    %8 = vector.load %arg4[%c0_5, %c0_6] : memref<8x8xbf16, #tpu.memory_space<vmem>>, vector<8x8xbf16>
    %cst = arith.constant dense<0.000000e+00> : vector<32x8xf32>
    %9 = tpu.matmul %7, %8, %cst {dimension_numbers = #tpu.dot_dimension_numbers<[1], [0], [0], [1], [0, 0, 1, 1], [], []>} : vector<32x8xbf16>, vector<8x8xbf16>, vector<32x8xf32> -> vector<32x8xf32>
    %c0_7 = arith.constant 0 : index
    %c0_8 = arith.constant 0 : index
    %10 = vector.load %arg5[%c0_7, %c0_8] : memref<1x8xf32, #tpu.memory_space<vmem>>, vector<1x8xf32>
    %11 = vector.broadcast %10 : vector<1x8xf32> to vector<32x8xf32>
    %12 = arith.addf %9, %11 : vector<32x8xf32>
    %c0_9 = arith.constant 0 : index
    %c0_10 = arith.constant 0 : index
    %c0_11 = arith.constant 0 : index
    %13 = vector.load %arg6[%c0_9, %c0_10, %c0_11] : memref<1x32x4xbf16, #tpu.memory_space<vmem>>, vector<1x32x4xbf16>
    %14 = vector.shape_cast %13 : vector<1x32x4xbf16> to vector<32x4xbf16>
    %c0_12 = arith.constant 0 : index
    %c0_13 = arith.constant 0 : index
    %15 = vector.load %arg7[%c0_12, %c0_13] : memref<4x8xbf16, #tpu.memory_space<vmem>>, vector<4x8xbf16>
    %cst_14 = arith.constant dense<0.000000e+00> : vector<32x8xf32>
    %16 = tpu.matmul %14, %15, %cst_14 {dimension_numbers = #tpu.dot_dimension_numbers<[1], [0], [0], [1], [0, 0, 1, 1], [], []>} : vector<32x4xbf16>, vector<4x8xbf16>, vector<32x8xf32> -> vector<32x8xf32>
    %17 = arith.addf %12, %16 : vector<32x8xf32>
    %c0_15 = arith.constant 0 : index
    %c0_16 = arith.constant 0 : index
    %18 = vector.load %arg8[%c0_15, %c0_16] : memref<1x8xf32, #tpu.memory_space<vmem>>, vector<1x8xf32>
    %19 = vector.broadcast %18 : vector<1x8xf32> to vector<32x8xf32>
    %20 = arith.addf %17, %19 : vector<32x8xf32>
    %cst_17 = arith.constant 0.000000e+00 : f32
    %21 = vector.broadcast %cst_17 : f32 to vector<32x8xf32>
    %22 = arith.maximumf %20, %21 : vector<32x8xf32>
    %23 = arith.truncf %22 : vector<32x8xf32> to vector<32x8xbf16>
    %c0_18 = arith.constant 0 : index
    %c0_19 = arith.constant 0 : index
    %c0_20 = arith.constant 0 : index
    %24 = vector.load %arg9[%c0_18, %c0_19, %c0_20] : memref<1x32x8xbf16, #tpu.memory_space<vmem>>, vector<1x32x8xbf16>
    %25 = vector.shape_cast %24 : vector<1x32x8xbf16> to vector<32x8xbf16>
    %26 = vector.shape_cast %23 : vector<32x8xbf16> to vector<1x32x8xbf16>
    tpu.vector_store %arg9[%c0_18, %c0_19, %c0_20], %26 {strides = array<i32>} : memref<1x32x8xbf16, #tpu.memory_space<vmem>>, vector<1x32x8xbf16>,
    return
  }
  func.func @transform_0(%arg0: i32, %arg1: i32) -> (i32, i32, i32) {
    %c0_i32 = arith.constant 0 : i32
    %c0_i32_0 = arith.constant 0 : i32
    return %arg0, %arg1, %c0_i32 : i32, i32, i32
  }
  func.func @transform_1(%arg0: i32, %arg1: i32) -> (i32, i32, i32) {
    %c0_i32 = arith.constant 0 : i32
    %c0_i32_0 = arith.constant 0 : i32
    %c0_i32_1 = arith.constant 0 : i32
    return %arg0, %c0_i32, %c0_i32_0 : i32, i32, i32
  }
  func.func @transform_2(%arg0: i32, %arg1: i32) -> (i32, i32) {
    %c0_i32 = arith.constant 0 : i32
    %c0_i32_0 = arith.constant 0 : i32
    %c0_i32_1 = arith.constant 0 : i32
    return %c0_i32, %c0_i32_0 : i32, i32
  }
  func.func @transform_3(%arg0: i32, %arg1: i32) -> (i32, i32) {
    %c0_i32 = arith.constant 0 : i32
    %c0_i32_0 = arith.constant 0 : i32
    %c0_i32_1 = arith.constant 0 : i32
    return %c0_i32, %c0_i32_0 : i32, i32
  }
  func.func @transform_4(%arg0: i32, %arg1: i32) -> (i32, i32, i32) {
    %c0_i32 = arith.constant 0 : i32
    %c0_i32_0 = arith.constant 0 : i32
    return %arg0, %arg1, %c0_i32 : i32, i32, i32
  }
  func.func @transform_5(%arg0: i32, %arg1: i32) -> (i32, i32) {
    %c0_i32 = arith.constant 0 : i32
    %c0_i32_0 = arith.constant 0 : i32
    %c0_i32_1 = arith.constant 0 : i32
    return %c0_i32, %c0_i32_0 : i32, i32
  }
  func.func @transform_6(%arg0: i32, %arg1: i32) -> (i32, i32) {
    %c0_i32 = arith.constant 0 : i32
    %c0_i32_0 = arith.constant 0 : i32
    %c0_i32_1 = arith.constant 0 : i32
    return %c0_i32, %c0_i32_0 : i32, i32
  }
  func.func @transform_7(%arg0: i32, %arg1: i32) -> (i32, i32, i32) {
    %c0_i32 = arith.constant 0 : i32
    %c0_i32_0 = arith.constant 0 : i32
    return %arg0, %arg1, %c0_i32 : i32, i32, i32
  }
}

module attributes {stable_mosaic.version = 11 : i64} {
  func.func @_conv1x1_kernel(%arg0: i32, %arg1: i32, %arg2: memref<1x32x8xbf16, #tpu.memory_space<vmem>>, %arg3: memref<8x8xbf16, #tpu.memory_space<vmem>>, %arg4: memref<1x8xf32, #tpu.memory_space<vmem>>, %arg5: memref<1x32x8xbf16, #tpu.memory_space<vmem>>) attributes {dimension_semantics = [#tpu.dimension_semantics<parallel>, #tpu.dimension_semantics<parallel>], iteration_bounds = array<i64: 2, 2>, scalar_prefetch = 0 : i64, scratch_operands = 0 : i64, tpu.core_type = #tpu.core_type<tc>, window_params = [{transform_indices = @transform_0, window_bounds = array<i64: 1, 32, 8>}, {pipeline_mode = #tpu.pipeline_mode<synchronous>, transform_indices = @transform_1, window_bounds = array<i64: 8, 8>}, {pipeline_mode = #tpu.pipeline_mode<synchronous>, transform_indices = @transform_2, window_bounds = array<i64: 1, 8>}, {transform_indices = @transform_3, window_bounds = array<i64: 1, 32, 8>}]} {
    %c0 = arith.constant 0 : index
    %c0_0 = arith.constant 0 : index
    %c0_1 = arith.constant 0 : index
    %0 = vector.load %arg2[%c0, %c0_0, %c0_1] : memref<1x32x8xbf16, #tpu.memory_space<vmem>>, vector<1x32x8xbf16>
    %1 = vector.shape_cast %0 : vector<1x32x8xbf16> to vector<32x8xbf16>
    %c0_2 = arith.constant 0 : index
    %c0_3 = arith.constant 0 : index
    %2 = vector.load %arg3[%c0_2, %c0_3] : memref<8x8xbf16, #tpu.memory_space<vmem>>, vector<8x8xbf16>
    %cst = arith.constant dense<0.000000e+00> : vector<32x8xf32>
    %3 = tpu.matmul %1, %2, %cst {dimension_numbers = #tpu.dot_dimension_numbers<[1], [0], [0], [1], [0, 0, 1, 1], [], []>} : vector<32x8xbf16>, vector<8x8xbf16>, vector<32x8xf32> -> vector<32x8xf32>
    %c0_4 = arith.constant 0 : index
    %c0_5 = arith.constant 0 : index
    %4 = vector.load %arg4[%c0_4, %c0_5] : memref<1x8xf32, #tpu.memory_space<vmem>>, vector<1x8xf32>
    %5 = vector.broadcast %4 : vector<1x8xf32> to vector<32x8xf32>
    %6 = arith.addf %3, %5 : vector<32x8xf32>
    %cst_6 = arith.constant 0.000000e+00 : f32
    %7 = vector.broadcast %cst_6 : f32 to vector<32x8xf32>
    %8 = arith.maximumf %6, %7 : vector<32x8xf32>
    %9 = arith.truncf %8 : vector<32x8xf32> to vector<32x8xbf16>
    %c0_7 = arith.constant 0 : index
    %c0_8 = arith.constant 0 : index
    %c0_9 = arith.constant 0 : index
    %10 = vector.load %arg5[%c0_7, %c0_8, %c0_9] : memref<1x32x8xbf16, #tpu.memory_space<vmem>>, vector<1x32x8xbf16>
    %11 = vector.shape_cast %10 : vector<1x32x8xbf16> to vector<32x8xbf16>
    %12 = vector.shape_cast %9 : vector<32x8xbf16> to vector<1x32x8xbf16>
    tpu.vector_store %arg5[%c0_7, %c0_8, %c0_9], %12 {strides = array<i32>} : memref<1x32x8xbf16, #tpu.memory_space<vmem>>, vector<1x32x8xbf16>,
    return
  }
  func.func @transform_0(%arg0: i32, %arg1: i32) -> (i32, i32, i32) {
    %c0_i32 = arith.constant 0 : i32
    %c0_i32_0 = arith.constant 0 : i32
    return %arg0, %arg1, %c0_i32 : i32, i32, i32
  }
  func.func @transform_1(%arg0: i32, %arg1: i32) -> (i32, i32) {
    %c0_i32 = arith.constant 0 : i32
    %c0_i32_0 = arith.constant 0 : i32
    %c0_i32_1 = arith.constant 0 : i32
    return %c0_i32, %c0_i32_0 : i32, i32
  }
  func.func @transform_2(%arg0: i32, %arg1: i32) -> (i32, i32) {
    %c0_i32 = arith.constant 0 : i32
    %c0_i32_0 = arith.constant 0 : i32
    %c0_i32_1 = arith.constant 0 : i32
    return %c0_i32, %c0_i32_0 : i32, i32
  }
  func.func @transform_3(%arg0: i32, %arg1: i32) -> (i32, i32, i32) {
    %c0_i32 = arith.constant 0 : i32
    %c0_i32_0 = arith.constant 0 : i32
    return %arg0, %arg1, %c0_i32 : i32, i32, i32
  }
}

module attributes {stable_mosaic.version = 11 : i64} {
  func.func @_se_gate_kernel(%arg0: i32, %arg1: memref<1x1x8xf32, #tpu.memory_space<vmem>>, %arg2: memref<8x2xf32, #tpu.memory_space<vmem>>, %arg3: memref<1x2xf32, #tpu.memory_space<vmem>>, %arg4: memref<2x8xf32, #tpu.memory_space<vmem>>, %arg5: memref<1x8xf32, #tpu.memory_space<vmem>>, %arg6: memref<1x1x8xf32, #tpu.memory_space<vmem>>) attributes {dimension_semantics = [#tpu.dimension_semantics<parallel>], iteration_bounds = array<i64: 2>, scalar_prefetch = 0 : i64, scratch_operands = 0 : i64, tpu.core_type = #tpu.core_type<tc>, window_params = [{transform_indices = @transform_0, window_bounds = array<i64: 1, 1, 8>}, {pipeline_mode = #tpu.pipeline_mode<synchronous>, transform_indices = @transform_1, window_bounds = array<i64: 8, 2>}, {pipeline_mode = #tpu.pipeline_mode<synchronous>, transform_indices = @transform_2, window_bounds = array<i64: 1, 2>}, {pipeline_mode = #tpu.pipeline_mode<synchronous>, transform_indices = @transform_3, window_bounds = array<i64: 2, 8>}, {pipeline_mode = #tpu.pipeline_mode<synchronous>, transform_indices = @transform_4, window_bounds = array<i64: 1, 8>}, {transform_indices = @transform_5, window_bounds = array<i64: 1, 1, 8>}]} {
    %c0 = arith.constant 0 : index
    %c0_0 = arith.constant 0 : index
    %c0_1 = arith.constant 0 : index
    %0 = vector.load %arg1[%c0, %c0_0, %c0_1] : memref<1x1x8xf32, #tpu.memory_space<vmem>>, vector<1x1x8xf32>
    %1 = vector.shape_cast %0 : vector<1x1x8xf32> to vector<1x8xf32>
    %cst = arith.constant 1.562500e-02 : f32
    %2 = vector.broadcast %cst : f32 to vector<1x8xf32>
    %3 = arith.mulf %1, %2 : vector<1x8xf32>
    %c0_2 = arith.constant 0 : index
    %c0_3 = arith.constant 0 : index
    %4 = vector.load %arg2[%c0_2, %c0_3] : memref<8x2xf32, #tpu.memory_space<vmem>>, vector<8x2xf32>
    %cst_4 = arith.constant dense<0.000000e+00> : vector<1x2xf32>
    %5 = tpu.matmul %3, %4, %cst_4 {dimension_numbers = #tpu.dot_dimension_numbers<[1], [0], [0], [1], [0, 0, 1, 1], [], []>} : vector<1x8xf32>, vector<8x2xf32>, vector<1x2xf32> -> vector<1x2xf32>
    %c0_5 = arith.constant 0 : index
    %c0_6 = arith.constant 0 : index
    %6 = vector.load %arg3[%c0_5, %c0_6] : memref<1x2xf32, #tpu.memory_space<vmem>>, vector<1x2xf32>
    %7 = arith.addf %5, %6 : vector<1x2xf32>
    %cst_7 = arith.constant 0.000000e+00 : f32
    %8 = vector.broadcast %cst_7 : f32 to vector<1x2xf32>
    %9 = arith.maximumf %7, %8 : vector<1x2xf32>
    %c0_8 = arith.constant 0 : index
    %c0_9 = arith.constant 0 : index
    %10 = vector.load %arg4[%c0_8, %c0_9] : memref<2x8xf32, #tpu.memory_space<vmem>>, vector<2x8xf32>
    %cst_10 = arith.constant dense<0.000000e+00> : vector<1x8xf32>
    %11 = tpu.matmul %9, %10, %cst_10 {dimension_numbers = #tpu.dot_dimension_numbers<[1], [0], [0], [1], [0, 0, 1, 1], [], []>} : vector<1x2xf32>, vector<2x8xf32>, vector<1x8xf32> -> vector<1x8xf32>
    %c0_11 = arith.constant 0 : index
    %c0_12 = arith.constant 0 : index
    %12 = vector.load %arg5[%c0_11, %c0_12] : memref<1x8xf32, #tpu.memory_space<vmem>>, vector<1x8xf32>
    %13 = arith.addf %11, %12 : vector<1x8xf32>
    %cst_13 = arith.constant 0.000000e+00 : f32
    %14 = vector.broadcast %cst_13 : f32 to vector<1x8xf32>
    %15 = arith.subf %14, %13 : vector<1x8xf32>
    %16 = math.exp %15 : vector<1x8xf32>
    %cst_14 = arith.constant 1.000000e+00 : f32
    %17 = vector.broadcast %cst_14 : f32 to vector<1x8xf32>
    %18 = arith.addf %17, %16 : vector<1x8xf32>
    %cst_15 = arith.constant 1.000000e+00 : f32
    %19 = vector.broadcast %cst_15 : f32 to vector<1x8xf32>
    %20 = arith.divf %19, %18 : vector<1x8xf32>
    %c0_16 = arith.constant 0 : index
    %c0_17 = arith.constant 0 : index
    %c0_18 = arith.constant 0 : index
    %21 = vector.load %arg6[%c0_16, %c0_17, %c0_18] : memref<1x1x8xf32, #tpu.memory_space<vmem>>, vector<1x1x8xf32>
    %22 = vector.shape_cast %21 : vector<1x1x8xf32> to vector<1x8xf32>
    %23 = vector.shape_cast %20 : vector<1x8xf32> to vector<1x1x8xf32>
    tpu.vector_store %arg6[%c0_16, %c0_17, %c0_18], %23 {strides = array<i32>} : memref<1x1x8xf32, #tpu.memory_space<vmem>>, vector<1x1x8xf32>,
    return
  }
  func.func @transform_0(%arg0: i32) -> (i32, i32, i32) {
    %c0_i32 = arith.constant 0 : i32
    %c0_i32_0 = arith.constant 0 : i32
    %c0_i32_1 = arith.constant 0 : i32
    return %arg0, %c0_i32, %c0_i32_0 : i32, i32, i32
  }
  func.func @transform_1(%arg0: i32) -> (i32, i32) {
    %c0_i32 = arith.constant 0 : i32
    %c0_i32_0 = arith.constant 0 : i32
    %c0_i32_1 = arith.constant 0 : i32
    return %c0_i32, %c0_i32_0 : i32, i32
  }
  func.func @transform_2(%arg0: i32) -> (i32, i32) {
    %c0_i32 = arith.constant 0 : i32
    %c0_i32_0 = arith.constant 0 : i32
    %c0_i32_1 = arith.constant 0 : i32
    return %c0_i32, %c0_i32_0 : i32, i32
  }
  func.func @transform_3(%arg0: i32) -> (i32, i32) {
    %c0_i32 = arith.constant 0 : i32
    %c0_i32_0 = arith.constant 0 : i32
    %c0_i32_1 = arith.constant 0 : i32
    return %c0_i32, %c0_i32_0 : i32, i32
  }
  func.func @transform_4(%arg0: i32) -> (i32, i32) {
    %c0_i32 = arith.constant 0 : i32
    %c0_i32_0 = arith.constant 0 : i32
    %c0_i32_1 = arith.constant 0 : i32
    return %c0_i32, %c0_i32_0 : i32, i32
  }
  func.func @transform_5(%arg0: i32) -> (i32, i32, i32) {
    %c0_i32 = arith.constant 0 : i32
    %c0_i32_0 = arith.constant 0 : i32
    %c0_i32_1 = arith.constant 0 : i32
    return %arg0, %c0_i32, %c0_i32_0 : i32, i32, i32
  }
}

module attributes {stable_mosaic.version = 11 : i64} {
  func.func @_gconv3x3_kernel(%arg0: i32, %arg1: i32, %arg2: memref<1x1x10x10x8xbf16, #tpu.memory_space<vmem>>, %arg3: memref<9x4x2x2xbf16, #tpu.memory_space<vmem>>, %arg4: memref<1x8xf32, #tpu.memory_space<vmem>>, %arg5: memref<1x32x8xbf16, #tpu.memory_space<vmem>>, %arg6: memref<1x1x8xf32, #tpu.memory_space<vmem>>) attributes {dimension_semantics = [#tpu.dimension_semantics<parallel>, #tpu.dimension_semantics<arbitrary>], iteration_bounds = array<i64: 2, 2>, scalar_prefetch = 0 : i64, scratch_operands = 0 : i64, tpu.core_type = #tpu.core_type<tc>, window_params = [{transform_indices = @transform_0, window_bounds = array<i64: 1, 1, 10, 10, 8>}, {pipeline_mode = #tpu.pipeline_mode<synchronous>, transform_indices = @transform_1, window_bounds = array<i64: 9, 4, 2, 2>}, {pipeline_mode = #tpu.pipeline_mode<synchronous>, transform_indices = @transform_2, window_bounds = array<i64: 1, 8>}, {transform_indices = @transform_3, window_bounds = array<i64: 1, 32, 8>}, {transform_indices = @transform_4, window_bounds = array<i64: 1, 1, 8>}]} {
    %c4_i32 = arith.constant 4 : i32
    %0 = arith.muli %arg1, %c4_i32 : i32
    %cst = arith.constant 0.000000e+00 : f32
    %1 = vector.broadcast %cst : f32 to vector<32x2xf32>
    %cst_0 = arith.constant 0.000000e+00 : f32
    %2 = vector.broadcast %cst_0 : f32 to vector<32x2xf32>
    %cst_1 = arith.constant 0.000000e+00 : f32
    %3 = vector.broadcast %cst_1 : f32 to vector<32x2xf32>
    %cst_2 = arith.constant 0.000000e+00 : f32
    %4 = vector.broadcast %cst_2 : f32 to vector<32x2xf32>
    %c0_i32 = arith.constant 0 : i32
    %5 = arith.addi %0, %c0_i32 : i32
    %c0 = arith.constant 0 : index
    %c0_3 = arith.constant 0 : index
    %6 = arith.index_cast %5 : i32 to index
    %c0_4 = arith.constant 0 : index
    %c0_5 = arith.constant 0 : index
    %7 = vector.load %arg2[%c0, %c0_3, %6, %c0_4, %c0_5] : memref<1x1x10x10x8xbf16, #tpu.memory_space<vmem>>, vector<1x1x4x8x8xbf16>
    %8 = vector.shape_cast %7 : vector<1x1x4x8x8xbf16> to vector<4x8x8xbf16>
    %9 = arith.extf %8 : vector<4x8x8xbf16> to vector<4x8x8xf32>
    %10 = vector.shape_cast %9 : vector<4x8x8xf32> to vector<32x8xf32>
    %11 = arith.truncf %10 : vector<32x8xf32> to vector<32x8xbf16>
    %12 = vector.extract_strided_slice %11 {offsets = [0, 0], sizes = [32, 2], strides = [1, 1]} : vector<32x8xbf16> to vector<32x2xbf16>
    %c0_6 = arith.constant 0 : index
    %c0_7 = arith.constant 0 : index
    %c0_8 = arith.constant 0 : index
    %c0_9 = arith.constant 0 : index
    %13 = vector.load %arg3[%c0_6, %c0_7, %c0_8, %c0_9] : memref<9x4x2x2xbf16, #tpu.memory_space<vmem>>, vector<1x1x2x2xbf16>
    %14 = vector.shape_cast %13 : vector<1x1x2x2xbf16> to vector<2x2xbf16>
    %cst_10 = arith.constant dense<0.000000e+00> : vector<32x2xf32>
    %15 = tpu.matmul %12, %14, %cst_10 {dimension_numbers = #tpu.dot_dimension_numbers<[1], [0], [0], [1], [0, 0, 1, 1], [], []>} : vector<32x2xbf16>, vector<2x2xbf16>, vector<32x2xf32> -> vector<32x2xf32>
    %16 = arith.addf %1, %15 : vector<32x2xf32>
    %17 = vector.extract_strided_slice %11 {offsets = [0, 2], sizes = [32, 2], strides = [1, 1]} : vector<32x8xbf16> to vector<32x2xbf16>
    %c0_11 = arith.constant 0 : index
    %c1 = arith.constant 1 : index
    %c0_12 = arith.constant 0 : index
    %c0_13 = arith.constant 0 : index
    %18 = vector.load %arg3[%c0_11, %c1, %c0_12, %c0_13] : memref<9x4x2x2xbf16, #tpu.memory_space<vmem>>, vector<1x1x2x2xbf16>
    %19 = vector.shape_cast %18 : vector<1x1x2x2xbf16> to vector<2x2xbf16>
    %cst_14 = arith.constant dense<0.000000e+00> : vector<32x2xf32>
    %20 = tpu.matmul %17, %19, %cst_14 {dimension_numbers = #tpu.dot_dimension_numbers<[1], [0], [0], [1], [0, 0, 1, 1], [], []>} : vector<32x2xbf16>, vector<2x2xbf16>, vector<32x2xf32> -> vector<32x2xf32>
    %21 = arith.addf %2, %20 : vector<32x2xf32>
    %22 = vector.extract_strided_slice %11 {offsets = [0, 4], sizes = [32, 2], strides = [1, 1]} : vector<32x8xbf16> to vector<32x2xbf16>
    %c0_15 = arith.constant 0 : index
    %c2 = arith.constant 2 : index
    %c0_16 = arith.constant 0 : index
    %c0_17 = arith.constant 0 : index
    %23 = vector.load %arg3[%c0_15, %c2, %c0_16, %c0_17] : memref<9x4x2x2xbf16, #tpu.memory_space<vmem>>, vector<1x1x2x2xbf16>
    %24 = vector.shape_cast %23 : vector<1x1x2x2xbf16> to vector<2x2xbf16>
    %cst_18 = arith.constant dense<0.000000e+00> : vector<32x2xf32>
    %25 = tpu.matmul %22, %24, %cst_18 {dimension_numbers = #tpu.dot_dimension_numbers<[1], [0], [0], [1], [0, 0, 1, 1], [], []>} : vector<32x2xbf16>, vector<2x2xbf16>, vector<32x2xf32> -> vector<32x2xf32>
    %26 = arith.addf %3, %25 : vector<32x2xf32>
    %27 = vector.extract_strided_slice %11 {offsets = [0, 6], sizes = [32, 2], strides = [1, 1]} : vector<32x8xbf16> to vector<32x2xbf16>
    %c0_19 = arith.constant 0 : index
    %c3 = arith.constant 3 : index
    %c0_20 = arith.constant 0 : index
    %c0_21 = arith.constant 0 : index
    %28 = vector.load %arg3[%c0_19, %c3, %c0_20, %c0_21] : memref<9x4x2x2xbf16, #tpu.memory_space<vmem>>, vector<1x1x2x2xbf16>
    %29 = vector.shape_cast %28 : vector<1x1x2x2xbf16> to vector<2x2xbf16>
    %cst_22 = arith.constant dense<0.000000e+00> : vector<32x2xf32>
    %30 = tpu.matmul %27, %29, %cst_22 {dimension_numbers = #tpu.dot_dimension_numbers<[1], [0], [0], [1], [0, 0, 1, 1], [], []>} : vector<32x2xbf16>, vector<2x2xbf16>, vector<32x2xf32> -> vector<32x2xf32>
    %31 = arith.addf %4, %30 : vector<32x2xf32>
    %c0_i32_23 = arith.constant 0 : i32
    %32 = arith.addi %0, %c0_i32_23 : i32
    %c0_24 = arith.constant 0 : index
    %c0_25 = arith.constant 0 : index
    %33 = arith.index_cast %32 : i32 to index
    %c1_26 = arith.constant 1 : index
    %c0_27 = arith.constant 0 : index
    %34 = vector.load %arg2[%c0_24, %c0_25, %33, %c1_26, %c0_27] : memref<1x1x10x10x8xbf16, #tpu.memory_space<vmem>>, vector<1x1x4x8x8xbf16>
    %35 = vector.shape_cast %34 : vector<1x1x4x8x8xbf16> to vector<4x8x8xbf16>
    %36 = arith.extf %35 : vector<4x8x8xbf16> to vector<4x8x8xf32>
    %37 = vector.shape_cast %36 : vector<4x8x8xf32> to vector<32x8xf32>
    %38 = arith.truncf %37 : vector<32x8xf32> to vector<32x8xbf16>
    %39 = vector.extract_strided_slice %38 {offsets = [0, 0], sizes = [32, 2], strides = [1, 1]} : vector<32x8xbf16> to vector<32x2xbf16>
    %c1_28 = arith.constant 1 : index
    %c0_29 = arith.constant 0 : index
    %c0_30 = arith.constant 0 : index
    %c0_31 = arith.constant 0 : index
    %40 = vector.load %arg3[%c1_28, %c0_29, %c0_30, %c0_31] : memref<9x4x2x2xbf16, #tpu.memory_space<vmem>>, vector<1x1x2x2xbf16>
    %41 = vector.shape_cast %40 : vector<1x1x2x2xbf16> to vector<2x2xbf16>
    %cst_32 = arith.constant dense<0.000000e+00> : vector<32x2xf32>
    %42 = tpu.matmul %39, %41, %cst_32 {dimension_numbers = #tpu.dot_dimension_numbers<[1], [0], [0], [1], [0, 0, 1, 1], [], []>} : vector<32x2xbf16>, vector<2x2xbf16>, vector<32x2xf32> -> vector<32x2xf32>
    %43 = arith.addf %16, %42 : vector<32x2xf32>
    %44 = vector.extract_strided_slice %38 {offsets = [0, 2], sizes = [32, 2], strides = [1, 1]} : vector<32x8xbf16> to vector<32x2xbf16>
    %c1_33 = arith.constant 1 : index
    %c1_34 = arith.constant 1 : index
    %c0_35 = arith.constant 0 : index
    %c0_36 = arith.constant 0 : index
    %45 = vector.load %arg3[%c1_33, %c1_34, %c0_35, %c0_36] : memref<9x4x2x2xbf16, #tpu.memory_space<vmem>>, vector<1x1x2x2xbf16>
    %46 = vector.shape_cast %45 : vector<1x1x2x2xbf16> to vector<2x2xbf16>
    %cst_37 = arith.constant dense<0.000000e+00> : vector<32x2xf32>
    %47 = tpu.matmul %44, %46, %cst_37 {dimension_numbers = #tpu.dot_dimension_numbers<[1], [0], [0], [1], [0, 0, 1, 1], [], []>} : vector<32x2xbf16>, vector<2x2xbf16>, vector<32x2xf32> -> vector<32x2xf32>
    %48 = arith.addf %21, %47 : vector<32x2xf32>
    %49 = vector.extract_strided_slice %38 {offsets = [0, 4], sizes = [32, 2], strides = [1, 1]} : vector<32x8xbf16> to vector<32x2xbf16>
    %c1_38 = arith.constant 1 : index
    %c2_39 = arith.constant 2 : index
    %c0_40 = arith.constant 0 : index
    %c0_41 = arith.constant 0 : index
    %50 = vector.load %arg3[%c1_38, %c2_39, %c0_40, %c0_41] : memref<9x4x2x2xbf16, #tpu.memory_space<vmem>>, vector<1x1x2x2xbf16>
    %51 = vector.shape_cast %50 : vector<1x1x2x2xbf16> to vector<2x2xbf16>
    %cst_42 = arith.constant dense<0.000000e+00> : vector<32x2xf32>
    %52 = tpu.matmul %49, %51, %cst_42 {dimension_numbers = #tpu.dot_dimension_numbers<[1], [0], [0], [1], [0, 0, 1, 1], [], []>} : vector<32x2xbf16>, vector<2x2xbf16>, vector<32x2xf32> -> vector<32x2xf32>
    %53 = arith.addf %26, %52 : vector<32x2xf32>
    %54 = vector.extract_strided_slice %38 {offsets = [0, 6], sizes = [32, 2], strides = [1, 1]} : vector<32x8xbf16> to vector<32x2xbf16>
    %c1_43 = arith.constant 1 : index
    %c3_44 = arith.constant 3 : index
    %c0_45 = arith.constant 0 : index
    %c0_46 = arith.constant 0 : index
    %55 = vector.load %arg3[%c1_43, %c3_44, %c0_45, %c0_46] : memref<9x4x2x2xbf16, #tpu.memory_space<vmem>>, vector<1x1x2x2xbf16>
    %56 = vector.shape_cast %55 : vector<1x1x2x2xbf16> to vector<2x2xbf16>
    %cst_47 = arith.constant dense<0.000000e+00> : vector<32x2xf32>
    %57 = tpu.matmul %54, %56, %cst_47 {dimension_numbers = #tpu.dot_dimension_numbers<[1], [0], [0], [1], [0, 0, 1, 1], [], []>} : vector<32x2xbf16>, vector<2x2xbf16>, vector<32x2xf32> -> vector<32x2xf32>
    %58 = arith.addf %31, %57 : vector<32x2xf32>
    %c0_i32_48 = arith.constant 0 : i32
    %59 = arith.addi %0, %c0_i32_48 : i32
    %c0_49 = arith.constant 0 : index
    %c0_50 = arith.constant 0 : index
    %60 = arith.index_cast %59 : i32 to index
    %c2_51 = arith.constant 2 : index
    %c0_52 = arith.constant 0 : index
    %61 = vector.load %arg2[%c0_49, %c0_50, %60, %c2_51, %c0_52] : memref<1x1x10x10x8xbf16, #tpu.memory_space<vmem>>, vector<1x1x4x8x8xbf16>
    %62 = vector.shape_cast %61 : vector<1x1x4x8x8xbf16> to vector<4x8x8xbf16>
    %63 = arith.extf %62 : vector<4x8x8xbf16> to vector<4x8x8xf32>
    %64 = vector.shape_cast %63 : vector<4x8x8xf32> to vector<32x8xf32>
    %65 = arith.truncf %64 : vector<32x8xf32> to vector<32x8xbf16>
    %66 = vector.extract_strided_slice %65 {offsets = [0, 0], sizes = [32, 2], strides = [1, 1]} : vector<32x8xbf16> to vector<32x2xbf16>
    %c2_53 = arith.constant 2 : index
    %c0_54 = arith.constant 0 : index
    %c0_55 = arith.constant 0 : index
    %c0_56 = arith.constant 0 : index
    %67 = vector.load %arg3[%c2_53, %c0_54, %c0_55, %c0_56] : memref<9x4x2x2xbf16, #tpu.memory_space<vmem>>, vector<1x1x2x2xbf16>
    %68 = vector.shape_cast %67 : vector<1x1x2x2xbf16> to vector<2x2xbf16>
    %cst_57 = arith.constant dense<0.000000e+00> : vector<32x2xf32>
    %69 = tpu.matmul %66, %68, %cst_57 {dimension_numbers = #tpu.dot_dimension_numbers<[1], [0], [0], [1], [0, 0, 1, 1], [], []>} : vector<32x2xbf16>, vector<2x2xbf16>, vector<32x2xf32> -> vector<32x2xf32>
    %70 = arith.addf %43, %69 : vector<32x2xf32>
    %71 = vector.extract_strided_slice %65 {offsets = [0, 2], sizes = [32, 2], strides = [1, 1]} : vector<32x8xbf16> to vector<32x2xbf16>
    %c2_58 = arith.constant 2 : index
    %c1_59 = arith.constant 1 : index
    %c0_60 = arith.constant 0 : index
    %c0_61 = arith.constant 0 : index
    %72 = vector.load %arg3[%c2_58, %c1_59, %c0_60, %c0_61] : memref<9x4x2x2xbf16, #tpu.memory_space<vmem>>, vector<1x1x2x2xbf16>
    %73 = vector.shape_cast %72 : vector<1x1x2x2xbf16> to vector<2x2xbf16>
    %cst_62 = arith.constant dense<0.000000e+00> : vector<32x2xf32>
    %74 = tpu.matmul %71, %73, %cst_62 {dimension_numbers = #tpu.dot_dimension_numbers<[1], [0], [0], [1], [0, 0, 1, 1], [], []>} : vector<32x2xbf16>, vector<2x2xbf16>, vector<32x2xf32> -> vector<32x2xf32>
    %75 = arith.addf %48, %74 : vector<32x2xf32>
    %76 = vector.extract_strided_slice %65 {offsets = [0, 4], sizes = [32, 2], strides = [1, 1]} : vector<32x8xbf16> to vector<32x2xbf16>
    %c2_63 = arith.constant 2 : index
    %c2_64 = arith.constant 2 : index
    %c0_65 = arith.constant 0 : index
    %c0_66 = arith.constant 0 : index
    %77 = vector.load %arg3[%c2_63, %c2_64, %c0_65, %c0_66] : memref<9x4x2x2xbf16, #tpu.memory_space<vmem>>, vector<1x1x2x2xbf16>
    %78 = vector.shape_cast %77 : vector<1x1x2x2xbf16> to vector<2x2xbf16>
    %cst_67 = arith.constant dense<0.000000e+00> : vector<32x2xf32>
    %79 = tpu.matmul %76, %78, %cst_67 {dimension_numbers = #tpu.dot_dimension_numbers<[1], [0], [0], [1], [0, 0, 1, 1], [], []>} : vector<32x2xbf16>, vector<2x2xbf16>, vector<32x2xf32> -> vector<32x2xf32>
    %80 = arith.addf %53, %79 : vector<32x2xf32>
    %81 = vector.extract_strided_slice %65 {offsets = [0, 6], sizes = [32, 2], strides = [1, 1]} : vector<32x8xbf16> to vector<32x2xbf16>
    %c2_68 = arith.constant 2 : index
    %c3_69 = arith.constant 3 : index
    %c0_70 = arith.constant 0 : index
    %c0_71 = arith.constant 0 : index
    %82 = vector.load %arg3[%c2_68, %c3_69, %c0_70, %c0_71] : memref<9x4x2x2xbf16, #tpu.memory_space<vmem>>, vector<1x1x2x2xbf16>
    %83 = vector.shape_cast %82 : vector<1x1x2x2xbf16> to vector<2x2xbf16>
    %cst_72 = arith.constant dense<0.000000e+00> : vector<32x2xf32>
    %84 = tpu.matmul %81, %83, %cst_72 {dimension_numbers = #tpu.dot_dimension_numbers<[1], [0], [0], [1], [0, 0, 1, 1], [], []>} : vector<32x2xbf16>, vector<2x2xbf16>, vector<32x2xf32> -> vector<32x2xf32>
    %85 = arith.addf %58, %84 : vector<32x2xf32>
    %c1_i32 = arith.constant 1 : i32
    %86 = arith.addi %0, %c1_i32 : i32
    %c0_73 = arith.constant 0 : index
    %c0_74 = arith.constant 0 : index
    %87 = arith.index_cast %86 : i32 to index
    %c0_75 = arith.constant 0 : index
    %c0_76 = arith.constant 0 : index
    %88 = vector.load %arg2[%c0_73, %c0_74, %87, %c0_75, %c0_76] : memref<1x1x10x10x8xbf16, #tpu.memory_space<vmem>>, vector<1x1x4x8x8xbf16>
    %89 = vector.shape_cast %88 : vector<1x1x4x8x8xbf16> to vector<4x8x8xbf16>
    %90 = arith.extf %89 : vector<4x8x8xbf16> to vector<4x8x8xf32>
    %91 = vector.shape_cast %90 : vector<4x8x8xf32> to vector<32x8xf32>
    %92 = arith.truncf %91 : vector<32x8xf32> to vector<32x8xbf16>
    %93 = vector.extract_strided_slice %92 {offsets = [0, 0], sizes = [32, 2], strides = [1, 1]} : vector<32x8xbf16> to vector<32x2xbf16>
    %c3_77 = arith.constant 3 : index
    %c0_78 = arith.constant 0 : index
    %c0_79 = arith.constant 0 : index
    %c0_80 = arith.constant 0 : index
    %94 = vector.load %arg3[%c3_77, %c0_78, %c0_79, %c0_80] : memref<9x4x2x2xbf16, #tpu.memory_space<vmem>>, vector<1x1x2x2xbf16>
    %95 = vector.shape_cast %94 : vector<1x1x2x2xbf16> to vector<2x2xbf16>
    %cst_81 = arith.constant dense<0.000000e+00> : vector<32x2xf32>
    %96 = tpu.matmul %93, %95, %cst_81 {dimension_numbers = #tpu.dot_dimension_numbers<[1], [0], [0], [1], [0, 0, 1, 1], [], []>} : vector<32x2xbf16>, vector<2x2xbf16>, vector<32x2xf32> -> vector<32x2xf32>
    %97 = arith.addf %70, %96 : vector<32x2xf32>
    %98 = vector.extract_strided_slice %92 {offsets = [0, 2], sizes = [32, 2], strides = [1, 1]} : vector<32x8xbf16> to vector<32x2xbf16>
    %c3_82 = arith.constant 3 : index
    %c1_83 = arith.constant 1 : index
    %c0_84 = arith.constant 0 : index
    %c0_85 = arith.constant 0 : index
    %99 = vector.load %arg3[%c3_82, %c1_83, %c0_84, %c0_85] : memref<9x4x2x2xbf16, #tpu.memory_space<vmem>>, vector<1x1x2x2xbf16>
    %100 = vector.shape_cast %99 : vector<1x1x2x2xbf16> to vector<2x2xbf16>
    %cst_86 = arith.constant dense<0.000000e+00> : vector<32x2xf32>
    %101 = tpu.matmul %98, %100, %cst_86 {dimension_numbers = #tpu.dot_dimension_numbers<[1], [0], [0], [1], [0, 0, 1, 1], [], []>} : vector<32x2xbf16>, vector<2x2xbf16>, vector<32x2xf32> -> vector<32x2xf32>
    %102 = arith.addf %75, %101 : vector<32x2xf32>
    %103 = vector.extract_strided_slice %92 {offsets = [0, 4], sizes = [32, 2], strides = [1, 1]} : vector<32x8xbf16> to vector<32x2xbf16>
    %c3_87 = arith.constant 3 : index
    %c2_88 = arith.constant 2 : index
    %c0_89 = arith.constant 0 : index
    %c0_90 = arith.constant 0 : index
    %104 = vector.load %arg3[%c3_87, %c2_88, %c0_89, %c0_90] : memref<9x4x2x2xbf16, #tpu.memory_space<vmem>>, vector<1x1x2x2xbf16>
    %105 = vector.shape_cast %104 : vector<1x1x2x2xbf16> to vector<2x2xbf16>
    %cst_91 = arith.constant dense<0.000000e+00> : vector<32x2xf32>
    %106 = tpu.matmul %103, %105, %cst_91 {dimension_numbers = #tpu.dot_dimension_numbers<[1], [0], [0], [1], [0, 0, 1, 1], [], []>} : vector<32x2xbf16>, vector<2x2xbf16>, vector<32x2xf32> -> vector<32x2xf32>
    %107 = arith.addf %80, %106 : vector<32x2xf32>
    %108 = vector.extract_strided_slice %92 {offsets = [0, 6], sizes = [32, 2], strides = [1, 1]} : vector<32x8xbf16> to vector<32x2xbf16>
    %c3_92 = arith.constant 3 : index
    %c3_93 = arith.constant 3 : index
    %c0_94 = arith.constant 0 : index
    %c0_95 = arith.constant 0 : index
    %109 = vector.load %arg3[%c3_92, %c3_93, %c0_94, %c0_95] : memref<9x4x2x2xbf16, #tpu.memory_space<vmem>>, vector<1x1x2x2xbf16>
    %110 = vector.shape_cast %109 : vector<1x1x2x2xbf16> to vector<2x2xbf16>
    %cst_96 = arith.constant dense<0.000000e+00> : vector<32x2xf32>
    %111 = tpu.matmul %108, %110, %cst_96 {dimension_numbers = #tpu.dot_dimension_numbers<[1], [0], [0], [1], [0, 0, 1, 1], [], []>} : vector<32x2xbf16>, vector<2x2xbf16>, vector<32x2xf32> -> vector<32x2xf32>
    %112 = arith.addf %85, %111 : vector<32x2xf32>
    %c1_i32_97 = arith.constant 1 : i32
    %113 = arith.addi %0, %c1_i32_97 : i32
    %c0_98 = arith.constant 0 : index
    %c0_99 = arith.constant 0 : index
    %114 = arith.index_cast %113 : i32 to index
    %c1_100 = arith.constant 1 : index
    %c0_101 = arith.constant 0 : index
    %115 = vector.load %arg2[%c0_98, %c0_99, %114, %c1_100, %c0_101] : memref<1x1x10x10x8xbf16, #tpu.memory_space<vmem>>, vector<1x1x4x8x8xbf16>
    %116 = vector.shape_cast %115 : vector<1x1x4x8x8xbf16> to vector<4x8x8xbf16>
    %117 = arith.extf %116 : vector<4x8x8xbf16> to vector<4x8x8xf32>
    %118 = vector.shape_cast %117 : vector<4x8x8xf32> to vector<32x8xf32>
    %119 = arith.truncf %118 : vector<32x8xf32> to vector<32x8xbf16>
    %120 = vector.extract_strided_slice %119 {offsets = [0, 0], sizes = [32, 2], strides = [1, 1]} : vector<32x8xbf16> to vector<32x2xbf16>
    %c4 = arith.constant 4 : index
    %c0_102 = arith.constant 0 : index
    %c0_103 = arith.constant 0 : index
    %c0_104 = arith.constant 0 : index
    %121 = vector.load %arg3[%c4, %c0_102, %c0_103, %c0_104] : memref<9x4x2x2xbf16, #tpu.memory_space<vmem>>, vector<1x1x2x2xbf16>
    %122 = vector.shape_cast %121 : vector<1x1x2x2xbf16> to vector<2x2xbf16>
    %cst_105 = arith.constant dense<0.000000e+00> : vector<32x2xf32>
    %123 = tpu.matmul %120, %122, %cst_105 {dimension_numbers = #tpu.dot_dimension_numbers<[1], [0], [0], [1], [0, 0, 1, 1], [], []>} : vector<32x2xbf16>, vector<2x2xbf16>, vector<32x2xf32> -> vector<32x2xf32>
    %124 = arith.addf %97, %123 : vector<32x2xf32>
    %125 = vector.extract_strided_slice %119 {offsets = [0, 2], sizes = [32, 2], strides = [1, 1]} : vector<32x8xbf16> to vector<32x2xbf16>
    %c4_106 = arith.constant 4 : index
    %c1_107 = arith.constant 1 : index
    %c0_108 = arith.constant 0 : index
    %c0_109 = arith.constant 0 : index
    %126 = vector.load %arg3[%c4_106, %c1_107, %c0_108, %c0_109] : memref<9x4x2x2xbf16, #tpu.memory_space<vmem>>, vector<1x1x2x2xbf16>
    %127 = vector.shape_cast %126 : vector<1x1x2x2xbf16> to vector<2x2xbf16>
    %cst_110 = arith.constant dense<0.000000e+00> : vector<32x2xf32>
    %128 = tpu.matmul %125, %127, %cst_110 {dimension_numbers = #tpu.dot_dimension_numbers<[1], [0], [0], [1], [0, 0, 1, 1], [], []>} : vector<32x2xbf16>, vector<2x2xbf16>, vector<32x2xf32> -> vector<32x2xf32>
    %129 = arith.addf %102, %128 : vector<32x2xf32>
    %130 = vector.extract_strided_slice %119 {offsets = [0, 4], sizes = [32, 2], strides = [1, 1]} : vector<32x8xbf16> to vector<32x2xbf16>
    %c4_111 = arith.constant 4 : index
    %c2_112 = arith.constant 2 : index
    %c0_113 = arith.constant 0 : index
    %c0_114 = arith.constant 0 : index
    %131 = vector.load %arg3[%c4_111, %c2_112, %c0_113, %c0_114] : memref<9x4x2x2xbf16, #tpu.memory_space<vmem>>, vector<1x1x2x2xbf16>
    %132 = vector.shape_cast %131 : vector<1x1x2x2xbf16> to vector<2x2xbf16>
    %cst_115 = arith.constant dense<0.000000e+00> : vector<32x2xf32>
    %133 = tpu.matmul %130, %132, %cst_115 {dimension_numbers = #tpu.dot_dimension_numbers<[1], [0], [0], [1], [0, 0, 1, 1], [], []>} : vector<32x2xbf16>, vector<2x2xbf16>, vector<32x2xf32> -> vector<32x2xf32>
    %134 = arith.addf %107, %133 : vector<32x2xf32>
    %135 = vector.extract_strided_slice %119 {offsets = [0, 6], sizes = [32, 2], strides = [1, 1]} : vector<32x8xbf16> to vector<32x2xbf16>
    %c4_116 = arith.constant 4 : index
    %c3_117 = arith.constant 3 : index
    %c0_118 = arith.constant 0 : index
    %c0_119 = arith.constant 0 : index
    %136 = vector.load %arg3[%c4_116, %c3_117, %c0_118, %c0_119] : memref<9x4x2x2xbf16, #tpu.memory_space<vmem>>, vector<1x1x2x2xbf16>
    %137 = vector.shape_cast %136 : vector<1x1x2x2xbf16> to vector<2x2xbf16>
    %cst_120 = arith.constant dense<0.000000e+00> : vector<32x2xf32>
    %138 = tpu.matmul %135, %137, %cst_120 {dimension_numbers = #tpu.dot_dimension_numbers<[1], [0], [0], [1], [0, 0, 1, 1], [], []>} : vector<32x2xbf16>, vector<2x2xbf16>, vector<32x2xf32> -> vector<32x2xf32>
    %139 = arith.addf %112, %138 : vector<32x2xf32>
    %c1_i32_121 = arith.constant 1 : i32
    %140 = arith.addi %0, %c1_i32_121 : i32
    %c0_122 = arith.constant 0 : index
    %c0_123 = arith.constant 0 : index
    %141 = arith.index_cast %140 : i32 to index
    %c2_124 = arith.constant 2 : index
    %c0_125 = arith.constant 0 : index
    %142 = vector.load %arg2[%c0_122, %c0_123, %141, %c2_124, %c0_125] : memref<1x1x10x10x8xbf16, #tpu.memory_space<vmem>>, vector<1x1x4x8x8xbf16>
    %143 = vector.shape_cast %142 : vector<1x1x4x8x8xbf16> to vector<4x8x8xbf16>
    %144 = arith.extf %143 : vector<4x8x8xbf16> to vector<4x8x8xf32>
    %145 = vector.shape_cast %144 : vector<4x8x8xf32> to vector<32x8xf32>
    %146 = arith.truncf %145 : vector<32x8xf32> to vector<32x8xbf16>
    %147 = vector.extract_strided_slice %146 {offsets = [0, 0], sizes = [32, 2], strides = [1, 1]} : vector<32x8xbf16> to vector<32x2xbf16>
    %c5 = arith.constant 5 : index
    %c0_126 = arith.constant 0 : index
    %c0_127 = arith.constant 0 : index
    %c0_128 = arith.constant 0 : index
    %148 = vector.load %arg3[%c5, %c0_126, %c0_127, %c0_128] : memref<9x4x2x2xbf16, #tpu.memory_space<vmem>>, vector<1x1x2x2xbf16>
    %149 = vector.shape_cast %148 : vector<1x1x2x2xbf16> to vector<2x2xbf16>
    %cst_129 = arith.constant dense<0.000000e+00> : vector<32x2xf32>
    %150 = tpu.matmul %147, %149, %cst_129 {dimension_numbers = #tpu.dot_dimension_numbers<[1], [0], [0], [1], [0, 0, 1, 1], [], []>} : vector<32x2xbf16>, vector<2x2xbf16>, vector<32x2xf32> -> vector<32x2xf32>
    %151 = arith.addf %124, %150 : vector<32x2xf32>
    %152 = vector.extract_strided_slice %146 {offsets = [0, 2], sizes = [32, 2], strides = [1, 1]} : vector<32x8xbf16> to vector<32x2xbf16>
    %c5_130 = arith.constant 5 : index
    %c1_131 = arith.constant 1 : index
    %c0_132 = arith.constant 0 : index
    %c0_133 = arith.constant 0 : index
    %153 = vector.load %arg3[%c5_130, %c1_131, %c0_132, %c0_133] : memref<9x4x2x2xbf16, #tpu.memory_space<vmem>>, vector<1x1x2x2xbf16>
    %154 = vector.shape_cast %153 : vector<1x1x2x2xbf16> to vector<2x2xbf16>
    %cst_134 = arith.constant dense<0.000000e+00> : vector<32x2xf32>
    %155 = tpu.matmul %152, %154, %cst_134 {dimension_numbers = #tpu.dot_dimension_numbers<[1], [0], [0], [1], [0, 0, 1, 1], [], []>} : vector<32x2xbf16>, vector<2x2xbf16>, vector<32x2xf32> -> vector<32x2xf32>
    %156 = arith.addf %129, %155 : vector<32x2xf32>
    %157 = vector.extract_strided_slice %146 {offsets = [0, 4], sizes = [32, 2], strides = [1, 1]} : vector<32x8xbf16> to vector<32x2xbf16>
    %c5_135 = arith.constant 5 : index
    %c2_136 = arith.constant 2 : index
    %c0_137 = arith.constant 0 : index
    %c0_138 = arith.constant 0 : index
    %158 = vector.load %arg3[%c5_135, %c2_136, %c0_137, %c0_138] : memref<9x4x2x2xbf16, #tpu.memory_space<vmem>>, vector<1x1x2x2xbf16>
    %159 = vector.shape_cast %158 : vector<1x1x2x2xbf16> to vector<2x2xbf16>
    %cst_139 = arith.constant dense<0.000000e+00> : vector<32x2xf32>
    %160 = tpu.matmul %157, %159, %cst_139 {dimension_numbers = #tpu.dot_dimension_numbers<[1], [0], [0], [1], [0, 0, 1, 1], [], []>} : vector<32x2xbf16>, vector<2x2xbf16>, vector<32x2xf32> -> vector<32x2xf32>
    %161 = arith.addf %134, %160 : vector<32x2xf32>
    %162 = vector.extract_strided_slice %146 {offsets = [0, 6], sizes = [32, 2], strides = [1, 1]} : vector<32x8xbf16> to vector<32x2xbf16>
    %c5_140 = arith.constant 5 : index
    %c3_141 = arith.constant 3 : index
    %c0_142 = arith.constant 0 : index
    %c0_143 = arith.constant 0 : index
    %163 = vector.load %arg3[%c5_140, %c3_141, %c0_142, %c0_143] : memref<9x4x2x2xbf16, #tpu.memory_space<vmem>>, vector<1x1x2x2xbf16>
    %164 = vector.shape_cast %163 : vector<1x1x2x2xbf16> to vector<2x2xbf16>
    %cst_144 = arith.constant dense<0.000000e+00> : vector<32x2xf32>
    %165 = tpu.matmul %162, %164, %cst_144 {dimension_numbers = #tpu.dot_dimension_numbers<[1], [0], [0], [1], [0, 0, 1, 1], [], []>} : vector<32x2xbf16>, vector<2x2xbf16>, vector<32x2xf32> -> vector<32x2xf32>
    %166 = arith.addf %139, %165 : vector<32x2xf32>
    %c2_i32 = arith.constant 2 : i32
    %167 = arith.addi %0, %c2_i32 : i32
    %c0_145 = arith.constant 0 : index
    %c0_146 = arith.constant 0 : index
    %168 = arith.index_cast %167 : i32 to index
    %c0_147 = arith.constant 0 : index
    %c0_148 = arith.constant 0 : index
    %169 = vector.load %arg2[%c0_145, %c0_146, %168, %c0_147, %c0_148] : memref<1x1x10x10x8xbf16, #tpu.memory_space<vmem>>, vector<1x1x4x8x8xbf16>
    %170 = vector.shape_cast %169 : vector<1x1x4x8x8xbf16> to vector<4x8x8xbf16>
    %171 = arith.extf %170 : vector<4x8x8xbf16> to vector<4x8x8xf32>
    %172 = vector.shape_cast %171 : vector<4x8x8xf32> to vector<32x8xf32>
    %173 = arith.truncf %172 : vector<32x8xf32> to vector<32x8xbf16>
    %174 = vector.extract_strided_slice %173 {offsets = [0, 0], sizes = [32, 2], strides = [1, 1]} : vector<32x8xbf16> to vector<32x2xbf16>
    %c6 = arith.constant 6 : index
    %c0_149 = arith.constant 0 : index
    %c0_150 = arith.constant 0 : index
    %c0_151 = arith.constant 0 : index
    %175 = vector.load %arg3[%c6, %c0_149, %c0_150, %c0_151] : memref<9x4x2x2xbf16, #tpu.memory_space<vmem>>, vector<1x1x2x2xbf16>
    %176 = vector.shape_cast %175 : vector<1x1x2x2xbf16> to vector<2x2xbf16>
    %cst_152 = arith.constant dense<0.000000e+00> : vector<32x2xf32>
    %177 = tpu.matmul %174, %176, %cst_152 {dimension_numbers = #tpu.dot_dimension_numbers<[1], [0], [0], [1], [0, 0, 1, 1], [], []>} : vector<32x2xbf16>, vector<2x2xbf16>, vector<32x2xf32> -> vector<32x2xf32>
    %178 = arith.addf %151, %177 : vector<32x2xf32>
    %179 = vector.extract_strided_slice %173 {offsets = [0, 2], sizes = [32, 2], strides = [1, 1]} : vector<32x8xbf16> to vector<32x2xbf16>
    %c6_153 = arith.constant 6 : index
    %c1_154 = arith.constant 1 : index
    %c0_155 = arith.constant 0 : index
    %c0_156 = arith.constant 0 : index
    %180 = vector.load %arg3[%c6_153, %c1_154, %c0_155, %c0_156] : memref<9x4x2x2xbf16, #tpu.memory_space<vmem>>, vector<1x1x2x2xbf16>
    %181 = vector.shape_cast %180 : vector<1x1x2x2xbf16> to vector<2x2xbf16>
    %cst_157 = arith.constant dense<0.000000e+00> : vector<32x2xf32>
    %182 = tpu.matmul %179, %181, %cst_157 {dimension_numbers = #tpu.dot_dimension_numbers<[1], [0], [0], [1], [0, 0, 1, 1], [], []>} : vector<32x2xbf16>, vector<2x2xbf16>, vector<32x2xf32> -> vector<32x2xf32>
    %183 = arith.addf %156, %182 : vector<32x2xf32>
    %184 = vector.extract_strided_slice %173 {offsets = [0, 4], sizes = [32, 2], strides = [1, 1]} : vector<32x8xbf16> to vector<32x2xbf16>
    %c6_158 = arith.constant 6 : index
    %c2_159 = arith.constant 2 : index
    %c0_160 = arith.constant 0 : index
    %c0_161 = arith.constant 0 : index
    %185 = vector.load %arg3[%c6_158, %c2_159, %c0_160, %c0_161] : memref<9x4x2x2xbf16, #tpu.memory_space<vmem>>, vector<1x1x2x2xbf16>
    %186 = vector.shape_cast %185 : vector<1x1x2x2xbf16> to vector<2x2xbf16>
    %cst_162 = arith.constant dense<0.000000e+00> : vector<32x2xf32>
    %187 = tpu.matmul %184, %186, %cst_162 {dimension_numbers = #tpu.dot_dimension_numbers<[1], [0], [0], [1], [0, 0, 1, 1], [], []>} : vector<32x2xbf16>, vector<2x2xbf16>, vector<32x2xf32> -> vector<32x2xf32>
    %188 = arith.addf %161, %187 : vector<32x2xf32>
    %189 = vector.extract_strided_slice %173 {offsets = [0, 6], sizes = [32, 2], strides = [1, 1]} : vector<32x8xbf16> to vector<32x2xbf16>
    %c6_163 = arith.constant 6 : index
    %c3_164 = arith.constant 3 : index
    %c0_165 = arith.constant 0 : index
    %c0_166 = arith.constant 0 : index
    %190 = vector.load %arg3[%c6_163, %c3_164, %c0_165, %c0_166] : memref<9x4x2x2xbf16, #tpu.memory_space<vmem>>, vector<1x1x2x2xbf16>
    %191 = vector.shape_cast %190 : vector<1x1x2x2xbf16> to vector<2x2xbf16>
    %cst_167 = arith.constant dense<0.000000e+00> : vector<32x2xf32>
    %192 = tpu.matmul %189, %191, %cst_167 {dimension_numbers = #tpu.dot_dimension_numbers<[1], [0], [0], [1], [0, 0, 1, 1], [], []>} : vector<32x2xbf16>, vector<2x2xbf16>, vector<32x2xf32> -> vector<32x2xf32>
    %193 = arith.addf %166, %192 : vector<32x2xf32>
    %c2_i32_168 = arith.constant 2 : i32
    %194 = arith.addi %0, %c2_i32_168 : i32
    %c0_169 = arith.constant 0 : index
    %c0_170 = arith.constant 0 : index
    %195 = arith.index_cast %194 : i32 to index
    %c1_171 = arith.constant 1 : index
    %c0_172 = arith.constant 0 : index
    %196 = vector.load %arg2[%c0_169, %c0_170, %195, %c1_171, %c0_172] : memref<1x1x10x10x8xbf16, #tpu.memory_space<vmem>>, vector<1x1x4x8x8xbf16>
    %197 = vector.shape_cast %196 : vector<1x1x4x8x8xbf16> to vector<4x8x8xbf16>
    %198 = arith.extf %197 : vector<4x8x8xbf16> to vector<4x8x8xf32>
    %199 = vector.shape_cast %198 : vector<4x8x8xf32> to vector<32x8xf32>
    %200 = arith.truncf %199 : vector<32x8xf32> to vector<32x8xbf16>
    %201 = vector.extract_strided_slice %200 {offsets = [0, 0], sizes = [32, 2], strides = [1, 1]} : vector<32x8xbf16> to vector<32x2xbf16>
    %c7 = arith.constant 7 : index
    %c0_173 = arith.constant 0 : index
    %c0_174 = arith.constant 0 : index
    %c0_175 = arith.constant 0 : index
    %202 = vector.load %arg3[%c7, %c0_173, %c0_174, %c0_175] : memref<9x4x2x2xbf16, #tpu.memory_space<vmem>>, vector<1x1x2x2xbf16>
    %203 = vector.shape_cast %202 : vector<1x1x2x2xbf16> to vector<2x2xbf16>
    %cst_176 = arith.constant dense<0.000000e+00> : vector<32x2xf32>
    %204 = tpu.matmul %201, %203, %cst_176 {dimension_numbers = #tpu.dot_dimension_numbers<[1], [0], [0], [1], [0, 0, 1, 1], [], []>} : vector<32x2xbf16>, vector<2x2xbf16>, vector<32x2xf32> -> vector<32x2xf32>
    %205 = arith.addf %178, %204 : vector<32x2xf32>
    %206 = vector.extract_strided_slice %200 {offsets = [0, 2], sizes = [32, 2], strides = [1, 1]} : vector<32x8xbf16> to vector<32x2xbf16>
    %c7_177 = arith.constant 7 : index
    %c1_178 = arith.constant 1 : index
    %c0_179 = arith.constant 0 : index
    %c0_180 = arith.constant 0 : index
    %207 = vector.load %arg3[%c7_177, %c1_178, %c0_179, %c0_180] : memref<9x4x2x2xbf16, #tpu.memory_space<vmem>>, vector<1x1x2x2xbf16>
    %208 = vector.shape_cast %207 : vector<1x1x2x2xbf16> to vector<2x2xbf16>
    %cst_181 = arith.constant dense<0.000000e+00> : vector<32x2xf32>
    %209 = tpu.matmul %206, %208, %cst_181 {dimension_numbers = #tpu.dot_dimension_numbers<[1], [0], [0], [1], [0, 0, 1, 1], [], []>} : vector<32x2xbf16>, vector<2x2xbf16>, vector<32x2xf32> -> vector<32x2xf32>
    %210 = arith.addf %183, %209 : vector<32x2xf32>
    %211 = vector.extract_strided_slice %200 {offsets = [0, 4], sizes = [32, 2], strides = [1, 1]} : vector<32x8xbf16> to vector<32x2xbf16>
    %c7_182 = arith.constant 7 : index
    %c2_183 = arith.constant 2 : index
    %c0_184 = arith.constant 0 : index
    %c0_185 = arith.constant 0 : index
    %212 = vector.load %arg3[%c7_182, %c2_183, %c0_184, %c0_185] : memref<9x4x2x2xbf16, #tpu.memory_space<vmem>>, vector<1x1x2x2xbf16>
    %213 = vector.shape_cast %212 : vector<1x1x2x2xbf16> to vector<2x2xbf16>
    %cst_186 = arith.constant dense<0.000000e+00> : vector<32x2xf32>
    %214 = tpu.matmul %211, %213, %cst_186 {dimension_numbers = #tpu.dot_dimension_numbers<[1], [0], [0], [1], [0, 0, 1, 1], [], []>} : vector<32x2xbf16>, vector<2x2xbf16>, vector<32x2xf32> -> vector<32x2xf32>
    %215 = arith.addf %188, %214 : vector<32x2xf32>
    %216 = vector.extract_strided_slice %200 {offsets = [0, 6], sizes = [32, 2], strides = [1, 1]} : vector<32x8xbf16> to vector<32x2xbf16>
    %c7_187 = arith.constant 7 : index
    %c3_188 = arith.constant 3 : index
    %c0_189 = arith.constant 0 : index
    %c0_190 = arith.constant 0 : index
    %217 = vector.load %arg3[%c7_187, %c3_188, %c0_189, %c0_190] : memref<9x4x2x2xbf16, #tpu.memory_space<vmem>>, vector<1x1x2x2xbf16>
    %218 = vector.shape_cast %217 : vector<1x1x2x2xbf16> to vector<2x2xbf16>
    %cst_191 = arith.constant dense<0.000000e+00> : vector<32x2xf32>
    %219 = tpu.matmul %216, %218, %cst_191 {dimension_numbers = #tpu.dot_dimension_numbers<[1], [0], [0], [1], [0, 0, 1, 1], [], []>} : vector<32x2xbf16>, vector<2x2xbf16>, vector<32x2xf32> -> vector<32x2xf32>
    %220 = arith.addf %193, %219 : vector<32x2xf32>
    %c2_i32_192 = arith.constant 2 : i32
    %221 = arith.addi %0, %c2_i32_192 : i32
    %c0_193 = arith.constant 0 : index
    %c0_194 = arith.constant 0 : index
    %222 = arith.index_cast %221 : i32 to index
    %c2_195 = arith.constant 2 : index
    %c0_196 = arith.constant 0 : index
    %223 = vector.load %arg2[%c0_193, %c0_194, %222, %c2_195, %c0_196] : memref<1x1x10x10x8xbf16, #tpu.memory_space<vmem>>, vector<1x1x4x8x8xbf16>
    %224 = vector.shape_cast %223 : vector<1x1x4x8x8xbf16> to vector<4x8x8xbf16>
    %225 = arith.extf %224 : vector<4x8x8xbf16> to vector<4x8x8xf32>
    %226 = vector.shape_cast %225 : vector<4x8x8xf32> to vector<32x8xf32>
    %227 = arith.truncf %226 : vector<32x8xf32> to vector<32x8xbf16>
    %228 = vector.extract_strided_slice %227 {offsets = [0, 0], sizes = [32, 2], strides = [1, 1]} : vector<32x8xbf16> to vector<32x2xbf16>
    %c8 = arith.constant 8 : index
    %c0_197 = arith.constant 0 : index
    %c0_198 = arith.constant 0 : index
    %c0_199 = arith.constant 0 : index
    %229 = vector.load %arg3[%c8, %c0_197, %c0_198, %c0_199] : memref<9x4x2x2xbf16, #tpu.memory_space<vmem>>, vector<1x1x2x2xbf16>
    %230 = vector.shape_cast %229 : vector<1x1x2x2xbf16> to vector<2x2xbf16>
    %cst_200 = arith.constant dense<0.000000e+00> : vector<32x2xf32>
    %231 = tpu.matmul %228, %230, %cst_200 {dimension_numbers = #tpu.dot_dimension_numbers<[1], [0], [0], [1], [0, 0, 1, 1], [], []>} : vector<32x2xbf16>, vector<2x2xbf16>, vector<32x2xf32> -> vector<32x2xf32>
    %232 = arith.addf %205, %231 : vector<32x2xf32>
    %233 = vector.extract_strided_slice %227 {offsets = [0, 2], sizes = [32, 2], strides = [1, 1]} : vector<32x8xbf16> to vector<32x2xbf16>
    %c8_201 = arith.constant 8 : index
    %c1_202 = arith.constant 1 : index
    %c0_203 = arith.constant 0 : index
    %c0_204 = arith.constant 0 : index
    %234 = vector.load %arg3[%c8_201, %c1_202, %c0_203, %c0_204] : memref<9x4x2x2xbf16, #tpu.memory_space<vmem>>, vector<1x1x2x2xbf16>
    %235 = vector.shape_cast %234 : vector<1x1x2x2xbf16> to vector<2x2xbf16>
    %cst_205 = arith.constant dense<0.000000e+00> : vector<32x2xf32>
    %236 = tpu.matmul %233, %235, %cst_205 {dimension_numbers = #tpu.dot_dimension_numbers<[1], [0], [0], [1], [0, 0, 1, 1], [], []>} : vector<32x2xbf16>, vector<2x2xbf16>, vector<32x2xf32> -> vector<32x2xf32>
    %237 = arith.addf %210, %236 : vector<32x2xf32>
    %238 = vector.extract_strided_slice %227 {offsets = [0, 4], sizes = [32, 2], strides = [1, 1]} : vector<32x8xbf16> to vector<32x2xbf16>
    %c8_206 = arith.constant 8 : index
    %c2_207 = arith.constant 2 : index
    %c0_208 = arith.constant 0 : index
    %c0_209 = arith.constant 0 : index
    %239 = vector.load %arg3[%c8_206, %c2_207, %c0_208, %c0_209] : memref<9x4x2x2xbf16, #tpu.memory_space<vmem>>, vector<1x1x2x2xbf16>
    %240 = vector.shape_cast %239 : vector<1x1x2x2xbf16> to vector<2x2xbf16>
    %cst_210 = arith.constant dense<0.000000e+00> : vector<32x2xf32>
    %241 = tpu.matmul %238, %240, %cst_210 {dimension_numbers = #tpu.dot_dimension_numbers<[1], [0], [0], [1], [0, 0, 1, 1], [], []>} : vector<32x2xbf16>, vector<2x2xbf16>, vector<32x2xf32> -> vector<32x2xf32>
    %242 = arith.addf %215, %241 : vector<32x2xf32>
    %243 = vector.extract_strided_slice %227 {offsets = [0, 6], sizes = [32, 2], strides = [1, 1]} : vector<32x8xbf16> to vector<32x2xbf16>
    %c8_211 = arith.constant 8 : index
    %c3_212 = arith.constant 3 : index
    %c0_213 = arith.constant 0 : index
    %c0_214 = arith.constant 0 : index
    %244 = vector.load %arg3[%c8_211, %c3_212, %c0_213, %c0_214] : memref<9x4x2x2xbf16, #tpu.memory_space<vmem>>, vector<1x1x2x2xbf16>
    %245 = vector.shape_cast %244 : vector<1x1x2x2xbf16> to vector<2x2xbf16>
    %cst_215 = arith.constant dense<0.000000e+00> : vector<32x2xf32>
    %246 = tpu.matmul %243, %245, %cst_215 {dimension_numbers = #tpu.dot_dimension_numbers<[1], [0], [0], [1], [0, 0, 1, 1], [], []>} : vector<32x2xbf16>, vector<2x2xbf16>, vector<32x2xf32> -> vector<32x2xf32>
    %247 = arith.addf %220, %246 : vector<32x2xf32>
    %c0_i32_216 = arith.constant 0 : i32
    %248 = arith.cmpi eq, %arg1, %c0_i32_216 : i32
    %249 = arith.extui %248 : i1 to i32
    %c0_i32_217 = arith.constant 0 : i32
    %250 = arith.cmpi ne, %249, %c0_i32_217 : i32
    scf.if %250 {
      %cst_270 = arith.constant 0.000000e+00 : f32
      %319 = vector.broadcast %cst_270 : f32 to vector<1x1x8xf32>
      %c0_271 = arith.constant 0 : index
      %c0_272 = arith.constant 0 : index
      %c0_273 = arith.constant 0 : index
      %320 = vector.load %arg6[%c0_271, %c0_272, %c0_273] : memref<1x1x8xf32, #tpu.memory_space<vmem>>, vector<1x1x8xf32>
      tpu.vector_store %arg6[%c0_271, %c0_272, %c0_273], %319 {strides = array<i32>} : memref<1x1x8xf32, #tpu.memory_space<vmem>>, vector<1x1x8xf32>,
    } else {
    }
    %c0_218 = arith.constant 0 : index
    %c0_219 = arith.constant 0 : index
    %251 = vector.load %arg4[%c0_218, %c0_219] : memref<1x8xf32, #tpu.memory_space<vmem>>, vector<1x2xf32>
    %252 = vector.broadcast %251 : vector<1x2xf32> to vector<32x2xf32>
    %253 = arith.addf %232, %252 : vector<32x2xf32>
    %cst_220 = arith.constant 0.000000e+00 : f32
    %254 = vector.broadcast %cst_220 : f32 to vector<32x2xf32>
    %255 = arith.maximumf %253, %254 : vector<32x2xf32>
    %256 = arith.truncf %255 : vector<32x2xf32> to vector<32x2xbf16>
    %c0_221 = arith.constant 0 : index
    %c0_222 = arith.constant 0 : index
    %c0_223 = arith.constant 0 : index
    %257 = vector.load %arg5[%c0_221, %c0_222, %c0_223] : memref<1x32x8xbf16, #tpu.memory_space<vmem>>, vector<1x32x2xbf16>
    %258 = vector.shape_cast %257 : vector<1x32x2xbf16> to vector<32x2xbf16>
    %259 = vector.shape_cast %256 : vector<32x2xbf16> to vector<1x32x2xbf16>
    tpu.vector_store %arg5[%c0_221, %c0_222, %c0_223], %259 {strides = array<i32>} : memref<1x32x8xbf16, #tpu.memory_space<vmem>>, vector<1x32x2xbf16>,
    %c0_224 = arith.constant 0 : index
    %c0_225 = arith.constant 0 : index
    %c0_226 = arith.constant 0 : index
    %260 = vector.load %arg6[%c0_224, %c0_225, %c0_226] : memref<1x1x8xf32, #tpu.memory_space<vmem>>, vector<1x1x2xf32>
    %261 = vector.shape_cast %260 : vector<1x1x2xf32> to vector<1x2xf32>
    %cst_227 = arith.constant dense<0.000000e+00> : vector<2xf32>
    %262 = vector.multi_reduction <add>, %255, %cst_227 [0] : vector<32x2xf32> to vector<2xf32>
    %263 = vector.shape_cast %262 : vector<2xf32> to vector<1x2xf32>
    %264 = arith.addf %261, %263 : vector<1x2xf32>
    %c0_228 = arith.constant 0 : index
    %c0_229 = arith.constant 0 : index
    %c0_230 = arith.constant 0 : index
    %265 = vector.load %arg6[%c0_228, %c0_229, %c0_230] : memref<1x1x8xf32, #tpu.memory_space<vmem>>, vector<1x1x2xf32>
    %266 = vector.shape_cast %265 : vector<1x1x2xf32> to vector<1x2xf32>
    %267 = vector.shape_cast %264 : vector<1x2xf32> to vector<1x1x2xf32>
    tpu.vector_store %arg6[%c0_228, %c0_229, %c0_230], %267 {strides = array<i32>} : memref<1x1x8xf32, #tpu.memory_space<vmem>>, vector<1x1x2xf32>,
    %c0_231 = arith.constant 0 : index
    %c2_232 = arith.constant 2 : index
    %268 = vector.load %arg4[%c0_231, %c2_232] : memref<1x8xf32, #tpu.memory_space<vmem>>, vector<1x2xf32>
    %269 = vector.broadcast %268 : vector<1x2xf32> to vector<32x2xf32>
    %270 = arith.addf %237, %269 : vector<32x2xf32>
    %cst_233 = arith.constant 0.000000e+00 : f32
    %271 = vector.broadcast %cst_233 : f32 to vector<32x2xf32>
    %272 = arith.maximumf %270, %271 : vector<32x2xf32>
    %273 = arith.truncf %272 : vector<32x2xf32> to vector<32x2xbf16>
    %c0_234 = arith.constant 0 : index
    %c0_235 = arith.constant 0 : index
    %c2_236 = arith.constant 2 : index
    %274 = vector.load %arg5[%c0_234, %c0_235, %c2_236] : memref<1x32x8xbf16, #tpu.memory_space<vmem>>, vector<1x32x2xbf16>
    %275 = vector.shape_cast %274 : vector<1x32x2xbf16> to vector<32x2xbf16>
    %276 = vector.shape_cast %273 : vector<32x2xbf16> to vector<1x32x2xbf16>
    tpu.vector_store %arg5[%c0_234, %c0_235, %c2_236], %276 {strides = array<i32>} : memref<1x32x8xbf16, #tpu.memory_space<vmem>>, vector<1x32x2xbf16>,
    %c0_237 = arith.constant 0 : index
    %c0_238 = arith.constant 0 : index
    %c2_239 = arith.constant 2 : index
    %277 = vector.load %arg6[%c0_237, %c0_238, %c2_239] : memref<1x1x8xf32, #tpu.memory_space<vmem>>, vector<1x1x2xf32>
    %278 = vector.shape_cast %277 : vector<1x1x2xf32> to vector<1x2xf32>
    %cst_240 = arith.constant dense<0.000000e+00> : vector<2xf32>
    %279 = vector.multi_reduction <add>, %272, %cst_240 [0] : vector<32x2xf32> to vector<2xf32>
    %280 = vector.shape_cast %279 : vector<2xf32> to vector<1x2xf32>
    %281 = arith.addf %278, %280 : vector<1x2xf32>
    %c0_241 = arith.constant 0 : index
    %c0_242 = arith.constant 0 : index
    %c2_243 = arith.constant 2 : index
    %282 = vector.load %arg6[%c0_241, %c0_242, %c2_243] : memref<1x1x8xf32, #tpu.memory_space<vmem>>, vector<1x1x2xf32>
    %283 = vector.shape_cast %282 : vector<1x1x2xf32> to vector<1x2xf32>
    %284 = vector.shape_cast %281 : vector<1x2xf32> to vector<1x1x2xf32>
    tpu.vector_store %arg6[%c0_241, %c0_242, %c2_243], %284 {strides = array<i32>} : memref<1x1x8xf32, #tpu.memory_space<vmem>>, vector<1x1x2xf32>,
    %c0_244 = arith.constant 0 : index
    %c4_245 = arith.constant 4 : index
    %285 = vector.load %arg4[%c0_244, %c4_245] : memref<1x8xf32, #tpu.memory_space<vmem>>, vector<1x2xf32>
    %286 = vector.broadcast %285 : vector<1x2xf32> to vector<32x2xf32>
    %287 = arith.addf %242, %286 : vector<32x2xf32>
    %cst_246 = arith.constant 0.000000e+00 : f32
    %288 = vector.broadcast %cst_246 : f32 to vector<32x2xf32>
    %289 = arith.maximumf %287, %288 : vector<32x2xf32>
    %290 = arith.truncf %289 : vector<32x2xf32> to vector<32x2xbf16>
    %c0_247 = arith.constant 0 : index
    %c0_248 = arith.constant 0 : index
    %c4_249 = arith.constant 4 : index
    %291 = vector.load %arg5[%c0_247, %c0_248, %c4_249] : memref<1x32x8xbf16, #tpu.memory_space<vmem>>, vector<1x32x2xbf16>
    %292 = vector.shape_cast %291 : vector<1x32x2xbf16> to vector<32x2xbf16>
    %293 = vector.shape_cast %290 : vector<32x2xbf16> to vector<1x32x2xbf16>
    tpu.vector_store %arg5[%c0_247, %c0_248, %c4_249], %293 {strides = array<i32>} : memref<1x32x8xbf16, #tpu.memory_space<vmem>>, vector<1x32x2xbf16>,
    %c0_250 = arith.constant 0 : index
    %c0_251 = arith.constant 0 : index
    %c4_252 = arith.constant 4 : index
    %294 = vector.load %arg6[%c0_250, %c0_251, %c4_252] : memref<1x1x8xf32, #tpu.memory_space<vmem>>, vector<1x1x2xf32>
    %295 = vector.shape_cast %294 : vector<1x1x2xf32> to vector<1x2xf32>
    %cst_253 = arith.constant dense<0.000000e+00> : vector<2xf32>
    %296 = vector.multi_reduction <add>, %289, %cst_253 [0] : vector<32x2xf32> to vector<2xf32>
    %297 = vector.shape_cast %296 : vector<2xf32> to vector<1x2xf32>
    %298 = arith.addf %295, %297 : vector<1x2xf32>
    %c0_254 = arith.constant 0 : index
    %c0_255 = arith.constant 0 : index
    %c4_256 = arith.constant 4 : index
    %299 = vector.load %arg6[%c0_254, %c0_255, %c4_256] : memref<1x1x8xf32, #tpu.memory_space<vmem>>, vector<1x1x2xf32>
    %300 = vector.shape_cast %299 : vector<1x1x2xf32> to vector<1x2xf32>
    %301 = vector.shape_cast %298 : vector<1x2xf32> to vector<1x1x2xf32>
    tpu.vector_store %arg6[%c0_254, %c0_255, %c4_256], %301 {strides = array<i32>} : memref<1x1x8xf32, #tpu.memory_space<vmem>>, vector<1x1x2xf32>,
    %c0_257 = arith.constant 0 : index
    %c6_258 = arith.constant 6 : index
    %302 = vector.load %arg4[%c0_257, %c6_258] : memref<1x8xf32, #tpu.memory_space<vmem>>, vector<1x2xf32>
    %303 = vector.broadcast %302 : vector<1x2xf32> to vector<32x2xf32>
    %304 = arith.addf %247, %303 : vector<32x2xf32>
    %cst_259 = arith.constant 0.000000e+00 : f32
    %305 = vector.broadcast %cst_259 : f32 to vector<32x2xf32>
    %306 = arith.maximumf %304, %305 : vector<32x2xf32>
    %307 = arith.truncf %306 : vector<32x2xf32> to vector<32x2xbf16>
    %c0_260 = arith.constant 0 : index
    %c0_261 = arith.constant 0 : index
    %c6_262 = arith.constant 6 : index
    %308 = vector.load %arg5[%c0_260, %c0_261, %c6_262] : memref<1x32x8xbf16, #tpu.memory_space<vmem>>, vector<1x32x2xbf16>
    %309 = vector.shape_cast %308 : vector<1x32x2xbf16> to vector<32x2xbf16>
    %310 = vector.shape_cast %307 : vector<32x2xbf16> to vector<1x32x2xbf16>
    tpu.vector_store %arg5[%c0_260, %c0_261, %c6_262], %310 {strides = array<i32>} : memref<1x32x8xbf16, #tpu.memory_space<vmem>>, vector<1x32x2xbf16>,
    %c0_263 = arith.constant 0 : index
    %c0_264 = arith.constant 0 : index
    %c6_265 = arith.constant 6 : index
    %311 = vector.load %arg6[%c0_263, %c0_264, %c6_265] : memref<1x1x8xf32, #tpu.memory_space<vmem>>, vector<1x1x2xf32>
    %312 = vector.shape_cast %311 : vector<1x1x2xf32> to vector<1x2xf32>
    %cst_266 = arith.constant dense<0.000000e+00> : vector<2xf32>
    %313 = vector.multi_reduction <add>, %306, %cst_266 [0] : vector<32x2xf32> to vector<2xf32>
    %314 = vector.shape_cast %313 : vector<2xf32> to vector<1x2xf32>
    %315 = arith.addf %312, %314 : vector<1x2xf32>
    %c0_267 = arith.constant 0 : index
    %c0_268 = arith.constant 0 : index
    %c6_269 = arith.constant 6 : index
    %316 = vector.load %arg6[%c0_267, %c0_268, %c6_269] : memref<1x1x8xf32, #tpu.memory_space<vmem>>, vector<1x1x2xf32>
    %317 = vector.shape_cast %316 : vector<1x1x2xf32> to vector<1x2xf32>
    %318 = vector.shape_cast %315 : vector<1x2xf32> to vector<1x1x2xf32>
    tpu.vector_store %arg6[%c0_267, %c0_268, %c6_269], %318 {strides = array<i32>} : memref<1x1x8xf32, #tpu.memory_space<vmem>>, vector<1x1x2xf32>,
    return
  }
  func.func @transform_0(%arg0: i32, %arg1: i32) -> (i32, i32, i32, i32, i32) {
    %c0_i32 = arith.constant 0 : i32
    %c0_i32_0 = arith.constant 0 : i32
    %c0_i32_1 = arith.constant 0 : i32
    %c0_i32_2 = arith.constant 0 : i32
    %c0_i32_3 = arith.constant 0 : i32
    return %arg0, %c0_i32, %c0_i32_0, %c0_i32_1, %c0_i32_2 : i32, i32, i32, i32, i32
  }
  func.func @transform_1(%arg0: i32, %arg1: i32) -> (i32, i32, i32, i32) {
    %c0_i32 = arith.constant 0 : i32
    %c0_i32_0 = arith.constant 0 : i32
    %c0_i32_1 = arith.constant 0 : i32
    %c0_i32_2 = arith.constant 0 : i32
    %c0_i32_3 = arith.constant 0 : i32
    return %c0_i32, %c0_i32_0, %c0_i32_1, %c0_i32_2 : i32, i32, i32, i32
  }
  func.func @transform_2(%arg0: i32, %arg1: i32) -> (i32, i32) {
    %c0_i32 = arith.constant 0 : i32
    %c0_i32_0 = arith.constant 0 : i32
    %c0_i32_1 = arith.constant 0 : i32
    return %c0_i32, %c0_i32_0 : i32, i32
  }
  func.func @transform_3(%arg0: i32, %arg1: i32) -> (i32, i32, i32) {
    %c0_i32 = arith.constant 0 : i32
    %c0_i32_0 = arith.constant 0 : i32
    return %arg0, %arg1, %c0_i32 : i32, i32, i32
  }
  func.func @transform_4(%arg0: i32, %arg1: i32) -> (i32, i32, i32) {
    %c0_i32 = arith.constant 0 : i32
    %c0_i32_0 = arith.constant 0 : i32
    %c0_i32_1 = arith.constant 0 : i32
    return %arg0, %c0_i32, %c0_i32_0 : i32, i32, i32
  }
}

module attributes {stable_mosaic.version = 11 : i64} {
  func.func @_block3_kernel(%arg0: i32, %arg1: i32, %arg2: memref<1x32x8xbf16, #tpu.memory_space<vmem>>, %arg3: memref<1x1x8xf32, #tpu.memory_space<vmem>>, %arg4: memref<8x8xbf16, #tpu.memory_space<vmem>>, %arg5: memref<1x8xf32, #tpu.memory_space<vmem>>, %arg6: memref<1x32x8xbf16, #tpu.memory_space<vmem>>, %arg7: memref<1x32x8xbf16, #tpu.memory_space<vmem>>) attributes {dimension_semantics = [#tpu.dimension_semantics<parallel>, #tpu.dimension_semantics<parallel>], iteration_bounds = array<i64: 2, 2>, scalar_prefetch = 0 : i64, scratch_operands = 0 : i64, tpu.core_type = #tpu.core_type<tc>, window_params = [{transform_indices = @transform_0, window_bounds = array<i64: 1, 32, 8>}, {transform_indices = @transform_1, window_bounds = array<i64: 1, 1, 8>}, {pipeline_mode = #tpu.pipeline_mode<synchronous>, transform_indices = @transform_2, window_bounds = array<i64: 8, 8>}, {pipeline_mode = #tpu.pipeline_mode<synchronous>, transform_indices = @transform_3, window_bounds = array<i64: 1, 8>}, {transform_indices = @transform_4, window_bounds = array<i64: 1, 32, 8>}, {transform_indices = @transform_5, window_bounds = array<i64: 1, 32, 8>}]} {
    %c0 = arith.constant 0 : index
    %c0_0 = arith.constant 0 : index
    %c0_1 = arith.constant 0 : index
    %0 = vector.load %arg2[%c0, %c0_0, %c0_1] : memref<1x32x8xbf16, #tpu.memory_space<vmem>>, vector<1x32x8xbf16>
    %1 = vector.shape_cast %0 : vector<1x32x8xbf16> to vector<32x8xbf16>
    %2 = arith.extf %1 : vector<32x8xbf16> to vector<32x8xf32>
    %c0_2 = arith.constant 0 : index
    %c0_3 = arith.constant 0 : index
    %c0_4 = arith.constant 0 : index
    %3 = vector.load %arg3[%c0_2, %c0_3, %c0_4] : memref<1x1x8xf32, #tpu.memory_space<vmem>>, vector<1x1x8xf32>
    %4 = vector.shape_cast %3 : vector<1x1x8xf32> to vector<1x8xf32>
    %5 = vector.broadcast %4 : vector<1x8xf32> to vector<32x8xf32>
    %6 = arith.mulf %2, %5 : vector<32x8xf32>
    %7 = arith.truncf %6 : vector<32x8xf32> to vector<32x8xbf16>
    %c0_5 = arith.constant 0 : index
    %c0_6 = arith.constant 0 : index
    %8 = vector.load %arg4[%c0_5, %c0_6] : memref<8x8xbf16, #tpu.memory_space<vmem>>, vector<8x8xbf16>
    %cst = arith.constant dense<0.000000e+00> : vector<32x8xf32>
    %9 = tpu.matmul %7, %8, %cst {dimension_numbers = #tpu.dot_dimension_numbers<[1], [0], [0], [1], [0, 0, 1, 1], [], []>} : vector<32x8xbf16>, vector<8x8xbf16>, vector<32x8xf32> -> vector<32x8xf32>
    %c0_7 = arith.constant 0 : index
    %c0_8 = arith.constant 0 : index
    %10 = vector.load %arg5[%c0_7, %c0_8] : memref<1x8xf32, #tpu.memory_space<vmem>>, vector<1x8xf32>
    %11 = vector.broadcast %10 : vector<1x8xf32> to vector<32x8xf32>
    %12 = arith.addf %9, %11 : vector<32x8xf32>
    %c0_9 = arith.constant 0 : index
    %c0_10 = arith.constant 0 : index
    %c0_11 = arith.constant 0 : index
    %13 = vector.load %arg6[%c0_9, %c0_10, %c0_11] : memref<1x32x8xbf16, #tpu.memory_space<vmem>>, vector<1x32x8xbf16>
    %14 = vector.shape_cast %13 : vector<1x32x8xbf16> to vector<32x8xbf16>
    %15 = arith.extf %14 : vector<32x8xbf16> to vector<32x8xf32>
    %16 = arith.addf %12, %15 : vector<32x8xf32>
    %cst_12 = arith.constant 0.000000e+00 : f32
    %17 = vector.broadcast %cst_12 : f32 to vector<32x8xf32>
    %18 = arith.maximumf %16, %17 : vector<32x8xf32>
    %19 = arith.truncf %18 : vector<32x8xf32> to vector<32x8xbf16>
    %c0_13 = arith.constant 0 : index
    %c0_14 = arith.constant 0 : index
    %c0_15 = arith.constant 0 : index
    %20 = vector.load %arg7[%c0_13, %c0_14, %c0_15] : memref<1x32x8xbf16, #tpu.memory_space<vmem>>, vector<1x32x8xbf16>
    %21 = vector.shape_cast %20 : vector<1x32x8xbf16> to vector<32x8xbf16>
    %22 = vector.shape_cast %19 : vector<32x8xbf16> to vector<1x32x8xbf16>
    tpu.vector_store %arg7[%c0_13, %c0_14, %c0_15], %22 {strides = array<i32>} : memref<1x32x8xbf16, #tpu.memory_space<vmem>>, vector<1x32x8xbf16>,
    return
  }
  func.func @transform_0(%arg0: i32, %arg1: i32) -> (i32, i32, i32) {
    %c0_i32 = arith.constant 0 : i32
    %c0_i32_0 = arith.constant 0 : i32
    return %arg0, %arg1, %c0_i32 : i32, i32, i32
  }
  func.func @transform_1(%arg0: i32, %arg1: i32) -> (i32, i32, i32) {
    %c0_i32 = arith.constant 0 : i32
    %c0_i32_0 = arith.constant 0 : i32
    %c0_i32_1 = arith.constant 0 : i32
    return %arg0, %c0_i32, %c0_i32_0 : i32, i32, i32
  }
  func.func @transform_2(%arg0: i32, %arg1: i32) -> (i32, i32) {
    %c0_i32 = arith.constant 0 : i32
    %c0_i32_0 = arith.constant 0 : i32
    %c0_i32_1 = arith.constant 0 : i32
    return %c0_i32, %c0_i32_0 : i32, i32
  }
  func.func @transform_3(%arg0: i32, %arg1: i32) -> (i32, i32) {
    %c0_i32 = arith.constant 0 : i32
    %c0_i32_0 = arith.constant 0 : i32
    %c0_i32_1 = arith.constant 0 : i32
    return %c0_i32, %c0_i32_0 : i32, i32
  }
  func.func @transform_4(%arg0: i32, %arg1: i32) -> (i32, i32, i32) {
    %c0_i32 = arith.constant 0 : i32
    %c0_i32_0 = arith.constant 0 : i32
    return %arg0, %arg1, %c0_i32 : i32, i32, i32
  }
  func.func @transform_5(%arg0: i32, %arg1: i32) -> (i32, i32, i32) {
    %c0_i32 = arith.constant 0 : i32
    %c0_i32_0 = arith.constant 0 : i32
    return %arg0, %arg1, %c0_i32 : i32, i32, i32
  }
}

</mosaic_0001>

<bundles_post_ra>
// kernel: _lambda_.8
= control target key start
LH: loop header
LB: loop body
LE: loop exit
PB: predicated region body
PF: predicated region fallthrough
CT: control target
= control target key end

     0   :  { %s654_s12 = smov 0   ;;  %s656_s13 = smov 0   ;;  %s771_s0 = inlined_call_operand.vmem [shape: bf16[2,256,4], index: 0, kind: input, shape index: {}]   ;;  %s772_s1 = inlined_call_operand.vmem [shape: bf16[4,8], index: 1, kind: input, shape index: {}]   ;;  %s773_s2 = inlined_call_operand.vmem [shape: f32[1,8], index: 2, kind: input, shape index: {}]   ;;  %s774_s3 = inlined_call_operand.vmem [shape: bf16[2,256,8], index: 3, kind: output, shape index: {}]  }
   0x1   :  { %s658_s14 = smov 0   ;;  %s660_s15 = smov 0  }
   0x2   :  { %s662_s16 = smov 0  }
   0x3 LB: > { %s22_s17 = sadd.s32 1, %s624_s14  ;;  %s25_s18 = sadd.s32 1, %s628_s15  ;;  %s632_s16 = sphi %s662_s16, %s13_s16   ;;  %s628_s15 = sphi %s660_s15, %s778_s15   ;;  %s624_s14 = sphi %s658_s14, %s777_s14   ;;  %s620_s13 = sphi %s656_s13, %s776_s13   ;;  %s616_s12 = sphi %s654_s12, %s775_s12  }
   0x4   : > { %p23_p0 = scmp.ge.s32.totalorder %s22_s17, 2  ;;  %p493_p1 = scmp.ge.s32.totalorder %s632_s16, 1 }
   0x5   : > { %p158_p2 = scmp.lt.s32.totalorder %s632_s16, 5 }
   0x6   : > { %s780_s17 = smov (%p23_p0, %s22_s17), 0  ;;  %s782_s18 = smov (!%p23_p0, %s25_s18), %s628_s15 }
   0x7   : > { %p159_p3 = pnand %p493_p1, %p158_p2  ;;  %p27_p4 = scmp.ge.s32.totalorder %s782_s18, 2 }
   0x8   : > { %s494_s21 = sshll.u32 (!%p159_p3), %s616_s12, 4  ;;  %p191_p5 = scmp.lt.s32.totalorder (!%p159_p3), %s620_s13, 1 }
   0x9   : > { %s784_s18 = smov (%p27_p4, %s782_s18), 0  ;;  %162 = sbr.rel (%p159_p3) target bundleno = 185 (0xb9), region = 32 }
   0xa   : > { %p193_p6 = scmp.lt.s32.totalorder (!%p159_p3), %s494_s21, 31 }
   0xe   : > { %v227_v0 = vld [vmem:[%s772_s1] sm:$0x3]  ;;  %vm297_vm0 = vcmask 1041408   ;;  %s786_s13 = smov (!%p191_p5, %s620_s13), 1  ;;  %s788_s21 = smov (!%p193_p6, %s494_s21), 31  ;;  %vm272_vm1 = vcmask 31744  }
   0xf   : > { %v299_v1 = vsel %vm297_vm0, %v227_v0, 0  ;;  %s495_s22 = sshll.u32 %s786_s13, 5  ;;  %v701_v10 = vld [vmem:[%s773_s2] ss:$0 sm:$0xff]  ;;  %vm382_vm2 = vcmask 60416  }
  0x10   : > { %308 = vmatpush.bf16.msra.mxu0 %v299_v1  ;;  %550 = vmatpush.bf16.msra.mxu1 %v299_v1  ;;  %s196_s23 = sadd.s32 %s495_s22, %s788_s21 }
  0x11   : > { %551 = vmatpush.bf16.msra.mxu2 %v299_v1  ;;  %552 = vmatpush.bf16.msra.mxu3 %v299_v1  ;;  %s496_s24 = sshll.u32 %s196_s23, 2 }
  0x12   : > { %s198_s27 = scalar_lea.vmem %s771_s0, %s496_s24  ;;  %s708_s5 = scalar_lea.vmem %s774_s3, %s496_s24 }
  0x13   : > { %v542_v2 = vld [vmem:[%s198_s27] sm:$0xff]  ;;  %v544_v3 = vld [vmem:[%s198_s27 + $0x10] sm:$0xff]  ;;  %v543_v6 = vld [vmem:[%s198_s27 + $0x8] sm:$0xff] }
  0x14   : > { %v546_v4 = vld [vmem:[%s198_s27 + $0x20] sm:$0xff]  ;;  %v548_v5 = vld [vmem:[%s198_s27 + $0x30] sm:$0xff]  ;;  %532 = vmatmul.msk.bf16.vlgmr.msra.gmra.mxu0 %vm272_vm1, %v542_v2  ;;  %534 = vmatmul.msk.bf16.vlgmr.msra.gmra.mxu1 %vm272_vm1, %v544_v3  ;;  %v545_v7 = vld [vmem:[%s198_s27 + $0x18] sm:$0xff] }
  0x15   : > { %536 = vmatmul.msk.bf16.vlgmr.msra.gmra.mxu2 %vm272_vm1, %v546_v4  ;;  %538 = vmatmul.msk.bf16.vlgmr.msra.gmra.mxu3 %vm272_vm1, %v548_v5  ;;  %v547_v8 = vld [vmem:[%s198_s27 + $0x28] sm:$0xff]  ;;  %v549_v9 = vld [vmem:[%s198_s27 + $0x38] sm:$0xff] }
  0x24   : > { %533 = vmatmul.msk.bf16.gmra.mxu0 %vm272_vm1, %v543_v6  ;;  %535 = vmatmul.msk.bf16.gmra.mxu1 %vm272_vm1, %v545_v7 }
  0x25   : > { %537 = vmatmul.msk.bf16.gmra.mxu2 %vm272_vm1, %v547_v8  ;;  %539 = vmatmul.msk.bf16.gmra.mxu3 %vm272_vm1, %v549_v9 }
  0x91   : > { %v310_v11 = vpop.f32.mrf.mxu0  ;;  %v320_v12 = vpop.f32.mrf.mxu1 }
  0x92   : > { %v311_v13 = vadd.f32 %v701_v10, %v310_v11  ;;  %v321_v14 = vadd.f32 %v701_v10, %v320_v12 }
  0x94   : > { %v350_v15 = vmax.f32 %v311_v13, 0.0  ;;  %v354_v16 = vmax.f32 %v321_v14, 0.0 }
  0x96   : > { %v366_v17 = vpack.c.bf16 %v350_v15, %v350_v15  ;;  %v370_v18 = vpack.c.bf16 %v354_v16, %v354_v16 }
  0x98   : > { %383 = vst.msk [vmem:[%s708_s5] sm:$0xf] %vm382_vm2, %v366_v17  ;;  %v330_v19 = vpop.f32.mrf.mxu2  ;;  %v340_v20 = vpop.f32.mrf.mxu3 }
  0x99   : > { %387 = vst.msk [vmem:[%s708_s5 + $0x10] sm:$0xf] %vm382_vm2, %v370_v18  ;;  %v331_v21 = vadd.f32 %v701_v10, %v330_v19  ;;  %v341_v22 = vadd.f32 %v701_v10, %v340_v20  ;;  %v312_v23 = vpop.f32.mrf.mxu0  ;;  %v322_v24 = vpop.f32.mrf.mxu1 }
  0x9a   : > { %v313_v25 = vadd.f32 %v701_v10, %v312_v23  ;;  %v323_v26 = vadd.f32 %v701_v10, %v322_v24 }
  0x9b   : > { %v358_v27 = vmax.f32 %v331_v21, 0.0  ;;  %v362_v28 = vmax.f32 %v341_v22, 0.0 }
  0x9c   : > { %v351_v29 = vmax.f32 %v313_v25, 0.0  ;;  %v355_v30 = vmax.f32 %v323_v26, 0.0 }
  0x9d   : > { %v374_v31 = vpack.c.bf16 %v358_v27, %v358_v27  ;;  %v378_v32 = vpack.c.bf16 %v362_v28, %v362_v28 }
  0x9e   : > { %v367_v33 = vpack.c.bf16 %v351_v29, %v351_v29  ;;  %v371_v34 = vpack.c.bf16 %v355_v30, %v355_v30 }
  0x9f   : > { %391 = vst.msk [vmem:[%s708_s5 + $0x20] sm:$0xf] %vm382_vm2, %v374_v31 }
  0xa0   : > { %395 = vst.msk [vmem:[%s708_s5 + $0x30] sm:$0xf] %vm382_vm2, %v378_v32  ;;  %v332_v35 = vpop.f32.mrf.mxu2  ;;  %v342_v36 = vpop.f32.mrf.mxu3 }
  0xa1   : > { %384 = vst.msk [vmem:[%s708_s5 + $0x4] sm:$0xf] %vm382_vm2, %v367_v33  ;;  %v333_v37 = vadd.f32 %v701_v10, %v332_v35  ;;  %v343_v38 = vadd.f32 %v701_v10, %v342_v36  ;;  %v315_v39 = vpop.f32.mrf.mxu0  ;;  %v325_v40 = vpop.f32.mrf.mxu1 }
  0xa2   : > { %388 = vst.msk [vmem:[%s708_s5 + $0x14] sm:$0xf] %vm382_vm2, %v371_v34  ;;  %v316_v41 = vadd.f32 %v701_v10, %v315_v39  ;;  %v326_v42 = vadd.f32 %v701_v10, %v325_v40 }
  0xa3   : > { %v359_v43 = vmax.f32 %v333_v37, 0.0  ;;  %v363_v44 = vmax.f32 %v343_v38, 0.0 }
  0xa4   : > { %v352_v45 = vmax.f32 %v316_v41, 0.0  ;;  %v356_v46 = vmax.f32 %v326_v42, 0.0 }
  0xa5   : > { %v375_v47 = vpack.c.bf16 %v359_v43, %v359_v43  ;;  %v379_v48 = vpack.c.bf16 %v363_v44, %v363_v44 }
  0xa6   : > { %v368_v49 = vpack.c.bf16 %v352_v45, %v352_v45  ;;  %v372_v50 = vpack.c.bf16 %v356_v46, %v356_v46 }
  0xa7   : > { %392 = vst.msk [vmem:[%s708_s5 + $0x24] sm:$0xf] %vm382_vm2, %v375_v47 }
  0xa8   : > { %396 = vst.msk [vmem:[%s708_s5 + $0x34] sm:$0xf] %vm382_vm2, %v379_v48  ;;  %v335_v51 = vpop.f32.mrf.mxu2  ;;  %v345_v52 = vpop.f32.mrf.mxu3 }
  0xa9   : > { %385 = vst.msk [vmem:[%s708_s5 + $0x8] sm:$0xf] %vm382_vm2, %v368_v49  ;;  %v336_v53 = vadd.f32 %v701_v10, %v335_v51  ;;  %v346_v54 = vadd.f32 %v701_v10, %v345_v52  ;;  %v317_v55 = vpop.f32.mrf.mxu0  ;;  %v327_v56 = vpop.f32.mrf.mxu1 }
  0xaa   : > { %389 = vst.msk [vmem:[%s708_s5 + $0x18] sm:$0xf] %vm382_vm2, %v372_v50  ;;  %v318_v57 = vadd.f32 %v701_v10, %v317_v55  ;;  %v328_v58 = vadd.f32 %v701_v10, %v327_v56 }
  0xab   : > { %v360_v59 = vmax.f32 %v336_v53, 0.0  ;;  %v364_v60 = vmax.f32 %v346_v54, 0.0 }
  0xac   : > { %v353_v61 = vmax.f32 %v318_v57, 0.0  ;;  %v357_v62 = vmax.f32 %v328_v58, 0.0 }
  0xad   : > { %v376_v63 = vpack.c.bf16 %v360_v59, %v360_v59  ;;  %v380_v0 = vpack.c.bf16 %v364_v60, %v364_v60 }
  0xae   : > { %v369_v1 = vpack.c.bf16 %v353_v61, %v353_v61  ;;  %v373_v2 = vpack.c.bf16 %v357_v62, %v357_v62 }
  0xaf   : > { %393 = vst.msk [vmem:[%s708_s5 + $0x28] sm:$0xf] %vm382_vm2, %v376_v63 }
  0xb0   : > { %397 = vst.msk [vmem:[%s708_s5 + $0x38] sm:$0xf] %vm382_vm2, %v380_v0  ;;  %v337_v3 = vpop.f32.mrf.mxu2  ;;  %v347_v4 = vpop.f32.mrf.mxu3 }
  0xb1   : > { %386 = vst.msk [vmem:[%s708_s5 + $0xc] sm:$0xf] %vm382_vm2, %v369_v1  ;;  %v338_v5 = vadd.f32 %v701_v10, %v337_v3  ;;  %v348_v6 = vadd.f32 %v701_v10, %v347_v4 }
  0xb2   : > { %390 = vst.msk [vmem:[%s708_s5 + $0x1c] sm:$0xf] %vm382_vm2, %v373_v2 }
  0xb3   : > { %v361_v7 = vmax.f32 %v338_v5, 0.0  ;;  %v365_v8 = vmax.f32 %v348_v6, 0.0 }
  0xb5   : > { %v377_v9 = vpack.c.bf16 %v361_v7, %v361_v7  ;;  %v381_v11 = vpack.c.bf16 %v365_v8, %v365_v8 }
  0xb7   : > { %394 = vst.msk [vmem:[%s708_s5 + $0x2c] sm:$0xf] %vm382_vm2, %v377_v9 }
  0xb8   : > { %398 = vst.msk [vmem:[%s708_s5 + $0x3c] sm:$0xf] %vm382_vm2, %v381_v11 }
  0xb9 PF: > { %s13_s16 = sadd.s32 1, %s632_s16   ;;  %s775_s12 = smov %s624_s14 }
  0xba   : > { %p10_p7 = scmp.ge.s32.totalorder %s13_s16, 6   ;;  %s776_s13 = smov %s628_s15 }
  0xbb   : > { %s777_s14 = smov %s780_s17  ;;  %s778_s15 = smov %s784_s18 }
  0xbc   :  { %12 = sbr.rel (!%p10_p7) target bundleno = 3 (0x3), region = 62 }

// kernel: _lambda_.10
= control target key start
LH: loop header
LB: loop body
LE: loop exit
PB: predicated region body
PF: predicated region fallthrough
CT: control target
= control target key end

     0   :  { %s404_s20 = smov 0   ;;  %s434_s0 = inlined_call_operand.vmem [shape: f32[2,1,8], index: 0, kind: input, shape index: {}]   ;;  %s435_s1 = inlined_call_operand.vmem [shape: f32[8,1], index: 1, kind: input, shape index: {}]   ;;  %s436_s2 = inlined_call_operand.<no memory space> [shape: f32[1,1], index: 2, kind: input, shape index: {}]   ;;  %s437_s3 = inlined_call_operand.vmem [shape: f32[1,8], index: 3, kind: input, shape index: {}]   ;;  %s438_s4 = inlined_call_operand.vmem [shape: f32[1,8], index: 4, kind: input, shape index: {}]   ;;  %s439_s5 = inlined_call_operand.vmem [shape: f32[2,1,8], index: 5, kind: output, shape index: {}]  }
   0x1   :  { %v10_v0 = vstv %s436_s2 }
   0x2   :  { %11 = vst [vmem:[#allocation2] sm:$0x1] %v10_v0 }
   0x3 LB: > { %s341_s21 = sadd.s32 4294967295, %s369_s20   ;;  %p345_p0 = scmp.ge.s32.totalorder %s369_s20, 1  ;;  %s369_s20 = sphi %s404_s20, %s17_s20  }
   0x4   : > { %p187_p1 = scmp.lt.s32.totalorder %s369_s20, 3 }
   0x6   : > { %p188_p2 = pnand %p345_p0, %p187_p1 }
   0x7   : > { %p211_p3 = scmp.lt.s32.totalorder (!%p188_p2), %s341_s21, 1 }
   0x8   : > { %191 = sbr.rel (%p188_p2) target bundleno = 307 (0x133), region = 40 }
   0xd   : > { %v219_v1 = vld [vmem:[%s435_s1] sm:$0xff]  ;;  %s441_s21 = smov (!%p211_p3, %s341_s21), 1  ;;  %vm221_vm0 = vcmask 64512   ;;  %vm252_vm1 = vcmask 1040384   ;;  %vm248_vm2 = vcmask 7168   ;;  %vm295_vm6 = vcmask 57344  }
   0xe   : > { %240 = vmatpush.msra.mxu0 %v219_v1  ;;  %s213_s25 = scalar_lea.vmem %s434_s0, %s441_s21  ;;  %v246_v4 = vld [vmem:[%s437_s3] sm:$0x1]  ;;  %s216_s7 = scalar_lea.vmem %s439_s5, %s441_s21 }
   0xf   : > { %v217_v2 = vld [vmem:[%s213_s25] sm:$0x1]  ;;  %347 = vmatpush.msk.msra.mxu1 %vm252_vm1, %v246_v4 }
  0x10   : > { %v218_v3 = vmul.f32 0.015625, %v217_v2  ;;  %v220_v5 = vld [vmem:[#allocation2] sm:$0x1] }
  0x11   : > { %v247_v9 = vld [vmem:[%s438_s4] sm:$0x1] }
  0x12   : > { %346 = vmatmul.msk.f32.vlgmr.msra.gmra.mxu0 %vm221_vm0, %v218_v3 }
  0x8f   : > { %v242_v6 = vpop.f32.mrf.mxu0 }
  0x90   : > { %v243_v7 = vadd.f32 %v242_v6, %v220_v5 }
  0x92   : > { %v245_v8 = vmax.f32 %v243_v7, 0.0 }
  0x94   : > { %348 = vmatmul.msk.f32.vlgmr.msra.gmra.mxu1 %vm248_vm2, %v245_v8 }
 0x111   : > { %v273_v10 = vpop.f32.mrf.mxu1 }
 0x112   : > { %v274_v11 = vadd.f32 %v273_v10, %v247_v9 }
 0x114   : > { %v276_v12 = vsub.f32 0.0, %v274_v11 }
 0x116   : > { %v277_v13 = vmul.f32 1.442695, %v276_v12 }
 0x118   : > { %359 = vpow2.f32 %v277_v13 }
 0x11e   : > { %v360_v14 = vpop.eup %359 }
 0x11f   : > { %v279_v15 = vadd.f32 1.0, %v360_v14 }
 0x121   : > { %361 = vrcp.f32 %v279_v15  ;;  %v291_v19 = vand.u32 2147483648, %v279_v15  ;;  %v289_v21 = vand.u32 2147483647, %v279_v15  ;;  %vm285_vm4 = vweird.f32 %v279_v15 }
 0x123   : > { %v292_v23 = vor.u32 1.1754944e-38, %v291_v19  ;;  %vm290_vm7 = vcmp.eq.f32.partialorder %v289_v21, 8.507059e+37 }
 0x127   : > { %v362_v16 = vpop.eup %361 }
 0x128   : > { %v281_v17 = vmul.f32 %v362_v16, %v279_v15  ;;  %vm286_vm3 = vweird.f32 %v362_v16 }
 0x129   : > { %vm287_vm5 = vmor %vm285_vm4, %vm286_vm3 }
 0x12a   : > { %v282_v18 = vsub.f32 1.0, %v281_v17 }
 0x12c   : > { %v283_v20 = vmul.f32 %v362_v16, %v282_v18 }
 0x12e   : > { %v284_v22 = vadd.f32 %v362_v16, %v283_v20 }
 0x130   : > { %v288_v24 = vsel %vm287_vm5, %v362_v16, %v284_v22 }
 0x131   : > { %v293_v25 = vsel %vm290_vm7, %v292_v23, %v288_v24 }
 0x132   : > { %296 = vst.msk [vmem:[%s216_s7] sm:$0x1] %vm295_vm6, %v293_v25 }
 0x133 PF: > { %s17_s20 = sadd.s32 1, %s369_s20  }
 0x134   : > { %p14_p4 = scmp.ge.s32.totalorder %s17_s20, 4  }
 0x136   :  { %16 = sbr.rel (!%p14_p4) target bundleno = 3 (0x3), region = 70 }

// kernel: _lambda_.11
= control target key start
LH: loop header
LB: loop body
LE: loop exit
PB: predicated region body
PF: predicated region fallthrough
CT: control target
= control target key end

     0   :  { %s773_s24 = smov 0   ;;  %s775_s25 = smov 0   ;;  %s853_s0 = inlined_call_operand.vmem [shape: bf16[2,64,8], index: 0, kind: input, shape index: {}]   ;;  %s854_s1 = inlined_call_operand.vmem [shape: f32[2,1,8], index: 1, kind: input, shape index: {}]   ;;  %s855_s2 = inlined_call_operand.vmem [shape: bf16[8,8], index: 2, kind: input, shape index: {}]   ;;  %s856_s3 = inlined_call_operand.vmem [shape: f32[1,8], index: 3, kind: input, shape index: {}]   ;;  %s857_s4 = inlined_call_operand.vmem [shape: bf16[2,64,4], index: 4, kind: input, shape index: {}]   ;;  %s858_s5 = inlined_call_operand.vmem [shape: bf16[4,8], index: 5, kind: input, shape index: {}]   ;;  %s859_s6 = inlined_call_operand.vmem [shape: f32[1,8], index: 6, kind: input, shape index: {}]   ;;  %s860_s7 = inlined_call_operand.vmem [shape: bf16[2,64,8], index: 7, kind: output, shape index: {}]  }
   0x1   :  { %s777_s26 = smov 0   ;;  %s779_s27 = smov 0  }
   0x2   :  { %s781_s28 = smov 0  }
   0x3 LB: > { %s26_s29 = sadd.s32 1, %s723_s26  ;;  %s29_s30 = sadd.s32 1, %s727_s27  ;;  %s731_s28 = sphi %s781_s28, %s17_s28   ;;  %s727_s27 = sphi %s779_s27, %s864_s27   ;;  %s723_s26 = sphi %s777_s26, %s863_s26   ;;  %s719_s25 = sphi %s775_s25, %s862_s25   ;;  %s715_s24 = sphi %s773_s24, %s861_s24  }
   0x4   : > { %p27_p0 = scmp.ge.s32.totalorder %s26_s29, 2  ;;  %p613_p1 = scmp.ge.s32.totalorder %s731_s28, 1 }
   0x5   : > { %p283_p2 = scmp.lt.s32.totalorder %s731_s28, 5 }
   0x6   : > { %s866_s29 = smov (%p27_p0, %s26_s29), 0  ;;  %s868_s30 = smov (!%p27_p0, %s29_s30), %s727_s27 }
   0x7   : > { %p284_p3 = pnand %p613_p1, %p283_p2  ;;  %p31_p4 = scmp.ge.s32.totalorder %s868_s30, 2 }
   0x8   : > { %s614_s10 = sshll.u32 (!%p284_p3), %s715_s24, 2  ;;  %p336_p5 = scmp.lt.s32.totalorder (!%p284_p3), %s719_s25, 1 }
   0x9   : > { %s870_s30 = smov (%p31_p4, %s868_s30), 0  ;;  %287 = sbr.rel (%p284_p3) target bundleno = 178 (0xb2), region = 48 }
   0xa   : > { %p338_p6 = scmp.lt.s32.totalorder (!%p284_p3), %s614_s10, 7 }
   0xe   : > { %v426_v0 = vld [vmem:[%s858_s5] sm:$0x3]  ;;  %vm444_vm0 = vcmask 1041408   ;;  %vm399_vm1 = vcmask 1043456   ;;  %s872_s25 = smov (!%p336_p5, %s719_s25), 1  ;;  %s874_s10 = smov (!%p338_p6, %s614_s10), 7 }
   0xf   : > { %v446_v1 = vsel %vm444_vm0, %v426_v0, 0  ;;  %v387_v2 = vld [vmem:[%s855_s2] sm:$0xf]  ;;  %s615_s13 = sshll.u32 %s872_s25, 3  ;;  %s347_s16 = scalar_lea.vmem %s854_s1, %s872_s25  ;;  %vm437_vm2 = vcmask 31744   ;;  %vm392_vm3 = vcmask 64512  }
  0x10   : > { %649 = vmatpush.bf16.msra.mxu3 %v446_v1  ;;  %v401_v3 = vsel %vm399_vm1, %v387_v2, 0  ;;  %455 = vmatpush.bf16.msra.mxu1 %v446_v1  ;;  %s341_s17 = sadd.s32 %s615_s13, %s874_s10  ;;  %v690_v4 = vld [vmem:[%s347_s16] ss:$0 sm:$0xff]  ;;  %vm487_vm4 = vcmask 60416  }
  0x11   : > { %410 = vmatpush.bf16.msra.mxu0 %v401_v3  ;;  %648 = vmatpush.bf16.msra.mxu2 %v401_v3  ;;  %s812_s18 = sshll.u32 %s341_s17, 2  ;;  %v691_v19 = vld [vmem:[%s856_s3] ss:$0 sm:$0xff] }
  0x12   : > { %s356_s21 = scalar_lea.vmem %s857_s4, %s812_s18  ;;  %s343_s24 = scalar_lea.vmem %s853_s0, %s812_s18  ;;  %v692_v23 = vld [vmem:[%s859_s6] ss:$0 sm:$0xff] }
  0x13   : > { %v638_v5 = vld [vmem:[%s356_s21 + $0x8] sm:$0xff]  ;;  %v640_v6 = vld [vmem:[%s343_s24] sm:$0xff]   ;;  %s366_s13 = scalar_lea.vmem %s860_s7, %s812_s18 }
  0x14   : > { %v647_v7 = vld [vmem:[%s343_s24 + $0x8] sm:$0xff]   ;;  %v641_v8 = vunpack.c.l.bf16 %v640_v6  ;;  %v642_v9 = vunpack.c.h.bf16 %v640_v6  ;;  %v637_v12 = vld [vmem:[%s356_s21] sm:$0xff]  ;;  %634 = vmatmul.msk.bf16.vlgmr.msra.gmra.mxu3 %vm437_vm2, %v638_v5 }
  0x15   : > { %v645_v10 = vunpack.c.l.bf16 %v647_v7  ;;  %v646_v11 = vunpack.c.h.bf16 %v647_v7  ;;  %633 = vmatmul.msk.bf16.vlgmr.msra.gmra.mxu1 %vm437_vm2, %v637_v12 }
  0x16   : > { %v381_v13 = vmul.f32 %v690_v4, %v641_v8  ;;  %v382_v14 = vmul.f32 %v690_v4, %v642_v9 }
  0x17   : > { %v383_v15 = vmul.f32 %v690_v4, %v645_v10  ;;  %v384_v16 = vmul.f32 %v690_v4, %v646_v11 }
  0x18   : > { %v385_v17 = vpack.c.bf16 %v382_v14, %v381_v13 }
  0x19   : > { %v386_v18 = vpack.c.bf16 %v384_v16, %v383_v15 }
  0x1a   : > { %623 = vmatmul.msk.bf16.vlgmr.msra.gmra.mxu0 %vm392_vm3, %v385_v17 }
  0x1b   : > { %624 = vmatmul.msk.bf16.vlgmr.msra.gmra.mxu2 %vm392_vm3, %v386_v18 }
  0x92   : > { %v457_v21 = vpop.f32.mrf.mxu1 }
  0x97   : > { %v412_v20 = vpop.f32.mrf.mxu0  ;;  %v462_v26 = vpop.f32.mrf.mxu3 }
  0x98   : > { %v413_v22 = vadd.f32 %v691_v19, %v412_v20 }
  0x9a   : > { %v467_v24 = vadd.f32 %v457_v21, %v413_v22  ;;  %v459_v34 = vpop.f32.mrf.mxu1 }
  0x9c   : > { %v475_v25 = vadd.f32 %v692_v23, %v467_v24 }
  0x9e   : > { %v417_v27 = vpop.f32.mrf.mxu2  ;;  %v479_v28 = vmax.f32 %v475_v25, 0.0 }
  0x9f   : > { %v418_v29 = vadd.f32 %v691_v19, %v417_v27  ;;  %v414_v30 = vpop.f32.mrf.mxu0  ;;  %v464_v43 = vpop.f32.mrf.mxu3 }
  0xa0   : > { %v483_v31 = vpack.c.bf16 %v479_v28, %v479_v28  ;;  %v415_v33 = vadd.f32 %v691_v19, %v414_v30 }
  0xa1   : > { %v469_v32 = vadd.f32 %v462_v26, %v418_v29 }
  0xa2   : > { %488 = vst.msk [vmem:[%s366_s13] sm:$0xf] %vm487_vm4, %v483_v31  ;;  %v468_v36 = vadd.f32 %v459_v34, %v415_v33 }
  0xa3   : > { %v477_v35 = vadd.f32 %v692_v23, %v469_v32 }
  0xa4   : > { %v476_v38 = vadd.f32 %v692_v23, %v468_v36 }
  0xa5   : > { %v481_v37 = vmax.f32 %v477_v35, 0.0 }
  0xa6   : > { %v419_v39 = vpop.f32.mrf.mxu2  ;;  %v480_v41 = vmax.f32 %v476_v38, 0.0 }
  0xa7   : > { %v485_v40 = vpack.c.bf16 %v481_v37, %v481_v37  ;;  %v420_v42 = vadd.f32 %v691_v19, %v419_v39 }
  0xa8   : > { %v484_v44 = vpack.c.bf16 %v480_v41, %v480_v41 }
  0xa9   : > { %490 = vst.msk [vmem:[%s366_s13 + $0x8] sm:$0xf] %vm487_vm4, %v485_v40  ;;  %v470_v45 = vadd.f32 %v464_v43, %v420_v42 }
  0xaa   : > { %489 = vst.msk [vmem:[%s366_s13 + $0x4] sm:$0xf] %vm487_vm4, %v484_v44 }
  0xab   : > { %v478_v46 = vadd.f32 %v692_v23, %v470_v45 }
  0xad   : > { %v482_v47 = vmax.f32 %v478_v46, 0.0 }
  0xaf   : > { %v486_v48 = vpack.c.bf16 %v482_v47, %v482_v47 }
  0xb1   : > { %491 = vst.msk [vmem:[%s366_s13 + $0xc] sm:$0xf] %vm487_vm4, %v486_v48 }
  0xb2 PF: > { %s17_s28 = sadd.s32 1, %s731_s28   ;;  %s861_s24 = smov %s723_s26 }
  0xb3   : > { %p14_p7 = scmp.ge.s32.totalorder %s17_s28, 6   ;;  %s862_s25 = smov %s727_s27 }
  0xb4   : > { %s863_s26 = smov %s866_s29  ;;  %s864_s27 = smov %s870_s30 }
  0xb5   :  { %16 = sbr.rel (!%p14_p7) target bundleno = 3 (0x3), region = 84 }

// kernel: _lambda_.12
= control target key start
LH: loop header
LB: loop body
LE: loop exit
PB: predicated region body
PF: predicated region fallthrough
CT: control target
= control target key end

     0   :  { %s490_s12 = smov 0   ;;  %s492_s13 = smov 0   ;;  %s547_s0 = inlined_call_operand.vmem [shape: bf16[2,64,8], index: 0, kind: input, shape index: {}]   ;;  %s548_s1 = inlined_call_operand.vmem [shape: bf16[8,8], index: 1, kind: input, shape index: {}]   ;;  %s549_s2 = inlined_call_operand.vmem [shape: f32[1,8], index: 2, kind: input, shape index: {}]   ;;  %s550_s3 = inlined_call_operand.vmem [shape: bf16[2,64,8], index: 3, kind: output, shape index: {}]  }
   0x1   :  { %s494_s14 = smov 0   ;;  %s496_s15 = smov 0  }
   0x2   :  { %s498_s16 = smov 0  }
   0x3 LB: > { %s22_s17 = sadd.s32 1, %s460_s14  ;;  %s25_s18 = sadd.s32 1, %s464_s15  ;;  %s468_s16 = sphi %s498_s16, %s13_s16   ;;  %s464_s15 = sphi %s496_s15, %s554_s15   ;;  %s460_s14 = sphi %s494_s14, %s553_s14   ;;  %s456_s13 = sphi %s492_s13, %s552_s13   ;;  %s452_s12 = sphi %s490_s12, %s551_s12  }
   0x4   : > { %p23_p0 = scmp.ge.s32.totalorder %s22_s17, 2  ;;  %p367_p1 = scmp.ge.s32.totalorder %s468_s16, 1 }
   0x5   : > { %p158_p2 = scmp.lt.s32.totalorder %s468_s16, 5 }
   0x6   : > { %s556_s17 = smov (%p23_p0, %s22_s17), 0  ;;  %s558_s18 = smov (!%p23_p0, %s25_s18), %s464_s15 }
   0x7   : > { %p159_p3 = pnand %p367_p1, %p158_p2  ;;  %p27_p4 = scmp.ge.s32.totalorder %s558_s18, 2 }
   0x8   : > { %s368_s21 = sshll.u32 (!%p159_p3), %s452_s12, 2  ;;  %p191_p5 = scmp.lt.s32.totalorder (!%p159_p3), %s456_s13, 1 }
   0x9   : > { %s560_s18 = smov (%p27_p4, %s558_s18), 0  ;;  %162 = sbr.rel (%p159_p3) target bundleno = 162 (0xa2), region = 32 }
   0xa   : > { %p193_p6 = scmp.lt.s32.totalorder (!%p159_p3), %s368_s21, 7 }
   0xe   : > { %v215_v0 = vld [vmem:[%s548_s1] sm:$0xf]  ;;  %vm237_vm0 = vcmask 1043456   ;;  %s562_s13 = smov (!%p191_p5, %s456_s13), 1  ;;  %s564_s21 = smov (!%p193_p6, %s368_s21), 7  ;;  %vm230_vm1 = vcmask 64512  }
   0xf   : > { %v239_v1 = vsel %vm237_vm0, %v215_v0, 0  ;;  %s369_s22 = sshll.u32 %s562_s13, 3  ;;  %v429_v4 = vld [vmem:[%s549_s2] ss:$0 sm:$0xff]  ;;  %vm268_vm2 = vcmask 60416  }
  0x10   : > { %248 = vmatpush.bf16.msra.mxu0 %v239_v1  ;;  %388 = vmatpush.bf16.msra.mxu1 %v239_v1  ;;  %s196_s23 = sadd.s32 %s369_s22, %s564_s21 }
  0x11   : > { %s370_s24 = sshll.u32 %s196_s23, 2 }
  0x12   : > { %s198_s27 = scalar_lea.vmem %s547_s0, %s370_s24  ;;  %s208_s5 = scalar_lea.vmem %s550_s3, %s370_s24 }
  0x13   : > { %v386_v2 = vld [vmem:[%s198_s27] sm:$0xff]  ;;  %v387_v3 = vld [vmem:[%s198_s27 + $0x8] sm:$0xff] }
  0x14   : > { %382 = vmatmul.msk.bf16.vlgmr.msra.gmra.mxu0 %vm230_vm1, %v386_v2  ;;  %383 = vmatmul.msk.bf16.vlgmr.msra.gmra.mxu1 %vm230_vm1, %v387_v3 }
  0x91   : > { %v250_v5 = vpop.f32.mrf.mxu0  ;;  %v255_v6 = vpop.f32.mrf.mxu1 }
  0x92   : > { %v251_v7 = vadd.f32 %v429_v4, %v250_v5  ;;  %v256_v8 = vadd.f32 %v429_v4, %v255_v6 }
  0x94   : > { %v260_v9 = vmax.f32 %v251_v7, 0.0  ;;  %v262_v10 = vmax.f32 %v256_v8, 0.0 }
  0x96   : > { %v264_v11 = vpack.c.bf16 %v260_v9, %v260_v9  ;;  %v266_v12 = vpack.c.bf16 %v262_v10, %v262_v10 }
  0x98   : > { %269 = vst.msk [vmem:[%s208_s5] sm:$0xf] %vm268_vm2, %v264_v11 }
  0x99   : > { %271 = vst.msk [vmem:[%s208_s5 + $0x8] sm:$0xf] %vm268_vm2, %v266_v12  ;;  %v252_v13 = vpop.f32.mrf.mxu0  ;;  %v257_v14 = vpop.f32.mrf.mxu1 }
  0x9a   : > { %v253_v15 = vadd.f32 %v429_v4, %v252_v13  ;;  %v258_v16 = vadd.f32 %v429_v4, %v257_v14 }
  0x9c   : > { %v261_v17 = vmax.f32 %v253_v15, 0.0  ;;  %v263_v18 = vmax.f32 %v258_v16, 0.0 }
  0x9e   : > { %v265_v19 = vpack.c.bf16 %v261_v17, %v261_v17  ;;  %v267_v20 = vpack.c.bf16 %v263_v18, %v263_v18 }
  0xa0   : > { %270 = vst.msk [vmem:[%s208_s5 + $0x4] sm:$0xf] %vm268_vm2, %v265_v19 }
  0xa1   : > { %272 = vst.msk [vmem:[%s208_s5 + $0xc] sm:$0xf] %vm268_vm2, %v267_v20 }
  0xa2 PF: > { %s13_s16 = sadd.s32 1, %s468_s16   ;;  %s551_s12 = smov %s460_s14 }
  0xa3   : > { %p10_p7 = scmp.ge.s32.totalorder %s13_s16, 6   ;;  %s552_s13 = smov %s464_s15 }
  0xa4   : > { %s553_s14 = smov %s556_s17  ;;  %s554_s15 = smov %s560_s18 }
  0xa5   :  { %12 = sbr.rel (!%p10_p7) target bundleno = 3 (0x3), region = 62 }

// kernel: _lambda_.14
= control target key start
LH: loop header
LB: loop body
LE: loop exit
PB: predicated region body
PF: predicated region fallthrough
CT: control target
= control target key end

     0   :  { %s399_s18 = smov 0   ;;  %s432_s0 = inlined_call_operand.vmem [shape: f32[2,1,8], index: 0, kind: input, shape index: {}]   ;;  %s433_s1 = inlined_call_operand.vmem [shape: f32[8,2], index: 1, kind: input, shape index: {}]   ;;  %s434_s2 = inlined_call_operand.vmem [shape: f32[1,2], index: 2, kind: input, shape index: {}]   ;;  %s435_s3 = inlined_call_operand.vmem [shape: f32[2,8], index: 3, kind: input, shape index: {}]   ;;  %s436_s4 = inlined_call_operand.vmem [shape: f32[1,8], index: 4, kind: input, shape index: {}]   ;;  %s437_s5 = inlined_call_operand.vmem [shape: f32[2,1,8], index: 5, kind: output, shape index: {}]  }
   0x1 LB: > { %s339_s19 = sadd.s32 4294967295, %s367_s18   ;;  %p343_p0 = scmp.ge.s32.totalorder %s367_s18, 1  ;;  %s367_s18 = sphi %s399_s18, %s15_s18  }
   0x2   : > { %p185_p1 = scmp.lt.s32.totalorder %s367_s18, 3 }
   0x4   : > { %p186_p2 = pnand %p343_p0, %p185_p1 }
   0x5   : > { %p209_p3 = scmp.lt.s32.totalorder (!%p186_p2), %s339_s19, 1 }
   0x6   : > { %189 = sbr.rel (%p186_p2) target bundleno = 305 (0x131), region = 40 }
   0xb   : > { %v217_v0 = vld [vmem:[%s433_s1] sm:$0xff]  ;;  %s439_s19 = smov (!%p209_p3, %s339_s19), 1  ;;  %vm219_vm0 = vcmask 64512   ;;  %vm250_vm1 = vcmask 1041408   ;;  %vm246_vm2 = vcmask 15360   ;;  %vm293_vm6 = vcmask 57344  }
   0xc   : > { %238 = vmatpush.msra.mxu0 %v217_v0  ;;  %s211_s24 = scalar_lea.vmem %s432_s0, %s439_s19  ;;  %v244_v3 = vld [vmem:[%s435_s3] sm:$0x3]  ;;  %s214_s8 = scalar_lea.vmem %s437_s5, %s439_s19 }
   0xd   : > { %v215_v1 = vld [vmem:[%s211_s24] sm:$0x1]  ;;  %345 = vmatpush.msk.msra.mxu1 %vm250_vm1, %v244_v3 }
   0xe   : > { %v216_v2 = vmul.f32 0.015625, %v215_v1  ;;  %v218_v4 = vld [vmem:[%s434_s2] sm:$0x1] }
   0xf   : > { %v245_v8 = vld [vmem:[%s436_s4] sm:$0x1] }
  0x10   : > { %344 = vmatmul.msk.f32.vlgmr.msra.gmra.mxu0 %vm219_vm0, %v216_v2 }
  0x8d   : > { %v240_v5 = vpop.f32.mrf.mxu0 }
  0x8e   : > { %v241_v6 = vadd.f32 %v240_v5, %v218_v4 }
  0x90   : > { %v243_v7 = vmax.f32 %v241_v6, 0.0 }
  0x92   : > { %346 = vmatmul.msk.f32.vlgmr.msra.gmra.mxu1 %vm246_vm2, %v243_v7 }
 0x10f   : > { %v271_v9 = vpop.f32.mrf.mxu1 }
 0x110   : > { %v272_v10 = vadd.f32 %v271_v9, %v245_v8 }
 0x112   : > { %v274_v11 = vsub.f32 0.0, %v272_v10 }
 0x114   : > { %v275_v12 = vmul.f32 1.442695, %v274_v11 }
 0x116   : > { %357 = vpow2.f32 %v275_v12 }
 0x11c   : > { %v358_v13 = vpop.eup %357 }
 0x11d   : > { %v277_v14 = vadd.f32 1.0, %v358_v13 }
 0x11f   : > { %359 = vrcp.f32 %v277_v14  ;;  %v289_v18 = vand.u32 2147483648, %v277_v14  ;;  %v287_v20 = vand.u32 2147483647, %v277_v14  ;;  %vm283_vm4 = vweird.f32 %v277_v14 }
 0x121   : > { %v290_v22 = vor.u32 1.1754944e-38, %v289_v18  ;;  %vm288_vm7 = vcmp.eq.f32.partialorder %v287_v20, 8.507059e+37 }
 0x125   : > { %v360_v15 = vpop.eup %359 }
 0x126   : > { %v279_v16 = vmul.f32 %v360_v15, %v277_v14  ;;  %vm284_vm3 = vweird.f32 %v360_v15 }
 0x127   : > { %vm285_vm5 = vmor %vm283_vm4, %vm284_vm3 }
 0x128   : > { %v280_v17 = vsub.f32 1.0, %v279_v16 }
 0x12a   : > { %v281_v19 = vmul.f32 %v360_v15, %v280_v17 }
 0x12c   : > { %v282_v21 = vadd.f32 %v360_v15, %v281_v19 }
 0x12e   : > { %v286_v23 = vsel %vm285_vm5, %v360_v15, %v282_v21 }
 0x12f   : > { %v291_v24 = vsel %vm288_vm7, %v290_v22, %v286_v23 }
 0x130   : > { %294 = vst.msk [vmem:[%s214_s8] sm:$0x1] %vm293_vm6, %v291_v24 }
 0x131 PF: > { %s15_s18 = sadd.s32 1, %s367_s18  }
 0x132   : > { %p12_p4 = scmp.ge.s32.totalorder %s15_s18, 4  }
 0x134   :  { %14 = sbr.rel (!%p12_p4) target bundleno = 1 (0x1), region = 70 }

// kernel: _lambda_.15
= control target key start
LH: loop header
LB: loop body
LE: loop exit
PB: predicated region body
PF: predicated region fallthrough
CT: control target
= control target key end

     0   :  { %10 = vsyncpa [#allocation3], 0  ;;  %s897_s0 = inlined_call_operand.vmem [shape: bf16[2,64,8], index: 0, kind: input, shape index: {}]   ;;  %s898_s1 = inlined_call_operand.vmem [shape: f32[2,1,8], index: 1, kind: input, shape index: {}]   ;;  %s899_s2 = inlined_call_operand.vmem [shape: bf16[8,8], index: 2, kind: input, shape index: {}]   ;;  %s900_s3 = inlined_call_operand.vmem [shape: f32[1,8], index: 3, kind: input, shape index: {}]   ;;  %s901_s4 = inlined_call_operand.vmem [shape: bf16[2,64,8], index: 4, kind: input, shape index: {}]   ;;  %s902_s5 = inlined_call_operand.hbm [shape: bf16[2,64,8], index: 5, kind: output, shape index: {}]  }
   0x1   :  { %12 = vsyncpa [#allocation3 + $0x1], 0  ;;  %s752_s18 = smov 0   ;;  %s754_s19 = smov 0  }
   0x2   :  { %s756_s20 = smov 0   ;;  %s758_s21 = smov 0  }
   0x3   :  { %s760_s22 = smov 0   ;;  %s762_s23 = smov 0  }
   0x4   :  { %s764_s24 = smov 0   ;;  %s766_s25 = smov 0  }
   0x5 LB: > { %s510_s26 = sadd.s32 4294967295, %s718_s25   ;;  %s511_s27 = sadd.s32 4294967294, %s718_s25   ;;  %s718_s25 = sphi %s766_s25, %s18_s25   ;;  %s714_s24 = sphi %s764_s24, %s911_s24   ;;  %s710_s23 = sphi %s762_s23, %s910_s23   ;;  %s706_s22 = sphi %s760_s22, %s909_s22   ;;  %s702_s21 = sphi %s758_s21, %s908_s21   ;;  %s698_s20 = sphi %s756_s20, %s907_s20   ;;  %s694_s19 = sphi %s754_s19, %s906_s19   ;;  %s690_s18 = sphi %s752_s18, %s905_s18  }
   0x6   : > { %s27_s28 = sadd.s32 1, %s710_s23  ;;  %s30_s29 = sadd.s32 1, %s714_s24 }
   0x7   : > { %p28_p0 = scmp.ge.s32.totalorder %s27_s28, 2  ;;  %p173_p1 = scmp.ne.s32.totalorder %s698_s20, %s694_s19 }
   0x8   : > { %p174_p2 = scmp.eq.s32.totalorder %s510_s26, 3  ;;  %p179_p5 = scmp.ne.s32.totalorder %s694_s19, %s690_s18 }
   0x9   : > { %s913_s28 = smov (%p28_p0, %s27_s28), 0  ;;  %s915_s29 = smov (!%p28_p0, %s30_s29), %s714_s24 }
   0xa   : > { %s159_s30 = ssub.s32 %s710_s23, %s913_s28  ;;  %p803_p3 = por %p174_p2, %p173_p1 }
   0xb   : > { %p32_p4 = scmp.ge.s32.totalorder %s915_s29, 2  ;;  %p180_p6 = scmp.eq.s32.totalorder %s511_s27, 3 }
   0xc   : > { %p514_p7 = scmp.ge.s32.totalorder %s718_s25, 1  ;;  %p236_p9 = scmp.lt.s32.totalorder %s718_s25, 5 }
   0xd   : > { %s917_s29 = smov (%p32_p4, %s915_s29), 0  ;;  %p812_p8 = por %p180_p6, %p179_p5 }
   0xe   : > { %s158_s8 = ssub.s32 %s714_s24, %s917_s29  ;;  %s163_s9 = sadd.s32 1, %s698_s20 }
   0xf   : > { %s160_s10 = sor.u32 %s159_s30, %s158_s8  ;;  %p237_p10 = pnand %p514_p7, %p236_p9 }
  0x10   : > { %p161_p11 = scmp.eq.s32.totalorder %s160_s10, 0  ;;  %s827_s14 = sshll.u32 (!%p237_p10), %s702_s21, 2 }
  0x11   : > { %240 = sbr.rel (%p237_p10) target bundleno = 182 (0xb6), region = 40  ;;  %p281_p12 = scmp.lt.s32.totalorder (!%p237_p10), %s706_s22, 1 }
  0x12   : > { %s821_s11 = scalar_select %p161_p11, %s698_s20, %s163_s9  }
  0x13   : > { %p283_p13 = scmp.lt.s32.totalorder (!%p237_p10), %s827_s14, 7  ;;  %s526_s27 = sshll.u32 (!%p237_p10), %s706_s22, 3 }
  0x16   : > { %v323_v0 = vld [vmem:[%s899_s2] sm:$0xf]  ;;  %vm335_vm0 = vcmask 1043456   ;;  %s282_s15 = scalar_select %p281_p12, %s706_s22, 1  ;;  %vm328_vm1 = vcmask 64512   ;;  %vm378_vm2 = vcmask 60416  }
  0x17   : > { %v337_v1 = vsel %vm335_vm0, %v323_v0, 0  ;;  %s284_s16 = scalar_select %p283_p13, %s827_s14, 7  ;;  %v623_v17 = vld [vmem:[%s900_s3] ss:$0 sm:$0xff] }
  0x18   : > { %346 = vmatpush.bf16.msra.mxu0 %v337_v1  ;;  %548 = vmatpush.bf16.msra.mxu1 %v337_v1  ;;  %s517_s17 = sshll.u32 %s282_s15, 3  ;;  %s292_s30 = scalar_lea.vmem %s898_s1, %s282_s15 }
  0x19   : > { %s286_s8 = sadd.s32 %s517_s17, %s284_s16  ;;  %v622_v2 = vld [vmem:[%s292_s30] ss:$0 sm:$0xff]  ;;  %s277_s30 = sand.u32 1, %s694_s19  }
  0x1a   : > { %s518_s9 = sshll.u32 %s286_s8, 2  ;;  %s395_s8 = sadd.s32 %s526_s27, %s827_s14 }
  0x1b   : > { %s288_s21 = scalar_lea.vmem %s897_s0, %s518_s9  ;;  %s301_s16 = scalar_lea.vmem %s901_s4, %s518_s9 }
  0x1c   : > { %v531_v3 = vld [vmem:[%s288_s21] sm:$0xff]   ;;  %v546_v4 = vld [vmem:[%s288_s21 + $0x8] sm:$0xff]   ;;  %s515_s10 = sshll.u32 %s277_s30, 4  ;;  %s527_s9 = sshll.u32 %s395_s8, 2 }
  0x1d   : > { %v532_v5 = vunpack.c.l.bf16 %v531_v3  ;;  %v533_v6 = vunpack.c.h.bf16 %v531_v3  ;;  %v536_v7 = vunpack.c.l.bf16 %v546_v4  ;;  %v537_v8 = vunpack.c.h.bf16 %v546_v4  ;;  %v539_v15 = vld [vmem:[%s301_s16] sm:$0xff]   ;;  %v547_v16 = vld [vmem:[%s301_s16 + $0x8] sm:$0xff]   ;;  %s397_s21 = scalar_lea.hbm %s902_s5, %s527_s9  ;;  %s279_s13 = scalar_lea.vmem [#allocation2], %s515_s10 }
  0x1e   : > { %v540_v18 = vunpack.c.l.bf16 %v539_v15  ;;  %v544_v19 = vunpack.c.l.bf16 %v547_v16  ;;  %v541_v30 = vunpack.c.h.bf16 %v539_v15  ;;  %v545_v31 = vunpack.c.h.bf16 %v547_v16  ;;  %s400_s14 = sshll.u32 %s397_s21, 4  ;;  %s398_s15 = sshll.u32 %s279_s13, 4  ;;  %s401_s14 = int_to_ptr.hbm [resolvable:$true] %s400_s14  ;;  %s399_s15 = int_to_ptr.vmem [resolvable:$true] %s398_s15 }
  0x1f   : > { %v317_v9 = vmul.f32 %v622_v2, %v532_v5  ;;  %v318_v10 = vmul.f32 %v622_v2, %v533_v6  ;;  %v319_v11 = vmul.f32 %v622_v2, %v536_v7  ;;  %v320_v12 = vmul.f32 %v622_v2, %v537_v8  ;;  %s384_s16 = scalar_lea.sflag [#allocation3], %s277_s30  ;;  %s638_s17 = sshra.s32 %s401_s14, 4  ;;  %s639_s17 = int_to_ptr.hbm [resolvable:$true] %s638_s17 }
  0x20   : > { %s640_s26 = scalar_lea.hbm %s639_s17, 16  ;;  %s644_s10 = scalar_lea.hbm %s902_s5, 64 }
  0x21   : > { %v321_v13 = vpack.c.bf16 %v318_v10, %v317_v9  ;;  %v322_v14 = vpack.c.bf16 %v320_v12, %v319_v11  ;;  %p641_p0 = scmp.ne.s32.totalorder %s639_s17, %s640_s26  ;;  %p645_p4 = scmp.lt.s32.totalorder %s639_s17, %s902_s5 }
  0x22   : > { %p646_p5 = scmp.lt.s32.totalorder %s644_s10, %s640_s26 }
  0x23   : > { %522 = vmatmul.msk.bf16.vlgmr.msra.gmra.mxu0 %vm328_vm1, %v321_v13  ;;  %523 = vmatmul.msk.bf16.vlgmr.msra.gmra.mxu1 %vm328_vm1, %v322_v14  ;;  %p642_p1 = pnand %p641_p0, %p803_p3 }
  0x24   : > { %p647_p6 = por %p646_p5, %p645_p4 }
  0x25   : > { %p643_p2 = pneg %p642_p1 }
  0x27   : > { %p648_p7 = pnand %p647_p6, %p643_p2 }
  0xa0   : > { %v348_v20 = vpop.f32.mrf.mxu0  ;;  %v353_v21 = vpop.f32.mrf.mxu1 }
  0xa1   : > { %v349_v22 = vadd.f32 %v623_v17, %v348_v20  ;;  %v354_v23 = vadd.f32 %v623_v17, %v353_v21 }
  0xa3   : > { %v366_v24 = vadd.f32 %v540_v18, %v349_v22  ;;  %v368_v25 = vadd.f32 %v544_v19, %v354_v23 }
  0xa5   : > { %v370_v26 = vmax.f32 %v366_v24, 0.0  ;;  %v372_v27 = vmax.f32 %v368_v25, 0.0 }
  0xa7   : > { %v374_v28 = vpack.c.bf16 %v370_v26, %v370_v26  ;;  %v376_v29 = vpack.c.bf16 %v372_v27, %v372_v27 }
  0xa8   : > { %v350_v32 = vpop.f32.mrf.mxu0  ;;  %v355_v33 = vpop.f32.mrf.mxu1 }
  0xa9   : > { %379 = vst.msk [vmem:[%s279_s13] sm:$0xf] %vm378_vm2, %v374_v28  ;;  %v351_v34 = vadd.f32 %v623_v17, %v350_v32  ;;  %v356_v35 = vadd.f32 %v623_v17, %v355_v33 }
  0xaa   : > { %381 = vst.msk [vmem:[%s279_s13 + $0x8] sm:$0xf] %vm378_vm2, %v376_v29 }
  0xab   : > { %v367_v36 = vadd.f32 %v541_v30, %v351_v34  ;;  %v369_v37 = vadd.f32 %v545_v31, %v356_v35 }
  0xad   : > { %v371_v38 = vmax.f32 %v367_v36, 0.0  ;;  %v373_v39 = vmax.f32 %v369_v37, 0.0 }
  0xaf   : > { %v375_v40 = vpack.c.bf16 %v371_v38, %v371_v38  ;;  %v377_v41 = vpack.c.bf16 %v373_v39, %v373_v39 }
  0xb1   : > { %380 = vst.msk [vmem:[%s279_s13 + $0x4] sm:$0xf] %vm378_vm2, %v375_v40 }
  0xb2   : > { %382 = vst.msk [vmem:[%s279_s13 + $0xc] sm:$0xf] %vm378_vm2, %v377_v41 }
  0xb3   : > { %651 = shalt.err (!%p648_p7)
}
  0xb4   : > { %s720_s30 = smov 64   ;;  %s721_s12 = smov 4  }
  0xb5   : > { %549 = dma.vmem_to_hbm [thread:$0]  (%p803_p3), %s399_s15, 256, %s401_s14, %s384_s16, %s720_s30, %s720_s30, %s721_s12  }
  0xb6 PF: > { %p555_p9 = scmp.ge.s32.totalorder %s718_s25, 2  ;;  %s415_s21 = sand.u32 1, %s690_s18  }
  0xb7   : > { %s416_s13 = scalar_lea.sflag [#allocation3], %s415_s21 }
  0xb8   : > { %p552_p10 = pnand %p555_p9, %p812_p8 }
  0xba   : > { %p553_p11 = pneg %p552_p10 }
  0xbc   : > { %685 = dma.done.wait (%p553_p11), %s416_s13, 256  }
  0xbd   : > { %687 = vsyncadd (%p553_p11), %s416_s13, 4294967040  ;;  %s18_s25 = sadd.s32 1, %s718_s25   ;;  %s905_s18 = smov %s694_s19 }
  0xbe   : > { %p15_p12 = scmp.ge.s32.totalorder %s18_s25, 6   ;;  %s906_s19 = smov %s698_s20 }
  0xbf   : > { %s907_s20 = smov %s821_s11  ;;  %s908_s21 = smov %s710_s23 }
  0xc0   : > { %s909_s22 = smov %s714_s24  ;;  %s910_s23 = smov %s913_s28 }
  0xc1   : > { %s911_s24 = smov %s917_s29  ;;  %17 = sbr.rel (!%p15_p12) target bundleno = 5 (0x5), region = 81 }
  0xc6   :  { %422 = vsyncpa [#allocation3], 1 }
  0xc7   :  { %424 = vsyncpa [#allocation3 + $0x1], 1 }

// kernel: _lambda_.9
= control target key start
LH: loop header
LB: loop body
LE: loop exit
PB: predicated region body
PF: predicated region fallthrough
CT: control target
= control target key end

     0   :  { %s2504_s15 = smov 0   ;;  %s2506_s16 = smov 0   ;;  %s3165_s0 = inlined_call_operand.vmem [shape: bf16[2,4,9,9,8], index: 0, kind: input, shape index: {}]   ;;  %s3166_s1 = inlined_call_operand.vmem [shape: bf16[9,4,2,2], index: 1, kind: input, shape index: {}]   ;;  %s3167_s2 = inlined_call_operand.vmem [shape: f32[1,8], index: 2, kind: input, shape index: {}]   ;;  %s3168_s3 = inlined_call_operand.vmem [shape: bf16[2,64,8], index: 3, kind: output, shape index: {0}]   ;;  %s3169_s4 = inlined_call_operand.vmem [shape: f32[2,1,8], index: 4, kind: output, shape index: {1}]  }
   0x1   :  { %s2508_s17 = smov 0   ;;  %s2510_s18 = smov 0  }
   0x2   :  { %s2512_s19 = smov 0  }
   0x3 LB: > { %s24_s20 = sadd.s32 1, %s2462_s17  ;;  %s27_s21 = sadd.s32 1, %s2466_s18  ;;  %s2470_s19 = sphi %s2512_s19, %s15_s19   ;;  %s2466_s18 = sphi %s2510_s18, %s3173_s18   ;;  %s2462_s17 = sphi %s2508_s17, %s3172_s17   ;;  %s2458_s16 = sphi %s2506_s16, %s3171_s16   ;;  %s2454_s15 = sphi %s2504_s15, %s3170_s15  }
   0x4   : > { %p25_p0 = scmp.ge.s32.totalorder %s24_s20, 2  ;;  %p2207_p1 = scmp.ge.s32.totalorder %s2470_s19, 1 }
   0x5   : > { %p179_p2 = scmp.lt.s32.totalorder %s2470_s19, 5 }
   0x6   : > { %s3175_s20 = smov (%p25_p0, %s24_s20), 0  ;;  %s3177_s21 = smov (!%p25_p0, %s27_s21), %s2466_s18 }
   0x7   : > { %p180_p3 = pnand %p2207_p1, %p179_p2  ;;  %p29_p4 = scmp.ge.s32.totalorder %s3177_s21, 2 }
   0x8   : > { %p212_p5 = scmp.lt.s32.totalorder (!%p180_p3), %s2458_s16, 1  ;;  %s2209_s22 = sshll.u32 (!%p180_p3), %s2454_s15, 2 }
   0x9   : > { %s3179_s21 = smov (%p29_p4, %s3177_s21), 0  ;;  %183 = sbr.rel (%p180_p3) target bundleno = 848 (0x350), region = 32 }
   0xa   : > { %p220_p6 = scmp.lt.s32.totalorder (!%p180_p3), %s2209_s22, 7  ;;  %s2373_s23 = sshll.u32 (!%p180_p3), %s2454_s15, 5 }
   0xb   : > { %s2472_s12 = smov (!%p180_p3), 126   ;;  %s2473_s13 = smov (!%p180_p3), 122  }
   0xc   : > { %p2369_p7 = scmp.ne.s32.totalorder (!%p180_p3), %s2454_s15, 0 }
   0xe   : > { %s3181_s16 = smov (!%p212_p5, %s2458_s16), 1  ;;  %s3183_s22 = smov (!%p220_p6, %s2209_s22), 7  ;;  %v2224_v42 = vld [vmem:[%s3166_s1 + $0x4] sm:$0x1]  ;;  %vm288_vm0 = vcmask 1040384   ;;  %vm571_vm1 = vcmask 1046528  }
   0xf   : > { %s2380_s24 = smul.u32 288, %s3181_s16  ;;  %s2210_s25 = sshll.u32 %s3181_s16, 3  ;;  %v247_v43 = vld [vmem:[%s3166_s1] sm:$0x1]  ;;  %v290_v46 = vsel %vm288_vm0, %v2224_v42, 0  ;;  %vm281_vm2 = vcmask 15360  }
  0x10   : > { %s223_s26 = sadd.s32 %s2210_s25, %s3183_s22  ;;  %s2541_s29 = scalar_lea.vmem %s3169_s4, %s3181_s16  ;;  %v328_v47 = vsel %vm288_vm0, %v247_v43, 0  ;;  %299 = vmatpush.bf16.msra.mxu0 %v290_v46  ;;  %v2229_v59 = vld [vmem:[%s3166_s1 + $0x5] sm:$0x1]  ;;  %v2239_v42 = vld [vmem:[%s3166_s1 + $0x7] sm:$0x1] }
  0x11   : > { %s216_s6 = scalar_lea.vmem %s3165_s0, %s2380_s24  ;;  %s2211_s7 = sshll.u32 %s223_s26, 2  ;;  %337 = vmatpush.bf16.msra.mxu1 %v328_v47  ;;  %v362_v63 = vsel %vm288_vm0, %v2229_v59, 0  ;;  %v2217_v43 = vld [vmem:[%s3166_s1 + $0x3] sm:$0x1] }
  0x12   : > { %s2549_s10 = scalar_lea.vmem %s3168_s3, %s2211_s7  ;;  %s2551_s11 = scalar_lea.vmem %s216_s6, %s2373_s23  ;;  %371 = vmatpush.bf16.msra.mxu2 %v362_v63  ;;  %v526_v46 = vsel %vm288_vm0, %v2217_v43, 0 }
  0x13   : > { %v2222_v0 = vld [vmem:[%s2551_s11 + $0x58] sm:$0xf]  ;;  %v2223_v1 = vld [vmem:[%s2551_s11 + $0x60] sm:$0xf]  ;;  %v2220_v4 = vld [vmem:[%s2551_s11 + $0x48] sm:$0xf] }
  0x14   : > { %v263_v2 = vunpack.c.l.bf16 %v2222_v0  ;;  %v264_v3 = vunpack.c.l.bf16 %v2223_v1  ;;  %v2221_v5 = vld [vmem:[%s2551_s11 + $0x50] sm:$0xf]  ;;  %v261_v7 = vunpack.c.l.bf16 %v2220_v4  ;;  %v238_v9 = vld [vmem:[%s2551_s11 + $0x18] sm:$0xf]  ;;  %v235_v11 = vld [vmem:[%s2551_s11] sm:$0xf] }
  0x15   : > { %v237_v6 = vld [vmem:[%s2551_s11 + $0x10] sm:$0xf]  ;;  %v262_v8 = vunpack.c.l.bf16 %v2221_v5  ;;  %v236_v12 = vld [vmem:[%s2551_s11 + $0x8] sm:$0xf]  ;;  %v242_v15 = vunpack.c.l.bf16 %v238_v9  ;;  %v239_v16 = vunpack.c.l.bf16 %v235_v11  ;;  %v547_v36 = vld [vmem:[%s2551_s11] sm:$0xf] }
  0x16   : > { %v241_v10 = vunpack.c.l.bf16 %v237_v6  ;;  %v267_v13 = vpack.c.bf16 %v263_v2, %v263_v2  ;;  %v268_v14 = vpack.c.bf16 %v264_v3, %v264_v3  ;;  %v265_v17 = vpack.c.bf16 %v261_v7, %v261_v7  ;;  %v548_v37 = vld [vmem:[%s2551_s11 + $0x4] sm:$0x1]  ;;  %v549_v38 = vld [vmem:[%s2551_s11 + $0x8] sm:$0xf]  ;;  %v550_v39 = vld [vmem:[%s2551_s11 + $0xc] sm:$0x1] }
  0x17   : > { %v266_v18 = vpack.c.bf16 %v262_v8, %v262_v8  ;;  %v240_v19 = vunpack.c.l.bf16 %v236_v12  ;;  %v246_v23 = vpack.c.bf16 %v242_v15, %v242_v15  ;;  %v243_v26 = vpack.c.bf16 %v239_v16, %v239_v16  ;;  %v551_v52 = vld [vmem:[%s2551_s11 + $0x10] sm:$0xf]  ;;  %v552_v53 = vld [vmem:[%s2551_s11 + $0x14] sm:$0x1]  ;;  %v553_v54 = vld [vmem:[%s2551_s11 + $0x18] sm:$0xf] }
  0x18   : > { %v277_v20 = vunpack.c.l.b16 %v267_v13  ;;  %v278_v21 = vunpack.c.l.b16 %v268_v14  ;;  %v245_v22 = vpack.c.bf16 %v241_v10, %v241_v10  ;;  %v275_v24 = vunpack.c.l.b16 %v265_v17  ;;  %v554_v55 = vld [vmem:[%s2551_s11 + $0x1c] sm:$0x1]  ;;  %s2474_s24 = smov 124   ;;  %v2258_v13 = vld [vmem:[%s2551_s11 + $0x90] sm:$0xf] }
  0x19   : > { %v276_v25 = vunpack.c.l.b16 %v266_v18  ;;  %v244_v27 = vpack.c.bf16 %v240_v19, %v240_v19  ;;  %v318_v31 = vunpack.c.l.b16 %v246_v23  ;;  %v315_v32 = vunpack.c.l.b16 %v243_v26  ;;  %v2259_v14 = vld [vmem:[%s2551_s11 + $0x98] sm:$0xf]  ;;  %v2261_v23 = vld [vmem:[%s2551_s11 + $0xa8] sm:$0xf] }
  0x1a   : > { %v2561_v28 = vpack.c.b16 %v278_v21, %v277_v20  ;;  %v317_v30 = vunpack.c.l.b16 %v245_v22  ;;  %v555_v40 = vunpack.c.l.bf16 %v547_v36  ;;  %v556_v41 = vunpack.c.l.bf16 %v548_v37  ;;  %v2260_v22 = vld [vmem:[%s2551_s11 + $0xa0] sm:$0xf]  ;;  %v2276_v36 = vld [vmem:[%s2551_s11 + $0xd8] sm:$0xf] }
  0x1b   : > { %v279_v29 = vpack.c.b16 %v276_v25, %v275_v24  ;;  %v316_v33 = vunpack.c.l.b16 %v244_v27  ;;  %v557_v44 = vunpack.c.l.bf16 %v549_v38  ;;  %v558_v45 = vunpack.c.l.bf16 %v550_v39  ;;  %v2277_v37 = vld [vmem:[%s2551_s11 + $0xe0] sm:$0xf] }
  0x1c   : > { %353 = vrot.lane.b32.xlu1 %v2561_v28, %s2472_s12  ;;  %v2567_v34 = vpack.c.b16 %v318_v31, %v317_v30  ;;  %v572_v48 = vrot.slane %v555_v40, 1  ;;  %v573_v49 = vrot.slane %v556_v41, 1  ;;  %v559_v57 = vunpack.c.l.bf16 %v551_v52 }
  0x1d   : > { %351 = vrot.lane.b32.xlu0 %v279_v29, %s2472_s12  ;;  %483 = vrot.lane.b32.xlu2 %v279_v29, %s2473_s13  ;;  %v319_v35 = vpack.c.b16 %v316_v33, %v315_v32  ;;  %v575_v50 = vrot.slane %v557_v44, 1  ;;  %v576_v51 = vrot.slane %v558_v45, 1  ;;  %v560_v58 = vunpack.c.l.bf16 %v552_v53  ;;  %v2234_v44 = vld [vmem:[%s3166_s1 + $0x6] sm:$0x1]  ;;  %v2278_v53 = vld [vmem:[%s2551_s11 + $0xe8] sm:$0xf] }
  0x1e   : > { %v574_v56 = vsel %vm571_vm1, %v572_v48, %v573_v49  ;;  %v561_v61 = vunpack.c.l.bf16 %v553_v54  ;;  %v562_v62 = vunpack.c.l.bf16 %v554_v55  ;;  %2225 = vmatmul.msk.bf16.vlgmr.msra.gmra.mxu0 %vm281_vm2, %v279_v29  ;;  %v578_v2 = vrot.slane %v559_v57, 1  ;;  %v2216_v48 = vld [vmem:[%s3166_s1 + $0x2] sm:$0x1]  ;;  %v2279_v54 = vld [vmem:[%s2551_s11 + $0xf0] sm:$0xf] }
  0x1f   : > { %v577_v60 = vsel %vm571_vm1, %v575_v50, %v576_v51  ;;  %2227 = vmatmul.msk.bf16.vlgmr.msra.gmra.mxu1 %vm281_vm2, %v319_v35  ;;  %v588_v0 = vpack.c.bf16 %v574_v56, %v574_v56  ;;  %v579_v3 = vrot.slane %v560_v58, 1  ;;  %v757_v17 = vunpack.c.l.bf16 %v2258_v13 }
  0x20   : > { %v589_v1 = vpack.c.bf16 %v577_v60, %v577_v60  ;;  %v581_v4 = vrot.slane %v561_v61, 1  ;;  %v582_v5 = vrot.slane %v562_v62, 1  ;;  %v758_v18 = vunpack.c.l.bf16 %v2259_v14 }
  0x21   : > { %v598_v6 = vunpack.c.l.b16 %v588_v0  ;;  %v580_v8 = vsel %vm571_vm1, %v578_v2, %v579_v3  ;;  %v761_v20 = vpack.c.bf16 %v757_v17, %v757_v17  ;;  %v759_v26 = vunpack.c.l.bf16 %v2260_v22  ;;  %v2293_v2 = vld [vmem:[%s2551_s11 + $0x94] sm:$0x1]  ;;  %v2294_v3 = vld [vmem:[%s2551_s11 + $0x98] sm:$0xf]  ;;  %v2253_v22 = vld [vmem:[%s3166_s1 + $0xb] sm:$0x1] }
  0x22   : > { %v599_v7 = vunpack.c.l.b16 %v589_v1  ;;  %v583_v9 = vsel %vm571_vm1, %v581_v4, %v582_v5  ;;  %v590_v11 = vpack.c.bf16 %v580_v8, %v580_v8  ;;  %v762_v21 = vpack.c.bf16 %v758_v18, %v758_v18  ;;  %v2292_v1 = vld [vmem:[%s2551_s11 + $0x90] sm:$0xf]  ;;  %v2295_v4 = vld [vmem:[%s2551_s11 + $0x9c] sm:$0x1] }
  0x23   : > { %v591_v12 = vpack.c.bf16 %v583_v9, %v583_v9  ;;  %v771_v24 = vunpack.c.l.b16 %v761_v20  ;;  %v760_v27 = vunpack.c.l.bf16 %v2261_v23  ;;  %v930_v38 = vunpack.c.l.bf16 %v2276_v36  ;;  %v2244_v23 = vld [vmem:[%s3166_s1 + $0x8] sm:$0x1] }
  0x24   : > { %385 = vrot.lane.b32.xlu1 %v2567_v34, %s2472_s12  ;;  %v2609_v10 = vpack.c.b16 %v599_v7, %v598_v6  ;;  %v600_v15 = vunpack.c.l.b16 %v590_v11  ;;  %v772_v25 = vunpack.c.l.b16 %v762_v21  ;;  %v931_v39 = vunpack.c.l.bf16 %v2277_v37  ;;  %v2250_v21 = vld [vmem:[%s3166_s1 + $0xa] sm:$0x1]  ;;  %v2296_v37 = vld [vmem:[%s2551_s11 + $0xa0] sm:$0xf] }
  0x25   : > { %383 = vrot.lane.b32.xlu0 %v319_v35, %s2472_s12  ;;  %515 = vrot.lane.b32.xlu2 %v319_v35, %s2473_s13  ;;  %v601_v16 = vunpack.c.l.b16 %v591_v12  ;;  %v764_v30 = vpack.c.bf16 %v760_v27, %v760_v27  ;;  %v934_v40 = vpack.c.bf16 %v930_v38, %v930_v38  ;;  %v494_v45 = vsel %vm288_vm0, %v2239_v42, 0  ;;  %v2297_v38 = vld [vmem:[%s2551_s11 + $0xa4] sm:$0x1] }
  0x26   : > { %v935_v41 = vpack.c.bf16 %v931_v39, %v931_v39  ;;  %v428_v47 = vsel %vm288_vm0, %v2234_v44, 0  ;;  %503 = vmatpush.bf16.msrb.mxu2 %v494_v45  ;;  %v460_v50 = vsel %vm288_vm0, %v2216_v48, 0  ;;  %v932_v55 = vunpack.c.l.bf16 %v2278_v53  ;;  %v2298_v39 = vld [vmem:[%s2551_s11 + $0xa8] sm:$0xf] }
  0x27   : > { %v2623_v19 = vpack.c.b16 %v601_v16, %v600_v15  ;;  %v774_v32 = vunpack.c.l.b16 %v764_v30  ;;  %v944_v49 = vunpack.c.l.b16 %v934_v40  ;;  %437 = vmatpush.bf16.msrb.mxu0 %v428_v47  ;;  %469 = vmatpush.bf16.msrb.mxu1 %v460_v50  ;;  %v933_v56 = vunpack.c.l.bf16 %v2279_v54  ;;  %v2247_v30 = vld [vmem:[%s3166_s1 + $0x9] sm:$0x1] }
  0x28   : > { %v945_v51 = vunpack.c.l.b16 %v935_v41  ;;  %v936_v57 = vpack.c.bf16 %v932_v55, %v932_v55  ;;  %v1104_v5 = vunpack.c.l.bf16 %v2292_v1  ;;  %v1105_v6 = vunpack.c.l.bf16 %v2293_v2  ;;  %v2299_v41 = vld [vmem:[%s2551_s11 + $0xac] sm:$0x1] }
  0x29   : > { %v937_v58 = vpack.c.bf16 %v933_v56, %v933_v56  ;;  %v1106_v7 = vunpack.c.l.bf16 %v2294_v3  ;;  %v1107_v8 = vunpack.c.l.bf16 %v2295_v4  ;;  %v611_v27 = vsel %vm288_vm0, %v2244_v23, 0  ;;  %v2268_v4 = vld [vmem:[%s3166_s1 + $0xe] sm:$0x1] }
  0x2a   : > { %v2671_v52 = vpack.c.b16 %v945_v51, %v944_v49  ;;  %v946_v59 = vunpack.c.l.b16 %v936_v57  ;;  %v1120_v9 = vrot.slane %v1104_v5, 1  ;;  %v1121_v11 = vrot.slane %v1105_v6, 1  ;;  %v2271_v5 = vld [vmem:[%s3166_s1 + $0xf] sm:$0x1] }
  0x2b   : > { %v947_v60 = vunpack.c.l.b16 %v937_v58  ;;  %v1123_v12 = vrot.slane %v1106_v7, 1  ;;  %v1124_v13 = vrot.slane %v1107_v8, 1  ;;  %620 = vmatpush.bf16.msra.mxu0 %v611_v27  ;;  %v1108_v42 = vunpack.c.l.bf16 %v2296_v37 }
  0x2c   : > { %449 = vrot.lane.b32.xlu1 %v319_v35, %s2474_s24  ;;  %v1122_v15 = vsel %vm571_vm1, %v1120_v9, %v1121_v11  ;;  %v1109_v43 = vunpack.c.l.bf16 %v2297_v38  ;;  %v1110_v44 = vunpack.c.l.bf16 %v2298_v39  ;;  %v1111_v45 = vunpack.c.l.bf16 %v2299_v41  ;;  %v2265_v11 = vld [vmem:[%s3166_s1 + $0xd] sm:$0x1]  ;;  %v2286_v38 = vld [vmem:[%s3166_s1 + $0x12] sm:$0x1]  ;;  %v2289_v39 = vld [vmem:[%s3166_s1 + $0x13] sm:$0x1] }
  0x2d   : > { %417 = vrot.lane.b32.xlu0 %v279_v29, %s2474_s24  ;;  %485 = vrot.lane.b32.xlu2 %v2561_v28, %s2473_s13  ;;  %v763_v29 = vpack.c.bf16 %v759_v26, %v759_v26  ;;  %v2681_v61 = vpack.c.b16 %v947_v60, %v946_v59  ;;  %v1125_v17 = vsel %vm571_vm1, %v1123_v12, %v1124_v13  ;;  %v725_v26 = vsel %vm288_vm0, %v2253_v22, 0  ;;  %v2314_v60 = vld [vmem:[%s2551_s11 + $0x8] sm:$0xf]  ;;  %v2280_v41 = vld [vmem:[%s3166_s1 + $0x10] sm:$0x1] }
  0x2e   : > { %2226 = vmatmul.msk.bf16.gmra.mxu0 %vm281_vm2, %v2561_v28  ;;  %v1136_v18 = vpack.c.bf16 %v1122_v15, %v1122_v15  ;;  %v1127_v47 = vrot.slane %v1109_v43, 1  ;;  %v1129_v48 = vrot.slane %v1110_v44, 1  ;;  %v1130_v49 = vrot.slane %v1111_v45, 1 }
  0x2f   : > { %2228 = vmatmul.msk.bf16.gmra.mxu1 %vm281_vm2, %v2567_v34  ;;  %v773_v31 = vunpack.c.l.b16 %v763_v29  ;;  %v860_v6 = vsel %vm288_vm0, %v2268_v4, 0  ;;  %v898_v7 = vsel %vm288_vm0, %v2271_v5, 0  ;;  %v822_v13 = vsel %vm288_vm0, %v2265_v11, 0  ;;  %v2351_v11 = vld [vmem:[%s2551_s11 + $0x10] sm:$0xf] }
  0x30   : > { %v1146_v29 = vunpack.c.l.b16 %v1136_v18  ;;  %v1131_v51 = vsel %vm571_vm1, %v1129_v48, %v1130_v49  ;;  %v2317_v18 = vld [vmem:[%s2551_s11 + $0x20] sm:$0xf]  ;;  %v1071_v43 = vsel %vm288_vm0, %v2289_v39, 0  ;;  %v957_v48 = vsel %vm288_vm0, %v2280_v41, 0 }
  0x31   : > { %v2641_v33 = vpack.c.b16 %v774_v32, %v773_v31  ;;  %v649_v32 = vsel %vm288_vm0, %v2247_v30, 0  ;;  %v1139_v54 = vpack.c.bf16 %v1131_v51, %v1131_v51  ;;  %v2334_v30 = vld [vmem:[%s2551_s11 + $0x58] sm:$0xf] }
  0x32   : > { %658 = vmatpush.bf16.msra.mxu1 %v649_v32 }
  0x33   : > { %v1149_v56 = vunpack.c.l.b16 %v1139_v54 }
  0x34   : > { %419 = vrot.lane.b32.xlu1 %v2561_v28, %s2474_s24  ;;  %v2633_v28 = vpack.c.b16 %v772_v25, %v771_v24  ;;  %v1137_v24 = vpack.c.bf16 %v1125_v17, %v1125_v17  ;;  %v687_v25 = vsel %vm288_vm0, %v2250_v21, 0  ;;  %v2316_v17 = vld [vmem:[%s2551_s11 + $0x18] sm:$0xf]  ;;  %v1309_v21 = vunpack.c.l.bf16 %v2317_v18 }
  0x35   : > { %451 = vrot.lane.b32.xlu2 %v2567_v34, %s2474_s24  ;;  %517 = vrot.lane.b32.xlu0 %v2567_v34, %s2473_s13  ;;  %v2215_v34 = vld [vmem:[%s3166_s1 + $0x1] sm:$0x1] }
  0x36   : > { %v394_v35 = vsel %vm288_vm0, %v2215_v34, 0  ;;  %v1147_v31 = vunpack.c.l.b16 %v1137_v24  ;;  %v1313_v23 = vpack.c.bf16 %v1309_v21, %v1309_v21 }
  0x37   : > { %403 = vmatpush.bf16.msra.mxu3 %v394_v35 }
  0x38   : > { %v2715_v34 = vpack.c.b16 %v1147_v31, %v1146_v29 }
  0x3b   : > { %535 = vmatpush.bf16.msrb.mxu3 %v526_v46  ;;  %v1126_v46 = vrot.slane %v1108_v42, 1  ;;  %v1033_v42 = vsel %vm288_vm0, %v2286_v38, 0 }
  0x3c   : > { %714 = vrot.lane.b32.xlu1 %v2609_v10, %s2473_s13 }
  0x3d   : > { %676 = vrot.lane.b32.xlu0 %v2609_v10, %s2474_s24  ;;  %638 = vrot.lane.b32.xlu2 %v2609_v10, %s2472_s12  ;;  %v1128_v50 = vsel %vm571_vm1, %v1126_v46, %v1127_v47  ;;  %v2283_v46 = vld [vmem:[%s3166_s1 + $0x11] sm:$0x1] }
  0x3e   : > { %v1138_v53 = vpack.c.bf16 %v1128_v50, %v1128_v50  ;;  %v995_v49 = vsel %vm288_vm0, %v2283_v46, 0 }
  0x40   : > { %v1148_v55 = vunpack.c.l.b16 %v1138_v53 }
  0x42   : > { %v2733_v58 = vpack.c.b16 %v1149_v56, %v1148_v55  ;;  %v2335_v56 = vld [vmem:[%s2551_s11 + $0x60] sm:$0xf] }
  0x44   : > { %716 = vrot.lane.b32.xlu1 %v2623_v19, %s2473_s13 }
  0x45   : > { %678 = vrot.lane.b32.xlu0 %v2623_v19, %s2474_s24  ;;  %640 = vrot.lane.b32.xlu2 %v2623_v19, %s2472_s12 }
  0x4c   : > { %887 = vrot.lane.b32.xlu1 %v2633_v28, %s2473_s13 }
  0x4d   : > { %849 = vrot.lane.b32.xlu0 %v2633_v28, %s2474_s24  ;;  %811 = vrot.lane.b32.xlu2 %v2633_v28, %s2472_s12 }
  0x54   : > { %889 = vrot.lane.b32.xlu1 %v2641_v33, %s2473_s13 }
  0x55   : > { %851 = vrot.lane.b32.xlu0 %v2641_v33, %s2474_s24  ;;  %813 = vrot.lane.b32.xlu2 %v2641_v33, %s2472_s12 }
  0x5c   : > { %1060 = vrot.lane.b32.xlu1 %v2671_v52, %s2473_s13 }
  0x5d   : > { %1022 = vrot.lane.b32.xlu0 %v2671_v52, %s2474_s24  ;;  %984 = vrot.lane.b32.xlu2 %v2671_v52, %s2472_s12 }
  0x64   : > { %1062 = vrot.lane.b32.xlu1 %v2681_v61, %s2473_s13 }
  0x65   : > { %1024 = vrot.lane.b32.xlu0 %v2681_v61, %s2474_s24  ;;  %986 = vrot.lane.b32.xlu2 %v2681_v61, %s2472_s12 }
  0x6c   : > { %1262 = vrot.lane.b32.xlu1 %v2715_v34, %s2473_s13 }
  0x6d   : > { %1224 = vrot.lane.b32.xlu0 %v2715_v34, %s2474_s24  ;;  %1186 = vrot.lane.b32.xlu2 %v2715_v34, %s2472_s12 }
  0x74   : > { %1264 = vrot.lane.b32.xlu1 %v2733_v58, %s2473_s13 }
  0x75   : > { %1226 = vrot.lane.b32.xlu0 %v2733_v58, %s2474_s24  ;;  %1188 = vrot.lane.b32.xlu2 %v2733_v58, %s2472_s12 }
  0x77   : > { %v2687_v63 = vpop.permute.xlu2 %483 }
  0x7f   : > { %v516_v20 = vpop.permute.xlu2 %515 }
  0x87   : > { %v486_v40 = vpop.permute.xlu2 %485 }
  0x8e   : > { %v354_v62 = vpop.permute.xlu1 %353 }
  0x8f   : > { %v352_v0 = vpop.permute.xlu0 %351  ;;  %v452_v57 = vpop.permute.xlu2 %451 }
  0x90   : > { %2230 = vmatmul.msk.bf16.vlgmr.msra.gmra.mxu2 %vm281_vm2, %v352_v0  ;;  %v1306_v0 = vunpack.c.l.bf16 %v2314_v60  ;;  %v1481_v60 = vunpack.c.l.bf16 %v2335_v56 }
  0x91   : > { %696 = vmatpush.bf16.msra.mxu2 %v687_v25  ;;  %v1323_v25 = vunpack.c.l.b16 %v1313_v23 }
  0x92   : > { %v1310_v2 = vpack.c.bf16 %v1306_v0, %v1306_v0  ;;  %v1485_v0 = vpack.c.bf16 %v1481_v60, %v1481_v60 }
  0x94   : > { %v1320_v8 = vunpack.c.l.b16 %v1310_v2 }
  0x96   : > { %v386_v14 = vpop.permute.xlu1 %385 }
  0x97   : > { %v384_v16 = vpop.permute.xlu0 %383  ;;  %v639_v15 = vpop.permute.xlu2 %638 }
  0x98   : > { %2232 = vmatmul.msk.bf16.vlgmr.msra.gmra.mxu3 %vm281_vm2, %v384_v16 }
  0x99   : > { %734 = vmatpush.bf16.msra.mxu3 %v725_v26 }
  0x9e   : > { %v450_v35 = vpop.permute.xlu1 %449 }
  0x9f   : > { %v418_v36 = vpop.permute.xlu0 %417  ;;  %2237 = vmatmul.msk.bf16.vlgmr.msrb.gmra.mxu1 %vm281_vm2, %v450_v35  ;;  %v641_v27 = vpop.permute.xlu2 %640  ;;  %v1480_v35 = vunpack.c.l.bf16 %v2334_v30 }
  0xa0   : > { %2231 = vmatmul.msk.bf16.gmra.mxu2 %vm281_vm2, %v354_v62  ;;  %2235 = vmatmul.msk.bf16.vlgmr.msrb.gmra.mxu0 %vm281_vm2, %v418_v36  ;;  %v2315_v62 = vld [vmem:[%s2551_s11 + $0x10] sm:$0xf] }
  0xa1   : > { %v1307_v1 = vunpack.c.l.bf16 %v2315_v62  ;;  %831 = vmatpush.bf16.msrb.mxu1 %v822_v13  ;;  %v1484_v37 = vpack.c.bf16 %v1480_v35, %v1480_v35 }
  0xa3   : > { %v1311_v3 = vpack.c.bf16 %v1307_v1, %v1307_v1  ;;  %v1494_v45 = vunpack.c.l.b16 %v1484_v37  ;;  %v2303_v37 = vld [vmem:[%s3166_s1 + $0x15] sm:$0x1] }
  0xa5   : > { %v1321_v9 = vunpack.c.l.b16 %v1311_v3 }
  0xa6   : > { %v420_v59 = vpop.permute.xlu1 %419 }
  0xa7   : > { %v518_v16 = vpop.permute.xlu0 %517  ;;  %v812_v51 = vpop.permute.xlu2 %811 }
  0xa8   : > { %2233 = vmatmul.msk.bf16.gmra.mxu3 %vm281_vm2, %v386_v14  ;;  %v2764_v14 = vpack.c.b16 %v1321_v9, %v1320_v8  ;;  %v2349_v8 = vld [vmem:[%s2551_s11 + $0x8] sm:$0xf]  ;;  %v2350_v9 = vld [vmem:[%s2551_s11 + $0xc] sm:$0x1] }
  0xa9   : > { %v1653_v13 = vunpack.c.l.bf16 %v2349_v8 }
  0xaa   : > { %1398 = vrot.lane.b32.xlu0 %v2764_v14, %s2474_s24  ;;  %1436 = vrot.lane.b32.xlu1 %v2764_v14, %s2473_s13 }
  0xab   : > { %1360 = vrot.lane.b32.xlu2 %v2764_v14, %s2472_s12  ;;  %v1669_v18 = vrot.slane %v1653_v13, 1  ;;  %v2327_v13 = vld [vmem:[%s3166_s1 + $0x1b] sm:$0x1] }
  0xae   : > { %v715_v31 = vpop.permute.xlu1 %714 }
  0xaf   : > { %2238 = vmatmul.msk.bf16.gmra.mxu1 %vm281_vm2, %v452_v57  ;;  %v677_v29 = vpop.permute.xlu0 %676  ;;  %v2336_v57 = vld [vmem:[%s2551_s11 + $0x68] sm:$0xf] }
  0xb0   : > { %2236 = vmatmul.msk.bf16.gmra.mxu0 %vm281_vm2, %v420_v59  ;;  %2240 = vmatmul.msk.bf16.vlgmr.msrb.gmra.mxu2 %vm281_vm2, %v2687_v63  ;;  %v2262_v63 = vld [vmem:[%s3166_s1 + $0xc] sm:$0x1]  ;;  %v1482_v62 = vunpack.c.l.bf16 %v2336_v57 }
  0xb1   : > { %869 = vmatpush.bf16.msrb.mxu2 %v860_v6  ;;  %v784_v12 = vsel %vm288_vm0, %v2262_v63, 0  ;;  %v814_v6 = vpop.permute.xlu2 %813 }
  0xb2   : > { %793 = vmatpush.bf16.msrb.mxu0 %v784_v12  ;;  %v1486_v1 = vpack.c.bf16 %v1482_v62, %v1482_v62  ;;  %v2352_v12 = vld [vmem:[%s2551_s11 + $0x14] sm:$0x1] }
  0xb4   : > { %v1496_v4 = vunpack.c.l.b16 %v1486_v1 }
  0xb6   : > { %v717_v59 = vpop.permute.xlu1 %716 }
  0xb7   : > { %v679_v53 = vpop.permute.xlu0 %678 }
  0xb8   : > { %2242 = vmatmul.msk.bf16.vlgmr.msrb.gmra.mxu3 %vm281_vm2, %v516_v20  ;;  %v1308_v20 = vunpack.c.l.bf16 %v2316_v17  ;;  %v1656_v17 = vunpack.c.l.bf16 %v2352_v12  ;;  %v2324_v12 = vld [vmem:[%s3166_s1 + $0x1a] sm:$0x1] }
  0xb9   : > { %907 = vmatpush.bf16.msrb.mxu3 %v898_v7  ;;  %v985_v38 = vpop.permute.xlu2 %984 }
  0xba   : > { %v1312_v22 = vpack.c.bf16 %v1308_v20, %v1308_v20  ;;  %v1673_v23 = vrot.slane %v1656_v17, 1 }
  0xbc   : > { %v1322_v24 = vunpack.c.l.b16 %v1312_v22 }
  0xbe   : > { %v2779_v26 = vpack.c.b16 %v1323_v25, %v1322_v24  ;;  %v888_v22 = vpop.permute.xlu1 %887 }
  0xbf   : > { %2248 = vmatmul.msk.bf16.vlgmr.msra.gmra.mxu1 %vm281_vm2, %v639_v15  ;;  %v850_v7 = vpop.permute.xlu0 %849  ;;  %v1654_v15 = vunpack.c.l.bf16 %v2350_v9 }
  0xc0   : > { %2241 = vmatmul.msk.bf16.gmra.mxu2 %vm281_vm2, %v486_v40  ;;  %2245 = vmatmul.msk.bf16.vlgmr.msra.gmra.mxu0 %vm281_vm2, %v2609_v10  ;;  %v2333_v10 = vld [vmem:[%s2551_s11 + $0x50] sm:$0xf]  ;;  %v339_v40 = vpop.f32.mrf.mxu1 }
  0xc1   : > { %1400 = vrot.lane.b32.xlu0 %v2779_v26, %s2474_s24  ;;  %1438 = vrot.lane.b32.xlu1 %v2779_v26, %s2473_s13  ;;  %v1479_v32 = vunpack.c.l.bf16 %v2333_v10  ;;  %v1670_v20 = vrot.slane %v1654_v15, 1  ;;  %v1447_v15 = vsel %vm288_vm0, %v2327_v13, 0 }
  0xc2   : > { %1362 = vrot.lane.b32.xlu2 %v2779_v26, %s2472_s12  ;;  %966 = vmatpush.bf16.msra.mxu0 %v957_v48 }
  0xc3   : > { %v1483_v36 = vpack.c.bf16 %v1479_v32, %v1479_v32  ;;  %1004 = vmatpush.bf16.msra.mxu1 %v995_v49  ;;  %v1671_v24 = vsel %vm571_vm1, %v1669_v18, %v1670_v20  ;;  %v2318_v18 = vld [vmem:[%s3166_s1 + $0x18] sm:$0x1]  ;;  %v2321_v20 = vld [vmem:[%s3166_s1 + $0x19] sm:$0x1] }
  0xc5   : > { %v1493_v44 = vunpack.c.l.b16 %v1483_v36  ;;  %v2300_v36 = vld [vmem:[%s3166_s1 + $0x14] sm:$0x1] }
  0xc7   : > { %v2812_v50 = vpack.c.b16 %v1494_v45, %v1493_v44  ;;  %v852_v41 = vpop.permute.xlu0 %851  ;;  %v2355_v44 = vld [vmem:[%s2551_s11 + $0x20] sm:$0xf]  ;;  %v2356_v45 = vld [vmem:[%s2551_s11 + $0x24] sm:$0x1] }
  0xc8   : > { %2243 = vmatmul.msk.bf16.gmra.mxu3 %vm281_vm2, %v518_v16  ;;  %v2826_v55 = vpop.f32.mrf.mxu1  ;;  %v1655_v16 = vunpack.c.l.bf16 %v2351_v11  ;;  %v1659_v49 = vunpack.c.l.bf16 %v2355_v44 }
  0xc9   : > { %1571 = vrot.lane.b32.xlu0 %v2812_v50, %s2474_s24  ;;  %1609 = vrot.lane.b32.xlu1 %v2812_v50, %s2473_s13 }
  0xca   : > { %1533 = vrot.lane.b32.xlu2 %v2812_v50, %s2472_s12  ;;  %v1672_v21 = vrot.slane %v1655_v16, 1  ;;  %v1678_v57 = vrot.slane %v1659_v49, 1 }
  0xcc   : > { %v1674_v25 = vsel %vm571_vm1, %v1672_v21, %v1673_v23 }
  0xcd   : > { %v1686_v10 = vpack.c.bf16 %v1674_v25, %v1674_v25  ;;  %v1371_v25 = vsel %vm288_vm0, %v2321_v20, 0 }
  0xcf   : > { %2249 = vmatmul.msk.bf16.gmra.mxu1 %vm281_vm2, %v641_v27  ;;  %v2306_v27 = vld [vmem:[%s3166_s1 + $0x16] sm:$0x1]  ;;  %v1696_v35 = vunpack.c.l.b16 %v1686_v10 }
  0xd0   : > { %2246 = vmatmul.msk.bf16.gmra.mxu0 %vm281_vm2, %v2623_v19  ;;  %2251 = vmatmul.msk.bf16.vlgmr.msra.gmra.mxu2 %vm281_vm2, %v677_v29  ;;  %v301_v19 = vpop.f32.mrf.mxu0  ;;  %v344_v3 = vpop.f32.mrf.mxu1  ;;  %v2309_v29 = vld [vmem:[%s3166_s1 + $0x17] sm:$0x1]  ;;  %v1235_v30 = vsel %vm288_vm0, %v2306_v27, 0 }
  0xd1   : > { %1042 = vmatpush.bf16.msra.mxu2 %v1033_v42  ;;  %v2808_v47 = vadd.f32 %v339_v40, %v301_v19  ;;  %v1159_v19 = vsel %vm288_vm0, %v2300_v36, 0  ;;  %v1197_v40 = vsel %vm288_vm0, %v2303_v37, 0  ;;  %v2353_v42 = vld [vmem:[%s2551_s11 + $0x18] sm:$0xf] }
  0xd2   : > { %v1657_v46 = vunpack.c.l.bf16 %v2353_v42 }
  0xd8   : > { %2254 = vmatmul.msk.bf16.vlgmr.msra.gmra.mxu3 %vm281_vm2, %v715_v31  ;;  %v2824_v54 = vpop.f32.mrf.mxu0  ;;  %v1273_v31 = vsel %vm288_vm0, %v2309_v29, 0 }
  0xd9   : > { %1080 = vmatpush.bf16.msra.mxu3 %v1071_v43  ;;  %v2354_v43 = vld [vmem:[%s2551_s11 + $0x1c] sm:$0x1] }
  0xda   : > { %v1658_v48 = vunpack.c.l.bf16 %v2354_v43 }
  0xdc   : > { %v1676_v56 = vrot.slane %v1658_v48, 1 }
  0xdf   : > { %2266 = vmatmul.msk.bf16.vlgmr.msrb.gmra.mxu1 %vm281_vm2, %v812_v51  ;;  %v1660_v51 = vunpack.c.l.bf16 %v2356_v45 }
  0xe0   : > { %2252 = vmatmul.msk.bf16.gmra.mxu2 %vm281_vm2, %v679_v53  ;;  %2263 = vmatmul.msk.bf16.vlgmr.msrb.gmra.mxu0 %vm281_vm2, %v2633_v28  ;;  %v306_v2 = vpop.f32.mrf.mxu0  ;;  %v1495_v28 = vunpack.c.l.b16 %v1485_v0  ;;  %v1675_v53 = vrot.slane %v1657_v46, 1 }
  0xe1   : > { %v2831_v5 = vadd.f32 %v344_v3, %v306_v2  ;;  %1168 = vmatpush.bf16.msrb.mxu0 %v1159_v19  ;;  %1206 = vmatpush.bf16.msrb.mxu1 %v1197_v40  ;;  %v1679_v60 = vrot.slane %v1660_v51, 1 }
  0xe2   : > { %v2833_v63 = vpack.c.b16 %v1496_v4, %v1495_v28  ;;  %v1677_v62 = vsel %vm571_vm1, %v1675_v53, %v1676_v56  ;;  %v987_v28 = vpop.permute.xlu2 %986 }
  0xe3   : > { %v1680_v0 = vsel %vm571_vm1, %v1678_v57, %v1679_v60  ;;  %v1687_v1 = vpack.c.bf16 %v1677_v62, %v1677_v62  ;;  %v2343_v57 = vld [vmem:[%s3166_s1 + $0x1e] sm:$0x1] }
  0xe4   : > { %1573 = vrot.lane.b32.xlu0 %v2833_v63, %s2474_s24  ;;  %1611 = vrot.lane.b32.xlu1 %v2833_v63, %s2473_s13 }
  0xe5   : > { %1535 = vrot.lane.b32.xlu2 %v2833_v63, %s2472_s12  ;;  %v1697_v2 = vunpack.c.l.b16 %v1687_v1  ;;  %v2337_v1 = vld [vmem:[%s3166_s1 + $0x1c] sm:$0x1] }
  0xe8   : > { %2255 = vmatmul.msk.bf16.gmra.mxu3 %vm281_vm2, %v717_v59  ;;  %v890_v59 = vpop.permute.xlu1 %889  ;;  %v2901_v9 = vpop.f32.mrf.mxu0 }
  0xea   : > { %v1187_v23 = vpop.permute.xlu2 %1186 }
  0xef   : > { %2267 = vmatmul.msk.bf16.gmra.mxu1 %vm281_vm2, %v814_v6  ;;  %v1023_v6 = vpop.permute.xlu0 %1022 }
  0xf0   : > { %2264 = vmatmul.msk.bf16.gmra.mxu0 %vm281_vm2, %v2641_v33  ;;  %2269 = vmatmul.msk.bf16.vlgmr.msrb.gmra.mxu2 %vm281_vm2, %v850_v7  ;;  %v1685_v33 = vpack.c.bf16 %v1671_v24, %v1671_v24  ;;  %v2899_v7 = vpop.f32.mrf.mxu1  ;;  %v1061_v11 = vpop.permute.xlu1 %1060  ;;  %v1333_v24 = vsel %vm288_vm0, %v2318_v18, 0 }
  0xf1   : > { %1244 = vmatpush.bf16.msrb.mxu2 %v1235_v30 }
  0xf2   : > { %v1695_v32 = vunpack.c.l.b16 %v1685_v33  ;;  %v1189_v42 = vpop.permute.xlu2 %1188 }
  0xf4   : > { %v2866_v39 = vpack.c.b16 %v1696_v35, %v1695_v32 }
  0xf6   : > { %1773 = vrot.lane.b32.xlu0 %v2866_v39, %s2474_s24  ;;  %1811 = vrot.lane.b32.xlu1 %v2866_v39, %s2473_s13 }
  0xf7   : > { %1735 = vrot.lane.b32.xlu2 %v2866_v39, %s2472_s12  ;;  %v1025_v27 = vpop.permute.xlu0 %1024 }
  0xf8   : > { %2272 = vmatmul.msk.bf16.vlgmr.msrb.gmra.mxu3 %vm281_vm2, %v888_v22  ;;  %v1063_v36 = vpop.permute.xlu1 %1062 }
  0xf9   : > { %1282 = vmatpush.bf16.msrb.mxu3 %v1273_v31 }
  0xff   : > { %2284 = vmatmul.msk.bf16.vlgmr.msra.gmra.mxu1 %vm281_vm2, %v985_v38  ;;  %v1225_v44 = vpop.permute.xlu0 %1224 }
 0x100   : > { %2270 = vmatmul.msk.bf16.gmra.mxu2 %vm281_vm2, %v852_v41  ;;  %2281 = vmatmul.msk.bf16.vlgmr.msra.gmra.mxu0 %vm281_vm2, %v2671_v52  ;;  %v1688_v52 = vpack.c.bf16 %v1680_v0, %v1680_v0  ;;  %v1263_v53 = vpop.permute.xlu1 %1262 }
 0x101   : > { %1342 = vmatpush.bf16.msra.mxu0 %v1333_v24  ;;  %1380 = vmatpush.bf16.msra.mxu1 %v1371_v25 }
 0x102   : > { %v1698_v3 = vunpack.c.l.b16 %v1688_v52  ;;  %v2340_v52 = vld [vmem:[%s3166_s1 + $0x1d] sm:$0x1] }
 0x104   : > { %v2887_v4 = vpack.c.b16 %v1698_v3, %v1697_v2 }
 0x106   : > { %1775 = vrot.lane.b32.xlu0 %v2887_v4, %s2474_s24  ;;  %1813 = vrot.lane.b32.xlu1 %v2887_v4, %s2473_s13 }
 0x107   : > { %1737 = vrot.lane.b32.xlu2 %v2887_v4, %s2472_s12  ;;  %v1227_v13 = vpop.permute.xlu0 %1226 }
 0x108   : > { %2273 = vmatmul.msk.bf16.gmra.mxu3 %vm281_vm2, %v890_v59  ;;  %v1582_v59 = vsel %vm288_vm0, %v2343_v57, 0 }
 0x10f   : > { %2285 = vmatmul.msk.bf16.gmra.mxu1 %vm281_vm2, %v987_v28  ;;  %v1361_v28 = vpop.permute.xlu2 %1360 }
 0x110   : > { %2282 = vmatmul.msk.bf16.gmra.mxu0 %vm281_vm2, %v2681_v61  ;;  %2287 = vmatmul.msk.bf16.vlgmr.msra.gmra.mxu2 %vm281_vm2, %v1023_v6  ;;  %v1409_v61 = vsel %vm288_vm0, %v2324_v12, 0  ;;  %v1506_v6 = vsel %vm288_vm0, %v2337_v1, 0 }
 0x111   : > { %1418 = vmatpush.bf16.msra.mxu2 %v1409_v61 }
 0x113   : > { %v373_v8 = vpop.f32.mrf.mxu2 }
 0x118   : > { %2290 = vmatmul.msk.bf16.vlgmr.msra.gmra.mxu3 %vm281_vm2, %v1061_v11 }
 0x119   : > { %1456 = vmatpush.bf16.msra.mxu3 %v1447_v15 }
 0x11b   : > { %v375_v16 = vpop.f32.mrf.mxu2  ;;  %v405_v17 = vpop.f32.mrf.mxu3 }
 0x11c   : > { %v406_v21 = vadd.f32 %v405_v17, %v373_v8  ;;  %v471_v22 = vpop.f32.mrf.mxu1  ;;  %v1544_v8 = vsel %vm288_vm0, %v2340_v52, 0 }
 0x11d   : > { %v439_v33 = vpop.f32.mrf.mxu0 }
 0x11e   : > { %v2920_v29 = vadd.f32 %v471_v22, %v439_v33  ;;  %v1363_v33 = vpop.permute.xlu2 %1362 }
 0x11f   : > { %2304 = vmatmul.msk.bf16.vlgmr.msrb.gmra.mxu1 %vm281_vm2, %v1187_v23  ;;  %v1265_v23 = vpop.permute.xlu1 %1264 }
 0x120   : > { %2288 = vmatmul.msk.bf16.gmra.mxu2 %vm281_vm2, %v1025_v27  ;;  %2301 = vmatmul.msk.bf16.vlgmr.msrb.gmra.mxu0 %vm281_vm2, %v2715_v34 }
 0x121   : > { %1515 = vmatpush.bf16.msrb.mxu0 %v1506_v6  ;;  %1553 = vmatpush.bf16.msrb.mxu1 %v1544_v8 }
 0x123   : > { %v378_v10 = vpop.f32.mrf.mxu2  ;;  %v407_v30 = vpop.f32.mrf.mxu3 }
 0x124   : > { %v408_v31 = vadd.f32 %v407_v30, %v375_v16  ;;  %v473_v32 = vpop.f32.mrf.mxu1  ;;  %v1399_v30 = vpop.permute.xlu0 %1398 }
 0x125   : > { %v441_v35 = vpop.f32.mrf.mxu0 }
 0x126   : > { %v2926_v37 = vadd.f32 %v473_v32, %v441_v35 }
 0x128   : > { %2291 = vmatmul.msk.bf16.gmra.mxu3 %vm281_vm2, %v1063_v36 }
 0x12b   : > { %v380_v38 = vpop.f32.mrf.mxu2  ;;  %v410_v19 = vpop.f32.mrf.mxu3 }
 0x12c   : > { %v411_v40 = vadd.f32 %v410_v19, %v378_v10  ;;  %v476_v41 = vpop.f32.mrf.mxu1 }
 0x12d   : > { %v444_v43 = vpop.f32.mrf.mxu0 }
 0x12e   : > { %v2929_v45 = vadd.f32 %v476_v41, %v444_v43 }
 0x12f   : > { %2305 = vmatmul.msk.bf16.gmra.mxu1 %vm281_vm2, %v1189_v42  ;;  %v1437_v42 = vpop.permute.xlu1 %1436 }
 0x130   : > { %2302 = vmatmul.msk.bf16.gmra.mxu0 %vm281_vm2, %v2733_v58  ;;  %2307 = vmatmul.msk.bf16.vlgmr.msrb.gmra.mxu2 %vm281_vm2, %v1225_v44  ;;  %v2346_v58 = vld [vmem:[%s3166_s1 + $0x1f] sm:$0x1] }
 0x131   : > { %v1620_v60 = vsel %vm288_vm0, %v2346_v58, 0  ;;  %1591 = vmatpush.bf16.msrb.mxu2 %v1582_v59 }
 0x133   : > { %v412_v34 = vpop.f32.mrf.mxu3  ;;  %v505_v46 = vpop.f32.mrf.mxu2 }
 0x134   : > { %v413_v48 = vadd.f32 %v412_v34, %v380_v38  ;;  %v478_v49 = vpop.f32.mrf.mxu1  ;;  %v2357_v34 = vld [vmem:[%s3166_s1 + $0x20] sm:$0x1] }
 0x135   : > { %v446_v51 = vpop.f32.mrf.mxu0  ;;  %v1708_v57 = vsel %vm288_vm0, %v2357_v34, 0 }
 0x136   : > { %v2935_v56 = vadd.f32 %v478_v49, %v446_v51 }
 0x138   : > { %2310 = vmatmul.msk.bf16.vlgmr.msrb.gmra.mxu3 %vm281_vm2, %v1263_v53  ;;  %v1534_v53 = vpop.permute.xlu2 %1533 }
 0x139   : > { %1629 = vmatpush.bf16.msrb.mxu3 %v1620_v60 }
 0x13b   : > { %v507_v62 = vpop.f32.mrf.mxu2  ;;  %v537_v0 = vpop.f32.mrf.mxu3 }
 0x13c   : > { %v538_v2 = vadd.f32 %v537_v0, %v505_v46  ;;  %v660_v3 = vpop.f32.mrf.mxu1  ;;  %v2360_v46 = vld [vmem:[%s3166_s1 + $0x21] sm:$0x1] }
 0x13d   : > { %v622_v11 = vpop.f32.mrf.mxu0  ;;  %v670_v12 = vadd.f32 %v660_v3, %v406_v21  ;;  %v1746_v58 = vsel %vm288_vm0, %v2360_v46, 0 }
 0x13e   : > { %v632_v61 = vadd.f32 %v622_v11, %v2808_v47 }
 0x13f   : > { %2322 = vmatmul.msk.bf16.vlgmr.msra.gmra.mxu1 %vm281_vm2, %v1361_v28 }
 0x140   : > { %2308 = vmatmul.msk.bf16.gmra.mxu2 %vm281_vm2, %v1227_v13  ;;  %2319 = vmatmul.msk.bf16.vlgmr.msra.gmra.mxu0 %vm281_vm2, %v2764_v14 }
 0x141   : > { %1717 = vmatpush.bf16.msra.mxu0 %v1708_v57  ;;  %1755 = vmatpush.bf16.msra.mxu1 %v1746_v58 }
 0x143   : > { %v510_v15 = vpop.f32.mrf.mxu2  ;;  %v539_v16 = vpop.f32.mrf.mxu3 }
 0x144   : > { %v540_v17 = vadd.f32 %v539_v16, %v507_v62  ;;  %v662_v18 = vpop.f32.mrf.mxu1  ;;  %v1401_v62 = vpop.permute.xlu0 %1400 }
 0x145   : > { %v624_v20 = vpop.f32.mrf.mxu0  ;;  %v671_v22 = vadd.f32 %v662_v18, %v408_v31 }
 0x148   : > { %2311 = vmatmul.msk.bf16.gmra.mxu3 %vm281_vm2, %v1265_v23 }
 0x14b   : > { %v512_v21 = vpop.f32.mrf.mxu2  ;;  %v542_v24 = vpop.f32.mrf.mxu3 }
 0x14c   : > { %v543_v25 = vadd.f32 %v542_v24, %v510_v15  ;;  %v665_v47 = vpop.f32.mrf.mxu1 }
 0x14d   : > { %v627_v27 = vpop.f32.mrf.mxu0  ;;  %v672_v10 = vadd.f32 %v665_v47, %v411_v40 }
 0x14e   : > { %v634_v32 = vadd.f32 %v627_v27, %v2831_v5  ;;  %v2363_v5 = vld [vmem:[%s3166_s1 + $0x22] sm:$0x1] }
 0x14f   : > { %2323 = vmatmul.msk.bf16.gmra.mxu1 %vm281_vm2, %v1363_v33  ;;  %v1784_v40 = vsel %vm288_vm0, %v2363_v5, 0 }
 0x150   : > { %2320 = vmatmul.msk.bf16.gmra.mxu0 %vm281_vm2, %v2779_v26  ;;  %2325 = vmatmul.msk.bf16.vlgmr.msra.gmra.mxu2 %vm281_vm2, %v1399_v30  ;;  %v2366_v26 = vld [vmem:[%s3166_s1 + $0x23] sm:$0x1] }
 0x151   : > { %v1822_v43 = vsel %vm288_vm0, %v2366_v26, 0  ;;  %1793 = vmatpush.bf16.msra.mxu2 %v1784_v40 }
 0x153   : > { %v544_v14 = vpop.f32.mrf.mxu3  ;;  %v698_v31 = vpop.f32.mrf.mxu2 }
 0x154   : > { %v545_v35 = vadd.f32 %v544_v14, %v512_v21  ;;  %v708_v36 = vadd.f32 %v698_v31, %v2920_v29  ;;  %v667_v38 = vpop.f32.mrf.mxu1 }
 0x155   : > { %v629_v19 = vpop.f32.mrf.mxu0  ;;  %v673_v41 = vadd.f32 %v667_v38, %v413_v48 }
 0x158   : > { %2328 = vmatmul.msk.bf16.vlgmr.msra.gmra.mxu3 %vm281_vm2, %v1437_v42 }
 0x159   : > { %1831 = vmatpush.bf16.msra.mxu3 %v1822_v43 }
 0x15b   : > { %v700_v29 = vpop.f32.mrf.mxu2  ;;  %v736_v44 = vpop.f32.mrf.mxu3 }
 0x15c   : > { %v709_v48 = vadd.f32 %v700_v29, %v2926_v37  ;;  %v746_v49 = vadd.f32 %v736_v44, %v538_v2  ;;  %v833_v51 = vpop.f32.mrf.mxu1  ;;  %v342_v37 = vadd.f32 %v2826_v55, %v2824_v54  ;;  %v1536_v54 = vpop.permute.xlu2 %1535 }
 0x15d   : > { %v795_v59 = vpop.f32.mrf.mxu0  ;;  %v843_v60 = vadd.f32 %v833_v51, %v670_v12  ;;  %v1439_v12 = vpop.permute.xlu1 %1438 }
 0x15e   : > { %v805_v0 = vadd.f32 %v795_v59, %v632_v61  ;;  %v633_v2 = vadd.f32 %v624_v20, %v342_v37  ;;  %v1572_v20 = vpop.permute.xlu0 %1571 }
 0x15f   : > { %2341 = vmatmul.msk.bf16.vlgmr.msrb.gmra.mxu1 %vm281_vm2, %v1534_v53 }
 0x160   : > { %2326 = vmatmul.msk.bf16.gmra.mxu2 %vm281_vm2, %v1401_v62  ;;  %2338 = vmatmul.msk.bf16.vlgmr.msrb.gmra.mxu0 %vm281_vm2, %v2812_v50 }
 0x163   : > { %v703_v1 = vpop.f32.mrf.mxu2  ;;  %v738_v52 = vpop.f32.mrf.mxu3 }
 0x164   : > { %v710_v3 = vadd.f32 %v703_v1, %v2929_v45  ;;  %v747_v28 = vadd.f32 %v738_v52, %v540_v17  ;;  %v835_v6 = vpop.f32.mrf.mxu1  ;;  %v347_v45 = vadd.f32 %v2899_v7, %v2901_v9  ;;  %v1736_v42 = vpop.permute.xlu2 %1735 }
 0x165   : > { %v797_v8 = vpop.f32.mrf.mxu0  ;;  %v844_v11 = vadd.f32 %v835_v6, %v671_v22 }
 0x166   : > { %v806_v13 = vadd.f32 %v797_v8, %v633_v2  ;;  %v1574_v9 = vpop.permute.xlu0 %1573 }
 0x168   : > { %2329 = vmatmul.msk.bf16.gmra.mxu3 %vm281_vm2, %v1439_v12 }
 0x16b   : > { %v705_v61 = vpop.f32.mrf.mxu2  ;;  %v741_v15 = vpop.f32.mrf.mxu3 }
 0x16c   : > { %v711_v50 = vadd.f32 %v705_v61, %v2935_v56  ;;  %v748_v16 = vadd.f32 %v741_v15, %v543_v25  ;;  %v838_v18 = vpop.f32.mrf.mxu1  ;;  %v635_v56 = vadd.f32 %v629_v19, %v347_v45  ;;  %v1738_v57 = vpop.permute.xlu2 %1737 }
 0x16d   : > { %v800_v55 = vpop.f32.mrf.mxu0  ;;  %v845_v23 = vadd.f32 %v838_v18, %v672_v10  ;;  %v1610_v10 = vpop.permute.xlu1 %1609 }
 0x16e   : > { %v807_v21 = vadd.f32 %v800_v55, %v634_v32 }
 0x16f   : > { %2342 = vmatmul.msk.bf16.gmra.mxu1 %vm281_vm2, %v1536_v54 }
 0x170   : > { %2339 = vmatmul.msk.bf16.gmra.mxu0 %vm281_vm2, %v2833_v63  ;;  %2344 = vmatmul.msk.bf16.vlgmr.msrb.gmra.mxu2 %vm281_vm2, %v1572_v20 }
 0x173   : > { %v743_v17 = vpop.f32.mrf.mxu3  ;;  %v871_v22 = vpop.f32.mrf.mxu2 }
 0x174   : > { %v749_v24 = vadd.f32 %v743_v17, %v545_v35  ;;  %v881_v25 = vadd.f32 %v871_v22, %v708_v36  ;;  %v840_v47 = vpop.f32.mrf.mxu1 }
 0x175   : > { %v802_v33 = vpop.f32.mrf.mxu0  ;;  %v846_v27 = vadd.f32 %v840_v47, %v673_v41  ;;  %v1612_v44 = vpop.permute.xlu1 %1611 }
 0x176   : > { %v808_v30 = vadd.f32 %v802_v33, %v635_v56 }
 0x178   : > { %2347 = vmatmul.msk.bf16.vlgmr.msrb.gmra.mxu3 %vm281_vm2, %v1610_v10 }
 0x17b   : > { %v873_v32 = vpop.f32.mrf.mxu2  ;;  %v909_v14 = vpop.f32.mrf.mxu3 }
 0x17c   : > { %v882_v63 = vadd.f32 %v873_v32, %v709_v48  ;;  %v919_v31 = vadd.f32 %v909_v14, %v746_v49  ;;  %v1006_v38 = vpop.f32.mrf.mxu1 }
 0x17d   : > { %v968_v5 = vpop.f32.mrf.mxu0  ;;  %v1016_v7 = vadd.f32 %v1006_v38, %v843_v60 }
 0x17e   : > { %v978_v26 = vadd.f32 %v968_v5, %v805_v0 }
 0x17f   : > { %2361 = vmatmul.msk.bf16.vlgmr.msra.gmra.mxu1 %vm281_vm2, %v1736_v42 }
 0x180   : > { %2345 = vmatmul.msk.bf16.gmra.mxu2 %vm281_vm2, %v1574_v9  ;;  %2358 = vmatmul.msk.bf16.vlgmr.msra.gmra.mxu0 %vm281_vm2, %v2866_v39  ;;  %v1774_v39 = vpop.permute.xlu0 %1773 }
 0x183   : > { %v876_v35 = vpop.f32.mrf.mxu2  ;;  %v911_v36 = vpop.f32.mrf.mxu3 }
 0x184   : > { %v883_v19 = vadd.f32 %v876_v35, %v710_v3  ;;  %v920_v41 = vadd.f32 %v911_v36, %v747_v28  ;;  %v1008_v40 = vpop.f32.mrf.mxu1  ;;  %v1812_v28 = vpop.permute.xlu1 %1811 }
 0x185   : > { %v970_v43 = vpop.f32.mrf.mxu0  ;;  %v1017_v29 = vadd.f32 %v1008_v40, %v844_v11 }
 0x186   : > { %v979_v34 = vadd.f32 %v970_v43, %v806_v13 }
 0x188   : > { %2348 = vmatmul.msk.bf16.gmra.mxu3 %vm281_vm2, %v1612_v44 }
 0x18b   : > { %v878_v46 = vpop.f32.mrf.mxu2  ;;  %v914_v48 = vpop.f32.mrf.mxu3 }
 0x18c   : > { %v884_v49 = vadd.f32 %v878_v46, %v711_v50  ;;  %v921_v51 = vadd.f32 %v914_v48, %v748_v16  ;;  %v1011_v53 = vpop.f32.mrf.mxu1  ;;  %v1776_v50 = vpop.permute.xlu0 %1775 }
 0x18d   : > { %v973_v58 = vpop.f32.mrf.mxu0  ;;  %v1018_v59 = vadd.f32 %v1011_v53, %v845_v23  ;;  %v1814_v17 = vpop.permute.xlu1 %1813 }
 0x18e   : > { %v980_v60 = vadd.f32 %v973_v58, %v807_v21 }
 0x18f   : > { %2362 = vmatmul.msk.bf16.gmra.mxu1 %vm281_vm2, %v1738_v57 }
 0x190   : > { %2359 = vmatmul.msk.bf16.gmra.mxu0 %vm281_vm2, %v2887_v4  ;;  %2364 = vmatmul.msk.bf16.vlgmr.msra.gmra.mxu2 %vm281_vm2, %v1774_v39 }
 0x193   : > { %v916_v62 = vpop.f32.mrf.mxu3  ;;  %v1044_v0 = vpop.f32.mrf.mxu2 }
 0x194   : > { %v922_v37 = vadd.f32 %v916_v62, %v749_v24  ;;  %v1054_v1 = vadd.f32 %v1044_v0, %v881_v25  ;;  %v1013_v52 = vpop.f32.mrf.mxu1 }
 0x195   : > { %v975_v2 = vpop.f32.mrf.mxu0  ;;  %v1019_v3 = vadd.f32 %v1013_v52, %v846_v27 }
 0x196   : > { %v981_v6 = vadd.f32 %v975_v2, %v808_v30 }
 0x198   : > { %2367 = vmatmul.msk.bf16.vlgmr.msra.gmra.mxu3 %vm281_vm2, %v1812_v28 }
 0x19b   : > { %v1046_v8 = vpop.f32.mrf.mxu2  ;;  %v1082_v11 = vpop.f32.mrf.mxu3 }
 0x19c   : > { %v1055_v12 = vadd.f32 %v1046_v8, %v882_v63  ;;  %v1092_v13 = vadd.f32 %v1082_v11, %v919_v31  ;;  %v1208_v61 = vpop.f32.mrf.mxu1 }
 0x19d   : > { %v1170_v15 = vpop.f32.mrf.mxu0  ;;  %v1218_v4 = vadd.f32 %v1208_v61, %v1016_v7 }
 0x19e   : > { %v1180_v16 = vadd.f32 %v1170_v15, %v978_v26 }
 0x1a0   : > { %2365 = vmatmul.msk.bf16.gmra.mxu2 %vm281_vm2, %v1776_v50 }
 0x1a3   : > { %v1049_v18 = vpop.f32.mrf.mxu2  ;;  %v1084_v54 = vpop.f32.mrf.mxu3 }
 0x1a4   : > { %v1056_v55 = vadd.f32 %v1049_v18, %v883_v19  ;;  %v1093_v23 = vadd.f32 %v1084_v54, %v920_v41  ;;  %v1210_v20 = vpop.f32.mrf.mxu1 }
 0x1a5   : > { %v1172_v21 = vpop.f32.mrf.mxu0  ;;  %v1219_v45 = vadd.f32 %v1210_v20, %v1017_v29 }
 0x1a6   : > { %v1181_v22 = vadd.f32 %v1172_v21, %v979_v34 }
 0x1a8   : > { %2368 = vmatmul.msk.bf16.gmra.mxu3 %vm281_vm2, %v1814_v17 }
 0x1ab   : > { %v1051_v56 = vpop.f32.mrf.mxu2  ;;  %v1087_v24 = vpop.f32.mrf.mxu3 }
 0x1ac   : > { %v1057_v25 = vadd.f32 %v1051_v56, %v884_v49  ;;  %v1094_v47 = vadd.f32 %v1087_v24, %v921_v51  ;;  %v1213_v33 = vpop.f32.mrf.mxu1 }
 0x1ad   : > { %v1175_v27 = vpop.f32.mrf.mxu0  ;;  %v1220_v10 = vadd.f32 %v1213_v33, %v1018_v59 }
 0x1ae   : > { %v1182_v30 = vadd.f32 %v1175_v27, %v980_v60 }
 0x1b3   : > { %v1089_v32 = vpop.f32.mrf.mxu3  ;;  %v1246_v14 = vpop.f32.mrf.mxu2 }
 0x1b4   : > { %v1095_v63 = vadd.f32 %v1089_v32, %v922_v37  ;;  %v1256_v31 = vadd.f32 %v1246_v14, %v1054_v1  ;;  %v1215_v38 = vpop.f32.mrf.mxu1 }
 0x1b5   : > { %v1177_v42 = vpop.f32.mrf.mxu0  ;;  %v3012_v5 = vadd.f32 %v1215_v38, %v1019_v3 }
 0x1b6   : > { %v3014_v7 = vadd.f32 %v1177_v42, %v981_v6 }
 0x1bb   : > { %v1248_v9 = vpop.f32.mrf.mxu2  ;;  %v1284_v26 = vpop.f32.mrf.mxu3 }
 0x1bc   : > { %v1257_v35 = vadd.f32 %v1248_v9, %v1055_v12  ;;  %v1294_v36 = vadd.f32 %v1284_v26, %v1092_v13  ;;  %v1382_v19 = vpop.f32.mrf.mxu1 }
 0x1bd   : > { %v1344_v41 = vpop.f32.mrf.mxu0  ;;  %v1392_v40 = vadd.f32 %v1382_v19, %v1218_v4 }
 0x1be   : > { %v1354_v43 = vadd.f32 %v1344_v41, %v1180_v16 }
 0x1c3   : > { %v1251_v29 = vpop.f32.mrf.mxu2  ;;  %v1286_v44 = vpop.f32.mrf.mxu3 }
 0x1c4   : > { %v1258_v34 = vadd.f32 %v1251_v29, %v1056_v55  ;;  %v1295_v46 = vadd.f32 %v1286_v44, %v1093_v23  ;;  %v1384_v48 = vpop.f32.mrf.mxu1 }
 0x1c5   : > { %v1346_v49 = vpop.f32.mrf.mxu0  ;;  %v1393_v51 = vadd.f32 %v1384_v48, %v1219_v45 }
 0x1c6   : > { %v1355_v53 = vadd.f32 %v1346_v49, %v1181_v22 }
 0x1cb   : > { %v1253_v57 = vpop.f32.mrf.mxu2  ;;  %v1289_v58 = vpop.f32.mrf.mxu3 }
 0x1cc   : > { %v3016_v59 = vadd.f32 %v1253_v57, %v1057_v25  ;;  %v1296_v39 = vadd.f32 %v1289_v58, %v1094_v47  ;;  %v1387_v60 = vpop.f32.mrf.mxu1 }
 0x1cd   : > { %v1349_v62 = vpop.f32.mrf.mxu0  ;;  %v1394_v0 = vadd.f32 %v1387_v60, %v1220_v10 }
 0x1ce   : > { %v1356_v37 = vadd.f32 %v1349_v62, %v1182_v30 }
 0x1d3   : > { %v1291_v1 = vpop.f32.mrf.mxu3  ;;  %v1420_v52 = vpop.f32.mrf.mxu2 }
 0x1d4   : > { %v3018_v2 = vadd.f32 %v1291_v1, %v1095_v63  ;;  %v1430_v3 = vadd.f32 %v1420_v52, %v1256_v31  ;;  %v1389_v28 = vpop.f32.mrf.mxu1 }
 0x1d5   : > { %v1351_v6 = vpop.f32.mrf.mxu0  ;;  %v1395_v49 = vadd.f32 %v1389_v28, %v3012_v5 }
 0x1db   : > { %v1422_v8 = vpop.f32.mrf.mxu2  ;;  %v1458_v11 = vpop.f32.mrf.mxu3 }
 0x1dc   : > { %v1431_v12 = vadd.f32 %v1422_v8, %v1257_v35  ;;  %v1468_v13 = vadd.f32 %v1458_v11, %v1294_v36  ;;  %v1555_v61 = vpop.f32.mrf.mxu1 }
 0x1dd   : > { %v1517_v15 = vpop.f32.mrf.mxu0  ;;  %v1565_v47 = vadd.f32 %v1555_v61, %v1392_v40 }
 0x1de   : > { %v1527_v10 = vadd.f32 %v1517_v15, %v1354_v43 }
 0x1e3   : > { %v1425_v4 = vpop.f32.mrf.mxu2  ;;  %v1460_v50 = vpop.f32.mrf.mxu3 }
 0x1e4   : > { %v1432_v16 = vadd.f32 %v1425_v4, %v1258_v34  ;;  %v1469_v18 = vadd.f32 %v1460_v50, %v1295_v46  ;;  %v1557_v54 = vpop.f32.mrf.mxu1 }
 0x1e5   : > { %v1519_v55 = vpop.f32.mrf.mxu0  ;;  %v1566_v31 = vadd.f32 %v1557_v54, %v1393_v51  ;;  %v1357_v51 = vadd.f32 %v1351_v6, %v3014_v7 }
 0x1e6   : > { %v1528_v9 = vadd.f32 %v1519_v55, %v1355_v53 }
 0x1eb   : > { %v1427_v23 = vpop.f32.mrf.mxu2  ;;  %v1463_v20 = vpop.f32.mrf.mxu3 }
 0x1ec   : > { %v1470_v21 = vadd.f32 %v1463_v20, %v1296_v39  ;;  %v1560_v45 = vpop.f32.mrf.mxu1  ;;  %v1433_v55 = vadd.f32 %v1427_v23, %v3016_v59 }
 0x1ed   : > { %v1522_v17 = vpop.f32.mrf.mxu0  ;;  %v1567_v41 = vadd.f32 %v1560_v45, %v1394_v0 }
 0x1ee   : > { %v1529_v43 = vadd.f32 %v1522_v17, %v1356_v37 }
 0x1f3   : > { %v1465_v22 = vpop.f32.mrf.mxu3  ;;  %v1593_v56 = vpop.f32.mrf.mxu2 }
 0x1f4   : > { %v1562_v24 = vpop.f32.mrf.mxu1  ;;  %v1603_v53 = vadd.f32 %v1593_v56, %v1430_v3 }
 0x1f5   : > { %v1524_v25 = vpop.f32.mrf.mxu0  ;;  %v1568_v57 = vadd.f32 %v1562_v24, %v1395_v49  ;;  %v1471_v24 = vadd.f32 %v1465_v22, %v3018_v2 }
 0x1f6   : > { %v1530_v60 = vadd.f32 %v1524_v25, %v1357_v51 }
 0x1fb   : > { %v1595_v33 = vpop.f32.mrf.mxu2  ;;  %v1631_v27 = vpop.f32.mrf.mxu3 }
 0x1fc   : > { %v1757_v30 = vpop.f32.mrf.mxu1  ;;  %v1604_v8 = vadd.f32 %v1595_v33, %v1431_v12  ;;  %v1641_v11 = vadd.f32 %v1631_v27, %v1468_v13 }
 0x1fd   : > { %v1719_v32 = vpop.f32.mrf.mxu0  ;;  %v3020_v14 = vadd.f32 %v1757_v30, %v1565_v47 }
 0x1fe   : > { %v3022_v63 = vadd.f32 %v1719_v32, %v1527_v10 }
 0x203   : > { %v1598_v38 = vpop.f32.mrf.mxu2  ;;  %v1633_v42 = vpop.f32.mrf.mxu3 }
 0x204   : > { %v1759_v26 = vpop.f32.mrf.mxu1  ;;  %v1605_v7 = vadd.f32 %v1598_v38, %v1432_v16  ;;  %v1642_v3 = vadd.f32 %v1633_v42, %v1469_v18 }
 0x205   : > { %v1721_v35 = vpop.f32.mrf.mxu0  ;;  %v3024_v36 = vadd.f32 %v1759_v26, %v1566_v31 }
 0x206   : > { %v3026_v19 = vadd.f32 %v1721_v35, %v1528_v9 }
 0x20b   : > { %v1600_v40 = vpop.f32.mrf.mxu2  ;;  %v1636_v29 = vpop.f32.mrf.mxu3 }
 0x20c   : > { %v1762_v44 = vpop.f32.mrf.mxu1  ;;  %v1606_v20 = vadd.f32 %v1600_v40, %v1433_v55  ;;  %v1643_v45 = vadd.f32 %v1636_v29, %v1470_v21 }
 0x20d   : > { %v1724_v34 = vpop.f32.mrf.mxu0  ;;  %v1769_v46 = vadd.f32 %v1762_v44, %v1567_v41 }
 0x20e   : > { %v3028_v48 = vadd.f32 %v1724_v34, %v1529_v43 }
 0x213   : > { %v1638_v58 = vpop.f32.mrf.mxu3  ;;  %v1795_v39 = vpop.f32.mrf.mxu2 }
 0x214   : > { %v3032_v62 = vadd.f32 %v1795_v39, %v1603_v53  ;;  %v1764_v0 = vpop.f32.mrf.mxu1  ;;  %v1644_v25 = vadd.f32 %v1638_v58, %v1471_v24 }
 0x215   : > { %v1726_v1 = vpop.f32.mrf.mxu0  ;;  %v1770_v52 = vadd.f32 %v1764_v0, %v1568_v57 }
 0x216   : > { %v3034_v37 = vadd.f32 %v1726_v1, %v1530_v60 }
 0x21b   : > { %v1797_v61 = vpop.f32.mrf.mxu2  ;;  %v1833_v15 = vpop.f32.mrf.mxu3 }
 0x21c   : > { %v3036_v4 = vadd.f32 %v1797_v61, %v1604_v8  ;;  %v1843_v5 = vadd.f32 %v1833_v15, %v1641_v11 }
 0x223   : > { %v1800_v28 = vpop.f32.mrf.mxu2  ;;  %v1835_v6 = vpop.f32.mrf.mxu3 }
 0x224   : > { %v3038_v50 = vadd.f32 %v1800_v28, %v1605_v7  ;;  %v1844_v54 = vadd.f32 %v1835_v6, %v1642_v3 }
 0x22b   : > { %v1802_v17 = vpop.f32.mrf.mxu2  ;;  %v1838_v56 = vpop.f32.mrf.mxu3 }
 0x22c   : > { %v1808_v12 = vadd.f32 %v1802_v17, %v1606_v20  ;;  %v1845_v13 = vadd.f32 %v1838_v56, %v1643_v45 }
 0x230   : > { %1850 = sbr.rel (%p2369_p7) target bundleno = 567 (0x237), region = 36 }
 0x233   : > { %v1840_v47 = vpop.f32.mrf.mxu3 }
 0x234   : > { %v1846_v33 = vadd.f32 %v1840_v47, %v1644_v25 }
 0x235   : > { %vm1851_vm3 = vcmask 57344   ;;  %v2475_v16 = vmov 0.0  }
 0x236   : > { %1852 = vst.msk [vmem:[%s2541_s29] sm:$0x1] %vm1851_vm3, %v2475_v16 }
 0x237 PF: > { %v2428_v59 = vld [vmem:[%s3167_s2] ss:$0 sm:$0xff]  ;;  %vm1869_vm4 = vcmask 11264   ;;  %vm1925_vm5 = vcmask 27664   ;;  %vm1889_vm6 = vcmask 8192   ;;  %vm1985_vm7 = vcmask 44064  }
 0x238   : > { %v2429_v18 = vld [vmem:[%s3167_s2] ss:$0 sm:$0xff]  ;;  %2014 = vrot.lane.b32.xlu1 %v2428_v59, %s2473_s13  ;;  %s2477_s13 = smov 4   ;;  %vm1949_vm8 = vcmask 24592   ;;  %vm2045_vm9 = vcmask 60464   ;;  %vm2009_vm10 = vcmask 40992  }
 0x239   : > { %1894 = vrot.lane.b32.xlu0 %v2429_v18, %s2472_s12  ;;  %v2430_v2 = vld [vmem:[%s3167_s2] ss:$0 sm:$0xff]  ;;  %s2476_s12 = smov 2   ;;  %vm2069_vm11 = vcmask 57392  }
 0x241   : > { %1954 = vrot.lane.b32.xlu0 %v2430_v2, %s2474_s24  ;;  %s2478_s24 = smov 6  }
 0x2aa   : > { %v2015_v23 = vpop.permute.xlu1 %2014 }
 0x2ab   : > { %v2017_v21 = vadd.f32 %v2015_v23, %v1843_v5  ;;  %v2018_v22 = vadd.f32 %v2015_v23, %v1844_v54  ;;  %v2019_v27 = vadd.f32 %v2015_v23, %v1845_v13  ;;  %v2020_v10 = vadd.f32 %v2015_v23, %v1846_v33  ;;  %v1895_v30 = vpop.permute.xlu0 %1894 }
 0x2ac   : > { %v1898_v32 = vadd.f32 %v1895_v30, %v3024_v36  ;;  %v1899_v31 = vadd.f32 %v1895_v30, %v1769_v46  ;;  %v1900_v38 = vadd.f32 %v1895_v30, %v1770_v52  ;;  %v1897_v42 = vadd.f32 %v1895_v30, %v3020_v14 }
 0x2ad   : > { %v3058_v9 = vmax.f32 %v2017_v21, 0.0  ;;  %v3060_v26 = vmax.f32 %v2018_v22, 0.0  ;;  %v3062_v35 = vmax.f32 %v2019_v27, 0.0  ;;  %v3064_v41 = vmax.f32 %v2020_v10, 0.0 }
 0x2ae   : > { %v1903_v40 = vmax.f32 %v1899_v31, 0.0  ;;  %v1902_v29 = vmax.f32 %v1898_v32, 0.0  ;;  %v1901_v43 = vmax.f32 %v1897_v42, 0.0  ;;  %v1904_v51 = vmax.f32 %v1900_v38, 0.0 }
 0x2af   : > { %v2051_v44 = vsel %vm281_vm2, %v3058_v9, 0.0  ;;  %v2052_v36 = vsel %vm281_vm2, %v3060_v26, 0.0  ;;  %v2054_v14 = vsel %vm281_vm2, %v3062_v35, 0.0  ;;  %v2056_v53 = vsel %vm281_vm2, %v3064_v41, 0.0 }
 0x2b0   : > { %v2053_v34 = vadd.f32 %v2052_v36, %v2051_v44  ;;  %v1907_v46 = vpack.c.bf16 %v1903_v40, %v1903_v40  ;;  %v1906_v49 = vpack.c.bf16 %v1902_v29, %v1902_v29  ;;  %v1905_v57 = vpack.c.bf16 %v1901_v43, %v1901_v43 }
 0x2b1   : > { %v1931_v58 = vsel %vm281_vm2, %v1901_v43, 0.0  ;;  %v1932_v39 = vsel %vm281_vm2, %v1902_v29, 0.0  ;;  %v1934_v1 = vsel %vm281_vm2, %v1903_v40, 0.0  ;;  %v1936_v3 = vsel %vm281_vm2, %v1904_v51, 0.0 }
 0x2b2   : > { %v2055_v60 = vadd.f32 %v2054_v14, %v2053_v34  ;;  %1917 = vrot.lane.b32.xlu1 %v1907_v46, %s2476_s12  ;;  %1915 = vrot.lane.b32.xlu0 %v1906_v49, %s2476_s12  ;;  %v1933_v0 = vadd.f32 %v1932_v39, %v1931_v58  ;;  %v1908_v24 = vpack.c.bf16 %v1904_v51, %v1904_v51  ;;  %v2431_v46 = vld [vmem:[%s3167_s2] ss:$0 sm:$0xff] }
 0x2b3   : > { %1913 = vrot.lane.b32.xlu2 %v1905_v57, %s2476_s12  ;;  %v1955_v52 = vpop.permute.xlu0 %1954  ;;  %v2026_v43 = vpack.c.bf16 %v3060_v26, %v3060_v26  ;;  %v2025_v36 = vpack.c.bf16 %v3058_v9, %v3058_v9  ;;  %v2028_v34 = vpack.c.bf16 %v3064_v41, %v3064_v41  ;;  %v2027_v26 = vpack.c.bf16 %v3062_v35, %v3062_v35 }
 0x2b4   : > { %v2057_v8 = vadd.f32 %v2056_v53, %v2055_v60  ;;  %v1935_v11 = vadd.f32 %v1934_v1, %v1933_v0  ;;  %v1957_v61 = vadd.f32 %v1955_v52, %v3032_v62  ;;  %v1958_v15 = vadd.f32 %v1955_v52, %v3036_v4 }
 0x2b5   : > { %v1959_v5 = vadd.f32 %v1955_v52, %v3038_v50  ;;  %v1960_v7 = vadd.f32 %v1955_v52, %v1808_v12  ;;  %v1857_v49 = vadd.f32 %v2431_v46, %v3022_v63  ;;  %v1860_v53 = vadd.f32 %v2431_v46, %v3034_v37 }
 0x2b6   : > { %v1961_v28 = vmax.f32 %v1957_v61, 0.0  ;;  %v1937_v6 = vadd.f32 %v1936_v3, %v1935_v11  ;;  %v2058_v54 = vrot.slane %v2057_v8, 4  ;;  %v1962_v55 = vmax.f32 %v1958_v15, 0.0 }
 0x2b7   : > { %v1964_v20 = vmax.f32 %v1960_v7, 0.0  ;;  %v1963_v45 = vmax.f32 %v1959_v5, 0.0  ;;  %v1861_v9 = vmax.f32 %v1857_v49, 0.0  ;;  %v1864_v57 = vmax.f32 %v1860_v53, 0.0 }
 0x2b8   : > { %v1991_v17 = vsel %vm281_vm2, %v1961_v28, 0.0  ;;  %v1938_v56 = vrot.slane %v1937_v6, 4  ;;  %v2059_v13 = vadd.f32 %v2058_v54, %v2057_v8  ;;  %v1992_v4 = vsel %vm281_vm2, %v1962_v55, 0.0  ;;  %v1874_v54 = vld [vmem:[%s2541_s29] sm:$0x1] }
 0x2b9   : > { %v1967_v25 = vpack.c.bf16 %v1963_v45, %v1963_v45  ;;  %v1994_v62 = vsel %vm281_vm2, %v1963_v45, 0.0  ;;  %v1993_v47 = vadd.f32 %v1992_v4, %v1991_v17  ;;  %v1996_v33 = vsel %vm281_vm2, %v1964_v20, 0.0 }
 0x2ba   : > { %v1939_v50 = vadd.f32 %v1938_v56, %v1937_v6  ;;  %v2060_v12 = vrot.slane %v2059_v13, 2  ;;  %v1966_v22 = vpack.c.bf16 %v1962_v55, %v1962_v55  ;;  %v1965_v29 = vpack.c.bf16 %v1961_v28, %v1961_v28 }
 0x2bb   : > { %1919 = vrot.lane.b32.xlu2 %v1908_v24, %s2476_s12  ;;  %1977 = vrot.lane.b32.xlu0 %v1967_v25, %s2477_s13  ;;  %v1995_v18 = vadd.f32 %v1994_v62, %v1993_v47  ;;  %v1968_v14 = vpack.c.bf16 %v1964_v20, %v1964_v20  ;;  %v1865_v51 = vpack.c.bf16 %v1861_v9, %v1861_v9  ;;  %v1875_v58 = vsel %vm281_vm2, %v1861_v9, 0.0 }
 0x2bc   : > { %v1940_v16 = vrot.slane %v1939_v50, 2  ;;  %v2061_v59 = vadd.f32 %v2060_v12, %v2059_v13  ;;  %v1868_v41 = vpack.c.bf16 %v1864_v57, %v1864_v57  ;;  %v1858_v35 = vadd.f32 %v2431_v46, %v3026_v19 }
 0x2bd   : > { %v1997_v21 = vadd.f32 %v1996_v33, %v1995_v18  ;;  %1870 = vst.msk [vmem:[%s2549_s10] sm:$0xf] %vm1869_vm4, %v1865_v51  ;;  %v1859_v39 = vadd.f32 %v2431_v46, %v3028_v48  ;;  %v1880_v52 = vsel %vm281_vm2, %v1864_v57, 0.0 }
 0x2be   : > { %v1941_v2 = vadd.f32 %v1940_v16, %v1939_v50  ;;  %v2062_v23 = vrot.slane %v2061_v59, 1  ;;  %1873 = vst.msk [vmem:[%s2549_s10 + $0xc] sm:$0xf] %vm1869_vm4, %v1868_v41  ;;  %v1862_v63 = vmax.f32 %v1858_v35, 0.0 }
 0x2bf   : > { %v1998_v30 = vrot.slane %v1997_v21, 4  ;;  %v1863_v60 = vmax.f32 %v1859_v39, 0.0 }
 0x2c0   : > { %v1942_v27 = vrot.slane %v1941_v2, 1  ;;  %v2063_v10 = vadd.f32 %v2062_v23, %v2061_v59  ;;  %v1876_v0 = vsel %vm281_vm2, %v1862_v63, 0.0  ;;  %v1866_v15 = vpack.c.bf16 %v1862_v63, %v1862_v63 }
 0x2c1   : > { %v1999_v31 = vadd.f32 %v1998_v30, %v1997_v21  ;;  %v1877_v1 = vadd.f32 %v1876_v0, %v1875_v58  ;;  %v1878_v37 = vsel %vm281_vm2, %v1863_v60, 0.0  ;;  %v1867_v19 = vpack.c.bf16 %v1863_v60, %v1863_v60 }
 0x2c2   : > { %v1943_v32 = vadd.f32 %v1942_v27, %v1941_v2  ;;  %1871 = vst.msk [vmem:[%s2549_s10 + $0x4] sm:$0xf] %vm1869_vm4, %v1866_v15 }
 0x2c3   : > { %2065 = vrot.lane.b32.xlu0 %v2063_v10, %s2478_s24  ;;  %1975 = vrot.lane.b32.xlu2 %v1966_v22, %s2477_s13  ;;  %v2000_v38 = vrot.slane %v1999_v31, 2  ;;  %v1879_v8 = vadd.f32 %v1878_v37, %v1877_v1  ;;  %1872 = vst.msk [vmem:[%s2549_s10 + $0x8] sm:$0xf] %vm1869_vm4, %v1867_v19 }
 0x2c4   : > { %1945 = vrot.lane.b32.xlu1 %v1943_v32, %s2476_s12 }
 0x2c5   : > { %v2001_v42 = vadd.f32 %v2000_v38, %v1999_v31  ;;  %v1881_v11 = vadd.f32 %v1880_v52, %v1879_v8 }
 0x2c7   : > { %v2002_v40 = vrot.slane %v2001_v42, 1  ;;  %v1882_v61 = vrot.slane %v1881_v11, 4 }
 0x2c9   : > { %v2003_v44 = vadd.f32 %v2002_v40, %v2001_v42  ;;  %v1883_v5 = vadd.f32 %v1882_v61, %v1881_v11 }
 0x2cb   : > { %2035 = vrot.lane.b32.xlu0 %v2026_v43, %s2478_s24  ;;  %2005 = vrot.lane.b32.xlu2 %v2003_v44, %s2477_s13  ;;  %v1884_v48 = vrot.slane %v1883_v5, 2 }
 0x2cc   : > { %1973 = vrot.lane.b32.xlu1 %v1965_v29, %s2477_s13 }
 0x2cd   : > { %v1885_v7 = vadd.f32 %v1884_v48, %v1883_v5 }
 0x2cf   : > { %v1886_v3 = vrot.slane %v1885_v7, 1 }
 0x2d1   : > { %v1887_v28 = vadd.f32 %v1886_v3, %v1885_v7 }
 0x2d3   : > { %2033 = vrot.lane.b32.xlu2 %v2025_v36, %s2478_s24  ;;  %v1888_v55 = vadd.f32 %v1887_v28, %v1874_v54 }
 0x2d4   : > { %1979 = vrot.lane.b32.xlu1 %v1968_v14, %s2477_s13 }
 0x2d5   : > { %1890 = vst.msk [vmem:[%s2541_s29] sm:$0x1] %vm1889_vm6, %v1888_v55 }
 0x2db   : > { %2039 = vrot.lane.b32.xlu2 %v2028_v34, %s2478_s24 }
 0x2dc   : > { %2037 = vrot.lane.b32.xlu1 %v2027_v26, %s2478_s24  ;;  %v1930_v25 = vld [vmem:[%s2541_s29] sm:$0x1] }
 0x30d   : > { %v1914_v6 = vpop.permute.xlu2 %1913 }
 0x30e   : > { %1926 = vst.msk [vmem:[%s2549_s10] sm:$0xf] %vm1925_vm5, %v1914_v6 }
 0x315   : > { %v1920_v20 = vpop.permute.xlu2 %1919 }
 0x316   : > { %1929 = vst.msk [vmem:[%s2549_s10 + $0xc] sm:$0xf] %vm1925_vm5, %v1920_v20 }
 0x31d   : > { %v1976_v56 = vpop.permute.xlu2 %1975 }
 0x324   : > { %v1918_v45 = vpop.permute.xlu1 %1917  ;;  %v1916_v17 = vpop.permute.xlu0 %1915 }
 0x325   : > { %1928 = vst.msk [vmem:[%s2549_s10 + $0x8] sm:$0xf] %vm1925_vm5, %v1918_v45  ;;  %v2006_v24 = vpop.permute.xlu2 %2005 }
 0x326   : > { %1927 = vst.msk [vmem:[%s2549_s10 + $0x4] sm:$0xf] %vm1925_vm5, %v1916_v17 }
 0x327   : > { %1987 = vst.msk [vmem:[%s2549_s10 + $0x4] sm:$0xf] %vm1985_vm7, %v1976_v56 }
 0x32d   : > { %v1978_v13 = vpop.permute.xlu0 %1977  ;;  %v2034_v12 = vpop.permute.xlu2 %2033 }
 0x32e   : > { %1988 = vst.msk [vmem:[%s2549_s10 + $0x8] sm:$0xf] %vm1985_vm7, %v1978_v13 }
 0x335   : > { %v2066_v62 = vpop.permute.xlu0 %2065  ;;  %v2040_v2 = vpop.permute.xlu2 %2039 }
 0x336   : > { %v1946_v4 = vpop.permute.xlu1 %1945 }
 0x337   : > { %v1948_v50 = vadd.f32 %v1946_v4, %v1930_v25 }
 0x339   : > { %1950 = vst.msk [vmem:[%s2541_s29] sm:$0x1] %vm1949_vm8, %v1948_v50 }
 0x33d   : > { %v2036_v47 = vpop.permute.xlu0 %2035 }
 0x33e   : > { %v1974_v33 = vpop.permute.xlu1 %1973  ;;  %2047 = vst.msk [vmem:[%s2549_s10 + $0x4] sm:$0xf] %vm2045_vm9, %v2036_v47 }
 0x33f   : > { %1986 = vst.msk [vmem:[%s2549_s10] sm:$0xf] %vm1985_vm7, %v1974_v33 }
 0x340   : > { %v1990_v16 = vld [vmem:[%s2541_s29] sm:$0x1]  ;;  %2046 = vst.msk [vmem:[%s2549_s10] sm:$0xf] %vm2045_vm9, %v2034_v12 }
 0x341   : > { %v2008_v59 = vadd.f32 %v2006_v24, %v1990_v16 }
 0x343   : > { %2010 = vst.msk [vmem:[%s2541_s29] sm:$0x1] %vm2009_vm10, %v2008_v59 }
 0x346   : > { %v1980_v18 = vpop.permute.xlu1 %1979 }
 0x347   : > { %1989 = vst.msk [vmem:[%s2549_s10 + $0xc] sm:$0xf] %vm1985_vm7, %v1980_v18 }
 0x348   : > { %2049 = vst.msk [vmem:[%s2549_s10 + $0xc] sm:$0xf] %vm2045_vm9, %v2040_v2 }
 0x34a   : > { %v2050_v23 = vld [vmem:[%s2541_s29] sm:$0x1] }
 0x34b   : > { %v2068_v21 = vadd.f32 %v2066_v62, %v2050_v23 }
 0x34d   : > { %2070 = vst.msk [vmem:[%s2541_s29] sm:$0x1] %vm2069_vm11, %v2068_v21 }
 0x34e   : > { %v2038_v22 = vpop.permute.xlu1 %2037 }
 0x34f   : > { %2048 = vst.msk [vmem:[%s2549_s10 + $0x8] sm:$0xf] %vm2045_vm9, %v2038_v22 }
 0x350 PF: > { %s15_s19 = sadd.s32 1, %s2470_s19   ;;  %s3170_s15 = smov %s2462_s17 }
 0x351   : > { %p12_p8 = scmp.ge.s32.totalorder %s15_s19, 6   ;;  %s3171_s16 = smov %s2466_s18 }
 0x352   : > { %s3172_s17 = smov %s3175_s20  ;;  %s3173_s18 = smov %s3179_s21 }
 0x353   :  { %14 = sbr.rel (!%p12_p8) target bundleno = 3 (0x3), region = 119 }

// kernel: _lambda_.13
= control target key start
LH: loop header
LB: loop body
LE: loop exit
PB: predicated region body
PF: predicated region fallthrough
CT: control target
= control target key end

     0   :  { %s2521_s15 = smov 0   ;;  %s2523_s16 = smov 0   ;;  %s3252_s0 = inlined_call_operand.vmem [shape: bf16[2,1,10,10,8], index: 0, kind: input, shape index: {}]   ;;  %s3253_s1 = inlined_call_operand.vmem [shape: bf16[9,4,2,2], index: 1, kind: input, shape index: {}]   ;;  %s3254_s2 = inlined_call_operand.vmem [shape: f32[1,8], index: 2, kind: input, shape index: {}]   ;;  %s3255_s3 = inlined_call_operand.vmem [shape: bf16[2,64,8], index: 3, kind: output, shape index: {0}]   ;;  %s3256_s4 = inlined_call_operand.vmem [shape: f32[2,1,8], index: 4, kind: output, shape index: {1}]  }
   0x1   :  { %s2525_s17 = smov 0   ;;  %s2527_s18 = smov 0  }
   0x2   :  { %s2529_s19 = smov 0  }
   0x3 LB: > { %s24_s20 = sadd.s32 1, %s2479_s17  ;;  %s27_s21 = sadd.s32 1, %s2483_s18  ;;  %s2487_s19 = sphi %s2529_s19, %s15_s19   ;;  %s2483_s18 = sphi %s2527_s18, %s3260_s18   ;;  %s2479_s17 = sphi %s2525_s17, %s3259_s17   ;;  %s2475_s16 = sphi %s2523_s16, %s3258_s16   ;;  %s2471_s15 = sphi %s2521_s15, %s3257_s15  }
   0x4   : > { %p25_p0 = scmp.ge.s32.totalorder %s24_s20, 2  ;;  %p2239_p1 = scmp.ge.s32.totalorder %s2487_s19, 1 }
   0x5   : > { %p179_p2 = scmp.lt.s32.totalorder %s2487_s19, 5 }
   0x6   : > { %s3262_s20 = smov (%p25_p0, %s24_s20), 0  ;;  %s3264_s21 = smov (!%p25_p0, %s27_s21), %s2483_s18 }
   0x7   : > { %p180_p3 = pnand %p2239_p1, %p179_p2  ;;  %p29_p4 = scmp.ge.s32.totalorder %s3264_s21, 2 }
   0x8   : > { %p212_p5 = scmp.lt.s32.totalorder (!%p180_p3), %s2475_s16, 1  ;;  %s2241_s22 = sshll.u32 (!%p180_p3), %s2471_s15, 2 }
   0x9   : > { %s3266_s21 = smov (%p29_p4, %s3264_s21), 0  ;;  %183 = sbr.rel (%p180_p3) target bundleno = 853 (0x355), region = 32 }
   0xa   : > { %p220_p6 = scmp.lt.s32.totalorder (!%p180_p3), %s2241_s22, 7  ;;  %s2394_s23 = sshll.u32 (!%p180_p3), %s2471_s15, 5 }
   0xb   : > { %s2489_s12 = smov (!%p180_p3), 126   ;;  %s2490_s13 = smov (!%p180_p3), 122  }
   0xc   : > { %p2390_p7 = scmp.ne.s32.totalorder (!%p180_p3), %s2471_s15, 0 }
   0xe   : > { %s3268_s16 = smov (!%p212_p5, %s2475_s16), 1  ;;  %s3270_s22 = smov (!%p220_p6, %s2241_s22), 7  ;;  %vm270_vm0 = vcmask 1046528   ;;  %v2250_v51 = vld [vmem:[%s3253_s1 + $0x4] sm:$0x1]  ;;  %vm310_vm1 = vcmask 1040384  }
   0xf   : > { %s2397_s24 = smul.u32 80, %s3268_s16  ;;  %s2242_s25 = sshll.u32 %s3268_s16, 3  ;;  %v247_v52 = vld [vmem:[%s3253_s1] sm:$0x1]  ;;  %v312_v54 = vsel %vm310_vm1, %v2250_v51, 0  ;;  %vm581_vm2 = vcmask 1045504  }
  0x10   : > { %s223_s26 = sadd.s32 %s2242_s25, %s3270_s22  ;;  %s2558_s29 = scalar_lea.vmem %s3256_s4, %s3268_s16  ;;  %v350_v55 = vsel %vm310_vm1, %v247_v52, 0  ;;  %321 = vmatpush.bf16.msra.mxu0 %v312_v54  ;;  %vm303_vm3 = vcmask 15360   ;;  %v2255_v63 = vld [vmem:[%s3253_s1 + $0x5] sm:$0x1] }
  0x11   : > { %s216_s6 = scalar_lea.vmem %s3252_s0, %s2397_s24  ;;  %s2243_s7 = sshll.u32 %s223_s26, 2  ;;  %359 = vmatpush.bf16.msra.mxu1 %v350_v55  ;;  %v2265_v55 = vld [vmem:[%s3253_s1 + $0x7] sm:$0x1] }
  0x12   : > { %s2566_s10 = scalar_lea.vmem %s3255_s3, %s2243_s7  ;;  %s2568_s11 = scalar_lea.vmem %s216_s6, %s2394_s23 }
  0x13   : > { %v237_v0 = vld [vmem:[%s2568_s11 + $0x10] sm:$0xf]  ;;  %v238_v1 = vld [vmem:[%s2568_s11 + $0x18] sm:$0xf]  ;;  %v2573_v2 = vld [vmem:[%s2568_s11 + $0x14] sm:$0x1] }
  0x14   : > { %v241_v3 = vunpack.c.l.bf16 %v237_v0  ;;  %v242_v4 = vunpack.c.l.bf16 %v238_v1  ;;  %v2576_v5 = vld [vmem:[%s2568_s11 + $0x1c] sm:$0x1]  ;;  %v260_v6 = vunpack.c.l.bf16 %v2573_v2  ;;  %v235_v7 = vld [vmem:[%s2568_s11] sm:$0xf]  ;;  %v236_v9 = vld [vmem:[%s2568_s11 + $0x8] sm:$0xf] }
  0x15   : > { %v261_v8 = vunpack.c.l.bf16 %v2576_v5  ;;  %v239_v10 = vunpack.c.l.bf16 %v235_v7  ;;  %v254_v11 = vld [vmem:[%s2568_s11 + $0x4] sm:$0x1]  ;;  %v255_v12 = vld [vmem:[%s2568_s11 + $0xc] sm:$0x1]  ;;  %v240_v16 = vunpack.c.l.bf16 %v236_v9  ;;  %v569_v48 = vld [vmem:[%s2568_s11] sm:$0xe] }
  0x16   : > { %v277_v13 = vrot.slane %v241_v3, 1  ;;  %v278_v14 = vrot.slane %v260_v6, 1  ;;  %v280_v15 = vrot.slane %v242_v4, 1  ;;  %v258_v18 = vunpack.c.l.bf16 %v254_v11  ;;  %v570_v49 = vld [vmem:[%s2568_s11 + $0x8] sm:$0xe]  ;;  %s2491_s24 = smov 124  }
  0x17   : > { %v281_v17 = vrot.slane %v261_v8, 1  ;;  %v259_v19 = vunpack.c.l.bf16 %v255_v12  ;;  %v271_v20 = vrot.slane %v239_v10, 1  ;;  %v274_v22 = vrot.slane %v240_v16, 1  ;;  %v571_v60 = vld [vmem:[%s2568_s11 + $0x10] sm:$0xe] }
  0x18   : > { %v279_v21 = vsel %vm270_vm0, %v277_v13, %v278_v14  ;;  %v272_v25 = vrot.slane %v258_v18, 1  ;;  %v245_v31 = vpack.c.bf16 %v241_v3, %v241_v3  ;;  %v246_v35 = vpack.c.bf16 %v242_v4, %v242_v4  ;;  %v572_v61 = vld [vmem:[%s2568_s11 + $0x18] sm:$0xe] }
  0x19   : > { %v282_v23 = vsel %vm270_vm0, %v280_v15, %v281_v17  ;;  %v289_v24 = vpack.c.bf16 %v279_v21, %v279_v21  ;;  %v275_v26 = vrot.slane %v259_v19, 1  ;;  %v243_v36 = vpack.c.bf16 %v239_v10, %v239_v10 }
  0x1a   : > { %v290_v27 = vpack.c.bf16 %v282_v23, %v282_v23  ;;  %v273_v29 = vsel %vm270_vm0, %v271_v20, %v272_v25  ;;  %v244_v40 = vpack.c.bf16 %v240_v16, %v240_v16  ;;  %v339_v42 = vunpack.c.l.b16 %v245_v31 }
  0x1b   : > { %v299_v28 = vunpack.c.l.b16 %v289_v24  ;;  %v276_v30 = vsel %vm270_vm0, %v274_v22, %v275_v26  ;;  %v287_v33 = vpack.c.bf16 %v273_v29, %v273_v29  ;;  %v340_v43 = vunpack.c.l.b16 %v246_v35  ;;  %v2286_v26 = vld [vmem:[%s2568_s11 + $0x18] sm:$0xf] }
  0x1c   : > { %v300_v32 = vunpack.c.l.b16 %v290_v27  ;;  %v288_v34 = vpack.c.bf16 %v276_v30, %v276_v30  ;;  %v337_v44 = vunpack.c.l.b16 %v243_v36  ;;  %v338_v45 = vunpack.c.l.b16 %v244_v40  ;;  %v2287_v27 = vld [vmem:[%s2568_s11 + $0x20] sm:$0xf]  ;;  %v2300_v40 = vld [vmem:[%s2568_s11 + $0x8] sm:$0xf] }
  0x1d   : > { %v297_v38 = vunpack.c.l.b16 %v287_v33  ;;  %v2598_v46 = vpack.c.b16 %v340_v43, %v339_v42  ;;  %v573_v50 = vunpack.c.l.bf16 %v569_v48  ;;  %v574_v53 = vunpack.c.l.bf16 %v570_v49  ;;  %v2302_v42 = vld [vmem:[%s2568_s11 + $0x10] sm:$0xf]  ;;  %v2690_v43 = vld [vmem:[%s2568_s11 + $0x14] sm:$0x1] }
  0x1e   : > { %v2592_v37 = vpack.c.b16 %v300_v32, %v299_v28  ;;  %v298_v39 = vunpack.c.l.b16 %v288_v34  ;;  %v341_v47 = vpack.c.b16 %v338_v45, %v337_v44  ;;  %v583_v57 = vrot.slane %v258_v18, 2  ;;  %v2285_v18 = vld [vmem:[%s2568_s11 + $0x10] sm:$0xf] }
  0x1f   : > { %v582_v56 = vrot.slane %v573_v50, 2  ;;  %v585_v58 = vrot.slane %v574_v53, 2  ;;  %v586_v59 = vrot.slane %v259_v19, 2  ;;  %v575_v1 = vunpack.c.l.bf16 %v571_v60 }
  0x20   : > { %375 = vrot.lane.b32.xlu1 %v2592_v37, %s2489_s12  ;;  %v301_v41 = vpack.c.b16 %v298_v39, %v297_v38  ;;  %v576_v3 = vunpack.c.l.bf16 %v572_v61  ;;  %2253 = vmatmul.msk.bf16.vlgmr.msra.gmra.mxu1 %vm303_vm3, %v341_v47  ;;  %v384_v4 = vsel %vm310_vm1, %v2255_v63, 0  ;;  %v589_v11 = vrot.slane %v260_v6, 2  ;;  %v2247_v38 = vld [vmem:[%s3253_s1 + $0x1] sm:$0x1] }
  0x21   : > { %v584_v62 = vsel %vm581_vm2, %v582_v56, %v583_v57  ;;  %v587_v0 = vsel %vm581_vm2, %v585_v58, %v586_v59  ;;  %393 = vmatpush.bf16.msra.mxu2 %v384_v4  ;;  %v588_v10 = vrot.slane %v575_v1, 2  ;;  %v592_v13 = vrot.slane %v261_v8, 2  ;;  %v2284_v8 = vld [vmem:[%s2568_s11 + $0x8] sm:$0xf]  ;;  %v2249_v56 = vld [vmem:[%s3253_s1 + $0x3] sm:$0x1] }
  0x22   : > { %373 = vrot.lane.b32.xlu0 %v301_v41, %s2489_s12  ;;  %505 = vrot.lane.b32.xlu2 %v301_v41, %s2490_s13  ;;  %v598_v7 = vpack.c.bf16 %v584_v62, %v584_v62  ;;  %v599_v9 = vpack.c.bf16 %v587_v0, %v587_v0  ;;  %v591_v12 = vrot.slane %v576_v3, 2  ;;  %v768_v21 = vunpack.c.l.bf16 %v2284_v8  ;;  %v2260_v57 = vld [vmem:[%s3253_s1 + $0x6] sm:$0x1]  ;;  %v2248_v62 = vld [vmem:[%s3253_s1 + $0x2] sm:$0x1] }
  0x23   : > { %2251 = vmatmul.msk.bf16.vlgmr.msra.gmra.mxu0 %vm303_vm3, %v301_v41  ;;  %v590_v16 = vsel %vm581_vm2, %v588_v10, %v589_v11  ;;  %v769_v22 = vunpack.c.l.bf16 %v2285_v18  ;;  %v770_v30 = vunpack.c.l.bf16 %v2286_v26  ;;  %v771_v31 = vunpack.c.l.bf16 %v2287_v27  ;;  %v2304_v4 = vld [vmem:[%s2568_s11 + $0x18] sm:$0xf]  ;;  %v2726_v10 = vld [vmem:[%s2568_s11 + $0x24] sm:$0x1]  ;;  %v2320_v27 = vld [vmem:[%s2568_s11 + $0x8] sm:$0xe] }
  0x24   : > { %v608_v14 = vunpack.c.l.b16 %v598_v7  ;;  %v609_v15 = vunpack.c.l.b16 %v599_v9  ;;  %v593_v2 = vsel %vm581_vm2, %v591_v12, %v592_v13  ;;  %v600_v17 = vpack.c.bf16 %v590_v16, %v590_v16  ;;  %v2722_v7 = vld [vmem:[%s2568_s11 + $0x1c] sm:$0x1]  ;;  %v2306_v9 = vld [vmem:[%s2568_s11 + $0x20] sm:$0xf] }
  0x25   : > { %v601_v5 = vpack.c.bf16 %v593_v2, %v593_v2  ;;  %v772_v24 = vpack.c.bf16 %v768_v21, %v768_v21  ;;  %v773_v25 = vpack.c.bf16 %v769_v22, %v769_v22  ;;  %v774_v33 = vpack.c.bf16 %v770_v30, %v770_v30 }
  0x26   : > { %v2640_v6 = vpack.c.b16 %v609_v15, %v608_v14  ;;  %v610_v19 = vunpack.c.l.b16 %v600_v17  ;;  %v775_v34 = vpack.c.bf16 %v771_v31, %v771_v31  ;;  %v416_v39 = vsel %vm310_vm1, %v2247_v38, 0 }
  0x27   : > { %v611_v20 = vunpack.c.l.b16 %v601_v5  ;;  %v782_v28 = vunpack.c.l.b16 %v772_v24  ;;  %v783_v29 = vunpack.c.l.b16 %v773_v25  ;;  %v784_v35 = vunpack.c.l.b16 %v774_v33  ;;  %425 = vmatpush.bf16.msra.mxu3 %v416_v39 }
  0x28   : > { %407 = vrot.lane.b32.xlu1 %v2598_v46, %s2489_s12  ;;  %v785_v36 = vunpack.c.l.b16 %v775_v34  ;;  %v942_v44 = vunpack.c.l.bf16 %v2300_v40  ;;  %v516_v59 = vsel %vm310_vm1, %v2265_v55, 0  ;;  %v548_v60 = vsel %vm310_vm1, %v2249_v56, 0 }
  0x29   : > { %v2654_v23 = vpack.c.b16 %v611_v20, %v610_v19  ;;  %v2664_v32 = vpack.c.b16 %v783_v29, %v782_v28  ;;  %v450_v61 = vsel %vm310_vm1, %v2260_v57, 0  ;;  %525 = vmatpush.bf16.msrb.mxu2 %v516_v59  ;;  %v482_v0 = vsel %vm310_vm1, %v2248_v62, 0  ;;  %v2321_v28 = vld [vmem:[%s2568_s11 + $0x10] sm:$0xe]  ;;  %v2323_v59 = vld [vmem:[%s2568_s11 + $0x20] sm:$0xe] }
  0x2a   : > { %405 = vrot.lane.b32.xlu0 %v341_v47, %s2489_s12  ;;  %537 = vrot.lane.b32.xlu2 %v341_v47, %s2490_s13  ;;  %v958_v48 = vrot.slane %v942_v44, 1  ;;  %v946_v11 = vunpack.c.l.bf16 %v2304_v4  ;;  %v947_v12 = vunpack.c.l.bf16 %v2722_v7  ;;  %v948_v13 = vunpack.c.l.bf16 %v2306_v9  ;;  %v2276_v44 = vld [vmem:[%s3253_s1 + $0xa] sm:$0x1] }
  0x2b   : > { %557 = vmatpush.bf16.msrb.mxu3 %v548_v60  ;;  %459 = vmatpush.bf16.msrb.mxu0 %v450_v61  ;;  %v949_v14 = vunpack.c.l.bf16 %v2726_v10  ;;  %v1140_v29 = vunpack.c.l.bf16 %v2320_v27  ;;  %v1141_v30 = vunpack.c.l.bf16 %v2321_v28  ;;  %v1143_v61 = vunpack.c.l.bf16 %v2323_v59  ;;  %v2338_v10 = vld [vmem:[%s2568_s11 + $0x10] sm:$0xf]  ;;  %v2291_v28 = vld [vmem:[%s3253_s1 + $0xd] sm:$0x1] }
  0x2c   : > { %491 = vmatpush.bf16.msrb.mxu1 %v482_v0  ;;  %v964_v15 = vrot.slane %v946_v11, 1  ;;  %v965_v16 = vrot.slane %v947_v12, 1  ;;  %v967_v2 = vrot.slane %v948_v13, 1 }
  0x2d   : > { %v968_v17 = vrot.slane %v949_v14, 1  ;;  %v1148_v31 = vrot.slane %v1140_v29, 2  ;;  %v1151_v34 = vrot.slane %v1141_v30, 2  ;;  %v1157_v0 = vrot.slane %v1143_v61, 2 }
  0x2e   : > { %v966_v5 = vsel %vm270_vm0, %v964_v15, %v965_v16  ;;  %v833_v30 = vsel %vm310_vm1, %v2291_v28, 0 }
  0x2f   : > { %v969_v8 = vsel %vm270_vm0, %v967_v2, %v968_v17  ;;  %v976_v18 = vpack.c.bf16 %v966_v5, %v966_v5 }
  0x30   : > { %471 = vrot.lane.b32.xlu1 %v341_v47, %s2491_s24  ;;  %2254 = vmatmul.msk.bf16.gmra.mxu1 %vm303_vm3, %v2598_v46  ;;  %v945_v47 = vunpack.c.l.bf16 %v2690_v43  ;;  %v977_v19 = vpack.c.bf16 %v969_v8, %v969_v8 }
  0x31   : > { %v986_v20 = vunpack.c.l.b16 %v976_v18 }
  0x32   : > { %439 = vrot.lane.b32.xlu0 %v301_v41, %s2491_s24  ;;  %507 = vrot.lane.b32.xlu2 %v2592_v37, %s2490_s13  ;;  %v2686_v41 = vld [vmem:[%s2568_s11 + $0xc] sm:$0x1]  ;;  %v962_v51 = vrot.slane %v945_v47, 1  ;;  %v987_v21 = vunpack.c.l.b16 %v977_v19  ;;  %v2294_v19 = vld [vmem:[%s3253_s1 + $0xe] sm:$0x1] }
  0x33   : > { %2252 = vmatmul.msk.bf16.gmra.mxu0 %vm303_vm3, %v2592_v37  ;;  %v943_v45 = vunpack.c.l.bf16 %v2686_v41 }
  0x34   : > { %v2736_v22 = vpack.c.b16 %v987_v21, %v986_v20  ;;  %v2297_v20 = vld [vmem:[%s3253_s1 + $0xf] sm:$0x1]  ;;  %v2288_v21 = vld [vmem:[%s3253_s1 + $0xc] sm:$0x1] }
  0x35   : > { %v959_v49 = vrot.slane %v943_v45, 1  ;;  %v1149_v33 = vrot.slane %v943_v45, 2  ;;  %v2279_v45 = vld [vmem:[%s3253_s1 + $0xb] sm:$0x1]  ;;  %v795_v29 = vsel %vm310_vm1, %v2288_v21, 0 }
  0x36   : > { %v2899_v21 = vld [vmem:[%s2568_s11 + $0x24] sm:$0x1] }
  0x37   : > { %v960_v52 = vsel %vm270_vm0, %v958_v48, %v959_v49  ;;  %v1150_v38 = vsel %vm581_vm2, %v1148_v31, %v1149_v33  ;;  %v735_v48 = vsel %vm310_vm1, %v2279_v45, 0 }
  0x38   : > { %441 = vrot.lane.b32.xlu1 %v2592_v37, %s2491_s24  ;;  %v2672_v37 = vpack.c.b16 %v785_v36, %v784_v35  ;;  %v974_v54 = vpack.c.bf16 %v960_v52, %v960_v52  ;;  %v1152_v35 = vrot.slane %v945_v47, 2  ;;  %v697_v47 = vsel %vm310_vm1, %v2276_v44, 0 }
  0x3a   : > { %473 = vrot.lane.b32.xlu2 %v2598_v46, %s2491_s24  ;;  %539 = vrot.lane.b32.xlu0 %v2598_v46, %s2490_s13  ;;  %v944_v46 = vunpack.c.l.bf16 %v2302_v42  ;;  %v984_v63 = vunpack.c.l.b16 %v974_v54  ;;  %v1153_v39 = vsel %vm581_vm2, %v1151_v34, %v1152_v35  ;;  %v1164_v42 = vpack.c.bf16 %v1150_v38, %v1150_v38  ;;  %v2340_v35 = vld [vmem:[%s2568_s11 + $0x20] sm:$0xf] }
  0x3b   : > { %v1165_v43 = vpack.c.bf16 %v1153_v39, %v1153_v39  ;;  %v1336_v38 = vunpack.c.l.bf16 %v2340_v35 }
  0x3c   : > { %v961_v50 = vrot.slane %v944_v46, 1  ;;  %v2270_v46 = vld [vmem:[%s3253_s1 + $0x8] sm:$0x1] }
  0x3d   : > { %v621_v49 = vsel %vm310_vm1, %v2270_v46, 0  ;;  %v1175_v52 = vunpack.c.l.b16 %v1165_v43 }
  0x3e   : > { %v963_v53 = vsel %vm270_vm0, %v961_v50, %v962_v51  ;;  %v1174_v50 = vunpack.c.l.b16 %v1164_v42  ;;  %v2273_v51 = vld [vmem:[%s3253_s1 + $0x9] sm:$0x1]  ;;  %630 = vmatpush.bf16.msra.mxu0 %v621_v49  ;;  %v2852_v49 = vld [vmem:[%s2568_s11 + $0x1c] sm:$0x1] }
  0x3f   : > { %v975_v58 = vpack.c.bf16 %v963_v53, %v963_v53  ;;  %v659_v53 = vsel %vm310_vm1, %v2273_v51, 0 }
  0x40   : > { %724 = vrot.lane.b32.xlu1 %v2640_v6, %s2490_s13  ;;  %668 = vmatpush.bf16.msra.mxu1 %v659_v53  ;;  %v2768_v54 = vpack.c.b16 %v1175_v52, %v1174_v50  ;;  %v1511_v53 = vunpack.c.l.bf16 %v2852_v49 }
  0x41   : > { %v985_v1 = vunpack.c.l.b16 %v975_v58  ;;  %v2322_v58 = vld [vmem:[%s2568_s11 + $0x18] sm:$0xe] }
  0x42   : > { %686 = vrot.lane.b32.xlu0 %v2640_v6, %s2491_s24  ;;  %648 = vrot.lane.b32.xlu2 %v2640_v6, %s2489_s12  ;;  %v1142_v60 = vunpack.c.l.bf16 %v2322_v58  ;;  %v1528_v58 = vrot.slane %v1511_v53, 1 }
  0x43   : > { %v2712_v3 = vpack.c.b16 %v985_v1, %v984_v63  ;;  %v1155_v63 = vrot.slane %v947_v12, 2  ;;  %v1158_v1 = vrot.slane %v949_v14, 2  ;;  %v2339_v12 = vld [vmem:[%s2568_s11 + $0x18] sm:$0xf]  ;;  %v1334_v14 = vunpack.c.l.bf16 %v2338_v10 }
  0x44   : > { %v1154_v62 = vrot.slane %v1142_v60, 2  ;;  %v1335_v5 = vunpack.c.l.bf16 %v2339_v12 }
  0x45   : > { %v1159_v9 = vsel %vm581_vm2, %v1157_v0, %v1158_v1  ;;  %v1338_v8 = vpack.c.bf16 %v1334_v14, %v1334_v14 }
  0x46   : > { %v1156_v4 = vsel %vm581_vm2, %v1154_v62, %v1155_v63  ;;  %v1167_v13 = vpack.c.bf16 %v1159_v9, %v1159_v9  ;;  %v1339_v18 = vpack.c.bf16 %v1335_v5, %v1335_v5  ;;  %v2314_v62 = vld [vmem:[%s3253_s1 + $0x12] sm:$0x1]  ;;  %v2317_v63 = vld [vmem:[%s3253_s1 + $0x13] sm:$0x1]  ;;  %v2308_v9 = vld [vmem:[%s3253_s1 + $0x10] sm:$0x1] }
  0x47   : > { %v1166_v11 = vpack.c.bf16 %v1156_v4, %v1156_v4  ;;  %v997_v10 = vsel %vm310_vm1, %v2308_v9, 0 }
  0x48   : > { %726 = vrot.lane.b32.xlu1 %v2654_v23, %s2490_s13  ;;  %v1177_v16 = vunpack.c.l.b16 %v1167_v13  ;;  %v1349_v27 = vunpack.c.l.b16 %v1339_v18  ;;  %v1111_v13 = vsel %vm310_vm1, %v2317_v63, 0 }
  0x49   : > { %v1176_v15 = vunpack.c.l.b16 %v1166_v11  ;;  %v1073_v11 = vsel %vm310_vm1, %v2314_v62, 0 }
  0x4a   : > { %688 = vrot.lane.b32.xlu0 %v2654_v23, %s2491_s24  ;;  %650 = vrot.lane.b32.xlu2 %v2654_v23, %s2489_s12 }
  0x4b   : > { %v2788_v17 = vpack.c.b16 %v1177_v16, %v1176_v15 }
  0x50   : > { %898 = vrot.lane.b32.xlu1 %v2664_v32, %s2490_s13 }
  0x52   : > { %860 = vrot.lane.b32.xlu0 %v2664_v32, %s2491_s24  ;;  %822 = vrot.lane.b32.xlu2 %v2664_v32, %s2489_s12 }
  0x58   : > { %900 = vrot.lane.b32.xlu1 %v2672_v37, %s2490_s13 }
  0x5a   : > { %862 = vrot.lane.b32.xlu0 %v2672_v37, %s2491_s24  ;;  %824 = vrot.lane.b32.xlu2 %v2672_v37, %s2489_s12 }
  0x60   : > { %1100 = vrot.lane.b32.xlu1 %v2712_v3, %s2490_s13 }
  0x62   : > { %1062 = vrot.lane.b32.xlu0 %v2712_v3, %s2491_s24  ;;  %1024 = vrot.lane.b32.xlu2 %v2712_v3, %s2489_s12 }
  0x68   : > { %1102 = vrot.lane.b32.xlu1 %v2736_v22, %s2490_s13 }
  0x6a   : > { %1064 = vrot.lane.b32.xlu0 %v2736_v22, %s2491_s24  ;;  %1026 = vrot.lane.b32.xlu2 %v2736_v22, %s2489_s12 }
  0x70   : > { %1290 = vrot.lane.b32.xlu1 %v2768_v54, %s2490_s13 }
  0x72   : > { %1252 = vrot.lane.b32.xlu0 %v2768_v54, %s2491_s24  ;;  %1214 = vrot.lane.b32.xlu2 %v2768_v54, %s2489_s12 }
  0x78   : > { %1292 = vrot.lane.b32.xlu1 %v2788_v17, %s2490_s13 }
  0x7a   : > { %1254 = vrot.lane.b32.xlu0 %v2788_v17, %s2491_s24  ;;  %1216 = vrot.lane.b32.xlu2 %v2788_v17, %s2489_s12 }
  0x7c   : > { %v2738_v25 = vpop.permute.xlu2 %505 }
  0x84   : > { %v538_v41 = vpop.permute.xlu2 %537 }
  0x8c   : > { %v508_v57 = vpop.permute.xlu2 %507 }
  0x92   : > { %v376_v24 = vpop.permute.xlu1 %375 }
  0x94   : > { %v374_v26 = vpop.permute.xlu0 %373  ;;  %v474_v2 = vpop.permute.xlu2 %473 }
  0x95   : > { %2256 = vmatmul.msk.bf16.vlgmr.msra.gmra.mxu2 %vm303_vm3, %v374_v26  ;;  %v1348_v26 = vunpack.c.l.b16 %v1338_v8 }
  0x96   : > { %706 = vmatpush.bf16.msra.mxu2 %v697_v47  ;;  %v2848_v47 = vld [vmem:[%s2568_s11 + $0x14] sm:$0x1] }
  0x97   : > { %v2819_v33 = vpack.c.b16 %v1349_v27, %v1348_v26  ;;  %v1509_v51 = vunpack.c.l.bf16 %v2848_v47  ;;  %v1513_v27 = vunpack.c.l.bf16 %v2899_v21  ;;  %v2333_v47 = vld [vmem:[%s3253_s1 + $0x17] sm:$0x1] }
  0x98   : > { %v1301_v49 = vsel %vm310_vm1, %v2333_v47, 0 }
  0x99   : > { %1426 = vrot.lane.b32.xlu0 %v2819_v33, %s2491_s24  ;;  %1464 = vrot.lane.b32.xlu1 %v2819_v33, %s2490_s13 }
  0x9a   : > { %v408_v36 = vpop.permute.xlu1 %407  ;;  %1388 = vrot.lane.b32.xlu2 %v2819_v33, %s2489_s12 }
  0x9c   : > { %v406_v40 = vpop.permute.xlu0 %405  ;;  %v649_v31 = vpop.permute.xlu2 %648 }
  0x9d   : > { %2258 = vmatmul.msk.bf16.vlgmr.msra.gmra.mxu3 %vm303_vm3, %v406_v40  ;;  %v1340_v40 = vpack.c.bf16 %v1336_v38, %v1336_v38  ;;  %v361_v4 = vpop.f32.mrf.mxu1 }
  0x9e   : > { %744 = vmatpush.bf16.msra.mxu3 %v735_v48  ;;  %v2356_v48 = vld [vmem:[%s2568_s11 + $0x18] sm:$0xf] }
  0x9f   : > { %v1350_v42 = vunpack.c.l.b16 %v1340_v40  ;;  %v1510_v52 = vunpack.c.l.bf16 %v2356_v48 }
  0xa0   : > { %v323_v0 = vpop.f32.mrf.mxu0 }
  0xa1   : > { %v2874_v16 = vadd.f32 %v361_v4, %v323_v0  ;;  %v2330_v0 = vld [vmem:[%s3253_s1 + $0x16] sm:$0x1] }
  0xa2   : > { %v472_v55 = vpop.permute.xlu1 %471 }
  0xa3   : > { %2263 = vmatmul.msk.bf16.vlgmr.msrb.gmra.mxu1 %vm303_vm3, %v472_v55 }
  0xa4   : > { %v440_v56 = vpop.permute.xlu0 %439  ;;  %842 = vmatpush.bf16.msrb.mxu1 %v833_v30  ;;  %v651_v44 = vpop.permute.xlu2 %650 }
  0xa5   : > { %2257 = vmatmul.msk.bf16.gmra.mxu2 %vm303_vm3, %v376_v24  ;;  %2261 = vmatmul.msk.bf16.vlgmr.msrb.gmra.mxu0 %vm303_vm3, %v440_v56  ;;  %v871_v24 = vsel %vm310_vm1, %v2294_v19, 0  ;;  %v1525_v56 = vrot.slane %v1509_v51, 1  ;;  %v2895_v19 = vpop.f32.mrf.mxu1 }
  0xa6   : > { %804 = vmatpush.bf16.msrb.mxu0 %v795_v29 }
  0xa8   : > { %v2893_v18 = vpop.f32.mrf.mxu0 }
  0xaa   : > { %v442_v7 = vpop.permute.xlu1 %441 }
  0xac   : > { %v540_v34 = vpop.permute.xlu0 %539  ;;  %v823_v14 = vpop.permute.xlu2 %822 }
  0xad   : > { %2259 = vmatmul.msk.bf16.gmra.mxu3 %vm303_vm3, %v408_v36  ;;  %v2341_v36 = vld [vmem:[%s2568_s11 + $0x28] sm:$0xf] }
  0xae   : > { %v1337_v39 = vunpack.c.l.bf16 %v2341_v36 }
  0xb0   : > { %v328_v40 = vpop.f32.mrf.mxu0 }
  0xb3   : > { %2264 = vmatmul.msk.bf16.gmra.mxu1 %vm303_vm3, %v474_v2  ;;  %v2311_v2 = vld [vmem:[%s3253_s1 + $0x11] sm:$0x1] }
  0xb4   : > { %v687_v46 = vpop.permute.xlu0 %686  ;;  %v1035_v12 = vsel %vm310_vm1, %v2311_v2, 0 }
  0xb5   : > { %2262 = vmatmul.msk.bf16.gmra.mxu0 %vm303_vm3, %v442_v7  ;;  %2266 = vmatmul.msk.bf16.vlgmr.msrb.gmra.mxu2 %vm303_vm3, %v2738_v25  ;;  %v909_v25 = vsel %vm310_vm1, %v2297_v20, 0  ;;  %v2358_v20 = vld [vmem:[%s2568_s11 + $0x20] sm:$0xf] }
  0xb6   : > { %880 = vmatpush.bf16.msrb.mxu2 %v871_v24  ;;  %v2360_v24 = vld [vmem:[%s2568_s11 + $0x28] sm:$0xf]  ;;  %v1512_v26 = vunpack.c.l.bf16 %v2358_v20 }
  0xb7   : > { %v1514_v28 = vunpack.c.l.bf16 %v2360_v24 }
  0xb8   : > { %v1530_v30 = vrot.slane %v1512_v26, 1  ;;  %v1721_v26 = vrot.slane %v1513_v27, 2 }
  0xbc   : > { %v689_v8 = vpop.permute.xlu0 %688 }
  0xbd   : > { %2268 = vmatmul.msk.bf16.vlgmr.msrb.gmra.mxu3 %vm303_vm3, %v538_v41  ;;  %v1341_v41 = vpack.c.bf16 %v1337_v39, %v1337_v39 }
  0xbe   : > { %918 = vmatpush.bf16.msrb.mxu3 %v909_v25  ;;  %v2903_v25 = vld [vmem:[%s2568_s11 + $0x2c] sm:$0x1] }
  0xbf   : > { %v1351_v43 = vunpack.c.l.b16 %v1341_v41  ;;  %v1515_v29 = vunpack.c.l.bf16 %v2903_v25 }
  0xc1   : > { %v2834_v45 = vpack.c.b16 %v1351_v43, %v1350_v42  ;;  %v1534_v35 = vrot.slane %v1515_v29, 1  ;;  %v366_v42 = vpop.f32.mrf.mxu1 }
  0xc3   : > { %2274 = vmatmul.msk.bf16.vlgmr.msra.gmra.mxu1 %vm303_vm3, %v649_v31  ;;  %1428 = vrot.lane.b32.xlu0 %v2834_v45, %s2491_s24  ;;  %v1533_v31 = vrot.slane %v1514_v28, 1 }
  0xc4   : > { %1466 = vrot.lane.b32.xlu1 %v2834_v45, %s2490_s13  ;;  %1390 = vrot.lane.b32.xlu2 %v2834_v45, %s2489_s12 }
  0xc5   : > { %2267 = vmatmul.msk.bf16.gmra.mxu2 %vm303_vm3, %v508_v57  ;;  %2271 = vmatmul.msk.bf16.vlgmr.msra.gmra.mxu0 %vm303_vm3, %v2640_v6  ;;  %v2354_v6 = vld [vmem:[%s2568_s11 + $0x10] sm:$0xf]  ;;  %v1527_v57 = vrot.slane %v1510_v52, 1  ;;  %v1535_v38 = vsel %vm270_vm0, %v1533_v31, %v1534_v35 }
  0xc6   : > { %v1508_v50 = vunpack.c.l.bf16 %v2354_v6  ;;  %1006 = vmatpush.bf16.msra.mxu0 %v997_v10  ;;  %1044 = vmatpush.bf16.msra.mxu1 %v1035_v12  ;;  %v1543_v41 = vpack.c.bf16 %v1535_v38, %v1535_v38  ;;  %v825_v6 = vpop.permute.xlu2 %824  ;;  %v2374_v52 = vld [vmem:[%s2568_s11 + $0x10] sm:$0xe]  ;;  %v2376_v12 = vld [vmem:[%s2568_s11 + $0x20] sm:$0xe] }
  0xc7   : > { %v1529_v60 = vsel %vm270_vm0, %v1527_v57, %v1528_v58  ;;  %v1715_v58 = vrot.slane %v1509_v51, 2 }
  0xc8   : > { %v1524_v55 = vrot.slane %v1508_v50, 1  ;;  %v1541_v1 = vpack.c.bf16 %v1529_v60, %v1529_v60  ;;  %v861_v50 = vpop.permute.xlu0 %860 }
  0xc9   : > { %v2986_v25 = vpop.f32.mrf.mxu1 }
  0xca   : > { %v1526_v59 = vsel %vm270_vm0, %v1524_v55, %v1525_v56  ;;  %v1551_v7 = vunpack.c.l.b16 %v1541_v1  ;;  %v2375_v55 = vld [vmem:[%s2568_s11 + $0x18] sm:$0xe]  ;;  %v1706_v56 = vunpack.c.l.bf16 %v2374_v52  ;;  %v1263_v1 = vsel %vm310_vm1, %v2330_v0, 0 }
  0xcb   : > { %v1540_v61 = vpack.c.bf16 %v1526_v59, %v1526_v59  ;;  %v1707_v57 = vunpack.c.l.bf16 %v2375_v55  ;;  %v2342_v55 = vld [vmem:[%s3253_s1 + $0x18] sm:$0x1] }
  0xcd   : > { %2269 = vmatmul.msk.bf16.gmra.mxu3 %vm303_vm3, %v540_v34  ;;  %v1550_v15 = vunpack.c.l.b16 %v1540_v61  ;;  %v1717_v59 = vrot.slane %v1707_v57, 2  ;;  %v1718_v61 = vrot.slane %v1511_v53, 2 }
  0xce   : > { %v1025_v9 = vpop.permute.xlu2 %1024 }
  0xcf   : > { %v2881_v5 = vpack.c.b16 %v1551_v7, %v1550_v15  ;;  %v1719_v63 = vsel %vm581_vm2, %v1717_v59, %v1718_v61 }
  0xd0   : > { %v1731_v51 = vpack.c.bf16 %v1719_v63, %v1719_v63  ;;  %v863_v10 = vpop.permute.xlu0 %862 }
  0xd1   : > { %1628 = vrot.lane.b32.xlu0 %v2881_v5, %s2491_s24  ;;  %1666 = vrot.lane.b32.xlu1 %v2881_v5, %s2490_s13 }
  0xd2   : > { %1590 = vrot.lane.b32.xlu2 %v2881_v5, %s2489_s12  ;;  %v1741_v4 = vunpack.c.l.b16 %v1731_v51 }
  0xd3   : > { %2275 = vmatmul.msk.bf16.gmra.mxu1 %vm303_vm3, %v651_v44  ;;  %v2914_v44 = vadd.f32 %v366_v42, %v328_v40  ;;  %v2348_v42 = vld [vmem:[%s3253_s1 + $0x1a] sm:$0x1] }
  0xd5   : > { %2272 = vmatmul.msk.bf16.gmra.mxu0 %vm303_vm3, %v2654_v23  ;;  %2277 = vmatmul.msk.bf16.vlgmr.msra.gmra.mxu2 %vm303_vm3, %v687_v46  ;;  %v725_v23 = vpop.permute.xlu1 %724  ;;  %v1553_v46 = vunpack.c.l.b16 %v1543_v41 }
  0xd6   : > { %1082 = vmatpush.bf16.msra.mxu2 %v1073_v11  ;;  %v2324_v11 = vld [vmem:[%s3253_s1 + $0x14] sm:$0x1] }
  0xd7   : > { %v1187_v2 = vsel %vm310_vm1, %v2324_v11, 0 }
  0xd8   : > { %v1063_v21 = vpop.permute.xlu0 %1062 }
  0xdd   : > { %2280 = vmatmul.msk.bf16.vlgmr.msra.gmra.mxu3 %vm303_vm3, %v725_v23  ;;  %v727_v34 = vpop.permute.xlu1 %726  ;;  %v1714_v23 = vrot.slane %v1706_v56, 2  ;;  %v2345_v56 = vld [vmem:[%s3253_s1 + $0x19] sm:$0x1] }
  0xde   : > { %1120 = vmatpush.bf16.msra.mxu3 %v1111_v13  ;;  %v2327_v13 = vld [vmem:[%s3253_s1 + $0x15] sm:$0x1]  ;;  %v1399_v59 = vsel %vm310_vm1, %v2345_v56, 0 }
  0xdf   : > { %v1716_v62 = vsel %vm581_vm2, %v1714_v23, %v1715_v58  ;;  %v1225_v7 = vsel %vm310_vm1, %v2327_v13, 0  ;;  %v1361_v58 = vsel %vm310_vm1, %v2342_v55, 0 }
  0xe0   : > { %v1065_v61 = vpop.permute.xlu0 %1064 }
  0xe3   : > { %2292 = vmatmul.msk.bf16.vlgmr.msrb.gmra.mxu1 %vm303_vm3, %v823_v14  ;;  %v2377_v14 = vld [vmem:[%s2568_s11 + $0x28] sm:$0xe] }
  0xe4   : > { %1234 = vmatpush.bf16.msrb.mxu1 %v1225_v7  ;;  %v1709_v20 = vunpack.c.l.bf16 %v2377_v14 }
  0xe5   : > { %2278 = vmatmul.msk.bf16.gmra.mxu2 %vm303_vm3, %v689_v8  ;;  %2289 = vmatmul.msk.bf16.vlgmr.msrb.gmra.mxu0 %vm303_vm3, %v2664_v32  ;;  %v1531_v32 = vrot.slane %v1513_v27, 1  ;;  %v899_v60 = vpop.permute.xlu1 %898  ;;  %v1708_v8 = vunpack.c.l.bf16 %v2376_v12 }
  0xe6   : > { %1196 = vmatpush.bf16.msrb.mxu0 %v1187_v2  ;;  %v1723_v28 = vrot.slane %v1709_v20, 2 }
  0xe7   : > { %v1532_v36 = vsel %vm270_vm0, %v1530_v30, %v1531_v32  ;;  %v1720_v24 = vrot.slane %v1708_v8, 2  ;;  %v1724_v30 = vrot.slane %v1515_v29, 2  ;;  %v2988_v29 = vpop.f32.mrf.mxu0 }
  0xe8   : > { %v1542_v39 = vpack.c.bf16 %v1532_v36, %v1532_v36  ;;  %v1253_v7 = vpop.permute.xlu0 %1252 }
  0xe9   : > { %v1722_v31 = vsel %vm581_vm2, %v1720_v24, %v1721_v26 }
  0xea   : > { %v1552_v43 = vunpack.c.l.b16 %v1542_v39  ;;  %v1732_v35 = vpack.c.bf16 %v1722_v31, %v1722_v31  ;;  %v1027_v39 = vpop.permute.xlu2 %1026 }
  0xec   : > { %v2916_v48 = vpack.c.b16 %v1553_v46, %v1552_v43  ;;  %v2351_v43 = vld [vmem:[%s3253_s1 + $0x1b] sm:$0x1] }
  0xed   : > { %2281 = vmatmul.msk.bf16.gmra.mxu3 %vm303_vm3, %v727_v34  ;;  %v901_v32 = vpop.permute.xlu1 %900  ;;  %v1725_v34 = vsel %vm581_vm2, %v1723_v28, %v1724_v30  ;;  %v1475_v46 = vsel %vm310_vm1, %v2351_v43, 0  ;;  %v2368_v28 = vld [vmem:[%s3253_s1 + $0x1e] sm:$0x1] }
  0xee   : > { %1630 = vrot.lane.b32.xlu0 %v2916_v48, %s2491_s24  ;;  %1668 = vrot.lane.b32.xlu1 %v2916_v48, %s2490_s13  ;;  %v1733_v36 = vpack.c.bf16 %v1725_v34, %v1725_v34  ;;  %v1639_v30 = vsel %vm310_vm1, %v2368_v28, 0 }
  0xef   : > { %1592 = vrot.lane.b32.xlu2 %v2916_v48, %s2489_s12 }
  0xf0   : > { %v1743_v38 = vunpack.c.l.b16 %v1733_v36  ;;  %v2362_v36 = vld [vmem:[%s3253_s1 + $0x1c] sm:$0x1]  ;;  %v1255_v43 = vpop.permute.xlu0 %1254 }
  0xf3   : > { %2293 = vmatmul.msk.bf16.gmra.mxu1 %vm303_vm3, %v825_v6  ;;  %v1215_v6 = vpop.permute.xlu2 %1214 }
  0xf5   : > { %2290 = vmatmul.msk.bf16.gmra.mxu0 %vm303_vm3, %v2672_v37  ;;  %2295 = vmatmul.msk.bf16.vlgmr.msrb.gmra.mxu2 %vm303_vm3, %v861_v50  ;;  %v1730_v37 = vpack.c.bf16 %v1716_v62, %v1716_v62  ;;  %v1101_v41 = vpop.permute.xlu1 %1100 }
  0xf6   : > { %1272 = vmatpush.bf16.msrb.mxu2 %v1263_v1 }
  0xf7   : > { %v1740_v53 = vunpack.c.l.b16 %v1730_v37 }
  0xf9   : > { %v2951_v15 = vpack.c.b16 %v1741_v4, %v1740_v53 }
  0xfb   : > { %1818 = vrot.lane.b32.xlu0 %v2951_v15, %s2491_s24  ;;  %1856 = vrot.lane.b32.xlu1 %v2951_v15, %s2490_s13  ;;  %v1217_v53 = vpop.permute.xlu2 %1216 }
  0xfc   : > { %1780 = vrot.lane.b32.xlu2 %v2951_v15, %s2489_s12 }
  0xfd   : > { %2298 = vmatmul.msk.bf16.vlgmr.msrb.gmra.mxu3 %vm303_vm3, %v899_v60  ;;  %v1103_v1 = vpop.permute.xlu1 %1102 }
  0xfe   : > { %1310 = vmatpush.bf16.msrb.mxu3 %v1301_v49 }
 0x103   : > { %2312 = vmatmul.msk.bf16.vlgmr.msra.gmra.mxu1 %vm303_vm3, %v1025_v9  ;;  %v1389_v31 = vpop.permute.xlu2 %1388 }
 0x104   : > { %1408 = vmatpush.bf16.msra.mxu1 %v1399_v59 }
 0x105   : > { %2296 = vmatmul.msk.bf16.gmra.mxu2 %vm303_vm3, %v863_v10  ;;  %2309 = vmatmul.msk.bf16.vlgmr.msra.gmra.mxu0 %vm303_vm3, %v2712_v3  ;;  %v1742_v3 = vunpack.c.l.b16 %v1732_v35  ;;  %v1291_v24 = vpop.permute.xlu1 %1290 }
 0x106   : > { %1370 = vmatpush.bf16.msra.mxu0 %v1361_v58 }
 0x107   : > { %v2974_v40 = vpack.c.b16 %v1743_v38, %v1742_v3  ;;  %v2365_v3 = vld [vmem:[%s3253_s1 + $0x1d] sm:$0x1] }
 0x109   : > { %1820 = vrot.lane.b32.xlu0 %v2974_v40, %s2491_s24  ;;  %1858 = vrot.lane.b32.xlu1 %v2974_v40, %s2490_s13 }
 0x10a   : > { %1782 = vrot.lane.b32.xlu2 %v2974_v40, %s2489_s12 }
 0x10d   : > { %2299 = vmatmul.msk.bf16.gmra.mxu3 %vm303_vm3, %v901_v32 }
 0x113   : > { %2313 = vmatmul.msk.bf16.gmra.mxu1 %vm303_vm3, %v1027_v39 }
 0x115   : > { %2310 = vmatmul.msk.bf16.gmra.mxu0 %vm303_vm3, %v2736_v22  ;;  %2315 = vmatmul.msk.bf16.vlgmr.msra.gmra.mxu2 %vm303_vm3, %v1063_v21  ;;  %v1437_v22 = vsel %vm310_vm1, %v2348_v42, 0  ;;  %v1563_v21 = vsel %vm310_vm1, %v2362_v36, 0 }
 0x116   : > { %1446 = vmatpush.bf16.msra.mxu2 %v1437_v22 }
 0x118   : > { %v395_v27 = vpop.f32.mrf.mxu2 }
 0x11d   : > { %2318 = vmatmul.msk.bf16.vlgmr.msra.gmra.mxu3 %vm303_vm3, %v1101_v41 }
 0x11e   : > { %1484 = vmatpush.bf16.msra.mxu3 %v1475_v46 }
 0x120   : > { %v397_v50 = vpop.f32.mrf.mxu2  ;;  %v427_v52 = vpop.f32.mrf.mxu3 }
 0x121   : > { %v428_v57 = vadd.f32 %v427_v52, %v395_v27  ;;  %v493_v23 = vpop.f32.mrf.mxu1  ;;  %v1601_v27 = vsel %vm310_vm1, %v2365_v3, 0 }
 0x122   : > { %v461_v60 = vpop.f32.mrf.mxu0 }
 0x123   : > { %v3007_v62 = vadd.f32 %v493_v23, %v461_v60  ;;  %2328 = vmatmul.msk.bf16.vlgmr.msrb.gmra.mxu1 %vm303_vm3, %v1215_v6  ;;  %v1293_v23 = vpop.permute.xlu1 %1292 }
 0x124   : > { %1610 = vmatpush.bf16.msrb.mxu1 %v1601_v27 }
 0x125   : > { %2316 = vmatmul.msk.bf16.gmra.mxu2 %vm303_vm3, %v1065_v61  ;;  %2325 = vmatmul.msk.bf16.vlgmr.msrb.gmra.mxu0 %vm303_vm3, %v2768_v54 }
 0x126   : > { %1572 = vmatpush.bf16.msrb.mxu0 %v1563_v21 }
 0x128   : > { %v400_v63 = vpop.f32.mrf.mxu2  ;;  %v429_v37 = vpop.f32.mrf.mxu3 }
 0x129   : > { %v430_v0 = vadd.f32 %v429_v37, %v397_v50  ;;  %v495_v47 = vpop.f32.mrf.mxu1  ;;  %v1427_v37 = vpop.permute.xlu0 %1426 }
 0x12a   : > { %v463_v51 = vpop.f32.mrf.mxu0 }
 0x12b   : > { %v3013_v49 = vadd.f32 %v495_v47, %v463_v51 }
 0x12d   : > { %2319 = vmatmul.msk.bf16.gmra.mxu3 %vm303_vm3, %v1103_v1 }
 0x130   : > { %v402_v4 = vpop.f32.mrf.mxu2  ;;  %v432_v9 = vpop.f32.mrf.mxu3 }
 0x131   : > { %v433_v11 = vadd.f32 %v432_v9, %v400_v63  ;;  %v498_v13 = vpop.f32.mrf.mxu1 }
 0x132   : > { %v466_v2 = vpop.f32.mrf.mxu0 }
 0x133   : > { %v3016_v10 = vadd.f32 %v498_v13, %v466_v2  ;;  %2329 = vmatmul.msk.bf16.gmra.mxu1 %vm303_vm3, %v1217_v53  ;;  %v1465_v13 = vpop.permute.xlu1 %1464 }
 0x135   : > { %2326 = vmatmul.msk.bf16.gmra.mxu0 %vm303_vm3, %v2788_v17  ;;  %2331 = vmatmul.msk.bf16.vlgmr.msrb.gmra.mxu2 %vm303_vm3, %v1253_v7  ;;  %v2371_v17 = vld [vmem:[%s3253_s1 + $0x1f] sm:$0x1] }
 0x136   : > { %v1677_v32 = vsel %vm310_vm1, %v2371_v17, 0  ;;  %1648 = vmatpush.bf16.msrb.mxu2 %v1639_v30 }
 0x138   : > { %v434_v54 = vpop.f32.mrf.mxu3  ;;  %v527_v12 = vpop.f32.mrf.mxu2 }
 0x139   : > { %v435_v14 = vadd.f32 %v434_v54, %v402_v4  ;;  %v500_v8 = vpop.f32.mrf.mxu1 }
 0x13a   : > { %v468_v20 = vpop.f32.mrf.mxu0 }
 0x13b   : > { %v3022_v26 = vadd.f32 %v500_v8, %v468_v20 }
 0x13d   : > { %2334 = vmatmul.msk.bf16.vlgmr.msrb.gmra.mxu3 %vm303_vm3, %v1291_v24 }
 0x13e   : > { %1686 = vmatpush.bf16.msrb.mxu3 %v1677_v32 }
 0x140   : > { %v529_v34 = vpop.f32.mrf.mxu2  ;;  %v559_v35 = vpop.f32.mrf.mxu3 }
 0x141   : > { %v560_v38 = vadd.f32 %v559_v35, %v527_v12  ;;  %v670_v39 = vpop.f32.mrf.mxu1  ;;  %v2378_v12 = vld [vmem:[%s3253_s1 + $0x20] sm:$0x1] }
 0x142   : > { %v632_v41 = vpop.f32.mrf.mxu0  ;;  %v680_v42 = vadd.f32 %v670_v39, %v428_v57  ;;  %v1391_v57 = vpop.permute.xlu2 %1390  ;;  %v1753_v28 = vsel %vm310_vm1, %v2378_v12, 0 }
 0x143   : > { %v642_v22 = vadd.f32 %v632_v41, %v2874_v16  ;;  %2346 = vmatmul.msk.bf16.vlgmr.msra.gmra.mxu1 %vm303_vm3, %v1389_v31  ;;  %v1429_v31 = vpop.permute.xlu0 %1428 }
 0x145   : > { %2332 = vmatmul.msk.bf16.gmra.mxu2 %vm303_vm3, %v1255_v43  ;;  %2343 = vmatmul.msk.bf16.vlgmr.msra.gmra.mxu0 %vm303_vm3, %v2819_v33 }
 0x146   : > { %1762 = vmatpush.bf16.msra.mxu0 %v1753_v28 }
 0x148   : > { %v532_v46 = vpop.f32.mrf.mxu2  ;;  %v561_v6 = vpop.f32.mrf.mxu3 }
 0x149   : > { %v562_v50 = vadd.f32 %v561_v6, %v529_v34  ;;  %v672_v52 = vpop.f32.mrf.mxu1 }
 0x14a   : > { %v634_v55 = vpop.f32.mrf.mxu0  ;;  %v681_v56 = vadd.f32 %v672_v52, %v430_v0  ;;  %v1591_v7 = vpop.permute.xlu2 %1590 }
 0x14d   : > { %2335 = vmatmul.msk.bf16.gmra.mxu3 %vm303_vm3, %v1293_v23 }
 0x150   : > { %v534_v58 = vpop.f32.mrf.mxu2  ;;  %v564_v59 = vpop.f32.mrf.mxu3 }
 0x151   : > { %v565_v16 = vadd.f32 %v564_v59, %v532_v46  ;;  %v675_v60 = vpop.f32.mrf.mxu1 }
 0x152   : > { %v637_v61 = vpop.f32.mrf.mxu0  ;;  %v682_v63 = vadd.f32 %v675_v60, %v433_v11 }
 0x153   : > { %v644_v47 = vadd.f32 %v637_v61, %v2914_v44  ;;  %2347 = vmatmul.msk.bf16.gmra.mxu1 %vm303_vm3, %v1391_v57  ;;  %v2384_v44 = vld [vmem:[%s3253_s1 + $0x22] sm:$0x1] }
 0x154   : > { %v1829_v11 = vsel %vm310_vm1, %v2384_v44, 0 }
 0x155   : > { %2344 = vmatmul.msk.bf16.gmra.mxu0 %vm303_vm3, %v2834_v45  ;;  %2349 = vmatmul.msk.bf16.vlgmr.msra.gmra.mxu2 %vm303_vm3, %v1427_v37  ;;  %v2387_v45 = vld [vmem:[%s3253_s1 + $0x23] sm:$0x1] }
 0x156   : > { %v1867_v2 = vsel %vm310_vm1, %v2387_v45, 0  ;;  %1838 = vmatpush.bf16.msra.mxu2 %v1829_v11 }
 0x158   : > { %v566_v33 = vpop.f32.mrf.mxu3  ;;  %v708_v0 = vpop.f32.mrf.mxu2 }
 0x159   : > { %v567_v51 = vadd.f32 %v566_v33, %v534_v58  ;;  %v718_v1 = vadd.f32 %v708_v0, %v3007_v62  ;;  %v677_v53 = vpop.f32.mrf.mxu1 }
 0x15a   : > { %v639_v4 = vpop.f32.mrf.mxu0  ;;  %v683_v9 = vadd.f32 %v677_v53, %v435_v14  ;;  %v2381_v14 = vld [vmem:[%s3253_s1 + $0x21] sm:$0x1] }
 0x15b   : > { %v1791_v17 = vsel %vm310_vm1, %v2381_v14, 0 }
 0x15c   : > { %1800 = vmatpush.bf16.msra.mxu1 %v1791_v17 }
 0x15d   : > { %2352 = vmatmul.msk.bf16.vlgmr.msra.gmra.mxu3 %vm303_vm3, %v1465_v13 }
 0x15e   : > { %1876 = vmatpush.bf16.msra.mxu3 %v1867_v2 }
 0x160   : > { %v710_v62 = vpop.f32.mrf.mxu2  ;;  %v746_v54 = vpop.f32.mrf.mxu3 }
 0x161   : > { %v719_v8 = vadd.f32 %v710_v62, %v3013_v49  ;;  %v756_v20 = vadd.f32 %v746_v54, %v560_v38  ;;  %v844_v24 = vpop.f32.mrf.mxu1  ;;  %v364_v49 = vadd.f32 %v2895_v19, %v2893_v18 }
 0x162   : > { %v806_v30 = vpop.f32.mrf.mxu0  ;;  %v854_v32 = vadd.f32 %v844_v24, %v680_v42  ;;  %v1467_v42 = vpop.permute.xlu1 %1466 }
 0x163   : > { %v816_v34 = vadd.f32 %v806_v30, %v642_v22  ;;  %2366 = vmatmul.msk.bf16.vlgmr.msrb.gmra.mxu1 %vm303_vm3, %v1591_v7  ;;  %v643_v3 = vadd.f32 %v634_v55, %v364_v49  ;;  %v1593_v22 = vpop.permute.xlu2 %1592  ;;  %v1629_v55 = vpop.permute.xlu0 %1628 }
 0x165   : > { %2350 = vmatmul.msk.bf16.gmra.mxu2 %vm303_vm3, %v1429_v31  ;;  %2363 = vmatmul.msk.bf16.vlgmr.msrb.gmra.mxu0 %vm303_vm3, %v2881_v5 }
 0x168   : > { %v713_v35 = vpop.f32.mrf.mxu2  ;;  %v748_v36 = vpop.f32.mrf.mxu3 }
 0x169   : > { %v720_v38 = vadd.f32 %v713_v35, %v3016_v10  ;;  %v757_v39 = vadd.f32 %v748_v36, %v562_v50  ;;  %v846_v21 = vpop.f32.mrf.mxu1  ;;  %v369_v10 = vadd.f32 %v2986_v25, %v2988_v29 }
 0x16a   : > { %v808_v27 = vpop.f32.mrf.mxu0  ;;  %v855_v41 = vadd.f32 %v846_v21, %v681_v56 }
 0x16b   : > { %v817_v43 = vadd.f32 %v808_v27, %v643_v3  ;;  %v645_v58 = vadd.f32 %v639_v4, %v369_v10  ;;  %v1631_v29 = vpop.permute.xlu0 %1630 }
 0x16d   : > { %2353 = vmatmul.msk.bf16.gmra.mxu3 %vm303_vm3, %v1467_v42 }
 0x170   : > { %v715_v46 = vpop.f32.mrf.mxu2  ;;  %v751_v6 = vpop.f32.mrf.mxu3 }
 0x171   : > { %v721_v5 = vadd.f32 %v715_v46, %v3022_v26  ;;  %v758_v52 = vadd.f32 %v751_v6, %v565_v16  ;;  %v849_v18 = vpop.f32.mrf.mxu1 }
 0x172   : > { %v811_v19 = vpop.f32.mrf.mxu0  ;;  %v856_v23 = vadd.f32 %v849_v18, %v682_v63  ;;  %v1667_v63 = vpop.permute.xlu1 %1666 }
 0x173   : > { %v818_v57 = vadd.f32 %v811_v19, %v644_v47  ;;  %2367 = vmatmul.msk.bf16.gmra.mxu1 %vm303_vm3, %v1593_v22  ;;  %v1781_v47 = vpop.permute.xlu2 %1780 }
 0x175   : > { %2364 = vmatmul.msk.bf16.gmra.mxu0 %vm303_vm3, %v2916_v48  ;;  %2369 = vmatmul.msk.bf16.vlgmr.msrb.gmra.mxu2 %vm303_vm3, %v1629_v55 }
 0x178   : > { %v753_v50 = vpop.f32.mrf.mxu3  ;;  %v882_v56 = vpop.f32.mrf.mxu2 }
 0x179   : > { %v759_v26 = vadd.f32 %v753_v50, %v567_v51  ;;  %v892_v59 = vadd.f32 %v882_v56, %v718_v1  ;;  %v851_v16 = vpop.f32.mrf.mxu1 }
 0x17a   : > { %v813_v60 = vpop.f32.mrf.mxu0  ;;  %v857_v61 = vadd.f32 %v851_v16, %v683_v9  ;;  %v1669_v62 = vpop.permute.xlu1 %1668 }
 0x17b   : > { %v819_v37 = vadd.f32 %v813_v60, %v645_v58  ;;  %v1783_v12 = vpop.permute.xlu2 %1782 }
 0x17d   : > { %2372 = vmatmul.msk.bf16.vlgmr.msrb.gmra.mxu3 %vm303_vm3, %v1667_v63 }
 0x180   : > { %v884_v33 = vpop.f32.mrf.mxu2  ;;  %v920_v48 = vpop.f32.mrf.mxu3 }
 0x181   : > { %v893_v0 = vadd.f32 %v884_v33, %v719_v8  ;;  %v930_v53 = vadd.f32 %v920_v48, %v756_v20  ;;  %v1046_v13 = vpop.f32.mrf.mxu1 }
 0x182   : > { %v1008_v44 = vpop.f32.mrf.mxu0  ;;  %v1056_v25 = vadd.f32 %v1046_v13, %v854_v32 }
 0x183   : > { %v1018_v45 = vadd.f32 %v1008_v44, %v816_v34  ;;  %2382 = vmatmul.msk.bf16.vlgmr.msra.gmra.mxu1 %vm303_vm3, %v1781_v47 }
 0x185   : > { %2370 = vmatmul.msk.bf16.gmra.mxu2 %vm303_vm3, %v1631_v29  ;;  %2379 = vmatmul.msk.bf16.vlgmr.msra.gmra.mxu0 %vm303_vm3, %v2951_v15  ;;  %v1819_v15 = vpop.permute.xlu0 %1818 }
 0x188   : > { %v887_v51 = vpop.f32.mrf.mxu2  ;;  %v922_v1 = vpop.f32.mrf.mxu3 }
 0x189   : > { %v894_v4 = vadd.f32 %v887_v51, %v720_v38  ;;  %v931_v9 = vadd.f32 %v922_v1, %v757_v39  ;;  %v1048_v11 = vpop.f32.mrf.mxu1  ;;  %v1857_v39 = vpop.permute.xlu1 %1856 }
 0x18a   : > { %v1010_v2 = vpop.f32.mrf.mxu0  ;;  %v1057_v7 = vadd.f32 %v1048_v11, %v855_v41 }
 0x18b   : > { %v1019_v54 = vadd.f32 %v1010_v2, %v817_v43 }
 0x18d   : > { %2373 = vmatmul.msk.bf16.gmra.mxu3 %vm303_vm3, %v1669_v62  ;;  %v1821_v6 = vpop.permute.xlu0 %1820 }
 0x190   : > { %v889_v14 = vpop.f32.mrf.mxu2  ;;  %v925_v8 = vpop.f32.mrf.mxu3 }
 0x191   : > { %v895_v20 = vadd.f32 %v889_v14, %v721_v5  ;;  %v932_v24 = vadd.f32 %v925_v8, %v758_v52  ;;  %v1051_v28 = vpop.f32.mrf.mxu1  ;;  %v1859_v50 = vpop.permute.xlu1 %1858 }
 0x192   : > { %v1013_v17 = vpop.f32.mrf.mxu0  ;;  %v1058_v30 = vadd.f32 %v1051_v28, %v856_v23 }
 0x193   : > { %v1020_v32 = vadd.f32 %v1013_v17, %v818_v57  ;;  %2383 = vmatmul.msk.bf16.gmra.mxu1 %vm303_vm3, %v1783_v12 }
 0x195   : > { %2380 = vmatmul.msk.bf16.gmra.mxu0 %vm303_vm3, %v2974_v40  ;;  %2385 = vmatmul.msk.bf16.vlgmr.msra.gmra.mxu2 %vm303_vm3, %v1819_v15 }
 0x198   : > { %v927_v31 = vpop.f32.mrf.mxu3  ;;  %v1084_v34 = vpop.f32.mrf.mxu2 }
 0x199   : > { %v933_v49 = vadd.f32 %v927_v31, %v759_v26  ;;  %v1094_v35 = vadd.f32 %v1084_v34, %v892_v59  ;;  %v1053_v36 = vpop.f32.mrf.mxu1 }
 0x19a   : > { %v1015_v3 = vpop.f32.mrf.mxu0  ;;  %v1059_v38 = vadd.f32 %v1053_v36, %v857_v61 }
 0x19b   : > { %v1021_v21 = vadd.f32 %v1015_v3, %v819_v37 }
 0x19d   : > { %2388 = vmatmul.msk.bf16.vlgmr.msra.gmra.mxu3 %vm303_vm3, %v1857_v39 }
 0x1a0   : > { %v1086_v27 = vpop.f32.mrf.mxu2  ;;  %v1122_v41 = vpop.f32.mrf.mxu3 }
 0x1a1   : > { %v1095_v42 = vadd.f32 %v1086_v27, %v893_v0  ;;  %v1132_v43 = vadd.f32 %v1122_v41, %v930_v53  ;;  %v1236_v22 = vpop.f32.mrf.mxu1 }
 0x1a2   : > { %v1198_v46 = vpop.f32.mrf.mxu0  ;;  %v1246_v40 = vadd.f32 %v1236_v22, %v1056_v25 }
 0x1a3   : > { %v1208_v5 = vadd.f32 %v1198_v46, %v1018_v45 }
 0x1a5   : > { %2386 = vmatmul.msk.bf16.gmra.mxu2 %vm303_vm3, %v1821_v6 }
 0x1a8   : > { %v1089_v52 = vpop.f32.mrf.mxu2  ;;  %v1124_v18 = vpop.f32.mrf.mxu3 }
 0x1a9   : > { %v1096_v19 = vadd.f32 %v1089_v52, %v894_v4  ;;  %v1133_v23 = vadd.f32 %v1124_v18, %v931_v9  ;;  %v1238_v55 = vpop.f32.mrf.mxu1 }
 0x1aa   : > { %v1200_v57 = vpop.f32.mrf.mxu0  ;;  %v1247_v10 = vadd.f32 %v1238_v55, %v1057_v7 }
 0x1ab   : > { %v1209_v56 = vadd.f32 %v1200_v57, %v1019_v54 }
 0x1ad   : > { %2389 = vmatmul.msk.bf16.gmra.mxu3 %vm303_vm3, %v1859_v50 }
 0x1b0   : > { %v1091_v58 = vpop.f32.mrf.mxu2  ;;  %v1127_v26 = vpop.f32.mrf.mxu3 }
 0x1b1   : > { %v1097_v59 = vadd.f32 %v1091_v58, %v895_v20  ;;  %v1134_v16 = vadd.f32 %v1127_v26, %v932_v24  ;;  %v1241_v60 = vpop.f32.mrf.mxu1 }
 0x1b2   : > { %v1203_v61 = vpop.f32.mrf.mxu0  ;;  %v1248_v63 = vadd.f32 %v1241_v60, %v1058_v30 }
 0x1b3   : > { %v1210_v37 = vadd.f32 %v1203_v61, %v1020_v32 }
 0x1b8   : > { %v1129_v47 = vpop.f32.mrf.mxu3  ;;  %v1274_v33 = vpop.f32.mrf.mxu2 }
 0x1b9   : > { %v1135_v48 = vadd.f32 %v1129_v47, %v933_v49  ;;  %v1284_v0 = vadd.f32 %v1274_v33, %v1094_v35  ;;  %v1243_v53 = vpop.f32.mrf.mxu1 }
 0x1ba   : > { %v1205_v13 = vpop.f32.mrf.mxu0  ;;  %v3099_v44 = vadd.f32 %v1243_v53, %v1059_v38 }
 0x1bb   : > { %v3101_v25 = vadd.f32 %v1205_v13, %v1021_v21 }
 0x1c0   : > { %v1276_v29 = vpop.f32.mrf.mxu2  ;;  %v1312_v45 = vpop.f32.mrf.mxu3 }
 0x1c1   : > { %v1285_v51 = vadd.f32 %v1276_v29, %v1095_v42  ;;  %v1322_v1 = vadd.f32 %v1312_v45, %v1132_v43  ;;  %v1410_v4 = vpop.f32.mrf.mxu1 }
 0x1c2   : > { %v1372_v9 = vpop.f32.mrf.mxu0  ;;  %v1420_v11 = vadd.f32 %v1410_v4, %v1246_v40 }
 0x1c3   : > { %v1382_v2 = vadd.f32 %v1372_v9, %v1208_v5 }
 0x1c8   : > { %v1279_v7 = vpop.f32.mrf.mxu2  ;;  %v1314_v62 = vpop.f32.mrf.mxu3 }
 0x1c9   : > { %v1286_v54 = vadd.f32 %v1279_v7, %v1096_v19  ;;  %v1323_v12 = vadd.f32 %v1314_v62, %v1133_v23  ;;  %v1412_v14 = vpop.f32.mrf.mxu1 }
 0x1ca   : > { %v1374_v8 = vpop.f32.mrf.mxu0  ;;  %v1421_v20 = vadd.f32 %v1412_v14, %v1247_v10 }
 0x1cb   : > { %v1383_v24 = vadd.f32 %v1374_v8, %v1209_v56 }
 0x1d0   : > { %v1281_v28 = vpop.f32.mrf.mxu2  ;;  %v1317_v17 = vpop.f32.mrf.mxu3 }
 0x1d1   : > { %v3103_v30 = vadd.f32 %v1281_v28, %v1097_v59  ;;  %v1324_v15 = vadd.f32 %v1317_v17, %v1134_v16  ;;  %v1415_v32 = vpop.f32.mrf.mxu1 }
 0x1d2   : > { %v1377_v31 = vpop.f32.mrf.mxu0  ;;  %v1422_v34 = vadd.f32 %v1415_v32, %v1248_v63 }
 0x1d3   : > { %v1384_v49 = vadd.f32 %v1377_v31, %v1210_v37 }
 0x1d8   : > { %v1319_v35 = vpop.f32.mrf.mxu3  ;;  %v1448_v36 = vpop.f32.mrf.mxu2 }
 0x1d9   : > { %v3105_v3 = vadd.f32 %v1319_v35, %v1135_v48  ;;  %v1458_v38 = vadd.f32 %v1448_v36, %v1284_v0  ;;  %v1417_v39 = vpop.f32.mrf.mxu1 }
 0x1da   : > { %v1379_v21 = vpop.f32.mrf.mxu0  ;;  %v1423_v8 = vadd.f32 %v1417_v39, %v3099_v44 }
 0x1e0   : > { %v1450_v27 = vpop.f32.mrf.mxu2  ;;  %v1486_v41 = vpop.f32.mrf.mxu3 }
 0x1e1   : > { %v1459_v42 = vadd.f32 %v1450_v27, %v1285_v51  ;;  %v1496_v43 = vadd.f32 %v1486_v41, %v1322_v1  ;;  %v1612_v22 = vpop.f32.mrf.mxu1 }
 0x1e2   : > { %v1574_v46 = vpop.f32.mrf.mxu0  ;;  %v1622_v16 = vadd.f32 %v1612_v22, %v1420_v11 }
 0x1e3   : > { %v1584_v63 = vadd.f32 %v1574_v46, %v1382_v2 }
 0x1e8   : > { %v1453_v40 = vpop.f32.mrf.mxu2  ;;  %v1488_v6 = vpop.f32.mrf.mxu3 }
 0x1e9   : > { %v1460_v5 = vadd.f32 %v1453_v40, %v1286_v54  ;;  %v1497_v52 = vadd.f32 %v1488_v6, %v1323_v12  ;;  %v1614_v18 = vpop.f32.mrf.mxu1 }
 0x1ea   : > { %v1576_v19 = vpop.f32.mrf.mxu0  ;;  %v1623_v0 = vadd.f32 %v1614_v18, %v1421_v20  ;;  %v1385_v20 = vadd.f32 %v1379_v21, %v3101_v25 }
 0x1eb   : > { %v1585_v29 = vadd.f32 %v1576_v19, %v1383_v24 }
 0x1f0   : > { %v1455_v23 = vpop.f32.mrf.mxu2  ;;  %v1491_v55 = vpop.f32.mrf.mxu3 }
 0x1f1   : > { %v1498_v57 = vadd.f32 %v1491_v55, %v1324_v15  ;;  %v1617_v10 = vpop.f32.mrf.mxu1  ;;  %v1461_v19 = vadd.f32 %v1455_v23, %v3103_v30 }
 0x1f2   : > { %v1579_v50 = vpop.f32.mrf.mxu0  ;;  %v1624_v9 = vadd.f32 %v1617_v10, %v1422_v34 }
 0x1f3   : > { %v1586_v2 = vadd.f32 %v1579_v50, %v1384_v49 }
 0x1f8   : > { %v1493_v56 = vpop.f32.mrf.mxu3  ;;  %v1650_v58 = vpop.f32.mrf.mxu2 }
 0x1f9   : > { %v1619_v26 = vpop.f32.mrf.mxu1  ;;  %v1660_v24 = vadd.f32 %v1650_v58, %v1458_v38 }
 0x1fa   : > { %v1581_v59 = vpop.f32.mrf.mxu0  ;;  %v1625_v28 = vadd.f32 %v1619_v26, %v1423_v8  ;;  %v1499_v26 = vadd.f32 %v1493_v56, %v3105_v3 }
 0x1fb   : > { %v1587_v32 = vadd.f32 %v1581_v59, %v1385_v20 }
 0x200   : > { %v1652_v60 = vpop.f32.mrf.mxu2  ;;  %v1688_v61 = vpop.f32.mrf.mxu3 }
 0x201   : > { %v1802_v37 = vpop.f32.mrf.mxu1  ;;  %v1661_v27 = vadd.f32 %v1652_v60, %v1459_v42  ;;  %v1698_v41 = vadd.f32 %v1688_v61, %v1496_v43 }
 0x202   : > { %v1764_v47 = vpop.f32.mrf.mxu0  ;;  %v3107_v33 = vadd.f32 %v1802_v37, %v1622_v16 }
 0x203   : > { %v3109_v48 = vadd.f32 %v1764_v47, %v1584_v63 }
 0x208   : > { %v1655_v53 = vpop.f32.mrf.mxu2  ;;  %v1690_v13 = vpop.f32.mrf.mxu3 }
 0x209   : > { %v1804_v45 = vpop.f32.mrf.mxu1  ;;  %v1662_v25 = vadd.f32 %v1655_v53, %v1460_v5  ;;  %v1699_v38 = vadd.f32 %v1690_v13, %v1497_v52 }
 0x20a   : > { %v1766_v51 = vpop.f32.mrf.mxu0  ;;  %v3111_v1 = vadd.f32 %v1804_v45, %v1623_v0 }
 0x20b   : > { %v3113_v4 = vadd.f32 %v1766_v51, %v1585_v29 }
 0x210   : > { %v1657_v11 = vpop.f32.mrf.mxu2  ;;  %v1693_v7 = vpop.f32.mrf.mxu3 }
 0x211   : > { %v1807_v62 = vpop.f32.mrf.mxu1  ;;  %v1663_v55 = vadd.f32 %v1657_v11, %v1461_v19  ;;  %v1700_v10 = vadd.f32 %v1693_v7, %v1498_v57 }
 0x212   : > { %v1769_v54 = vpop.f32.mrf.mxu0  ;;  %v1814_v12 = vadd.f32 %v1807_v62, %v1624_v9 }
 0x213   : > { %v3115_v14 = vadd.f32 %v1769_v54, %v1586_v2 }
 0x218   : > { %v1695_v17 = vpop.f32.mrf.mxu3  ;;  %v1840_v15 = vpop.f32.mrf.mxu2 }
 0x219   : > { %v3119_v31 = vadd.f32 %v1840_v15, %v1660_v24  ;;  %v1809_v34 = vpop.f32.mrf.mxu1  ;;  %v1701_v59 = vadd.f32 %v1695_v17, %v1499_v26 }
 0x21a   : > { %v1771_v35 = vpop.f32.mrf.mxu0  ;;  %v1815_v36 = vadd.f32 %v1809_v34, %v1625_v28 }
 0x21b   : > { %v3121_v49 = vadd.f32 %v1771_v35, %v1587_v32 }
 0x220   : > { %v1842_v22 = vpop.f32.mrf.mxu2  ;;  %v1878_v46 = vpop.f32.mrf.mxu3 }
 0x221   : > { %v3123_v40 = vadd.f32 %v1842_v22, %v1661_v27  ;;  %v1888_v44 = vadd.f32 %v1878_v46, %v1698_v41 }
 0x228   : > { %v1845_v39 = vpop.f32.mrf.mxu2  ;;  %v1880_v21 = vpop.f32.mrf.mxu3 }
 0x229   : > { %v3125_v6 = vadd.f32 %v1845_v39, %v1662_v25  ;;  %v1889_v18 = vadd.f32 %v1880_v21, %v1699_v38 }
 0x230   : > { %v1847_v50 = vpop.f32.mrf.mxu2  ;;  %v1883_v58 = vpop.f32.mrf.mxu3 }
 0x231   : > { %v1853_v42 = vadd.f32 %v1847_v50, %v1663_v55  ;;  %v1890_v43 = vadd.f32 %v1883_v58, %v1700_v10 }
 0x235   : > { %1895 = sbr.rel (%p2390_p7) target bundleno = 572 (0x23c), region = 36 }
 0x238   : > { %v1885_v16 = vpop.f32.mrf.mxu3 }
 0x239   : > { %v1891_v60 = vadd.f32 %v1885_v16, %v1701_v59 }
 0x23a   : > { %vm1896_vm4 = vcmask 57344   ;;  %v2492_v5 = vmov 0.0  }
 0x23b   : > { %1897 = vst.msk [vmem:[%s2558_s29] sm:$0x1] %vm1896_vm4, %v2492_v5 }
 0x23c PF: > { %v2445_v30 = vld [vmem:[%s3254_s2] ss:$0 sm:$0xff]  ;;  %vm1914_vm5 = vcmask 11264   ;;  %vm1970_vm6 = vcmask 27664   ;;  %vm1934_vm7 = vcmask 8192   ;;  %vm2030_vm8 = vcmask 44064  }
 0x23d   : > { %v2446_v52 = vld [vmem:[%s3254_s2] ss:$0 sm:$0xff]  ;;  %2059 = vrot.lane.b32.xlu1 %v2445_v30, %s2490_s13  ;;  %s2494_s13 = smov 4   ;;  %vm1994_vm9 = vcmask 24592   ;;  %vm2090_vm10 = vcmask 60464   ;;  %vm2054_vm11 = vcmask 40992  }
 0x23e   : > { %1939 = vrot.lane.b32.xlu0 %v2446_v52, %s2489_s12  ;;  %v2447_v3 = vld [vmem:[%s3254_s2] ss:$0 sm:$0xff]  ;;  %s2493_s12 = smov 2   ;;  %vm2114_vm12 = vcmask 57392  }
 0x246   : > { %1999 = vrot.lane.b32.xlu0 %v2447_v3, %s2491_s24  ;;  %s2495_s24 = smov 6  }
 0x2af   : > { %v2060_v23 = vpop.permute.xlu1 %2059 }
 0x2b0   : > { %v2062_v57 = vadd.f32 %v2060_v23, %v1888_v44  ;;  %v2063_v56 = vadd.f32 %v2060_v23, %v1889_v18  ;;  %v2064_v61 = vadd.f32 %v2060_v23, %v1890_v43  ;;  %v2065_v63 = vadd.f32 %v2060_v23, %v1891_v60  ;;  %v1940_v37 = vpop.permute.xlu0 %1939 }
 0x2b1   : > { %v1943_v47 = vadd.f32 %v1940_v37, %v3111_v1  ;;  %v1944_v0 = vadd.f32 %v1940_v37, %v1814_v12  ;;  %v1945_v53 = vadd.f32 %v1940_v37, %v1815_v36  ;;  %v1942_v13 = vadd.f32 %v1940_v37, %v3107_v33 }
 0x2b2   : > { %v3145_v29 = vmax.f32 %v2062_v57, 0.0  ;;  %v3147_v45 = vmax.f32 %v2063_v56, 0.0  ;;  %v3149_v51 = vmax.f32 %v2064_v61, 0.0  ;;  %v3151_v9 = vmax.f32 %v2065_v63, 0.0 }
 0x2b3   : > { %v1948_v11 = vmax.f32 %v1944_v0, 0.0  ;;  %v1947_v7 = vmax.f32 %v1943_v47, 0.0  ;;  %v1946_v2 = vmax.f32 %v1942_v13, 0.0  ;;  %v1949_v20 = vmax.f32 %v1945_v53, 0.0 }
 0x2b4   : > { %v2096_v62 = vsel %vm303_vm3, %v3145_v29, 0.0  ;;  %v2097_v1 = vsel %vm303_vm3, %v3147_v45, 0.0  ;;  %v2099_v33 = vsel %vm303_vm3, %v3149_v51, 0.0  ;;  %v2101_v24 = vsel %vm303_vm3, %v3151_v9, 0.0 }
 0x2b5   : > { %v2098_v54 = vadd.f32 %v2097_v1, %v2096_v62  ;;  %v1952_v12 = vpack.c.bf16 %v1948_v11, %v1948_v11  ;;  %v1951_v8 = vpack.c.bf16 %v1947_v7, %v1947_v7  ;;  %v1950_v28 = vpack.c.bf16 %v1946_v2, %v1946_v2 }
 0x2b6   : > { %v1976_v17 = vsel %vm303_vm3, %v1946_v2, 0.0  ;;  %v1977_v15 = vsel %vm303_vm3, %v1947_v7, 0.0  ;;  %v1979_v35 = vsel %vm303_vm3, %v1948_v11, 0.0  ;;  %v1981_v38 = vsel %vm303_vm3, %v1949_v20, 0.0 }
 0x2b7   : > { %v2100_v32 = vadd.f32 %v2099_v33, %v2098_v54  ;;  %1962 = vrot.lane.b32.xlu1 %v1952_v12, %s2493_s12  ;;  %1960 = vrot.lane.b32.xlu0 %v1951_v8, %s2493_s12  ;;  %v1978_v34 = vadd.f32 %v1977_v15, %v1976_v17  ;;  %v1953_v26 = vpack.c.bf16 %v1949_v20, %v1949_v20  ;;  %v2448_v12 = vld [vmem:[%s3254_s2] ss:$0 sm:$0xff] }
 0x2b8   : > { %1958 = vrot.lane.b32.xlu2 %v1950_v28, %s2493_s12  ;;  %v2000_v36 = vpop.permute.xlu0 %1999  ;;  %v2071_v2 = vpack.c.bf16 %v3147_v45, %v3147_v45  ;;  %v2070_v1 = vpack.c.bf16 %v3145_v29, %v3145_v29  ;;  %v2073_v54 = vpack.c.bf16 %v3151_v9, %v3151_v9  ;;  %v2072_v45 = vpack.c.bf16 %v3149_v51, %v3149_v51 }
 0x2b9   : > { %v2102_v27 = vadd.f32 %v2101_v24, %v2100_v32  ;;  %v1980_v41 = vadd.f32 %v1979_v35, %v1978_v34  ;;  %v2002_v22 = vadd.f32 %v2000_v36, %v3119_v31  ;;  %v2003_v46 = vadd.f32 %v2000_v36, %v3123_v40 }
 0x2ba   : > { %v2004_v44 = vadd.f32 %v2000_v36, %v3125_v6  ;;  %v2005_v25 = vadd.f32 %v2000_v36, %v1853_v42  ;;  %v1902_v8 = vadd.f32 %v2448_v12, %v3109_v48  ;;  %v1905_v24 = vadd.f32 %v2448_v12, %v3121_v49 }
 0x2bb   : > { %v2006_v39 = vmax.f32 %v2002_v22, 0.0  ;;  %v1982_v21 = vadd.f32 %v1981_v38, %v1980_v41  ;;  %v2103_v18 = vrot.slane %v2102_v27, 4  ;;  %v2007_v19 = vmax.f32 %v2003_v46, 0.0 }
 0x2bc   : > { %v2009_v55 = vmax.f32 %v2005_v25, 0.0  ;;  %v2008_v10 = vmax.f32 %v2004_v44, 0.0  ;;  %v1906_v29 = vmax.f32 %v1902_v8, 0.0  ;;  %v1909_v28 = vmax.f32 %v1905_v24, 0.0 }
 0x2bd   : > { %v2036_v50 = vsel %vm303_vm3, %v2006_v39, 0.0  ;;  %v1983_v58 = vrot.slane %v1982_v21, 4  ;;  %v2104_v43 = vadd.f32 %v2103_v18, %v2102_v27  ;;  %v2037_v40 = vsel %vm303_vm3, %v2007_v19, 0.0  ;;  %v1919_v18 = vld [vmem:[%s2558_s29] sm:$0x1] }
 0x2be   : > { %v2012_v59 = vpack.c.bf16 %v2008_v10, %v2008_v10  ;;  %v2039_v31 = vsel %vm303_vm3, %v2008_v10, 0.0  ;;  %v2038_v16 = vadd.f32 %v2037_v40, %v2036_v50  ;;  %v2041_v60 = vsel %vm303_vm3, %v2009_v55, 0.0 }
 0x2bf   : > { %v1984_v6 = vadd.f32 %v1983_v58, %v1982_v21  ;;  %v2105_v42 = vrot.slane %v2104_v43, 2  ;;  %v2011_v56 = vpack.c.bf16 %v2007_v19, %v2007_v19  ;;  %v2010_v7 = vpack.c.bf16 %v2006_v39, %v2006_v39 }
 0x2c0   : > { %1964 = vrot.lane.b32.xlu2 %v1953_v26, %s2493_s12  ;;  %2022 = vrot.lane.b32.xlu0 %v2012_v59, %s2494_s13  ;;  %v2040_v52 = vadd.f32 %v2039_v31, %v2038_v16  ;;  %v2013_v33 = vpack.c.bf16 %v2009_v55, %v2009_v55  ;;  %v1910_v20 = vpack.c.bf16 %v1906_v29, %v1906_v29  ;;  %v1920_v17 = vsel %vm303_vm3, %v1906_v29, 0.0 }
 0x2c1   : > { %v1985_v5 = vrot.slane %v1984_v6, 2  ;;  %v2106_v30 = vadd.f32 %v2105_v42, %v2104_v43  ;;  %v1913_v9 = vpack.c.bf16 %v1909_v28, %v1909_v28  ;;  %v1903_v51 = vadd.f32 %v2448_v12, %v3113_v4 }
 0x2c2   : > { %v2042_v57 = vadd.f32 %v2041_v60, %v2040_v52  ;;  %1915 = vst.msk [vmem:[%s2566_s10] sm:$0xf] %vm1914_vm5, %v1910_v20  ;;  %v1904_v15 = vadd.f32 %v2448_v12, %v3115_v14  ;;  %v1925_v36 = vsel %vm303_vm3, %v1909_v28, 0.0 }
 0x2c3   : > { %v1986_v3 = vadd.f32 %v1985_v5, %v1984_v6  ;;  %v2107_v23 = vrot.slane %v2106_v30, 1  ;;  %1918 = vst.msk [vmem:[%s2566_s10 + $0xc] sm:$0xf] %vm1914_vm5, %v1913_v9  ;;  %v1907_v48 = vmax.f32 %v1903_v51, 0.0 }
 0x2c4   : > { %v2043_v37 = vrot.slane %v2042_v57, 4  ;;  %v1908_v32 = vmax.f32 %v1904_v15, 0.0 }
 0x2c5   : > { %v1987_v61 = vrot.slane %v1986_v3, 1  ;;  %v2108_v63 = vadd.f32 %v2107_v23, %v2106_v30  ;;  %v1921_v34 = vsel %vm303_vm3, %v1907_v48, 0.0  ;;  %v1911_v46 = vpack.c.bf16 %v1907_v48, %v1907_v48 }
 0x2c6   : > { %v2044_v0 = vadd.f32 %v2043_v37, %v2042_v57  ;;  %v1922_v35 = vadd.f32 %v1921_v34, %v1920_v17  ;;  %v1923_v49 = vsel %vm303_vm3, %v1908_v32, 0.0  ;;  %v1912_v4 = vpack.c.bf16 %v1908_v32, %v1908_v32 }
 0x2c7   : > { %v1988_v47 = vadd.f32 %v1987_v61, %v1986_v3  ;;  %1916 = vst.msk [vmem:[%s2566_s10 + $0x4] sm:$0xf] %vm1914_vm5, %v1911_v46 }
 0x2c8   : > { %2110 = vrot.lane.b32.xlu0 %v2108_v63, %s2495_s24  ;;  %2020 = vrot.lane.b32.xlu2 %v2011_v56, %s2494_s13  ;;  %v2045_v53 = vrot.slane %v2044_v0, 2  ;;  %v1924_v27 = vadd.f32 %v1923_v49, %v1922_v35  ;;  %1917 = vst.msk [vmem:[%s2566_s10 + $0x8] sm:$0xf] %vm1914_vm5, %v1912_v4 }
 0x2c9   : > { %1990 = vrot.lane.b32.xlu1 %v1988_v47, %s2493_s12 }
 0x2ca   : > { %v2046_v13 = vadd.f32 %v2045_v53, %v2044_v0  ;;  %v1926_v41 = vadd.f32 %v1925_v36, %v1924_v27 }
 0x2cc   : > { %v2047_v11 = vrot.slane %v2046_v13, 1  ;;  %v1927_v22 = vrot.slane %v1926_v41, 4 }
 0x2ce   : > { %v2048_v62 = vadd.f32 %v2047_v11, %v2046_v13  ;;  %v1928_v44 = vadd.f32 %v1927_v22, %v1926_v41 }
 0x2d0   : > { %2080 = vrot.lane.b32.xlu0 %v2071_v2, %s2495_s24  ;;  %2050 = vrot.lane.b32.xlu2 %v2048_v62, %s2494_s13  ;;  %v1929_v14 = vrot.slane %v1928_v44, 2 }
 0x2d1   : > { %2018 = vrot.lane.b32.xlu1 %v2010_v7, %s2494_s13 }
 0x2d2   : > { %v1930_v25 = vadd.f32 %v1929_v14, %v1928_v44 }
 0x2d4   : > { %v1931_v38 = vrot.slane %v1930_v25, 1 }
 0x2d6   : > { %v1932_v39 = vadd.f32 %v1931_v38, %v1930_v25 }
 0x2d8   : > { %2078 = vrot.lane.b32.xlu2 %v2070_v1, %s2495_s24  ;;  %v1933_v19 = vadd.f32 %v1932_v39, %v1919_v18 }
 0x2d9   : > { %2024 = vrot.lane.b32.xlu1 %v2013_v33, %s2494_s13 }
 0x2da   : > { %1935 = vst.msk [vmem:[%s2558_s29] sm:$0x1] %vm1934_vm7, %v1933_v19 }
 0x2e0   : > { %2084 = vrot.lane.b32.xlu2 %v2073_v54, %s2495_s24 }
 0x2e1   : > { %2082 = vrot.lane.b32.xlu1 %v2072_v45, %s2495_s24  ;;  %v1975_v59 = vld [vmem:[%s2558_s29] sm:$0x1] }
 0x312   : > { %v1959_v21 = vpop.permute.xlu2 %1958 }
 0x313   : > { %1971 = vst.msk [vmem:[%s2566_s10] sm:$0xf] %vm1970_vm6, %v1959_v21 }
 0x31a   : > { %v1965_v55 = vpop.permute.xlu2 %1964 }
 0x31b   : > { %1974 = vst.msk [vmem:[%s2566_s10 + $0xc] sm:$0xf] %vm1970_vm6, %v1965_v55 }
 0x322   : > { %v2021_v58 = vpop.permute.xlu2 %2020 }
 0x329   : > { %v1963_v10 = vpop.permute.xlu1 %1962  ;;  %v1961_v50 = vpop.permute.xlu0 %1960 }
 0x32a   : > { %1973 = vst.msk [vmem:[%s2566_s10 + $0x8] sm:$0xf] %vm1970_vm6, %v1963_v10  ;;  %v2051_v26 = vpop.permute.xlu2 %2050 }
 0x32b   : > { %1972 = vst.msk [vmem:[%s2566_s10 + $0x4] sm:$0xf] %vm1970_vm6, %v1961_v50 }
 0x32c   : > { %2032 = vst.msk [vmem:[%s2566_s10 + $0x4] sm:$0xf] %vm2030_vm8, %v2021_v58 }
 0x332   : > { %v2023_v43 = vpop.permute.xlu0 %2022  ;;  %v2079_v42 = vpop.permute.xlu2 %2078 }
 0x333   : > { %2033 = vst.msk [vmem:[%s2566_s10 + $0x8] sm:$0xf] %vm2030_vm8, %v2023_v43 }
 0x33a   : > { %v2111_v31 = vpop.permute.xlu0 %2110  ;;  %v2085_v3 = vpop.permute.xlu2 %2084 }
 0x33b   : > { %v1991_v40 = vpop.permute.xlu1 %1990 }
 0x33c   : > { %v1993_v6 = vadd.f32 %v1991_v40, %v1975_v59 }
 0x33e   : > { %1995 = vst.msk [vmem:[%s2558_s29] sm:$0x1] %vm1994_vm9, %v1993_v6 }
 0x342   : > { %v2081_v16 = vpop.permute.xlu0 %2080 }
 0x343   : > { %v2019_v60 = vpop.permute.xlu1 %2018  ;;  %2092 = vst.msk [vmem:[%s2566_s10 + $0x4] sm:$0xf] %vm2090_vm10, %v2081_v16 }
 0x344   : > { %2031 = vst.msk [vmem:[%s2566_s10] sm:$0xf] %vm2030_vm8, %v2019_v60 }
 0x345   : > { %v2035_v5 = vld [vmem:[%s2558_s29] sm:$0x1]  ;;  %2091 = vst.msk [vmem:[%s2566_s10] sm:$0xf] %vm2090_vm10, %v2079_v42 }
 0x346   : > { %v2053_v30 = vadd.f32 %v2051_v26, %v2035_v5 }
 0x348   : > { %2055 = vst.msk [vmem:[%s2558_s29] sm:$0x1] %vm2054_vm11, %v2053_v30 }
 0x34b   : > { %v2025_v52 = vpop.permute.xlu1 %2024 }
 0x34c   : > { %2034 = vst.msk [vmem:[%s2566_s10 + $0xc] sm:$0xf] %vm2030_vm8, %v2025_v52 }
 0x34d   : > { %2094 = vst.msk [vmem:[%s2566_s10 + $0xc] sm:$0xf] %vm2090_vm10, %v2085_v3 }
 0x34f   : > { %v2095_v23 = vld [vmem:[%s2558_s29] sm:$0x1] }
 0x350   : > { %v2113_v57 = vadd.f32 %v2111_v31, %v2095_v23 }
 0x352   : > { %2115 = vst.msk [vmem:[%s2558_s29] sm:$0x1] %vm2114_vm12, %v2113_v57 }
 0x353   : > { %v2083_v56 = vpop.permute.xlu1 %2082 }
 0x354   : > { %2093 = vst.msk [vmem:[%s2566_s10 + $0x8] sm:$0xf] %vm2090_vm10, %v2083_v56 }
 0x355 PF: > { %s15_s19 = sadd.s32 1, %s2487_s19   ;;  %s3257_s15 = smov %s2479_s17 }
 0x356   : > { %p12_p8 = scmp.ge.s32.totalorder %s15_s19, 6   ;;  %s3258_s16 = smov %s2483_s18 }
 0x357   : > { %s3259_s17 = smov %s3262_s20  ;;  %s3260_s18 = smov %s3266_s21 }
 0x358   :  { %14 = sbr.rel (!%p12_p8) target bundleno = 3 (0x3), region = 116 }

</bundles_post_ra>
